<compile_context>
chip_gen: v6e
topology: v6e:2x2x1
jax: 0.10.0
libtpu: 0.0.40
codegen_flags: <defaults>
</compile_context>

<pallas_src>
import functools

import jax
import jax.numpy as jnp
from jax import lax
from jax.experimental import pallas as pl
from jax.experimental.pallas import tpu as pltpu

BN_EPS = 1e-5


def _sparse_gate(t, thresh=0.05):
    # (sign(t - thresh) + 1) / 2 -> 1 if t > thresh, 0 if t < thresh, 0.5 at ==
    return jnp.where(t > thresh, 1.0, jnp.where(t < thresh, 0.0, 0.5))


# ------------------------------ fused kernel -------------------------------

def _bottleneck_cbam_sparse_kernel(
        x_ref, w1_ref, w2_ref, w3_ref,
        s1_ref, b1_ref, s2_ref, b2_ref, s3_ref, b3_ref,
        caw1_ref, caw2_ref, saw_ref,
        o_ref,
        h1pad_ref, patch_ref, avgpad_ref, maxpad_ref,
        *, H, W, planes, pad1, pad2):
    f32 = jnp.float32
    bf16 = jnp.bfloat16
    HW = H * W
    P = planes

    x = x_ref[0]                                    # (HW, Cin) f32; also the residual

    # per-pixel column index (i % W); used to mask taps whose flat row shift
    # would wrap across an image-row boundary.
    col = lax.broadcasted_iota(jnp.int32, (HW, 1), 0) % W

    # ---------------- conv1 (1x1) + bn1 + relu ----------------
    h1 = jnp.dot(x.astype(bf16), w1_ref[...], preferred_element_type=f32)
    h1 = jnp.maximum(h1 * s1_ref[...] + b1_ref[...], 0.0)          # (HW, P)

    # ---------------- conv2 (3x3, pad=1, stride=1) + bn2 + relu ----------------
    # bf16 zero-padded flat copy of out1: tap (dy, dx) is a row shift of
    # dy*W + dx.  Only the pad rows are re-zeroed each step; the interior is
    # fully overwritten (pad rows are never touched by the interior store).
    zpad1 = jnp.zeros((pad1, P), bf16)
    h1pad_ref[0:pad1, :] = zpad1
    h1pad_ref[pad1 + HW:pad1 + HW + pad1, :] = zpad1
    h1pad_ref[pad1:pad1 + HW, :] = h1.astype(bf16)

    # Build the (HW, 9*P) im2col operand once (masked, bf16), then one wide-K
    # MXU matmul against w2 reshaped to (9*P, P).
    mask_l = (col >= 1).astype(bf16)                # valid for dx = -1
    mask_r = (col <= W - 2).astype(bf16)            # valid for dx = +1
    for dy in (-1, 0, 1):
        for dx in (-1, 0, 1):
            k = (dy + 1) * 3 + (dx + 1)
            off = pad1 + dy * W + dx
            p = h1pad_ref[off:off + HW, :]          # (HW, P) bf16
            if dx == -1:
                p = p * mask_l
            elif dx == 1:
                p = p * mask_r
            patch_ref[:, k * P:(k + 1) * P] = p

    h2 = jnp.dot(patch_ref[...], w2_ref[...], preferred_element_type=f32)
    h2 = jnp.maximum(h2 * s2_ref[...] + b2_ref[...], 0.0)          # (HW, P)

    # ---------------- conv3 (1x1) + bn3 ----------------
    h3 = jnp.dot(h2.astype(bf16), w3_ref[...], preferred_element_type=f32)
    h3 = h3 * s3_ref[...] + b3_ref[...]                            # (HW, C4)
    C4 = h3.shape[1]

    # ---------------- channel attention + sparse gate ----------------
    avg_c = jnp.mean(h3, axis=0, keepdims=True)                    # (1, C4)
    max_c = jnp.max(h3, axis=0, keepdims=True)                     # (1, C4)
    # Batch the two shared-MLP passes into one (2, C4) operand.
    is_row0 = lax.broadcasted_iota(jnp.int32, (2, C4), 0) == 0
    pooled = jnp.where(is_row0,
                       jnp.broadcast_to(avg_c, (2, C4)),
                       jnp.broadcast_to(max_c, (2, C4)))
    t = jnp.maximum(jnp.dot(pooled, caw1_ref[...], preferred_element_type=f32), 0.0)
    s = jnp.dot(t, caw2_ref[...], preferred_element_type=f32)      # (2, C4)
    ca = jax.nn.sigmoid(s[0:1, :] + s[1:2, :])                     # (1, C4)
    h4 = h3 * _sparse_gate(ca)                                     # (HW, C4)

    # ---------------- spatial attention (7x7, pad=3) + sparse gate ----------------
    zpad2 = jnp.zeros((pad2, 1), f32)
    avgpad_ref[0:pad2, :] = zpad2
    avgpad_ref[pad2 + HW:pad2 + HW + pad2, :] = zpad2
    maxpad_ref[0:pad2, :] = zpad2
    maxpad_ref[pad2 + HW:pad2 + HW + pad2, :] = zpad2
    avgpad_ref[pad2:pad2 + HW, :] = jnp.mean(h4, axis=1, keepdims=True)
    maxpad_ref[pad2:pad2 + HW, :] = jnp.max(h4, axis=1, keepdims=True)

    # column-boundary masks for dx in [-3, 3] (dx == 0 needs no mask)
    sa_masks = [((col + d >= 0) & (col + d < W)).astype(f32) for d in range(-3, 4)]

    acc_s = jnp.zeros((HW, 1), f32)
    for dy in range(-3, 4):
        for dx in range(-3, 4):
            k = ((dy + 3) * 7 + (dx + 3)) * 2       # flat (kh, kw, {avg,max}) index
            off = pad2 + dy * W + dx
            a = avgpad_ref[off:off + HW, :]
            m = maxpad_ref[off:off + HW, :]
            tap = saw_ref[k] * a + saw_ref[k + 1] * m
            if dx != 0:
                tap = tap * sa_masks[dx + 3]
            acc_s = acc_s + tap
    sa = jax.nn.sigmoid(acc_s)                                     # (HW, 1)

    # ---------------- out = relu(sa_gate * h4 + residual) ----------------
    o_ref[0] = jnp.maximum(h4 * _sparse_gate(sa) + x, 0.0)


# ------------------------------ wrapper -------------------------------------

def bottleneck_cbam_sparse_forward(x_nchw, params):
    x = jnp.transpose(x_nchw, (0, 2, 3, 1)).astype(jnp.float32)    # NHWC
    N, H, W, Cin = x.shape
    planes = params["w1"].shape[1]
    C4 = 4 * planes
    hidden = C4 // 16
    assert Cin == C4, "downsample=None requires inplanes == planes * 4"
    HW = H * W

    # flat-shift zero-pad sizes (>= W+1 for the 3x3 conv, >= 3W+3 for the 7x7),
    # rounded to a sublane multiple so the interior store stays aligned.
    pad1 = ((W + 1 + 7) // 8) * 8
    pad2 = ((3 * W + 3 + 7) // 8) * 8

    x_nlc = x.reshape(N, HW, Cin)
    w2_flat = params["w2"].reshape(9 * planes, planes)             # (9P, P) bf16

    kernel = functools.partial(
        _bottleneck_cbam_sparse_kernel,
        H=H, W=W, planes=planes, pad1=pad1, pad2=pad2)

    out = pl.pallas_call(
        kernel,
        out_shape=jax.ShapeDtypeStruct((N, HW, C4), jnp.float32),
        grid=(N,),
        in_specs=[
            pl.BlockSpec((1, HW, Cin), lambda n: (n, 0, 0)),           # x (+ residual)
            pl.BlockSpec((Cin, planes), lambda n: (0, 0)),             # conv1 w (bf16)
            pl.BlockSpec((9 * planes, planes), lambda n: (0, 0)),      # conv2 w, flat (bf16)
            pl.BlockSpec((planes, C4), lambda n: (0, 0)),              # conv3 w (bf16)
            pl.BlockSpec((1, planes), lambda n: (0, 0)),               # bn1 scale
            pl.BlockSpec((1, planes), lambda n: (0, 0)),               # bn1 shift
            pl.BlockSpec((1, planes), lambda n: (0, 0)),               # bn2 scale
            pl.BlockSpec((1, planes), lambda n: (0, 0)),               # bn2 shift
            pl.BlockSpec((1, C4), lambda n: (0, 0)),                   # bn3 scale
            pl.BlockSpec((1, C4), lambda n: (0, 0)),                   # bn3 shift
            pl.BlockSpec((C4, hidden), lambda n: (0, 0)),              # CA fc1
            pl.BlockSpec((hidden, C4), lambda n: (0, 0)),              # CA fc2
            pl.BlockSpec(memory_space=pltpu.MemorySpace.SMEM),         # SA 7x7 taps
        ],
        out_specs=pl.BlockSpec((1, HW, C4), lambda n: (n, 0, 0)),
        scratch_shapes=[
            pltpu.VMEM((HW + 2 * pad1, planes), jnp.bfloat16),         # padded out1 (bf16)
            pltpu.VMEM((HW, 9 * planes), jnp.bfloat16),                # im2col patch buffer
            pltpu.VMEM((HW + 2 * pad2, 1), jnp.float32),               # padded avg map
            pltpu.VMEM((HW + 2 * pad2, 1), jnp.float32),               # padded max map
        ],
        compiler_params=pltpu.CompilerParams(
            dimension_semantics=("parallel",),
            # below v7x physical (64 MiB), above v5e/v6e scoped defaults
            vmem_limit_bytes=48 * 1024 * 1024),
    )(x_nlc, params["w1"], w2_flat, params["w3"],
      params["bn1_scale"], params["bn1_shift"],
      params["bn2_scale"], params["bn2_shift"],
      params["bn3_scale"], params["bn3_shift"],
      params["ca_w1"], params["ca_w2"], params["sa_w_flat"])

    out = out.reshape(N, H, W, C4)
    return jnp.transpose(out, (0, 3, 1, 2))                        # NCHW


# --------------------------- parameter construction -------------------------

def init_params(key, inplanes, planes):
    C4 = 4 * planes
    hidden = C4 // 16
    assert hidden >= 1
    ks = jax.random.split(key, 18)

    def nrm(k, shape, scale=0.1):
        return (scale * jax.random.normal(k, shape)).astype(jnp.float32)

    def bn_fold(kg, kb, km, kv, C):
        gamma = 1.0 + nrm(kg, (C,))
        beta = nrm(kb, (C,))
        mean = nrm(km, (C,))
        var = 1.0 + 0.1 * jnp.abs(jax.random.normal(kv, (C,))).astype(jnp.float32)
        scale = gamma / jnp.sqrt(var + BN_EPS)
        shift = beta - mean * scale
        return scale.reshape(1, C), shift.reshape(1, C)

    p = {}
    p["w1"] = nrm(ks[0], (inplanes, planes)).astype(jnp.bfloat16)     # 1x1: (Cin, P)
    p["bn1_scale"], p["bn1_shift"] = bn_fold(ks[1], ks[2], ks[3], ks[4], planes)
    p["w2"] = nrm(ks[5], (9, planes, planes)).astype(jnp.bfloat16)    # 3x3: (kh*3+kw, I, O)
    p["bn2_scale"], p["bn2_shift"] = bn_fold(ks[6], ks[7], ks[8], ks[9], planes)
    p["w3"] = nrm(ks[10], (planes, C4)).astype(jnp.bfloat16)          # 1x1: (P, C4)
    p["bn3_scale"], p["bn3_shift"] = bn_fold(ks[11], ks[12], ks[13], ks[14], C4)
    p["ca_w1"] = nrm(ks[15], (C4, hidden))                            # CA shared MLP
    p["ca_w2"] = nrm(ks[16], (hidden, C4))
    sa_w = nrm(ks[17], (7, 7, 2))                                     # SA 7x7, (kh, kw, {avg,max})
    p["sa_w_hwi"] = sa_w
    p["sa_w_flat"] = sa_w.reshape(-1)                                 # SMEM scalar table
    return p


# ------------------------------ pure-JAX reference --------------------------

def reference_forward(x_nchw, p):
    x = jnp.transpose(x_nchw, (0, 2, 3, 1)).astype(jnp.float32)
    N, H, W, Cin = x.shape
    planes = p["w1"].shape[1]
    C4 = 4 * planes
    bf16 = jnp.bfloat16
    f32 = jnp.float32

    def bn(h, s, b):
        return h * s[0] + b[0]

    def dot_bf16(a, w):  # matches the kernel's bf16-operand / f32-accumulate matmuls
        return jnp.dot(a.astype(bf16), w.astype(bf16), preferred_element_type=f32)

    out = dot_bf16(x.reshape(-1, Cin), p["w1"]).reshape(N, H, W, planes)
    out = jnp.maximum(bn(out, p["bn1_scale"], p["bn1_shift"]), 0.0)

    out = lax.conv_general_dilated(
        out.astype(bf16), p["w2"].reshape(3, 3, planes, planes), (1, 1),
        ((1, 1), (1, 1)), dimension_numbers=("NHWC", "HWIO", "NHWC"),
        preferred_element_type=f32)
    out = jnp.maximum(bn(out, p["bn2_scale"], p["bn2_shift"]), 0.0)

    out = dot_bf16(out.reshape(-1, planes), p["w3"]).reshape(N, H, W, C4)
    out = bn(out, p["bn3_scale"], p["bn3_shift"])

    avg = jnp.mean(out, axis=(1, 2))
    mx = jnp.max(out, axis=(1, 2))

    def fc(v):
        h = jnp.maximum(v @ p["ca_w1"], 0.0)
        return h @ p["ca_w2"]

    ca = jax.nn.sigmoid(fc(avg) + fc(mx))
    ca = _sparse_gate(ca)
    out = out * ca[:, None, None, :]

    avg_s = jnp.mean(out, axis=3, keepdims=True)
    max_s = jnp.max(out, axis=3, keepdims=True)
    sa_in = jnp.concatenate([avg_s, max_s], axis=3)
    sa = lax.conv_general_dilated(
        sa_in, p["sa_w_hwi"].reshape(7, 7, 2, 1), (1, 1), ((3, 3), (3, 3)),
        dimension_numbers=("NHWC", "HWIO", "NHWC"), precision=lax.Precision.HIGHEST)
    sa = _sparse_gate(jax.nn.sigmoid(sa))
    out = out * sa

    out = jnp.maximum(out + x, 0.0)
    return jnp.transpose(out, (0, 3, 1, 2))


# ----------------------------------- main -----------------------------------

if __name__ == "__main__":
    key = jax.random.PRNGKey(0)
    kx, kp = jax.random.split(key)

    N, planes, H, W = 2, 16, 8, 8
    inplanes = 4 * planes  # 64 -> identity residual valid (downsample=None)

    x = jax.random.normal(kx, (N, inplanes, H, W), dtype=jnp.float32)
    params = init_params(kp, inplanes, planes)

    out = jax.jit(bottleneck_cbam_sparse_forward)(x, params)
    out = jax.block_until_ready(out)
    assert out.shape == (N, 4 * planes, H, W)

    ref = reference_forward(x, params)
    max_err = float(jnp.max(jnp.abs(out - ref)))
    assert max_err < 2e-2, f"mismatch vs reference: {max_err}"

    print("KERNEL_OK")
</pallas_src>

<mosaic_0001>
module attributes {stable_mosaic.version = 11 : i64} {
  func.func @_bottleneck_cbam_sparse_kernel(%arg0: i32, %arg1: memref<1x64x64xf32, #tpu.memory_space<vmem>>, %arg2: memref<64x16xbf16, #tpu.memory_space<vmem>>, %arg3: memref<144x16xbf16, #tpu.memory_space<vmem>>, %arg4: memref<16x64xbf16, #tpu.memory_space<vmem>>, %arg5: memref<1x16xf32, #tpu.memory_space<vmem>>, %arg6: memref<1x16xf32, #tpu.memory_space<vmem>>, %arg7: memref<1x16xf32, #tpu.memory_space<vmem>>, %arg8: memref<1x16xf32, #tpu.memory_space<vmem>>, %arg9: memref<1x64xf32, #tpu.memory_space<vmem>>, %arg10: memref<1x64xf32, #tpu.memory_space<vmem>>, %arg11: memref<64x4xf32, #tpu.memory_space<vmem>>, %arg12: memref<4x64xf32, #tpu.memory_space<vmem>>, %arg13: memref<98xf32, #tpu.memory_space<smem>>, %arg14: memref<1x64x64xf32, #tpu.memory_space<vmem>>, %arg15: memref<96x16xbf16, #tpu.memory_space<vmem>>, %arg16: memref<64x144xbf16, #tpu.memory_space<vmem>>, %arg17: memref<128x1xf32, #tpu.memory_space<vmem>>, %arg18: memref<128x1xf32, #tpu.memory_space<vmem>>) attributes {dimension_semantics = [#tpu.dimension_semantics<parallel>], iteration_bounds = array<i64: 2>, scalar_prefetch = 0 : i64, scratch_operands = 4 : i64, tpu.core_type = #tpu.core_type<tc>, window_params = [{transform_indices = @transform_0, window_bounds = array<i64: 1, 64, 64>}, {pipeline_mode = #tpu.pipeline_mode<synchronous>, transform_indices = @transform_1, window_bounds = array<i64: 64, 16>}, {pipeline_mode = #tpu.pipeline_mode<synchronous>, transform_indices = @transform_2, window_bounds = array<i64: 144, 16>}, {pipeline_mode = #tpu.pipeline_mode<synchronous>, transform_indices = @transform_3, window_bounds = array<i64: 16, 64>}, {pipeline_mode = #tpu.pipeline_mode<synchronous>, transform_indices = @transform_4, window_bounds = array<i64: 1, 16>}, {pipeline_mode = #tpu.pipeline_mode<synchronous>, transform_indices = @transform_5, window_bounds = array<i64: 1, 16>}, {pipeline_mode = #tpu.pipeline_mode<synchronous>, transform_indices = @transform_6, window_bounds = array<i64: 1, 16>}, {pipeline_mode = #tpu.pipeline_mode<synchronous>, transform_indices = @transform_7, window_bounds = array<i64: 1, 16>}, {pipeline_mode = #tpu.pipeline_mode<synchronous>, transform_indices = @transform_8, window_bounds = array<i64: 1, 64>}, {pipeline_mode = #tpu.pipeline_mode<synchronous>, transform_indices = @transform_9, window_bounds = array<i64: 1, 64>}, {pipeline_mode = #tpu.pipeline_mode<synchronous>, transform_indices = @transform_10, window_bounds = array<i64: 64, 4>}, {pipeline_mode = #tpu.pipeline_mode<synchronous>, transform_indices = @transform_11, window_bounds = array<i64: 4, 64>}, {transform_indices = @transform_12, window_bounds = array<i64: 98>}, {transform_indices = @transform_13, window_bounds = array<i64: 1, 64, 64>}]} {
    %c0 = arith.constant 0 : index
    %c0_0 = arith.constant 0 : index
    %c0_1 = arith.constant 0 : index
    %0 = vector.load %arg1[%c0, %c0_0, %c0_1] : memref<1x64x64xf32, #tpu.memory_space<vmem>>, vector<1x64x64xf32>
    %1 = vector.shape_cast %0 : vector<1x64x64xf32> to vector<64x64xf32>
    %2 = tpu.iota {dimensions = array<i32: 0>} : vector<64x1xi32>
    %c8_i32 = arith.constant 8 : i32
    %c0_i32 = arith.constant 0 : i32
    %3 = arith.cmpi eq, %c8_i32, %c0_i32 : i32
    %c1_i32 = arith.constant 1 : i32
    %4 = arith.select %3, %c1_i32, %c8_i32 : i32
    %5 = vector.broadcast %4 : i32 to vector<64x1xi32>
    %6 = arith.remsi %2, %5 : vector<64x1xi32>
    %c0_i32_2 = arith.constant 0 : i32
    %7 = vector.broadcast %c0_i32_2 : i32 to vector<64x1xi32>
    %8 = arith.cmpi ne, %6, %7 : vector<64x1xi32>
    %c0_i32_3 = arith.constant 0 : i32
    %9 = vector.broadcast %c0_i32_3 : i32 to vector<64x1xi32>
    %10 = arith.cmpi slt, %6, %9 : vector<64x1xi32>
    %c0_i32_4 = arith.constant 0 : i32
    %11 = arith.cmpi slt, %4, %c0_i32_4 : i32
    %12 = vector.broadcast %11 : i1 to vector<64x1xi1>
    %13 = vector.broadcast %12 : vector<64x1xi1> to vector<64x1xi1>
    %14 = arith.xori %10, %13 : vector<64x1xi1>
    %15 = arith.andi %14, %8 : vector<64x1xi1>
    %16 = vector.broadcast %4 : i32 to vector<64x1xi32>
    %17 = arith.addi %6, %16 : vector<64x1xi32>
    %18 = arith.select %15, %17, %6 : vector<64x1xi1>, vector<64x1xi32>
    %19 = arith.truncf %1 : vector<64x64xf32> to vector<64x64xbf16>
    %c0_5 = arith.constant 0 : index
    %c0_6 = arith.constant 0 : index
    %20 = vector.load %arg2[%c0_5, %c0_6] : memref<64x16xbf16, #tpu.memory_space<vmem>>, vector<64x16xbf16>
    %cst = arith.constant dense<0.000000e+00> : vector<64x16xf32>
    %21 = tpu.matmul %19, %20, %cst {dimension_numbers = #tpu.dot_dimension_numbers<[1], [0], [0], [1], [0, 0, 1, 1], [], []>} : vector<64x64xbf16>, vector<64x16xbf16>, vector<64x16xf32> -> vector<64x16xf32>
    %c0_7 = arith.constant 0 : index
    %c0_8 = arith.constant 0 : index
    %22 = vector.load %arg5[%c0_7, %c0_8] : memref<1x16xf32, #tpu.memory_space<vmem>>, vector<1x16xf32>
    %23 = vector.broadcast %22 : vector<1x16xf32> to vector<64x16xf32>
    %24 = arith.mulf %21, %23 : vector<64x16xf32>
    %c0_9 = arith.constant 0 : index
    %c0_10 = arith.constant 0 : index
    %25 = vector.load %arg6[%c0_9, %c0_10] : memref<1x16xf32, #tpu.memory_space<vmem>>, vector<1x16xf32>
    %26 = vector.broadcast %25 : vector<1x16xf32> to vector<64x16xf32>
    %27 = arith.addf %24, %26 : vector<64x16xf32>
    %cst_11 = arith.constant 0.000000e+00 : f32
    %28 = vector.broadcast %cst_11 : f32 to vector<64x16xf32>
    %29 = arith.maximumf %27, %28 : vector<64x16xf32>
    %cst_12 = arith.constant 0.000000e+00 : bf16
    %30 = vector.broadcast %cst_12 : bf16 to vector<16x16xbf16>
    %c0_13 = arith.constant 0 : index
    %c0_14 = arith.constant 0 : index
    %31 = vector.load %arg15[%c0_13, %c0_14] : memref<96x16xbf16, #tpu.memory_space<vmem>>, vector<16x16xbf16>
    tpu.vector_store %arg15[%c0_13, %c0_14], %30 {strides = array<i32>} : memref<96x16xbf16, #tpu.memory_space<vmem>>, vector<16x16xbf16>,
    %c80 = arith.constant 80 : index
    %c0_15 = arith.constant 0 : index
    %32 = vector.load %arg15[%c80, %c0_15] : memref<96x16xbf16, #tpu.memory_space<vmem>>, vector<16x16xbf16>
    tpu.vector_store %arg15[%c80, %c0_15], %30 {strides = array<i32>} : memref<96x16xbf16, #tpu.memory_space<vmem>>, vector<16x16xbf16>,
    %33 = arith.truncf %29 : vector<64x16xf32> to vector<64x16xbf16>
    %c16 = arith.constant 16 : index
    %c0_16 = arith.constant 0 : index
    %34 = vector.load %arg15[%c16, %c0_16] : memref<96x16xbf16, #tpu.memory_space<vmem>>, vector<64x16xbf16>
    tpu.vector_store %arg15[%c16, %c0_16], %33 {strides = array<i32>} : memref<96x16xbf16, #tpu.memory_space<vmem>>, vector<64x16xbf16>,
    %c1_i32_17 = arith.constant 1 : i32
    %35 = vector.broadcast %c1_i32_17 : i32 to vector<64x1xi32>
    %36 = arith.cmpi sge, %18, %35 : vector<64x1xi32>
    %37 = arith.extui %36 : vector<64x1xi1> to vector<64x1xi32>
    %38 = arith.sitofp %37 : vector<64x1xi32> to vector<64x1xf32>
    %39 = arith.truncf %38 : vector<64x1xf32> to vector<64x1xbf16>
    %c6_i32 = arith.constant 6 : i32
    %40 = vector.broadcast %c6_i32 : i32 to vector<64x1xi32>
    %41 = arith.cmpi sle, %18, %40 : vector<64x1xi32>
    %42 = arith.extui %41 : vector<64x1xi1> to vector<64x1xi32>
    %43 = arith.sitofp %42 : vector<64x1xi32> to vector<64x1xf32>
    %44 = arith.truncf %43 : vector<64x1xf32> to vector<64x1xbf16>
    %c7 = arith.constant 7 : index
    %c0_18 = arith.constant 0 : index
    %45 = vector.load %arg15[%c7, %c0_18] : memref<96x16xbf16, #tpu.memory_space<vmem>>, vector<64x16xbf16>
    %46 = vector.broadcast %39 : vector<64x1xbf16> to vector<64x16xbf16>
    %47 = arith.mulf %45, %46 : vector<64x16xbf16>
    %c0_19 = arith.constant 0 : index
    %c0_20 = arith.constant 0 : index
    %48 = vector.load %arg16[%c0_19, %c0_20] : memref<64x144xbf16, #tpu.memory_space<vmem>>, vector<64x16xbf16>
    tpu.vector_store %arg16[%c0_19, %c0_20], %47 {strides = array<i32>} : memref<64x144xbf16, #tpu.memory_space<vmem>>, vector<64x16xbf16>,
    %c8 = arith.constant 8 : index
    %c0_21 = arith.constant 0 : index
    %49 = vector.load %arg15[%c8, %c0_21] : memref<96x16xbf16, #tpu.memory_space<vmem>>, vector<64x16xbf16>
    %c0_22 = arith.constant 0 : index
    %c16_23 = arith.constant 16 : index
    %50 = vector.load %arg16[%c0_22, %c16_23] : memref<64x144xbf16, #tpu.memory_space<vmem>>, vector<64x16xbf16>
    tpu.vector_store %arg16[%c0_22, %c16_23], %49 {strides = array<i32>} : memref<64x144xbf16, #tpu.memory_space<vmem>>, vector<64x16xbf16>,
    %c9 = arith.constant 9 : index
    %c0_24 = arith.constant 0 : index
    %51 = vector.load %arg15[%c9, %c0_24] : memref<96x16xbf16, #tpu.memory_space<vmem>>, vector<64x16xbf16>
    %52 = vector.broadcast %44 : vector<64x1xbf16> to vector<64x16xbf16>
    %53 = arith.mulf %51, %52 : vector<64x16xbf16>
    %c0_25 = arith.constant 0 : index
    %c32 = arith.constant 32 : index
    %54 = vector.load %arg16[%c0_25, %c32] : memref<64x144xbf16, #tpu.memory_space<vmem>>, vector<64x16xbf16>
    tpu.vector_store %arg16[%c0_25, %c32], %53 {strides = array<i32>} : memref<64x144xbf16, #tpu.memory_space<vmem>>, vector<64x16xbf16>,
    %c15 = arith.constant 15 : index
    %c0_26 = arith.constant 0 : index
    %55 = vector.load %arg15[%c15, %c0_26] : memref<96x16xbf16, #tpu.memory_space<vmem>>, vector<64x16xbf16>
    %56 = vector.broadcast %39 : vector<64x1xbf16> to vector<64x16xbf16>
    %57 = arith.mulf %55, %56 : vector<64x16xbf16>
    %c0_27 = arith.constant 0 : index
    %c48 = arith.constant 48 : index
    %58 = vector.load %arg16[%c0_27, %c48] : memref<64x144xbf16, #tpu.memory_space<vmem>>, vector<64x16xbf16>
    tpu.vector_store %arg16[%c0_27, %c48], %57 {strides = array<i32>} : memref<64x144xbf16, #tpu.memory_space<vmem>>, vector<64x16xbf16>,
    %c16_28 = arith.constant 16 : index
    %c0_29 = arith.constant 0 : index
    %59 = vector.load %arg15[%c16_28, %c0_29] : memref<96x16xbf16, #tpu.memory_space<vmem>>, vector<64x16xbf16>
    %c0_30 = arith.constant 0 : index
    %c64 = arith.constant 64 : index
    %60 = vector.load %arg16[%c0_30, %c64] : memref<64x144xbf16, #tpu.memory_space<vmem>>, vector<64x16xbf16>
    tpu.vector_store %arg16[%c0_30, %c64], %59 {strides = array<i32>} : memref<64x144xbf16, #tpu.memory_space<vmem>>, vector<64x16xbf16>,
    %c17 = arith.constant 17 : index
    %c0_31 = arith.constant 0 : index
    %61 = vector.load %arg15[%c17, %c0_31] : memref<96x16xbf16, #tpu.memory_space<vmem>>, vector<64x16xbf16>
    %62 = vector.broadcast %44 : vector<64x1xbf16> to vector<64x16xbf16>
    %63 = arith.mulf %61, %62 : vector<64x16xbf16>
    %c0_32 = arith.constant 0 : index
    %c80_33 = arith.constant 80 : index
    %64 = vector.load %arg16[%c0_32, %c80_33] : memref<64x144xbf16, #tpu.memory_space<vmem>>, vector<64x16xbf16>
    tpu.vector_store %arg16[%c0_32, %c80_33], %63 {strides = array<i32>} : memref<64x144xbf16, #tpu.memory_space<vmem>>, vector<64x16xbf16>,
    %c23 = arith.constant 23 : index
    %c0_34 = arith.constant 0 : index
    %65 = vector.load %arg15[%c23, %c0_34] : memref<96x16xbf16, #tpu.memory_space<vmem>>, vector<64x16xbf16>
    %66 = vector.broadcast %39 : vector<64x1xbf16> to vector<64x16xbf16>
    %67 = arith.mulf %65, %66 : vector<64x16xbf16>
    %c0_35 = arith.constant 0 : index
    %c96 = arith.constant 96 : index
    %68 = vector.load %arg16[%c0_35, %c96] : memref<64x144xbf16, #tpu.memory_space<vmem>>, vector<64x16xbf16>
    tpu.vector_store %arg16[%c0_35, %c96], %67 {strides = array<i32>} : memref<64x144xbf16, #tpu.memory_space<vmem>>, vector<64x16xbf16>,
    %c24 = arith.constant 24 : index
    %c0_36 = arith.constant 0 : index
    %69 = vector.load %arg15[%c24, %c0_36] : memref<96x16xbf16, #tpu.memory_space<vmem>>, vector<64x16xbf16>
    %c0_37 = arith.constant 0 : index
    %c112 = arith.constant 112 : index
    %70 = vector.load %arg16[%c0_37, %c112] : memref<64x144xbf16, #tpu.memory_space<vmem>>, vector<64x16xbf16>
    tpu.vector_store %arg16[%c0_37, %c112], %69 {strides = array<i32>} : memref<64x144xbf16, #tpu.memory_space<vmem>>, vector<64x16xbf16>,
    %c25 = arith.constant 25 : index
    %c0_38 = arith.constant 0 : index
    %71 = vector.load %arg15[%c25, %c0_38] : memref<96x16xbf16, #tpu.memory_space<vmem>>, vector<64x16xbf16>
    %72 = vector.broadcast %44 : vector<64x1xbf16> to vector<64x16xbf16>
    %73 = arith.mulf %71, %72 : vector<64x16xbf16>
    %c0_39 = arith.constant 0 : index
    %c128 = arith.constant 128 : index
    %74 = vector.load %arg16[%c0_39, %c128] : memref<64x144xbf16, #tpu.memory_space<vmem>>, vector<64x16xbf16>
    tpu.vector_store %arg16[%c0_39, %c128], %73 {strides = array<i32>} : memref<64x144xbf16, #tpu.memory_space<vmem>>, vector<64x16xbf16>,
    %c0_40 = arith.constant 0 : index
    %c0_41 = arith.constant 0 : index
    %75 = vector.load %arg16[%c0_40, %c0_41] : memref<64x144xbf16, #tpu.memory_space<vmem>>, vector<64x144xbf16>
    %c0_42 = arith.constant 0 : index
    %c0_43 = arith.constant 0 : index
    %76 = vector.load %arg3[%c0_42, %c0_43] : memref<144x16xbf16, #tpu.memory_space<vmem>>, vector<144x16xbf16>
    %cst_44 = arith.constant dense<0.000000e+00> : vector<64x16xf32>
    %77 = tpu.matmul %75, %76, %cst_44 {dimension_numbers = #tpu.dot_dimension_numbers<[1], [0], [0], [1], [0, 0, 1, 1], [], []>} : vector<64x144xbf16>, vector<144x16xbf16>, vector<64x16xf32> -> vector<64x16xf32>
    %c0_45 = arith.constant 0 : index
    %c0_46 = arith.constant 0 : index
    %78 = vector.load %arg7[%c0_45, %c0_46] : memref<1x16xf32, #tpu.memory_space<vmem>>, vector<1x16xf32>
    %79 = vector.broadcast %78 : vector<1x16xf32> to vector<64x16xf32>
    %80 = arith.mulf %77, %79 : vector<64x16xf32>
    %c0_47 = arith.constant 0 : index
    %c0_48 = arith.constant 0 : index
    %81 = vector.load %arg8[%c0_47, %c0_48] : memref<1x16xf32, #tpu.memory_space<vmem>>, vector<1x16xf32>
    %82 = vector.broadcast %81 : vector<1x16xf32> to vector<64x16xf32>
    %83 = arith.addf %80, %82 : vector<64x16xf32>
    %cst_49 = arith.constant 0.000000e+00 : f32
    %84 = vector.broadcast %cst_49 : f32 to vector<64x16xf32>
    %85 = arith.maximumf %83, %84 : vector<64x16xf32>
    %86 = arith.truncf %85 : vector<64x16xf32> to vector<64x16xbf16>
    %c0_50 = arith.constant 0 : index
    %c0_51 = arith.constant 0 : index
    %87 = vector.load %arg4[%c0_50, %c0_51] : memref<16x64xbf16, #tpu.memory_space<vmem>>, vector<16x64xbf16>
    %cst_52 = arith.constant dense<0.000000e+00> : vector<64x64xf32>
    %88 = tpu.matmul %86, %87, %cst_52 {dimension_numbers = #tpu.dot_dimension_numbers<[1], [0], [0], [1], [0, 0, 1, 1], [], []>} : vector<64x16xbf16>, vector<16x64xbf16>, vector<64x64xf32> -> vector<64x64xf32>
    %c0_53 = arith.constant 0 : index
    %c0_54 = arith.constant 0 : index
    %89 = vector.load %arg9[%c0_53, %c0_54] : memref<1x64xf32, #tpu.memory_space<vmem>>, vector<1x64xf32>
    %90 = vector.broadcast %89 : vector<1x64xf32> to vector<64x64xf32>
    %91 = arith.mulf %88, %90 : vector<64x64xf32>
    %c0_55 = arith.constant 0 : index
    %c0_56 = arith.constant 0 : index
    %92 = vector.load %arg10[%c0_55, %c0_56] : memref<1x64xf32, #tpu.memory_space<vmem>>, vector<1x64xf32>
    %93 = vector.broadcast %92 : vector<1x64xf32> to vector<64x64xf32>
    %94 = arith.addf %91, %93 : vector<64x64xf32>
    %cst_57 = arith.constant dense<0.000000e+00> : vector<64xf32>
    %95 = vector.multi_reduction <add>, %94, %cst_57 [0] : vector<64x64xf32> to vector<64xf32>
    %96 = vector.shape_cast %95 : vector<64xf32> to vector<1x64xf32>
    %cst_58 = arith.constant 6.400000e+01 : f32
    %97 = vector.broadcast %cst_58 : f32 to vector<1x64xf32>
    %98 = arith.divf %96, %97 : vector<1x64xf32>
    %cst_59 = arith.constant dense<0xFF800000> : vector<64xf32>
    %99 = vector.multi_reduction <maximumf>, %94, %cst_59 [0] : vector<64x64xf32> to vector<64xf32>
    %100 = vector.shape_cast %99 : vector<64xf32> to vector<1x64xf32>
    %101 = tpu.iota {dimensions = array<i32: 0>} : vector<2x64xi32>
    %c0_i32_60 = arith.constant 0 : i32
    %102 = vector.broadcast %c0_i32_60 : i32 to vector<2x64xi32>
    %103 = arith.cmpi eq, %101, %102 : vector<2x64xi32>
    %104 = vector.shape_cast %98 : vector<1x64xf32> to vector<1x64xf32>
    %105 = vector.broadcast %104 : vector<1x64xf32> to vector<2x64xf32>
    %106 = vector.shape_cast %100 : vector<1x64xf32> to vector<1x64xf32>
    %107 = vector.broadcast %106 : vector<1x64xf32> to vector<2x64xf32>
    %108 = arith.select %103, %105, %107 : vector<2x64xi1>, vector<2x64xf32>
    %c0_61 = arith.constant 0 : index
    %c0_62 = arith.constant 0 : index
    %109 = vector.load %arg11[%c0_61, %c0_62] : memref<64x4xf32, #tpu.memory_space<vmem>>, vector<64x4xf32>
    %cst_63 = arith.constant dense<0.000000e+00> : vector<2x4xf32>
    %110 = tpu.matmul %108, %109, %cst_63 {dimension_numbers = #tpu.dot_dimension_numbers<[1], [0], [0], [1], [0, 0, 1, 1], [], []>} : vector<2x64xf32>, vector<64x4xf32>, vector<2x4xf32> -> vector<2x4xf32>
    %cst_64 = arith.constant 0.000000e+00 : f32
    %111 = vector.broadcast %cst_64 : f32 to vector<2x4xf32>
    %112 = arith.maximumf %110, %111 : vector<2x4xf32>
    %c0_65 = arith.constant 0 : index
    %c0_66 = arith.constant 0 : index
    %113 = vector.load %arg12[%c0_65, %c0_66] : memref<4x64xf32, #tpu.memory_space<vmem>>, vector<4x64xf32>
    %cst_67 = arith.constant dense<0.000000e+00> : vector<2x64xf32>
    %114 = tpu.matmul %112, %113, %cst_67 {dimension_numbers = #tpu.dot_dimension_numbers<[1], [0], [0], [1], [0, 0, 1, 1], [], []>} : vector<2x4xf32>, vector<4x64xf32>, vector<2x64xf32> -> vector<2x64xf32>
    %115 = vector.extract_strided_slice %114 {offsets = [0, 0], sizes = [1, 64], strides = [1, 1]} : vector<2x64xf32> to vector<1x64xf32>
    %116 = vector.extract_strided_slice %114 {offsets = [1, 0], sizes = [1, 64], strides = [1, 1]} : vector<2x64xf32> to vector<1x64xf32>
    %117 = arith.addf %115, %116 : vector<1x64xf32>
    %118 = arith.negf %117 : vector<1x64xf32>
    %119 = math.exp %118 : vector<1x64xf32>
    %cst_68 = arith.constant 1.000000e+00 : f32
    %120 = vector.broadcast %cst_68 : f32 to vector<1x64xf32>
    %121 = arith.addf %120, %119 : vector<1x64xf32>
    %122 = arith.divf %120, %121 : vector<1x64xf32>
    %cst_69 = arith.constant 5.000000e-02 : f32
    %123 = vector.broadcast %cst_69 : f32 to vector<1x64xf32>
    %124 = arith.cmpf ogt, %122, %123 : vector<1x64xf32>
    %cst_70 = arith.constant 5.000000e-02 : f32
    %125 = vector.broadcast %cst_70 : f32 to vector<1x64xf32>
    %126 = arith.cmpf olt, %122, %125 : vector<1x64xf32>
    %cst_71 = arith.constant 0.000000e+00 : f32
    %cst_72 = arith.constant 5.000000e-01 : f32
    %127 = vector.broadcast %cst_71 : f32 to vector<1x64xf32>
    %128 = vector.broadcast %cst_72 : f32 to vector<1x64xf32>
    %129 = arith.select %126, %127, %128 : vector<1x64xi1>, vector<1x64xf32>
    %cst_73 = arith.constant 1.000000e+00 : f32
    %130 = vector.broadcast %cst_73 : f32 to vector<1x64xf32>
    %131 = arith.select %124, %130, %129 : vector<1x64xi1>, vector<1x64xf32>
    %132 = vector.broadcast %131 : vector<1x64xf32> to vector<64x64xf32>
    %133 = arith.mulf %94, %132 : vector<64x64xf32>
    %cst_74 = arith.constant 0.000000e+00 : f32
    %134 = vector.broadcast %cst_74 : f32 to vector<32x1xf32>
    %c0_75 = arith.constant 0 : index
    %c0_76 = arith.constant 0 : index
    %135 = vector.load %arg17[%c0_75, %c0_76] : memref<128x1xf32, #tpu.memory_space<vmem>>, vector<32x1xf32>
    tpu.vector_store %arg17[%c0_75, %c0_76], %134 {strides = array<i32>} : memref<128x1xf32, #tpu.memory_space<vmem>>, vector<32x1xf32>,
    %c96_77 = arith.constant 96 : index
    %c0_78 = arith.constant 0 : index
    %136 = vector.load %arg17[%c96_77, %c0_78] : memref<128x1xf32, #tpu.memory_space<vmem>>, vector<32x1xf32>
    tpu.vector_store %arg17[%c96_77, %c0_78], %134 {strides = array<i32>} : memref<128x1xf32, #tpu.memory_space<vmem>>, vector<32x1xf32>,
    %c0_79 = arith.constant 0 : index
    %c0_80 = arith.constant 0 : index
    %137 = vector.load %arg18[%c0_79, %c0_80] : memref<128x1xf32, #tpu.memory_space<vmem>>, vector<32x1xf32>
    tpu.vector_store %arg18[%c0_79, %c0_80], %134 {strides = array<i32>} : memref<128x1xf32, #tpu.memory_space<vmem>>, vector<32x1xf32>,
    %c96_81 = arith.constant 96 : index
    %c0_82 = arith.constant 0 : index
    %138 = vector.load %arg18[%c96_81, %c0_82] : memref<128x1xf32, #tpu.memory_space<vmem>>, vector<32x1xf32>
    tpu.vector_store %arg18[%c96_81, %c0_82], %134 {strides = array<i32>} : memref<128x1xf32, #tpu.memory_space<vmem>>, vector<32x1xf32>,
    %cst_83 = arith.constant dense<0.000000e+00> : vector<64xf32>
    %139 = vector.multi_reduction <add>, %133, %cst_83 [1] : vector<64x64xf32> to vector<64xf32>
    %140 = vector.shape_cast %139 : vector<64xf32> to vector<64x1xf32>
    %cst_84 = arith.constant 6.400000e+01 : f32
    %141 = vector.broadcast %cst_84 : f32 to vector<64x1xf32>
    %142 = arith.divf %140, %141 : vector<64x1xf32>
    %c32_85 = arith.constant 32 : index
    %c0_86 = arith.constant 0 : index
    %143 = vector.load %arg17[%c32_85, %c0_86] : memref<128x1xf32, #tpu.memory_space<vmem>>, vector<64x1xf32>
    tpu.vector_store %arg17[%c32_85, %c0_86], %142 {strides = array<i32>} : memref<128x1xf32, #tpu.memory_space<vmem>>, vector<64x1xf32>,
    %cst_87 = arith.constant dense<0xFF800000> : vector<64xf32>
    %144 = vector.multi_reduction <maximumf>, %133, %cst_87 [1] : vector<64x64xf32> to vector<64xf32>
    %145 = vector.shape_cast %144 : vector<64xf32> to vector<64x1xf32>
    %c32_88 = arith.constant 32 : index
    %c0_89 = arith.constant 0 : index
    %146 = vector.load %arg18[%c32_88, %c0_89] : memref<128x1xf32, #tpu.memory_space<vmem>>, vector<64x1xf32>
    tpu.vector_store %arg18[%c32_88, %c0_89], %145 {strides = array<i32>} : memref<128x1xf32, #tpu.memory_space<vmem>>, vector<64x1xf32>,
    %c-3_i32 = arith.constant -3 : i32
    %147 = vector.broadcast %c-3_i32 : i32 to vector<64x1xi32>
    %148 = arith.addi %18, %147 : vector<64x1xi32>
    %c0_i32_90 = arith.constant 0 : i32
    %149 = vector.broadcast %c0_i32_90 : i32 to vector<64x1xi32>
    %150 = arith.cmpi sge, %148, %149 : vector<64x1xi32>
    %c-3_i32_91 = arith.constant -3 : i32
    %151 = vector.broadcast %c-3_i32_91 : i32 to vector<64x1xi32>
    %152 = arith.addi %18, %151 : vector<64x1xi32>
    %c8_i32_92 = arith.constant 8 : i32
    %153 = vector.broadcast %c8_i32_92 : i32 to vector<64x1xi32>
    %154 = arith.cmpi slt, %152, %153 : vector<64x1xi32>
    %155 = arith.andi %150, %154 : vector<64x1xi1>
    %156 = arith.extui %155 : vector<64x1xi1> to vector<64x1xi32>
    %157 = arith.sitofp %156 : vector<64x1xi32> to vector<64x1xf32>
    %c-2_i32 = arith.constant -2 : i32
    %158 = vector.broadcast %c-2_i32 : i32 to vector<64x1xi32>
    %159 = arith.addi %18, %158 : vector<64x1xi32>
    %c0_i32_93 = arith.constant 0 : i32
    %160 = vector.broadcast %c0_i32_93 : i32 to vector<64x1xi32>
    %161 = arith.cmpi sge, %159, %160 : vector<64x1xi32>
    %c-2_i32_94 = arith.constant -2 : i32
    %162 = vector.broadcast %c-2_i32_94 : i32 to vector<64x1xi32>
    %163 = arith.addi %18, %162 : vector<64x1xi32>
    %c8_i32_95 = arith.constant 8 : i32
    %164 = vector.broadcast %c8_i32_95 : i32 to vector<64x1xi32>
    %165 = arith.cmpi slt, %163, %164 : vector<64x1xi32>
    %166 = arith.andi %161, %165 : vector<64x1xi1>
    %167 = arith.extui %166 : vector<64x1xi1> to vector<64x1xi32>
    %168 = arith.sitofp %167 : vector<64x1xi32> to vector<64x1xf32>
    %c-1_i32 = arith.constant -1 : i32
    %169 = vector.broadcast %c-1_i32 : i32 to vector<64x1xi32>
    %170 = arith.addi %18, %169 : vector<64x1xi32>
    %c0_i32_96 = arith.constant 0 : i32
    %171 = vector.broadcast %c0_i32_96 : i32 to vector<64x1xi32>
    %172 = arith.cmpi sge, %170, %171 : vector<64x1xi32>
    %c-1_i32_97 = arith.constant -1 : i32
    %173 = vector.broadcast %c-1_i32_97 : i32 to vector<64x1xi32>
    %174 = arith.addi %18, %173 : vector<64x1xi32>
    %c8_i32_98 = arith.constant 8 : i32
    %175 = vector.broadcast %c8_i32_98 : i32 to vector<64x1xi32>
    %176 = arith.cmpi slt, %174, %175 : vector<64x1xi32>
    %177 = arith.andi %172, %176 : vector<64x1xi1>
    %178 = arith.extui %177 : vector<64x1xi1> to vector<64x1xi32>
    %179 = arith.sitofp %178 : vector<64x1xi32> to vector<64x1xf32>
    %c1_i32_99 = arith.constant 1 : i32
    %180 = vector.broadcast %c1_i32_99 : i32 to vector<64x1xi32>
    %181 = arith.addi %18, %180 : vector<64x1xi32>
    %c0_i32_100 = arith.constant 0 : i32
    %182 = vector.broadcast %c0_i32_100 : i32 to vector<64x1xi32>
    %183 = arith.cmpi sge, %181, %182 : vector<64x1xi32>
    %c1_i32_101 = arith.constant 1 : i32
    %184 = vector.broadcast %c1_i32_101 : i32 to vector<64x1xi32>
    %185 = arith.addi %18, %184 : vector<64x1xi32>
    %c8_i32_102 = arith.constant 8 : i32
    %186 = vector.broadcast %c8_i32_102 : i32 to vector<64x1xi32>
    %187 = arith.cmpi slt, %185, %186 : vector<64x1xi32>
    %188 = arith.andi %183, %187 : vector<64x1xi1>
    %189 = arith.extui %188 : vector<64x1xi1> to vector<64x1xi32>
    %190 = arith.sitofp %189 : vector<64x1xi32> to vector<64x1xf32>
    %c2_i32 = arith.constant 2 : i32
    %191 = vector.broadcast %c2_i32 : i32 to vector<64x1xi32>
    %192 = arith.addi %18, %191 : vector<64x1xi32>
    %c0_i32_103 = arith.constant 0 : i32
    %193 = vector.broadcast %c0_i32_103 : i32 to vector<64x1xi32>
    %194 = arith.cmpi sge, %192, %193 : vector<64x1xi32>
    %c2_i32_104 = arith.constant 2 : i32
    %195 = vector.broadcast %c2_i32_104 : i32 to vector<64x1xi32>
    %196 = arith.addi %18, %195 : vector<64x1xi32>
    %c8_i32_105 = arith.constant 8 : i32
    %197 = vector.broadcast %c8_i32_105 : i32 to vector<64x1xi32>
    %198 = arith.cmpi slt, %196, %197 : vector<64x1xi32>
    %199 = arith.andi %194, %198 : vector<64x1xi1>
    %200 = arith.extui %199 : vector<64x1xi1> to vector<64x1xi32>
    %201 = arith.sitofp %200 : vector<64x1xi32> to vector<64x1xf32>
    %c3_i32 = arith.constant 3 : i32
    %202 = vector.broadcast %c3_i32 : i32 to vector<64x1xi32>
    %203 = arith.addi %18, %202 : vector<64x1xi32>
    %c0_i32_106 = arith.constant 0 : i32
    %204 = vector.broadcast %c0_i32_106 : i32 to vector<64x1xi32>
    %205 = arith.cmpi sge, %203, %204 : vector<64x1xi32>
    %c3_i32_107 = arith.constant 3 : i32
    %206 = vector.broadcast %c3_i32_107 : i32 to vector<64x1xi32>
    %207 = arith.addi %18, %206 : vector<64x1xi32>
    %c8_i32_108 = arith.constant 8 : i32
    %208 = vector.broadcast %c8_i32_108 : i32 to vector<64x1xi32>
    %209 = arith.cmpi slt, %207, %208 : vector<64x1xi32>
    %210 = arith.andi %205, %209 : vector<64x1xi1>
    %211 = arith.extui %210 : vector<64x1xi1> to vector<64x1xi32>
    %212 = arith.sitofp %211 : vector<64x1xi32> to vector<64x1xf32>
    %cst_109 = arith.constant 0.000000e+00 : f32
    %213 = vector.broadcast %cst_109 : f32 to vector<64x1xf32>
    %c5 = arith.constant 5 : index
    %c0_110 = arith.constant 0 : index
    %214 = vector.load %arg17[%c5, %c0_110] : memref<128x1xf32, #tpu.memory_space<vmem>>, vector<64x1xf32>
    %c5_111 = arith.constant 5 : index
    %c0_112 = arith.constant 0 : index
    %215 = vector.load %arg18[%c5_111, %c0_112] : memref<128x1xf32, #tpu.memory_space<vmem>>, vector<64x1xf32>
    %c0_113 = arith.constant 0 : index
    %216 = memref.load %arg13[%c0_113] : memref<98xf32, #tpu.memory_space<smem>>
    %217 = vector.broadcast %216 : f32 to vector<64x1xf32>
    %218 = arith.mulf %217, %214 : vector<64x1xf32>
    %c1 = arith.constant 1 : index
    %219 = memref.load %arg13[%c1] : memref<98xf32, #tpu.memory_space<smem>>
    %220 = vector.broadcast %219 : f32 to vector<64x1xf32>
    %221 = arith.mulf %220, %215 : vector<64x1xf32>
    %222 = arith.addf %218, %221 : vector<64x1xf32>
    %223 = arith.mulf %222, %157 : vector<64x1xf32>
    %224 = arith.addf %213, %223 : vector<64x1xf32>
    %c6 = arith.constant 6 : index
    %c0_114 = arith.constant 0 : index
    %225 = vector.load %arg17[%c6, %c0_114] : memref<128x1xf32, #tpu.memory_space<vmem>>, vector<64x1xf32>
    %c6_115 = arith.constant 6 : index
    %c0_116 = arith.constant 0 : index
    %226 = vector.load %arg18[%c6_115, %c0_116] : memref<128x1xf32, #tpu.memory_space<vmem>>, vector<64x1xf32>
    %c2 = arith.constant 2 : index
    %227 = memref.load %arg13[%c2] : memref<98xf32, #tpu.memory_space<smem>>
    %228 = vector.broadcast %227 : f32 to vector<64x1xf32>
    %229 = arith.mulf %228, %225 : vector<64x1xf32>
    %c3 = arith.constant 3 : index
    %230 = memref.load %arg13[%c3] : memref<98xf32, #tpu.memory_space<smem>>
    %231 = vector.broadcast %230 : f32 to vector<64x1xf32>
    %232 = arith.mulf %231, %226 : vector<64x1xf32>
    %233 = arith.addf %229, %232 : vector<64x1xf32>
    %234 = arith.mulf %233, %168 : vector<64x1xf32>
    %235 = arith.addf %224, %234 : vector<64x1xf32>
    %c7_117 = arith.constant 7 : index
    %c0_118 = arith.constant 0 : index
    %236 = vector.load %arg17[%c7_117, %c0_118] : memref<128x1xf32, #tpu.memory_space<vmem>>, vector<64x1xf32>
    %c7_119 = arith.constant 7 : index
    %c0_120 = arith.constant 0 : index
    %237 = vector.load %arg18[%c7_119, %c0_120] : memref<128x1xf32, #tpu.memory_space<vmem>>, vector<64x1xf32>
    %c4 = arith.constant 4 : index
    %238 = memref.load %arg13[%c4] : memref<98xf32, #tpu.memory_space<smem>>
    %239 = vector.broadcast %238 : f32 to vector<64x1xf32>
    %240 = arith.mulf %239, %236 : vector<64x1xf32>
    %c5_121 = arith.constant 5 : index
    %241 = memref.load %arg13[%c5_121] : memref<98xf32, #tpu.memory_space<smem>>
    %242 = vector.broadcast %241 : f32 to vector<64x1xf32>
    %243 = arith.mulf %242, %237 : vector<64x1xf32>
    %244 = arith.addf %240, %243 : vector<64x1xf32>
    %245 = arith.mulf %244, %179 : vector<64x1xf32>
    %246 = arith.addf %235, %245 : vector<64x1xf32>
    %c8_122 = arith.constant 8 : index
    %c0_123 = arith.constant 0 : index
    %247 = vector.load %arg17[%c8_122, %c0_123] : memref<128x1xf32, #tpu.memory_space<vmem>>, vector<64x1xf32>
    %c8_124 = arith.constant 8 : index
    %c0_125 = arith.constant 0 : index
    %248 = vector.load %arg18[%c8_124, %c0_125] : memref<128x1xf32, #tpu.memory_space<vmem>>, vector<64x1xf32>
    %c6_126 = arith.constant 6 : index
    %249 = memref.load %arg13[%c6_126] : memref<98xf32, #tpu.memory_space<smem>>
    %250 = vector.broadcast %249 : f32 to vector<64x1xf32>
    %251 = arith.mulf %250, %247 : vector<64x1xf32>
    %c7_127 = arith.constant 7 : index
    %252 = memref.load %arg13[%c7_127] : memref<98xf32, #tpu.memory_space<smem>>
    %253 = vector.broadcast %252 : f32 to vector<64x1xf32>
    %254 = arith.mulf %253, %248 : vector<64x1xf32>
    %255 = arith.addf %251, %254 : vector<64x1xf32>
    %256 = arith.addf %246, %255 : vector<64x1xf32>
    %c9_128 = arith.constant 9 : index
    %c0_129 = arith.constant 0 : index
    %257 = vector.load %arg17[%c9_128, %c0_129] : memref<128x1xf32, #tpu.memory_space<vmem>>, vector<64x1xf32>
    %c9_130 = arith.constant 9 : index
    %c0_131 = arith.constant 0 : index
    %258 = vector.load %arg18[%c9_130, %c0_131] : memref<128x1xf32, #tpu.memory_space<vmem>>, vector<64x1xf32>
    %c8_132 = arith.constant 8 : index
    %259 = memref.load %arg13[%c8_132] : memref<98xf32, #tpu.memory_space<smem>>
    %260 = vector.broadcast %259 : f32 to vector<64x1xf32>
    %261 = arith.mulf %260, %257 : vector<64x1xf32>
    %c9_133 = arith.constant 9 : index
    %262 = memref.load %arg13[%c9_133] : memref<98xf32, #tpu.memory_space<smem>>
    %263 = vector.broadcast %262 : f32 to vector<64x1xf32>
    %264 = arith.mulf %263, %258 : vector<64x1xf32>
    %265 = arith.addf %261, %264 : vector<64x1xf32>
    %266 = arith.mulf %265, %190 : vector<64x1xf32>
    %267 = arith.addf %256, %266 : vector<64x1xf32>
    %c10 = arith.constant 10 : index
    %c0_134 = arith.constant 0 : index
    %268 = vector.load %arg17[%c10, %c0_134] : memref<128x1xf32, #tpu.memory_space<vmem>>, vector<64x1xf32>
    %c10_135 = arith.constant 10 : index
    %c0_136 = arith.constant 0 : index
    %269 = vector.load %arg18[%c10_135, %c0_136] : memref<128x1xf32, #tpu.memory_space<vmem>>, vector<64x1xf32>
    %c10_137 = arith.constant 10 : index
    %270 = memref.load %arg13[%c10_137] : memref<98xf32, #tpu.memory_space<smem>>
    %271 = vector.broadcast %270 : f32 to vector<64x1xf32>
    %272 = arith.mulf %271, %268 : vector<64x1xf32>
    %c11 = arith.constant 11 : index
    %273 = memref.load %arg13[%c11] : memref<98xf32, #tpu.memory_space<smem>>
    %274 = vector.broadcast %273 : f32 to vector<64x1xf32>
    %275 = arith.mulf %274, %269 : vector<64x1xf32>
    %276 = arith.addf %272, %275 : vector<64x1xf32>
    %277 = arith.mulf %276, %201 : vector<64x1xf32>
    %278 = arith.addf %267, %277 : vector<64x1xf32>
    %c11_138 = arith.constant 11 : index
    %c0_139 = arith.constant 0 : index
    %279 = vector.load %arg17[%c11_138, %c0_139] : memref<128x1xf32, #tpu.memory_space<vmem>>, vector<64x1xf32>
    %c11_140 = arith.constant 11 : index
    %c0_141 = arith.constant 0 : index
    %280 = vector.load %arg18[%c11_140, %c0_141] : memref<128x1xf32, #tpu.memory_space<vmem>>, vector<64x1xf32>
    %c12 = arith.constant 12 : index
    %281 = memref.load %arg13[%c12] : memref<98xf32, #tpu.memory_space<smem>>
    %282 = vector.broadcast %281 : f32 to vector<64x1xf32>
    %283 = arith.mulf %282, %279 : vector<64x1xf32>
    %c13 = arith.constant 13 : index
    %284 = memref.load %arg13[%c13] : memref<98xf32, #tpu.memory_space<smem>>
    %285 = vector.broadcast %284 : f32 to vector<64x1xf32>
    %286 = arith.mulf %285, %280 : vector<64x1xf32>
    %287 = arith.addf %283, %286 : vector<64x1xf32>
    %288 = arith.mulf %287, %212 : vector<64x1xf32>
    %289 = arith.addf %278, %288 : vector<64x1xf32>
    %c13_142 = arith.constant 13 : index
    %c0_143 = arith.constant 0 : index
    %290 = vector.load %arg17[%c13_142, %c0_143] : memref<128x1xf32, #tpu.memory_space<vmem>>, vector<64x1xf32>
    %c13_144 = arith.constant 13 : index
    %c0_145 = arith.constant 0 : index
    %291 = vector.load %arg18[%c13_144, %c0_145] : memref<128x1xf32, #tpu.memory_space<vmem>>, vector<64x1xf32>
    %c14 = arith.constant 14 : index
    %292 = memref.load %arg13[%c14] : memref<98xf32, #tpu.memory_space<smem>>
    %293 = vector.broadcast %292 : f32 to vector<64x1xf32>
    %294 = arith.mulf %293, %290 : vector<64x1xf32>
    %c15_146 = arith.constant 15 : index
    %295 = memref.load %arg13[%c15_146] : memref<98xf32, #tpu.memory_space<smem>>
    %296 = vector.broadcast %295 : f32 to vector<64x1xf32>
    %297 = arith.mulf %296, %291 : vector<64x1xf32>
    %298 = arith.addf %294, %297 : vector<64x1xf32>
    %299 = arith.mulf %298, %157 : vector<64x1xf32>
    %300 = arith.addf %289, %299 : vector<64x1xf32>
    %c14_147 = arith.constant 14 : index
    %c0_148 = arith.constant 0 : index
    %301 = vector.load %arg17[%c14_147, %c0_148] : memref<128x1xf32, #tpu.memory_space<vmem>>, vector<64x1xf32>
    %c14_149 = arith.constant 14 : index
    %c0_150 = arith.constant 0 : index
    %302 = vector.load %arg18[%c14_149, %c0_150] : memref<128x1xf32, #tpu.memory_space<vmem>>, vector<64x1xf32>
    %c16_151 = arith.constant 16 : index
    %303 = memref.load %arg13[%c16_151] : memref<98xf32, #tpu.memory_space<smem>>
    %304 = vector.broadcast %303 : f32 to vector<64x1xf32>
    %305 = arith.mulf %304, %301 : vector<64x1xf32>
    %c17_152 = arith.constant 17 : index
    %306 = memref.load %arg13[%c17_152] : memref<98xf32, #tpu.memory_space<smem>>
    %307 = vector.broadcast %306 : f32 to vector<64x1xf32>
    %308 = arith.mulf %307, %302 : vector<64x1xf32>
    %309 = arith.addf %305, %308 : vector<64x1xf32>
    %310 = arith.mulf %309, %168 : vector<64x1xf32>
    %311 = arith.addf %300, %310 : vector<64x1xf32>
    %c15_153 = arith.constant 15 : index
    %c0_154 = arith.constant 0 : index
    %312 = vector.load %arg17[%c15_153, %c0_154] : memref<128x1xf32, #tpu.memory_space<vmem>>, vector<64x1xf32>
    %c15_155 = arith.constant 15 : index
    %c0_156 = arith.constant 0 : index
    %313 = vector.load %arg18[%c15_155, %c0_156] : memref<128x1xf32, #tpu.memory_space<vmem>>, vector<64x1xf32>
    %c18 = arith.constant 18 : index
    %314 = memref.load %arg13[%c18] : memref<98xf32, #tpu.memory_space<smem>>
    %315 = vector.broadcast %314 : f32 to vector<64x1xf32>
    %316 = arith.mulf %315, %312 : vector<64x1xf32>
    %c19 = arith.constant 19 : index
    %317 = memref.load %arg13[%c19] : memref<98xf32, #tpu.memory_space<smem>>
    %318 = vector.broadcast %317 : f32 to vector<64x1xf32>
    %319 = arith.mulf %318, %313 : vector<64x1xf32>
    %320 = arith.addf %316, %319 : vector<64x1xf32>
    %321 = arith.mulf %320, %179 : vector<64x1xf32>
    %322 = arith.addf %311, %321 : vector<64x1xf32>
    %c16_157 = arith.constant 16 : index
    %c0_158 = arith.constant 0 : index
    %323 = vector.load %arg17[%c16_157, %c0_158] : memref<128x1xf32, #tpu.memory_space<vmem>>, vector<64x1xf32>
    %c16_159 = arith.constant 16 : index
    %c0_160 = arith.constant 0 : index
    %324 = vector.load %arg18[%c16_159, %c0_160] : memref<128x1xf32, #tpu.memory_space<vmem>>, vector<64x1xf32>
    %c20 = arith.constant 20 : index
    %325 = memref.load %arg13[%c20] : memref<98xf32, #tpu.memory_space<smem>>
    %326 = vector.broadcast %325 : f32 to vector<64x1xf32>
    %327 = arith.mulf %326, %323 : vector<64x1xf32>
    %c21 = arith.constant 21 : index
    %328 = memref.load %arg13[%c21] : memref<98xf32, #tpu.memory_space<smem>>
    %329 = vector.broadcast %328 : f32 to vector<64x1xf32>
    %330 = arith.mulf %329, %324 : vector<64x1xf32>
    %331 = arith.addf %327, %330 : vector<64x1xf32>
    %332 = arith.addf %322, %331 : vector<64x1xf32>
    %c17_161 = arith.constant 17 : index
    %c0_162 = arith.constant 0 : index
    %333 = vector.load %arg17[%c17_161, %c0_162] : memref<128x1xf32, #tpu.memory_space<vmem>>, vector<64x1xf32>
    %c17_163 = arith.constant 17 : index
    %c0_164 = arith.constant 0 : index
    %334 = vector.load %arg18[%c17_163, %c0_164] : memref<128x1xf32, #tpu.memory_space<vmem>>, vector<64x1xf32>
    %c22 = arith.constant 22 : index
    %335 = memref.load %arg13[%c22] : memref<98xf32, #tpu.memory_space<smem>>
    %336 = vector.broadcast %335 : f32 to vector<64x1xf32>
    %337 = arith.mulf %336, %333 : vector<64x1xf32>
    %c23_165 = arith.constant 23 : index
    %338 = memref.load %arg13[%c23_165] : memref<98xf32, #tpu.memory_space<smem>>
    %339 = vector.broadcast %338 : f32 to vector<64x1xf32>
    %340 = arith.mulf %339, %334 : vector<64x1xf32>
    %341 = arith.addf %337, %340 : vector<64x1xf32>
    %342 = arith.mulf %341, %190 : vector<64x1xf32>
    %343 = arith.addf %332, %342 : vector<64x1xf32>
    %c18_166 = arith.constant 18 : index
    %c0_167 = arith.constant 0 : index
    %344 = vector.load %arg17[%c18_166, %c0_167] : memref<128x1xf32, #tpu.memory_space<vmem>>, vector<64x1xf32>
    %c18_168 = arith.constant 18 : index
    %c0_169 = arith.constant 0 : index
    %345 = vector.load %arg18[%c18_168, %c0_169] : memref<128x1xf32, #tpu.memory_space<vmem>>, vector<64x1xf32>
    %c24_170 = arith.constant 24 : index
    %346 = memref.load %arg13[%c24_170] : memref<98xf32, #tpu.memory_space<smem>>
    %347 = vector.broadcast %346 : f32 to vector<64x1xf32>
    %348 = arith.mulf %347, %344 : vector<64x1xf32>
    %c25_171 = arith.constant 25 : index
    %349 = memref.load %arg13[%c25_171] : memref<98xf32, #tpu.memory_space<smem>>
    %350 = vector.broadcast %349 : f32 to vector<64x1xf32>
    %351 = arith.mulf %350, %345 : vector<64x1xf32>
    %352 = arith.addf %348, %351 : vector<64x1xf32>
    %353 = arith.mulf %352, %201 : vector<64x1xf32>
    %354 = arith.addf %343, %353 : vector<64x1xf32>
    %c19_172 = arith.constant 19 : index
    %c0_173 = arith.constant 0 : index
    %355 = vector.load %arg17[%c19_172, %c0_173] : memref<128x1xf32, #tpu.memory_space<vmem>>, vector<64x1xf32>
    %c19_174 = arith.constant 19 : index
    %c0_175 = arith.constant 0 : index
    %356 = vector.load %arg18[%c19_174, %c0_175] : memref<128x1xf32, #tpu.memory_space<vmem>>, vector<64x1xf32>
    %c26 = arith.constant 26 : index
    %357 = memref.load %arg13[%c26] : memref<98xf32, #tpu.memory_space<smem>>
    %358 = vector.broadcast %357 : f32 to vector<64x1xf32>
    %359 = arith.mulf %358, %355 : vector<64x1xf32>
    %c27 = arith.constant 27 : index
    %360 = memref.load %arg13[%c27] : memref<98xf32, #tpu.memory_space<smem>>
    %361 = vector.broadcast %360 : f32 to vector<64x1xf32>
    %362 = arith.mulf %361, %356 : vector<64x1xf32>
    %363 = arith.addf %359, %362 : vector<64x1xf32>
    %364 = arith.mulf %363, %212 : vector<64x1xf32>
    %365 = arith.addf %354, %364 : vector<64x1xf32>
    %c21_176 = arith.constant 21 : index
    %c0_177 = arith.constant 0 : index
    %366 = vector.load %arg17[%c21_176, %c0_177] : memref<128x1xf32, #tpu.memory_space<vmem>>, vector<64x1xf32>
    %c21_178 = arith.constant 21 : index
    %c0_179 = arith.constant 0 : index
    %367 = vector.load %arg18[%c21_178, %c0_179] : memref<128x1xf32, #tpu.memory_space<vmem>>, vector<64x1xf32>
    %c28 = arith.constant 28 : index
    %368 = memref.load %arg13[%c28] : memref<98xf32, #tpu.memory_space<smem>>
    %369 = vector.broadcast %368 : f32 to vector<64x1xf32>
    %370 = arith.mulf %369, %366 : vector<64x1xf32>
    %c29 = arith.constant 29 : index
    %371 = memref.load %arg13[%c29] : memref<98xf32, #tpu.memory_space<smem>>
    %372 = vector.broadcast %371 : f32 to vector<64x1xf32>
    %373 = arith.mulf %372, %367 : vector<64x1xf32>
    %374 = arith.addf %370, %373 : vector<64x1xf32>
    %375 = arith.mulf %374, %157 : vector<64x1xf32>
    %376 = arith.addf %365, %375 : vector<64x1xf32>
    %c22_180 = arith.constant 22 : index
    %c0_181 = arith.constant 0 : index
    %377 = vector.load %arg17[%c22_180, %c0_181] : memref<128x1xf32, #tpu.memory_space<vmem>>, vector<64x1xf32>
    %c22_182 = arith.constant 22 : index
    %c0_183 = arith.constant 0 : index
    %378 = vector.load %arg18[%c22_182, %c0_183] : memref<128x1xf32, #tpu.memory_space<vmem>>, vector<64x1xf32>
    %c30 = arith.constant 30 : index
    %379 = memref.load %arg13[%c30] : memref<98xf32, #tpu.memory_space<smem>>
    %380 = vector.broadcast %379 : f32 to vector<64x1xf32>
    %381 = arith.mulf %380, %377 : vector<64x1xf32>
    %c31 = arith.constant 31 : index
    %382 = memref.load %arg13[%c31] : memref<98xf32, #tpu.memory_space<smem>>
    %383 = vector.broadcast %382 : f32 to vector<64x1xf32>
    %384 = arith.mulf %383, %378 : vector<64x1xf32>
    %385 = arith.addf %381, %384 : vector<64x1xf32>
    %386 = arith.mulf %385, %168 : vector<64x1xf32>
    %387 = arith.addf %376, %386 : vector<64x1xf32>
    %c23_184 = arith.constant 23 : index
    %c0_185 = arith.constant 0 : index
    %388 = vector.load %arg17[%c23_184, %c0_185] : memref<128x1xf32, #tpu.memory_space<vmem>>, vector<64x1xf32>
    %c23_186 = arith.constant 23 : index
    %c0_187 = arith.constant 0 : index
    %389 = vector.load %arg18[%c23_186, %c0_187] : memref<128x1xf32, #tpu.memory_space<vmem>>, vector<64x1xf32>
    %c32_188 = arith.constant 32 : index
    %390 = memref.load %arg13[%c32_188] : memref<98xf32, #tpu.memory_space<smem>>
    %391 = vector.broadcast %390 : f32 to vector<64x1xf32>
    %392 = arith.mulf %391, %388 : vector<64x1xf32>
    %c33 = arith.constant 33 : index
    %393 = memref.load %arg13[%c33] : memref<98xf32, #tpu.memory_space<smem>>
    %394 = vector.broadcast %393 : f32 to vector<64x1xf32>
    %395 = arith.mulf %394, %389 : vector<64x1xf32>
    %396 = arith.addf %392, %395 : vector<64x1xf32>
    %397 = arith.mulf %396, %179 : vector<64x1xf32>
    %398 = arith.addf %387, %397 : vector<64x1xf32>
    %c24_189 = arith.constant 24 : index
    %c0_190 = arith.constant 0 : index
    %399 = vector.load %arg17[%c24_189, %c0_190] : memref<128x1xf32, #tpu.memory_space<vmem>>, vector<64x1xf32>
    %c24_191 = arith.constant 24 : index
    %c0_192 = arith.constant 0 : index
    %400 = vector.load %arg18[%c24_191, %c0_192] : memref<128x1xf32, #tpu.memory_space<vmem>>, vector<64x1xf32>
    %c34 = arith.constant 34 : index
    %401 = memref.load %arg13[%c34] : memref<98xf32, #tpu.memory_space<smem>>
    %402 = vector.broadcast %401 : f32 to vector<64x1xf32>
    %403 = arith.mulf %402, %399 : vector<64x1xf32>
    %c35 = arith.constant 35 : index
    %404 = memref.load %arg13[%c35] : memref<98xf32, #tpu.memory_space<smem>>
    %405 = vector.broadcast %404 : f32 to vector<64x1xf32>
    %406 = arith.mulf %405, %400 : vector<64x1xf32>
    %407 = arith.addf %403, %406 : vector<64x1xf32>
    %408 = arith.addf %398, %407 : vector<64x1xf32>
    %c25_193 = arith.constant 25 : index
    %c0_194 = arith.constant 0 : index
    %409 = vector.load %arg17[%c25_193, %c0_194] : memref<128x1xf32, #tpu.memory_space<vmem>>, vector<64x1xf32>
    %c25_195 = arith.constant 25 : index
    %c0_196 = arith.constant 0 : index
    %410 = vector.load %arg18[%c25_195, %c0_196] : memref<128x1xf32, #tpu.memory_space<vmem>>, vector<64x1xf32>
    %c36 = arith.constant 36 : index
    %411 = memref.load %arg13[%c36] : memref<98xf32, #tpu.memory_space<smem>>
    %412 = vector.broadcast %411 : f32 to vector<64x1xf32>
    %413 = arith.mulf %412, %409 : vector<64x1xf32>
    %c37 = arith.constant 37 : index
    %414 = memref.load %arg13[%c37] : memref<98xf32, #tpu.memory_space<smem>>
    %415 = vector.broadcast %414 : f32 to vector<64x1xf32>
    %416 = arith.mulf %415, %410 : vector<64x1xf32>
    %417 = arith.addf %413, %416 : vector<64x1xf32>
    %418 = arith.mulf %417, %190 : vector<64x1xf32>
    %419 = arith.addf %408, %418 : vector<64x1xf32>
    %c26_197 = arith.constant 26 : index
    %c0_198 = arith.constant 0 : index
    %420 = vector.load %arg17[%c26_197, %c0_198] : memref<128x1xf32, #tpu.memory_space<vmem>>, vector<64x1xf32>
    %c26_199 = arith.constant 26 : index
    %c0_200 = arith.constant 0 : index
    %421 = vector.load %arg18[%c26_199, %c0_200] : memref<128x1xf32, #tpu.memory_space<vmem>>, vector<64x1xf32>
    %c38 = arith.constant 38 : index
    %422 = memref.load %arg13[%c38] : memref<98xf32, #tpu.memory_space<smem>>
    %423 = vector.broadcast %422 : f32 to vector<64x1xf32>
    %424 = arith.mulf %423, %420 : vector<64x1xf32>
    %c39 = arith.constant 39 : index
    %425 = memref.load %arg13[%c39] : memref<98xf32, #tpu.memory_space<smem>>
    %426 = vector.broadcast %425 : f32 to vector<64x1xf32>
    %427 = arith.mulf %426, %421 : vector<64x1xf32>
    %428 = arith.addf %424, %427 : vector<64x1xf32>
    %429 = arith.mulf %428, %201 : vector<64x1xf32>
    %430 = arith.addf %419, %429 : vector<64x1xf32>
    %c27_201 = arith.constant 27 : index
    %c0_202 = arith.constant 0 : index
    %431 = vector.load %arg17[%c27_201, %c0_202] : memref<128x1xf32, #tpu.memory_space<vmem>>, vector<64x1xf32>
    %c27_203 = arith.constant 27 : index
    %c0_204 = arith.constant 0 : index
    %432 = vector.load %arg18[%c27_203, %c0_204] : memref<128x1xf32, #tpu.memory_space<vmem>>, vector<64x1xf32>
    %c40 = arith.constant 40 : index
    %433 = memref.load %arg13[%c40] : memref<98xf32, #tpu.memory_space<smem>>
    %434 = vector.broadcast %433 : f32 to vector<64x1xf32>
    %435 = arith.mulf %434, %431 : vector<64x1xf32>
    %c41 = arith.constant 41 : index
    %436 = memref.load %arg13[%c41] : memref<98xf32, #tpu.memory_space<smem>>
    %437 = vector.broadcast %436 : f32 to vector<64x1xf32>
    %438 = arith.mulf %437, %432 : vector<64x1xf32>
    %439 = arith.addf %435, %438 : vector<64x1xf32>
    %440 = arith.mulf %439, %212 : vector<64x1xf32>
    %441 = arith.addf %430, %440 : vector<64x1xf32>
    %c29_205 = arith.constant 29 : index
    %c0_206 = arith.constant 0 : index
    %442 = vector.load %arg17[%c29_205, %c0_206] : memref<128x1xf32, #tpu.memory_space<vmem>>, vector<64x1xf32>
    %c29_207 = arith.constant 29 : index
    %c0_208 = arith.constant 0 : index
    %443 = vector.load %arg18[%c29_207, %c0_208] : memref<128x1xf32, #tpu.memory_space<vmem>>, vector<64x1xf32>
    %c42 = arith.constant 42 : index
    %444 = memref.load %arg13[%c42] : memref<98xf32, #tpu.memory_space<smem>>
    %445 = vector.broadcast %444 : f32 to vector<64x1xf32>
    %446 = arith.mulf %445, %442 : vector<64x1xf32>
    %c43 = arith.constant 43 : index
    %447 = memref.load %arg13[%c43] : memref<98xf32, #tpu.memory_space<smem>>
    %448 = vector.broadcast %447 : f32 to vector<64x1xf32>
    %449 = arith.mulf %448, %443 : vector<64x1xf32>
    %450 = arith.addf %446, %449 : vector<64x1xf32>
    %451 = arith.mulf %450, %157 : vector<64x1xf32>
    %452 = arith.addf %441, %451 : vector<64x1xf32>
    %c30_209 = arith.constant 30 : index
    %c0_210 = arith.constant 0 : index
    %453 = vector.load %arg17[%c30_209, %c0_210] : memref<128x1xf32, #tpu.memory_space<vmem>>, vector<64x1xf32>
    %c30_211 = arith.constant 30 : index
    %c0_212 = arith.constant 0 : index
    %454 = vector.load %arg18[%c30_211, %c0_212] : memref<128x1xf32, #tpu.memory_space<vmem>>, vector<64x1xf32>
    %c44 = arith.constant 44 : index
    %455 = memref.load %arg13[%c44] : memref<98xf32, #tpu.memory_space<smem>>
    %456 = vector.broadcast %455 : f32 to vector<64x1xf32>
    %457 = arith.mulf %456, %453 : vector<64x1xf32>
    %c45 = arith.constant 45 : index
    %458 = memref.load %arg13[%c45] : memref<98xf32, #tpu.memory_space<smem>>
    %459 = vector.broadcast %458 : f32 to vector<64x1xf32>
    %460 = arith.mulf %459, %454 : vector<64x1xf32>
    %461 = arith.addf %457, %460 : vector<64x1xf32>
    %462 = arith.mulf %461, %168 : vector<64x1xf32>
    %463 = arith.addf %452, %462 : vector<64x1xf32>
    %c31_213 = arith.constant 31 : index
    %c0_214 = arith.constant 0 : index
    %464 = vector.load %arg17[%c31_213, %c0_214] : memref<128x1xf32, #tpu.memory_space<vmem>>, vector<64x1xf32>
    %c31_215 = arith.constant 31 : index
    %c0_216 = arith.constant 0 : index
    %465 = vector.load %arg18[%c31_215, %c0_216] : memref<128x1xf32, #tpu.memory_space<vmem>>, vector<64x1xf32>
    %c46 = arith.constant 46 : index
    %466 = memref.load %arg13[%c46] : memref<98xf32, #tpu.memory_space<smem>>
    %467 = vector.broadcast %466 : f32 to vector<64x1xf32>
    %468 = arith.mulf %467, %464 : vector<64x1xf32>
    %c47 = arith.constant 47 : index
    %469 = memref.load %arg13[%c47] : memref<98xf32, #tpu.memory_space<smem>>
    %470 = vector.broadcast %469 : f32 to vector<64x1xf32>
    %471 = arith.mulf %470, %465 : vector<64x1xf32>
    %472 = arith.addf %468, %471 : vector<64x1xf32>
    %473 = arith.mulf %472, %179 : vector<64x1xf32>
    %474 = arith.addf %463, %473 : vector<64x1xf32>
    %c32_217 = arith.constant 32 : index
    %c0_218 = arith.constant 0 : index
    %475 = vector.load %arg17[%c32_217, %c0_218] : memref<128x1xf32, #tpu.memory_space<vmem>>, vector<64x1xf32>
    %c32_219 = arith.constant 32 : index
    %c0_220 = arith.constant 0 : index
    %476 = vector.load %arg18[%c32_219, %c0_220] : memref<128x1xf32, #tpu.memory_space<vmem>>, vector<64x1xf32>
    %c48_221 = arith.constant 48 : index
    %477 = memref.load %arg13[%c48_221] : memref<98xf32, #tpu.memory_space<smem>>
    %478 = vector.broadcast %477 : f32 to vector<64x1xf32>
    %479 = arith.mulf %478, %475 : vector<64x1xf32>
    %c49 = arith.constant 49 : index
    %480 = memref.load %arg13[%c49] : memref<98xf32, #tpu.memory_space<smem>>
    %481 = vector.broadcast %480 : f32 to vector<64x1xf32>
    %482 = arith.mulf %481, %476 : vector<64x1xf32>
    %483 = arith.addf %479, %482 : vector<64x1xf32>
    %484 = arith.addf %474, %483 : vector<64x1xf32>
    %c33_222 = arith.constant 33 : index
    %c0_223 = arith.constant 0 : index
    %485 = vector.load %arg17[%c33_222, %c0_223] : memref<128x1xf32, #tpu.memory_space<vmem>>, vector<64x1xf32>
    %c33_224 = arith.constant 33 : index
    %c0_225 = arith.constant 0 : index
    %486 = vector.load %arg18[%c33_224, %c0_225] : memref<128x1xf32, #tpu.memory_space<vmem>>, vector<64x1xf32>
    %c50 = arith.constant 50 : index
    %487 = memref.load %arg13[%c50] : memref<98xf32, #tpu.memory_space<smem>>
    %488 = vector.broadcast %487 : f32 to vector<64x1xf32>
    %489 = arith.mulf %488, %485 : vector<64x1xf32>
    %c51 = arith.constant 51 : index
    %490 = memref.load %arg13[%c51] : memref<98xf32, #tpu.memory_space<smem>>
    %491 = vector.broadcast %490 : f32 to vector<64x1xf32>
    %492 = arith.mulf %491, %486 : vector<64x1xf32>
    %493 = arith.addf %489, %492 : vector<64x1xf32>
    %494 = arith.mulf %493, %190 : vector<64x1xf32>
    %495 = arith.addf %484, %494 : vector<64x1xf32>
    %c34_226 = arith.constant 34 : index
    %c0_227 = arith.constant 0 : index
    %496 = vector.load %arg17[%c34_226, %c0_227] : memref<128x1xf32, #tpu.memory_space<vmem>>, vector<64x1xf32>
    %c34_228 = arith.constant 34 : index
    %c0_229 = arith.constant 0 : index
    %497 = vector.load %arg18[%c34_228, %c0_229] : memref<128x1xf32, #tpu.memory_space<vmem>>, vector<64x1xf32>
    %c52 = arith.constant 52 : index
    %498 = memref.load %arg13[%c52] : memref<98xf32, #tpu.memory_space<smem>>
    %499 = vector.broadcast %498 : f32 to vector<64x1xf32>
    %500 = arith.mulf %499, %496 : vector<64x1xf32>
    %c53 = arith.constant 53 : index
    %501 = memref.load %arg13[%c53] : memref<98xf32, #tpu.memory_space<smem>>
    %502 = vector.broadcast %501 : f32 to vector<64x1xf32>
    %503 = arith.mulf %502, %497 : vector<64x1xf32>
    %504 = arith.addf %500, %503 : vector<64x1xf32>
    %505 = arith.mulf %504, %201 : vector<64x1xf32>
    %506 = arith.addf %495, %505 : vector<64x1xf32>
    %c35_230 = arith.constant 35 : index
    %c0_231 = arith.constant 0 : index
    %507 = vector.load %arg17[%c35_230, %c0_231] : memref<128x1xf32, #tpu.memory_space<vmem>>, vector<64x1xf32>
    %c35_232 = arith.constant 35 : index
    %c0_233 = arith.constant 0 : index
    %508 = vector.load %arg18[%c35_232, %c0_233] : memref<128x1xf32, #tpu.memory_space<vmem>>, vector<64x1xf32>
    %c54 = arith.constant 54 : index
    %509 = memref.load %arg13[%c54] : memref<98xf32, #tpu.memory_space<smem>>
    %510 = vector.broadcast %509 : f32 to vector<64x1xf32>
    %511 = arith.mulf %510, %507 : vector<64x1xf32>
    %c55 = arith.constant 55 : index
    %512 = memref.load %arg13[%c55] : memref<98xf32, #tpu.memory_space<smem>>
    %513 = vector.broadcast %512 : f32 to vector<64x1xf32>
    %514 = arith.mulf %513, %508 : vector<64x1xf32>
    %515 = arith.addf %511, %514 : vector<64x1xf32>
    %516 = arith.mulf %515, %212 : vector<64x1xf32>
    %517 = arith.addf %506, %516 : vector<64x1xf32>
    %c37_234 = arith.constant 37 : index
    %c0_235 = arith.constant 0 : index
    %518 = vector.load %arg17[%c37_234, %c0_235] : memref<128x1xf32, #tpu.memory_space<vmem>>, vector<64x1xf32>
    %c37_236 = arith.constant 37 : index
    %c0_237 = arith.constant 0 : index
    %519 = vector.load %arg18[%c37_236, %c0_237] : memref<128x1xf32, #tpu.memory_space<vmem>>, vector<64x1xf32>
    %c56 = arith.constant 56 : index
    %520 = memref.load %arg13[%c56] : memref<98xf32, #tpu.memory_space<smem>>
    %521 = vector.broadcast %520 : f32 to vector<64x1xf32>
    %522 = arith.mulf %521, %518 : vector<64x1xf32>
    %c57 = arith.constant 57 : index
    %523 = memref.load %arg13[%c57] : memref<98xf32, #tpu.memory_space<smem>>
    %524 = vector.broadcast %523 : f32 to vector<64x1xf32>
    %525 = arith.mulf %524, %519 : vector<64x1xf32>
    %526 = arith.addf %522, %525 : vector<64x1xf32>
    %527 = arith.mulf %526, %157 : vector<64x1xf32>
    %528 = arith.addf %517, %527 : vector<64x1xf32>
    %c38_238 = arith.constant 38 : index
    %c0_239 = arith.constant 0 : index
    %529 = vector.load %arg17[%c38_238, %c0_239] : memref<128x1xf32, #tpu.memory_space<vmem>>, vector<64x1xf32>
    %c38_240 = arith.constant 38 : index
    %c0_241 = arith.constant 0 : index
    %530 = vector.load %arg18[%c38_240, %c0_241] : memref<128x1xf32, #tpu.memory_space<vmem>>, vector<64x1xf32>
    %c58 = arith.constant 58 : index
    %531 = memref.load %arg13[%c58] : memref<98xf32, #tpu.memory_space<smem>>
    %532 = vector.broadcast %531 : f32 to vector<64x1xf32>
    %533 = arith.mulf %532, %529 : vector<64x1xf32>
    %c59 = arith.constant 59 : index
    %534 = memref.load %arg13[%c59] : memref<98xf32, #tpu.memory_space<smem>>
    %535 = vector.broadcast %534 : f32 to vector<64x1xf32>
    %536 = arith.mulf %535, %530 : vector<64x1xf32>
    %537 = arith.addf %533, %536 : vector<64x1xf32>
    %538 = arith.mulf %537, %168 : vector<64x1xf32>
    %539 = arith.addf %528, %538 : vector<64x1xf32>
    %c39_242 = arith.constant 39 : index
    %c0_243 = arith.constant 0 : index
    %540 = vector.load %arg17[%c39_242, %c0_243] : memref<128x1xf32, #tpu.memory_space<vmem>>, vector<64x1xf32>
    %c39_244 = arith.constant 39 : index
    %c0_245 = arith.constant 0 : index
    %541 = vector.load %arg18[%c39_244, %c0_245] : memref<128x1xf32, #tpu.memory_space<vmem>>, vector<64x1xf32>
    %c60 = arith.constant 60 : index
    %542 = memref.load %arg13[%c60] : memref<98xf32, #tpu.memory_space<smem>>
    %543 = vector.broadcast %542 : f32 to vector<64x1xf32>
    %544 = arith.mulf %543, %540 : vector<64x1xf32>
    %c61 = arith.constant 61 : index
    %545 = memref.load %arg13[%c61] : memref<98xf32, #tpu.memory_space<smem>>
    %546 = vector.broadcast %545 : f32 to vector<64x1xf32>
    %547 = arith.mulf %546, %541 : vector<64x1xf32>
    %548 = arith.addf %544, %547 : vector<64x1xf32>
    %549 = arith.mulf %548, %179 : vector<64x1xf32>
    %550 = arith.addf %539, %549 : vector<64x1xf32>
    %c40_246 = arith.constant 40 : index
    %c0_247 = arith.constant 0 : index
    %551 = vector.load %arg17[%c40_246, %c0_247] : memref<128x1xf32, #tpu.memory_space<vmem>>, vector<64x1xf32>
    %c40_248 = arith.constant 40 : index
    %c0_249 = arith.constant 0 : index
    %552 = vector.load %arg18[%c40_248, %c0_249] : memref<128x1xf32, #tpu.memory_space<vmem>>, vector<64x1xf32>
    %c62 = arith.constant 62 : index
    %553 = memref.load %arg13[%c62] : memref<98xf32, #tpu.memory_space<smem>>
    %554 = vector.broadcast %553 : f32 to vector<64x1xf32>
    %555 = arith.mulf %554, %551 : vector<64x1xf32>
    %c63 = arith.constant 63 : index
    %556 = memref.load %arg13[%c63] : memref<98xf32, #tpu.memory_space<smem>>
    %557 = vector.broadcast %556 : f32 to vector<64x1xf32>
    %558 = arith.mulf %557, %552 : vector<64x1xf32>
    %559 = arith.addf %555, %558 : vector<64x1xf32>
    %560 = arith.addf %550, %559 : vector<64x1xf32>
    %c41_250 = arith.constant 41 : index
    %c0_251 = arith.constant 0 : index
    %561 = vector.load %arg17[%c41_250, %c0_251] : memref<128x1xf32, #tpu.memory_space<vmem>>, vector<64x1xf32>
    %c41_252 = arith.constant 41 : index
    %c0_253 = arith.constant 0 : index
    %562 = vector.load %arg18[%c41_252, %c0_253] : memref<128x1xf32, #tpu.memory_space<vmem>>, vector<64x1xf32>
    %c64_254 = arith.constant 64 : index
    %563 = memref.load %arg13[%c64_254] : memref<98xf32, #tpu.memory_space<smem>>
    %564 = vector.broadcast %563 : f32 to vector<64x1xf32>
    %565 = arith.mulf %564, %561 : vector<64x1xf32>
    %c65 = arith.constant 65 : index
    %566 = memref.load %arg13[%c65] : memref<98xf32, #tpu.memory_space<smem>>
    %567 = vector.broadcast %566 : f32 to vector<64x1xf32>
    %568 = arith.mulf %567, %562 : vector<64x1xf32>
    %569 = arith.addf %565, %568 : vector<64x1xf32>
    %570 = arith.mulf %569, %190 : vector<64x1xf32>
    %571 = arith.addf %560, %570 : vector<64x1xf32>
    %c42_255 = arith.constant 42 : index
    %c0_256 = arith.constant 0 : index
    %572 = vector.load %arg17[%c42_255, %c0_256] : memref<128x1xf32, #tpu.memory_space<vmem>>, vector<64x1xf32>
    %c42_257 = arith.constant 42 : index
    %c0_258 = arith.constant 0 : index
    %573 = vector.load %arg18[%c42_257, %c0_258] : memref<128x1xf32, #tpu.memory_space<vmem>>, vector<64x1xf32>
    %c66 = arith.constant 66 : index
    %574 = memref.load %arg13[%c66] : memref<98xf32, #tpu.memory_space<smem>>
    %575 = vector.broadcast %574 : f32 to vector<64x1xf32>
    %576 = arith.mulf %575, %572 : vector<64x1xf32>
    %c67 = arith.constant 67 : index
    %577 = memref.load %arg13[%c67] : memref<98xf32, #tpu.memory_space<smem>>
    %578 = vector.broadcast %577 : f32 to vector<64x1xf32>
    %579 = arith.mulf %578, %573 : vector<64x1xf32>
    %580 = arith.addf %576, %579 : vector<64x1xf32>
    %581 = arith.mulf %580, %201 : vector<64x1xf32>
    %582 = arith.addf %571, %581 : vector<64x1xf32>
    %c43_259 = arith.constant 43 : index
    %c0_260 = arith.constant 0 : index
    %583 = vector.load %arg17[%c43_259, %c0_260] : memref<128x1xf32, #tpu.memory_space<vmem>>, vector<64x1xf32>
    %c43_261 = arith.constant 43 : index
    %c0_262 = arith.constant 0 : index
    %584 = vector.load %arg18[%c43_261, %c0_262] : memref<128x1xf32, #tpu.memory_space<vmem>>, vector<64x1xf32>
    %c68 = arith.constant 68 : index
    %585 = memref.load %arg13[%c68] : memref<98xf32, #tpu.memory_space<smem>>
    %586 = vector.broadcast %585 : f32 to vector<64x1xf32>
    %587 = arith.mulf %586, %583 : vector<64x1xf32>
    %c69 = arith.constant 69 : index
    %588 = memref.load %arg13[%c69] : memref<98xf32, #tpu.memory_space<smem>>
    %589 = vector.broadcast %588 : f32 to vector<64x1xf32>
    %590 = arith.mulf %589, %584 : vector<64x1xf32>
    %591 = arith.addf %587, %590 : vector<64x1xf32>
    %592 = arith.mulf %591, %212 : vector<64x1xf32>
    %593 = arith.addf %582, %592 : vector<64x1xf32>
    %c45_263 = arith.constant 45 : index
    %c0_264 = arith.constant 0 : index
    %594 = vector.load %arg17[%c45_263, %c0_264] : memref<128x1xf32, #tpu.memory_space<vmem>>, vector<64x1xf32>
    %c45_265 = arith.constant 45 : index
    %c0_266 = arith.constant 0 : index
    %595 = vector.load %arg18[%c45_265, %c0_266] : memref<128x1xf32, #tpu.memory_space<vmem>>, vector<64x1xf32>
    %c70 = arith.constant 70 : index
    %596 = memref.load %arg13[%c70] : memref<98xf32, #tpu.memory_space<smem>>
    %597 = vector.broadcast %596 : f32 to vector<64x1xf32>
    %598 = arith.mulf %597, %594 : vector<64x1xf32>
    %c71 = arith.constant 71 : index
    %599 = memref.load %arg13[%c71] : memref<98xf32, #tpu.memory_space<smem>>
    %600 = vector.broadcast %599 : f32 to vector<64x1xf32>
    %601 = arith.mulf %600, %595 : vector<64x1xf32>
    %602 = arith.addf %598, %601 : vector<64x1xf32>
    %603 = arith.mulf %602, %157 : vector<64x1xf32>
    %604 = arith.addf %593, %603 : vector<64x1xf32>
    %c46_267 = arith.constant 46 : index
    %c0_268 = arith.constant 0 : index
    %605 = vector.load %arg17[%c46_267, %c0_268] : memref<128x1xf32, #tpu.memory_space<vmem>>, vector<64x1xf32>
    %c46_269 = arith.constant 46 : index
    %c0_270 = arith.constant 0 : index
    %606 = vector.load %arg18[%c46_269, %c0_270] : memref<128x1xf32, #tpu.memory_space<vmem>>, vector<64x1xf32>
    %c72 = arith.constant 72 : index
    %607 = memref.load %arg13[%c72] : memref<98xf32, #tpu.memory_space<smem>>
    %608 = vector.broadcast %607 : f32 to vector<64x1xf32>
    %609 = arith.mulf %608, %605 : vector<64x1xf32>
    %c73 = arith.constant 73 : index
    %610 = memref.load %arg13[%c73] : memref<98xf32, #tpu.memory_space<smem>>
    %611 = vector.broadcast %610 : f32 to vector<64x1xf32>
    %612 = arith.mulf %611, %606 : vector<64x1xf32>
    %613 = arith.addf %609, %612 : vector<64x1xf32>
    %614 = arith.mulf %613, %168 : vector<64x1xf32>
    %615 = arith.addf %604, %614 : vector<64x1xf32>
    %c47_271 = arith.constant 47 : index
    %c0_272 = arith.constant 0 : index
    %616 = vector.load %arg17[%c47_271, %c0_272] : memref<128x1xf32, #tpu.memory_space<vmem>>, vector<64x1xf32>
    %c47_273 = arith.constant 47 : index
    %c0_274 = arith.constant 0 : index
    %617 = vector.load %arg18[%c47_273, %c0_274] : memref<128x1xf32, #tpu.memory_space<vmem>>, vector<64x1xf32>
    %c74 = arith.constant 74 : index
    %618 = memref.load %arg13[%c74] : memref<98xf32, #tpu.memory_space<smem>>
    %619 = vector.broadcast %618 : f32 to vector<64x1xf32>
    %620 = arith.mulf %619, %616 : vector<64x1xf32>
    %c75 = arith.constant 75 : index
    %621 = memref.load %arg13[%c75] : memref<98xf32, #tpu.memory_space<smem>>
    %622 = vector.broadcast %621 : f32 to vector<64x1xf32>
    %623 = arith.mulf %622, %617 : vector<64x1xf32>
    %624 = arith.addf %620, %623 : vector<64x1xf32>
    %625 = arith.mulf %624, %179 : vector<64x1xf32>
    %626 = arith.addf %615, %625 : vector<64x1xf32>
    %c48_275 = arith.constant 48 : index
    %c0_276 = arith.constant 0 : index
    %627 = vector.load %arg17[%c48_275, %c0_276] : memref<128x1xf32, #tpu.memory_space<vmem>>, vector<64x1xf32>
    %c48_277 = arith.constant 48 : index
    %c0_278 = arith.constant 0 : index
    %628 = vector.load %arg18[%c48_277, %c0_278] : memref<128x1xf32, #tpu.memory_space<vmem>>, vector<64x1xf32>
    %c76 = arith.constant 76 : index
    %629 = memref.load %arg13[%c76] : memref<98xf32, #tpu.memory_space<smem>>
    %630 = vector.broadcast %629 : f32 to vector<64x1xf32>
    %631 = arith.mulf %630, %627 : vector<64x1xf32>
    %c77 = arith.constant 77 : index
    %632 = memref.load %arg13[%c77] : memref<98xf32, #tpu.memory_space<smem>>
    %633 = vector.broadcast %632 : f32 to vector<64x1xf32>
    %634 = arith.mulf %633, %628 : vector<64x1xf32>
    %635 = arith.addf %631, %634 : vector<64x1xf32>
    %636 = arith.addf %626, %635 : vector<64x1xf32>
    %c49_279 = arith.constant 49 : index
    %c0_280 = arith.constant 0 : index
    %637 = vector.load %arg17[%c49_279, %c0_280] : memref<128x1xf32, #tpu.memory_space<vmem>>, vector<64x1xf32>
    %c49_281 = arith.constant 49 : index
    %c0_282 = arith.constant 0 : index
    %638 = vector.load %arg18[%c49_281, %c0_282] : memref<128x1xf32, #tpu.memory_space<vmem>>, vector<64x1xf32>
    %c78 = arith.constant 78 : index
    %639 = memref.load %arg13[%c78] : memref<98xf32, #tpu.memory_space<smem>>
    %640 = vector.broadcast %639 : f32 to vector<64x1xf32>
    %641 = arith.mulf %640, %637 : vector<64x1xf32>
    %c79 = arith.constant 79 : index
    %642 = memref.load %arg13[%c79] : memref<98xf32, #tpu.memory_space<smem>>
    %643 = vector.broadcast %642 : f32 to vector<64x1xf32>
    %644 = arith.mulf %643, %638 : vector<64x1xf32>
    %645 = arith.addf %641, %644 : vector<64x1xf32>
    %646 = arith.mulf %645, %190 : vector<64x1xf32>
    %647 = arith.addf %636, %646 : vector<64x1xf32>
    %c50_283 = arith.constant 50 : index
    %c0_284 = arith.constant 0 : index
    %648 = vector.load %arg17[%c50_283, %c0_284] : memref<128x1xf32, #tpu.memory_space<vmem>>, vector<64x1xf32>
    %c50_285 = arith.constant 50 : index
    %c0_286 = arith.constant 0 : index
    %649 = vector.load %arg18[%c50_285, %c0_286] : memref<128x1xf32, #tpu.memory_space<vmem>>, vector<64x1xf32>
    %c80_287 = arith.constant 80 : index
    %650 = memref.load %arg13[%c80_287] : memref<98xf32, #tpu.memory_space<smem>>
    %651 = vector.broadcast %650 : f32 to vector<64x1xf32>
    %652 = arith.mulf %651, %648 : vector<64x1xf32>
    %c81 = arith.constant 81 : index
    %653 = memref.load %arg13[%c81] : memref<98xf32, #tpu.memory_space<smem>>
    %654 = vector.broadcast %653 : f32 to vector<64x1xf32>
    %655 = arith.mulf %654, %649 : vector<64x1xf32>
    %656 = arith.addf %652, %655 : vector<64x1xf32>
    %657 = arith.mulf %656, %201 : vector<64x1xf32>
    %658 = arith.addf %647, %657 : vector<64x1xf32>
    %c51_288 = arith.constant 51 : index
    %c0_289 = arith.constant 0 : index
    %659 = vector.load %arg17[%c51_288, %c0_289] : memref<128x1xf32, #tpu.memory_space<vmem>>, vector<64x1xf32>
    %c51_290 = arith.constant 51 : index
    %c0_291 = arith.constant 0 : index
    %660 = vector.load %arg18[%c51_290, %c0_291] : memref<128x1xf32, #tpu.memory_space<vmem>>, vector<64x1xf32>
    %c82 = arith.constant 82 : index
    %661 = memref.load %arg13[%c82] : memref<98xf32, #tpu.memory_space<smem>>
    %662 = vector.broadcast %661 : f32 to vector<64x1xf32>
    %663 = arith.mulf %662, %659 : vector<64x1xf32>
    %c83 = arith.constant 83 : index
    %664 = memref.load %arg13[%c83] : memref<98xf32, #tpu.memory_space<smem>>
    %665 = vector.broadcast %664 : f32 to vector<64x1xf32>
    %666 = arith.mulf %665, %660 : vector<64x1xf32>
    %667 = arith.addf %663, %666 : vector<64x1xf32>
    %668 = arith.mulf %667, %212 : vector<64x1xf32>
    %669 = arith.addf %658, %668 : vector<64x1xf32>
    %c53_292 = arith.constant 53 : index
    %c0_293 = arith.constant 0 : index
    %670 = vector.load %arg17[%c53_292, %c0_293] : memref<128x1xf32, #tpu.memory_space<vmem>>, vector<64x1xf32>
    %c53_294 = arith.constant 53 : index
    %c0_295 = arith.constant 0 : index
    %671 = vector.load %arg18[%c53_294, %c0_295] : memref<128x1xf32, #tpu.memory_space<vmem>>, vector<64x1xf32>
    %c84 = arith.constant 84 : index
    %672 = memref.load %arg13[%c84] : memref<98xf32, #tpu.memory_space<smem>>
    %673 = vector.broadcast %672 : f32 to vector<64x1xf32>
    %674 = arith.mulf %673, %670 : vector<64x1xf32>
    %c85 = arith.constant 85 : index
    %675 = memref.load %arg13[%c85] : memref<98xf32, #tpu.memory_space<smem>>
    %676 = vector.broadcast %675 : f32 to vector<64x1xf32>
    %677 = arith.mulf %676, %671 : vector<64x1xf32>
    %678 = arith.addf %674, %677 : vector<64x1xf32>
    %679 = arith.mulf %678, %157 : vector<64x1xf32>
    %680 = arith.addf %669, %679 : vector<64x1xf32>
    %c54_296 = arith.constant 54 : index
    %c0_297 = arith.constant 0 : index
    %681 = vector.load %arg17[%c54_296, %c0_297] : memref<128x1xf32, #tpu.memory_space<vmem>>, vector<64x1xf32>
    %c54_298 = arith.constant 54 : index
    %c0_299 = arith.constant 0 : index
    %682 = vector.load %arg18[%c54_298, %c0_299] : memref<128x1xf32, #tpu.memory_space<vmem>>, vector<64x1xf32>
    %c86 = arith.constant 86 : index
    %683 = memref.load %arg13[%c86] : memref<98xf32, #tpu.memory_space<smem>>
    %684 = vector.broadcast %683 : f32 to vector<64x1xf32>
    %685 = arith.mulf %684, %681 : vector<64x1xf32>
    %c87 = arith.constant 87 : index
    %686 = memref.load %arg13[%c87] : memref<98xf32, #tpu.memory_space<smem>>
    %687 = vector.broadcast %686 : f32 to vector<64x1xf32>
    %688 = arith.mulf %687, %682 : vector<64x1xf32>
    %689 = arith.addf %685, %688 : vector<64x1xf32>
    %690 = arith.mulf %689, %168 : vector<64x1xf32>
    %691 = arith.addf %680, %690 : vector<64x1xf32>
    %c55_300 = arith.constant 55 : index
    %c0_301 = arith.constant 0 : index
    %692 = vector.load %arg17[%c55_300, %c0_301] : memref<128x1xf32, #tpu.memory_space<vmem>>, vector<64x1xf32>
    %c55_302 = arith.constant 55 : index
    %c0_303 = arith.constant 0 : index
    %693 = vector.load %arg18[%c55_302, %c0_303] : memref<128x1xf32, #tpu.memory_space<vmem>>, vector<64x1xf32>
    %c88 = arith.constant 88 : index
    %694 = memref.load %arg13[%c88] : memref<98xf32, #tpu.memory_space<smem>>
    %695 = vector.broadcast %694 : f32 to vector<64x1xf32>
    %696 = arith.mulf %695, %692 : vector<64x1xf32>
    %c89 = arith.constant 89 : index
    %697 = memref.load %arg13[%c89] : memref<98xf32, #tpu.memory_space<smem>>
    %698 = vector.broadcast %697 : f32 to vector<64x1xf32>
    %699 = arith.mulf %698, %693 : vector<64x1xf32>
    %700 = arith.addf %696, %699 : vector<64x1xf32>
    %701 = arith.mulf %700, %179 : vector<64x1xf32>
    %702 = arith.addf %691, %701 : vector<64x1xf32>
    %c56_304 = arith.constant 56 : index
    %c0_305 = arith.constant 0 : index
    %703 = vector.load %arg17[%c56_304, %c0_305] : memref<128x1xf32, #tpu.memory_space<vmem>>, vector<64x1xf32>
    %c56_306 = arith.constant 56 : index
    %c0_307 = arith.constant 0 : index
    %704 = vector.load %arg18[%c56_306, %c0_307] : memref<128x1xf32, #tpu.memory_space<vmem>>, vector<64x1xf32>
    %c90 = arith.constant 90 : index
    %705 = memref.load %arg13[%c90] : memref<98xf32, #tpu.memory_space<smem>>
    %706 = vector.broadcast %705 : f32 to vector<64x1xf32>
    %707 = arith.mulf %706, %703 : vector<64x1xf32>
    %c91 = arith.constant 91 : index
    %708 = memref.load %arg13[%c91] : memref<98xf32, #tpu.memory_space<smem>>
    %709 = vector.broadcast %708 : f32 to vector<64x1xf32>
    %710 = arith.mulf %709, %704 : vector<64x1xf32>
    %711 = arith.addf %707, %710 : vector<64x1xf32>
    %712 = arith.addf %702, %711 : vector<64x1xf32>
    %c57_308 = arith.constant 57 : index
    %c0_309 = arith.constant 0 : index
    %713 = vector.load %arg17[%c57_308, %c0_309] : memref<128x1xf32, #tpu.memory_space<vmem>>, vector<64x1xf32>
    %c57_310 = arith.constant 57 : index
    %c0_311 = arith.constant 0 : index
    %714 = vector.load %arg18[%c57_310, %c0_311] : memref<128x1xf32, #tpu.memory_space<vmem>>, vector<64x1xf32>
    %c92 = arith.constant 92 : index
    %715 = memref.load %arg13[%c92] : memref<98xf32, #tpu.memory_space<smem>>
    %716 = vector.broadcast %715 : f32 to vector<64x1xf32>
    %717 = arith.mulf %716, %713 : vector<64x1xf32>
    %c93 = arith.constant 93 : index
    %718 = memref.load %arg13[%c93] : memref<98xf32, #tpu.memory_space<smem>>
    %719 = vector.broadcast %718 : f32 to vector<64x1xf32>
    %720 = arith.mulf %719, %714 : vector<64x1xf32>
    %721 = arith.addf %717, %720 : vector<64x1xf32>
    %722 = arith.mulf %721, %190 : vector<64x1xf32>
    %723 = arith.addf %712, %722 : vector<64x1xf32>
    %c58_312 = arith.constant 58 : index
    %c0_313 = arith.constant 0 : index
    %724 = vector.load %arg17[%c58_312, %c0_313] : memref<128x1xf32, #tpu.memory_space<vmem>>, vector<64x1xf32>
    %c58_314 = arith.constant 58 : index
    %c0_315 = arith.constant 0 : index
    %725 = vector.load %arg18[%c58_314, %c0_315] : memref<128x1xf32, #tpu.memory_space<vmem>>, vector<64x1xf32>
    %c94 = arith.constant 94 : index
    %726 = memref.load %arg13[%c94] : memref<98xf32, #tpu.memory_space<smem>>
    %727 = vector.broadcast %726 : f32 to vector<64x1xf32>
    %728 = arith.mulf %727, %724 : vector<64x1xf32>
    %c95 = arith.constant 95 : index
    %729 = memref.load %arg13[%c95] : memref<98xf32, #tpu.memory_space<smem>>
    %730 = vector.broadcast %729 : f32 to vector<64x1xf32>
    %731 = arith.mulf %730, %725 : vector<64x1xf32>
    %732 = arith.addf %728, %731 : vector<64x1xf32>
    %733 = arith.mulf %732, %201 : vector<64x1xf32>
    %734 = arith.addf %723, %733 : vector<64x1xf32>
    %c59_316 = arith.constant 59 : index
    %c0_317 = arith.constant 0 : index
    %735 = vector.load %arg17[%c59_316, %c0_317] : memref<128x1xf32, #tpu.memory_space<vmem>>, vector<64x1xf32>
    %c59_318 = arith.constant 59 : index
    %c0_319 = arith.constant 0 : index
    %736 = vector.load %arg18[%c59_318, %c0_319] : memref<128x1xf32, #tpu.memory_space<vmem>>, vector<64x1xf32>
    %c96_320 = arith.constant 96 : index
    %737 = memref.load %arg13[%c96_320] : memref<98xf32, #tpu.memory_space<smem>>
    %738 = vector.broadcast %737 : f32 to vector<64x1xf32>
    %739 = arith.mulf %738, %735 : vector<64x1xf32>
    %c97 = arith.constant 97 : index
    %740 = memref.load %arg13[%c97] : memref<98xf32, #tpu.memory_space<smem>>
    %741 = vector.broadcast %740 : f32 to vector<64x1xf32>
    %742 = arith.mulf %741, %736 : vector<64x1xf32>
    %743 = arith.addf %739, %742 : vector<64x1xf32>
    %744 = arith.mulf %743, %212 : vector<64x1xf32>
    %745 = arith.addf %734, %744 : vector<64x1xf32>
    %746 = arith.negf %745 : vector<64x1xf32>
    %747 = math.exp %746 : vector<64x1xf32>
    %cst_321 = arith.constant 1.000000e+00 : f32
    %748 = vector.broadcast %cst_321 : f32 to vector<64x1xf32>
    %749 = arith.addf %748, %747 : vector<64x1xf32>
    %750 = arith.divf %748, %749 : vector<64x1xf32>
    %cst_322 = arith.constant 5.000000e-02 : f32
    %751 = vector.broadcast %cst_322 : f32 to vector<64x1xf32>
    %752 = arith.cmpf ogt, %750, %751 : vector<64x1xf32>
    %cst_323 = arith.constant 5.000000e-02 : f32
    %753 = vector.broadcast %cst_323 : f32 to vector<64x1xf32>
    %754 = arith.cmpf olt, %750, %753 : vector<64x1xf32>
    %cst_324 = arith.constant 0.000000e+00 : f32
    %cst_325 = arith.constant 5.000000e-01 : f32
    %755 = vector.broadcast %cst_324 : f32 to vector<64x1xf32>
    %756 = vector.broadcast %cst_325 : f32 to vector<64x1xf32>
    %757 = arith.select %754, %755, %756 : vector<64x1xi1>, vector<64x1xf32>
    %cst_326 = arith.constant 1.000000e+00 : f32
    %758 = vector.broadcast %cst_326 : f32 to vector<64x1xf32>
    %759 = arith.select %752, %758, %757 : vector<64x1xi1>, vector<64x1xf32>
    %760 = vector.broadcast %759 : vector<64x1xf32> to vector<64x64xf32>
    %761 = arith.mulf %133, %760 : vector<64x64xf32>
    %762 = arith.addf %761, %1 : vector<64x64xf32>
    %cst_327 = arith.constant 0.000000e+00 : f32
    %763 = vector.broadcast %cst_327 : f32 to vector<64x64xf32>
    %764 = arith.maximumf %762, %763 : vector<64x64xf32>
    %c0_328 = arith.constant 0 : index
    %c0_329 = arith.constant 0 : index
    %c0_330 = arith.constant 0 : index
    %765 = vector.load %arg14[%c0_328, %c0_329, %c0_330] : memref<1x64x64xf32, #tpu.memory_space<vmem>>, vector<1x64x64xf32>
    %766 = vector.shape_cast %765 : vector<1x64x64xf32> to vector<64x64xf32>
    %767 = vector.shape_cast %764 : vector<64x64xf32> to vector<1x64x64xf32>
    tpu.vector_store %arg14[%c0_328, %c0_329, %c0_330], %767 {strides = array<i32>} : memref<1x64x64xf32, #tpu.memory_space<vmem>>, vector<1x64x64xf32>,
    return
  }
  func.func @transform_0(%arg0: i32) -> (i32, i32, i32) {
    %c0_i32 = arith.constant 0 : i32
    %c0_i32_0 = arith.constant 0 : i32
    %c0_i32_1 = arith.constant 0 : i32
    return %arg0, %c0_i32, %c0_i32_0 : i32, i32, i32
  }
  func.func @transform_1(%arg0: i32) -> (i32, i32) {
    %c0_i32 = arith.constant 0 : i32
    %c0_i32_0 = arith.constant 0 : i32
    %c0_i32_1 = arith.constant 0 : i32
    return %c0_i32, %c0_i32_0 : i32, i32
  }
  func.func @transform_2(%arg0: i32) -> (i32, i32) {
    %c0_i32 = arith.constant 0 : i32
    %c0_i32_0 = arith.constant 0 : i32
    %c0_i32_1 = arith.constant 0 : i32
    return %c0_i32, %c0_i32_0 : i32, i32
  }
  func.func @transform_3(%arg0: i32) -> (i32, i32) {
    %c0_i32 = arith.constant 0 : i32
    %c0_i32_0 = arith.constant 0 : i32
    %c0_i32_1 = arith.constant 0 : i32
    return %c0_i32, %c0_i32_0 : i32, i32
  }
  func.func @transform_4(%arg0: i32) -> (i32, i32) {
    %c0_i32 = arith.constant 0 : i32
    %c0_i32_0 = arith.constant 0 : i32
    %c0_i32_1 = arith.constant 0 : i32
    return %c0_i32, %c0_i32_0 : i32, i32
  }
  func.func @transform_5(%arg0: i32) -> (i32, i32) {
    %c0_i32 = arith.constant 0 : i32
    %c0_i32_0 = arith.constant 0 : i32
    %c0_i32_1 = arith.constant 0 : i32
    return %c0_i32, %c0_i32_0 : i32, i32
  }
  func.func @transform_6(%arg0: i32) -> (i32, i32) {
    %c0_i32 = arith.constant 0 : i32
    %c0_i32_0 = arith.constant 0 : i32
    %c0_i32_1 = arith.constant 0 : i32
    return %c0_i32, %c0_i32_0 : i32, i32
  }
  func.func @transform_7(%arg0: i32) -> (i32, i32) {
    %c0_i32 = arith.constant 0 : i32
    %c0_i32_0 = arith.constant 0 : i32
    %c0_i32_1 = arith.constant 0 : i32
    return %c0_i32, %c0_i32_0 : i32, i32
  }
  func.func @transform_8(%arg0: i32) -> (i32, i32) {
    %c0_i32 = arith.constant 0 : i32
    %c0_i32_0 = arith.constant 0 : i32
    %c0_i32_1 = arith.constant 0 : i32
    return %c0_i32, %c0_i32_0 : i32, i32
  }
  func.func @transform_9(%arg0: i32) -> (i32, i32) {
    %c0_i32 = arith.constant 0 : i32
    %c0_i32_0 = arith.constant 0 : i32
    %c0_i32_1 = arith.constant 0 : i32
    return %c0_i32, %c0_i32_0 : i32, i32
  }
  func.func @transform_10(%arg0: i32) -> (i32, i32) {
    %c0_i32 = arith.constant 0 : i32
    %c0_i32_0 = arith.constant 0 : i32
    %c0_i32_1 = arith.constant 0 : i32
    return %c0_i32, %c0_i32_0 : i32, i32
  }
  func.func @transform_11(%arg0: i32) -> (i32, i32) {
    %c0_i32 = arith.constant 0 : i32
    %c0_i32_0 = arith.constant 0 : i32
    %c0_i32_1 = arith.constant 0 : i32
    return %c0_i32, %c0_i32_0 : i32, i32
  }
  func.func @transform_12(%arg0: i32) -> i32 {
    %c0_i32 = arith.constant 0 : i32
    %c0_i32_0 = arith.constant 0 : i32
    return %c0_i32 : i32
  }
  func.func @transform_13(%arg0: i32) -> (i32, i32, i32) {
    %c0_i32 = arith.constant 0 : i32
    %c0_i32_0 = arith.constant 0 : i32
    %c0_i32_1 = arith.constant 0 : i32
    return %arg0, %c0_i32, %c0_i32_0 : i32, i32, i32
  }
}

</mosaic_0001>

<bundles_post_ra>
// kernel: bottleneck_cbam_sparse_forward.1
= control target key start
LH: loop header
LB: loop body
LE: loop exit
PB: predicated region body
PF: predicated region fallthrough
CT: control target
= control target key end

     0   :  { %s11374_s0 = inlined_call_operand.hbm [shape: f32[2,64,64], index: 0, kind: input, shape index: {}]   ;;  %s11375_s1 = inlined_call_operand.vmem [shape: bf16[64,16], index: 1, kind: input, shape index: {}]   ;;  %s11376_s2 = inlined_call_operand.vmem [shape: bf16[144,16], index: 2, kind: input, shape index: {}]   ;;  %s11377_s3 = inlined_call_operand.vmem [shape: bf16[16,64], index: 3, kind: input, shape index: {}]   ;;  %s11378_s4 = inlined_call_operand.vmem [shape: f32[1,16], index: 4, kind: input, shape index: {}]   ;;  %s11379_s5 = inlined_call_operand.vmem [shape: f32[1,16], index: 5, kind: input, shape index: {}]   ;;  %s11380_s6 = inlined_call_operand.vmem [shape: f32[1,16], index: 6, kind: input, shape index: {}]   ;;  %s11381_s7 = inlined_call_operand.vmem [shape: f32[1,16], index: 7, kind: input, shape index: {}]   ;;  %s11382_s8 = inlined_call_operand.vmem [shape: f32[1,64], index: 8, kind: input, shape index: {}]   ;;  %s11383_s9 = inlined_call_operand.vmem [shape: f32[1,64], index: 9, kind: input, shape index: {}]   ;;  %s11384_s10 = inlined_call_operand.vmem [shape: f32[64,4], index: 10, kind: input, shape index: {}]   ;;  %s11385_s11 = inlined_call_operand.vmem [shape: f32[4,64], index: 11, kind: input, shape index: {}]   ;;  %s11386_s12 = inlined_call_operand.vmem [shape: f32[98], index: 12, kind: input, shape index: {}]   ;;  %s11387_s13 = inlined_call_operand.hbm [shape: f32[2,64,64], index: 13, kind: output, shape index: {}]  }
   0x1   :  { %11824 = sst [smem:[#allocation176_spill]] %s11374_s0 }
   0x2   :  { %11825 = sst [smem:[#allocation177_spill]] %s11375_s1 }
   0x3   :  { %11826 = sst [smem:[#allocation178_spill]] %s11376_s2 }
   0x4   :  { %11827 = sst [smem:[#allocation179_spill]] %s11377_s3 }
   0x5   :  { %11828 = sst [smem:[#allocation180_spill]] %s11378_s4 }
   0x6   :  { %11829 = sst [smem:[#allocation181_spill]] %s11379_s5 }
   0x7   :  { %11830 = sst [smem:[#allocation182_spill]] %s11380_s6 }
   0x8   :  { %11831 = sst [smem:[#allocation183_spill]] %s11381_s7 }
   0x9   :  { %11832 = sst [smem:[#allocation184_spill]] %s11382_s8 }
   0xa   :  { %11833 = sst [smem:[#allocation185_spill]] %s11383_s9 }
   0xb   :  { %11834 = sst [smem:[#allocation186_spill]] %s11384_s10 }
   0xc   :  { %11835 = sst [smem:[#allocation187_spill]] %s11385_s11 }
   0xd   :  { %11836 = sst [smem:[#allocation188_spill]] %s11386_s12 }
   0xe   :  { %11837 = sst [smem:[#allocation189_spill]] %s11387_s13 }
   0xf   :  { %18 = vsyncpa [#allocation7], 0 }
  0x10   :  { %20 = vsyncpa [#allocation7 + $0x1], 0 }
  0x11   :  { %21 = vsyncpa [#allocation9], 0 }
  0x12   :  { %22 = vsyncpa [#allocation8], 0 }
  0x13   :  { %24 = vsyncpa [#allocation8 + $0x1], 0  ;;  %s6821_s25 = smov 0   ;;  %s6823_s26 = smov 0  }
  0x14   :  { %s6825_s27 = smov 0   ;;  %s6827_s28 = smov 0  }
  0x15 LB: > { %11838 = sst [smem:[#allocation15_spill]] %s6717_s25  ;;  %s6842_s29 = sadd.s32 4294967295, %s6729_s28   ;;  %s6729_s28 = sphi %s6827_s28, %s12424_s28   ;;  %s6725_s27 = sphi %s6825_s27, %s12427_s27   ;;  %s6721_s26 = sphi %s6823_s26, %s12426_s26   ;;  %s6717_s25 = sphi %s6821_s25, %s12425_s25  }
  0x16   : > { %11839 = sst [smem:[#allocation16_spill]] %s6721_s26  ;;  %s6129_s30 = sadd.s32 4294967294, %s6729_s28  }
  0x17   : > { %11840 = sst [smem:[#allocation17_spill]] %s6725_s27  ;;  %s6846_s14 = sadd.s32 1, %s6729_s28  }
  0x18   : > { %11841 = sst [smem:[#allocation18_spill]] %s6729_s28  ;;  %s37_s15 = sadd.s32 1, %s6725_s27 }
  0x19   : > { %11842 = sst [smem:[#allocation19_spill]] %s6842_s29  ;;  %s34_s16 = ssub.s32 %s6729_s28, %s6846_s14 }
  0x1a   : > { %11843 = sst [smem:[#allocation20_spill]] %s6846_s14  ;;  %p44_p0 = scmp.ne.s32.totalorder %s6725_s27, %s6721_s26 }
  0x1b   : > { %p35_p1 = scmp.eq.s32.totalorder %s34_s16, 0  ;;  %p45_p2 = scmp.eq.s32.totalorder %s6729_s28, 0 }
  0x1c   : > { %p50_p3 = scmp.ne.s32.totalorder %s6721_s26, %s6717_s25  ;;  %p11389_p4 = scmp.eq.s32.totalorder %s6842_s29, 0 }
  0x1d   : > { %s6858_s17 = scalar_select %p35_p1, %s6725_s27, %s37_s15  }
  0x1e   : > { %p6860_p5 = por %p45_p2, %p44_p0  ;;  %p6866_p6 = por %p11389_p4, %p50_p3 }
  0x1f   : > { %11844 = sst [smem:[#allocation21_spill]] %s6858_s17  ;;  %p326_p7 = scmp.eq.s32.totalorder %s6842_s29, 1 }
  0x20   : > { %s11846_s19 = scalar_select %p6866_p6, 1, 0 }
  0x21   : > { %p332_p8 = scmp.eq.s32.totalorder %s6129_s30, 1  ;;  %p6130_p9 = scmp.ge.s32.totalorder %s6729_s28, 1 }
  0x22   : > { %p339_p10 = scmp.lt.s32.totalorder %s6729_s28, 3  ;;  %p6873_p11 = por %p326_p7, %p44_p0 }
  0x23   : > { %p6877_p12 = por %p332_p8, %p50_p3  ;;  %s11852_s12 = sld [smem:[#allocation188_spill]] }
  0x24   : > { %s11847_s20 = scalar_select %p6873_p11, 1, 0 }
  0x25   : > { %s11849_s21 = scalar_select %p6877_p12, 1, 0 }
  0x26   : > { %11848 = sst [smem:[#allocation22_spill]] %s11847_s20  ;;  %p6881_p13 = pnand %p6130_p9, %p339_p10 }
  0x27   : > { %11850 = sst [smem:[#allocation23_spill]] %s11849_s21  ;;  %p6474_p2 = scmp.lt.s32.totalorder %s6729_s28, 2 }
  0x28   : > { %s11851_s22 = scalar_select %p6881_p13, 1, 0 }
  0x29   : > { %s385_s15 = sshll.u32 %s11852_s12, 4  ;;  %p6461_p1 = pneg %p6881_p13  ;;  %s386_s15 = int_to_ptr.vmem [resolvable:$true] %s385_s15 }
  0x2a   : > { %s396_s16 = sand.u32 1, %s6725_s27   ;;  %p6901_p3 = pnand %p6474_p2, %p6860_p5 }
  0x2b   : > { %p6894_p7 = pnand %p6461_p1, %p11389_p4  ;;  %s6133_s23 = sshll.u32 %s396_s16, 6 }
  0x2c   : > { %s6618_s24 = scalar_lea.vmem %s386_s15, 16  ;;  %p6626_p12 = scmp.lt.s32.totalorder %s386_s15, %s386_s15 }
  0x2d   : > { %p6619_p8 = scmp.ne.s32.totalorder %s386_s15, %s6618_s24  ;;  %p6620_p9 = pneg %p6894_p7 }
  0x2e   : > { %p6627_p11 = scmp.lt.s32.totalorder %s6618_s24, %s6618_s24 }
  0x2f   : > { %p6621_p10 = pnand %p6620_p9, %p6619_p8 }
  0x30   : > { %p6628_p1 = por %p6627_p11, %p6626_p12 }
  0x31   : > { %p6622_p0 = pneg %p6621_p10 }
  0x33   : > { %p6629_p4 = pnand %p6628_p1, %p6622_p0 }
  0x35   : > { %6632 = shalt.err (!%p6629_p4)
}
  0x36   : > { %s6731_s12 = smov [#allocation10]   ;;  %s6369_s18 = sshll.u32 %s6729_s28, 10 }
  0x37   : > { %6464 = dma.vmem_to_smem (!%p6894_p7), %s386_s15, 16, %s6731_s12, [#allocation9]  }
  0x38   : > { %s400_s27 = scalar_lea.vmem [#allocation6], %s6133_s23  ;;  %s11855_s0 = sld [smem:[#allocation176_spill]] }
  0x39   : > { %s407_s14 = sshll.u32 %s400_s27, 4  ;;  %s6917_s24 = scalar_lea.sflag [#allocation7], %s396_s16  ;;  %s6915_s14 = int_to_ptr.vmem [resolvable:$true] %s407_s14 }
  0x3a   : > { %p6635_p5 = pneg %p6901_p3 }
  0x3e   : > { %s6913_s13 = scalar_lea.hbm %s11855_s0, %s6369_s18  ;;  %s6638_s15 = scalar_lea.hbm %s11855_s0, 2048 }
  0x3f   : > { %s6633_s20 = scalar_lea.hbm %s6913_s13, 1024  ;;  %p6639_p0 = scmp.lt.s32.totalorder %s6913_s13, %s11855_s0 }
  0x40   : > { %p6634_p4 = scmp.ne.s32.totalorder %s6913_s13, %s6633_s20  ;;  %p6640_p2 = scmp.lt.s32.totalorder %s6638_s15, %s6633_s20 }
  0x42   : > { %p6636_p11 = pnand %p6635_p5, %p6634_p4  ;;  %p6641_p7 = por %p6640_p2, %p6639_p0 }
  0x44   : > { %p6637_p12 = pneg %p6636_p11 }
  0x46   : > { %p6642_p8 = pnand %p6641_p7, %p6637_p12 }
  0x48   : > { %6645 = shalt.err (!%p6642_p8)
}
  0x49   : > { %s6646_s30 = scalar_lea.vmem %s6915_s14, 1024  ;;  %s6732_s16 = smov [#allocation6]  }
  0x4a   : > { %p6647_p9 = scmp.ne.s32.totalorder %s6915_s14, %s6646_s30  ;;  %s6651_s23 = sshll.u32 %s6732_s16, 4  ;;  %s6652_s23 = int_to_ptr.vmem [resolvable:$false] %s6651_s23 }
  0x4b   : > { %s6653_s18 = scalar_lea.vmem %s6652_s23, 2048  ;;  %p6654_p4 = scmp.lt.s32.totalorder %s6915_s14, %s6652_s23 }
  0x4c   : > { %p6649_p10 = pnand %p6647_p9, %p6635_p5  ;;  %p6655_p11 = scmp.lt.s32.totalorder %s6653_s18, %s6646_s30 }
  0x4e   : > { %p6650_p1 = pneg %p6649_p10  ;;  %p6656_p6 = por %p6655_p11, %p6654_p4 }
  0x50   : > { %p6657_p13 = pnand %p6656_p6, %p6650_p1 }
  0x52   : > { %6660 = shalt.err (!%p6657_p13)
}
  0x53   : > { %s6733_s20 = smov 128   ;;  %s6734_s12 = smov 8  }
  0x54   : > { %6468 = dma.hbm_to_vmem [thread:$0]  (!%p6901_p3), %s6913_s13, 1024, %s6915_s14, %s6917_s24, %s6733_s20, %s6733_s20, %s6734_s12  }
  0x55   : > { %p11856_p5 = scmp.ne.s32.totalorder %s11851_s22, 0 }
  0x57   : > { %419 = sbr.rel (%p11856_p5) target bundleno = 2253 (0x8cd), region = 72 }
  0x5c   : > { %s6941_s27 = sand.u32 1, %s6721_s26   ;;  %p11859_p6 = scmp.ne.s32.totalorder %s11846_s19, 0 }
  0x5d   : > { %11857 = sst [smem:[#allocation24_spill]] %s6941_s27  ;;  %s11418_s15 = sshll.u32 %s6941_s27, 6 }
  0x5e   : > { %s422_s25 = scalar_lea.sflag [#allocation7], %s6941_s27  ;;  %s6947_s21 = scalar_lea.vmem [#allocation6], %s11418_s15 }
  0x5f   : > { %11858 = sst [smem:[#allocation25_spill]] %s6947_s21 }
  0x60   : > { %6704 = dma.done.wait (%p11859_p6), %s422_s25, 1024  }
  0x61   : > { %6706 = vsyncadd (%p11859_p6), %s422_s25, 4294966272  ;;  %p11860_p13 = scmp.eq.s32.totalorder %s6842_s29, 0 }
  0x63   : > { %6708 = dma.done.wait (%p11860_p13), [#allocation9], 16   ;;  %p11861_p3 = pmov %p11860_p13 }
  0x65   : > { %6710 = vsyncadd (%p11861_p3), [#allocation9], 4294967280 }
  0x66   : > { %434 = sfence }
  0x67   : > { %s11862_s1 = sld [smem:[#allocation177_spill]]  ;;  %v474_v3 = vld [vmem:[%s6947_s21] sm:$0xff]  ;;  %v475_v4 = vld [vmem:[%s6947_s21 + $0x8] sm:$0xff]  ;;  %vm623_vm0 = vcmask 523264   ;;  %v476_v7 = vld [vmem:[%s6947_s21 + $0x10] sm:$0xff]  ;;  %v482_v16 = vlaneseq  ;;  %vm739_vm3 = vcmask 125952  }
  0x68   : > { %v587_v5 = vpack.c.bf16 %v475_v4, %v474_v3  ;;  %v477_v8 = vld [vmem:[%s6947_s21 + $0x18] sm:$0xff]  ;;  %v478_v9 = vld [vmem:[%s6947_s21 + $0x20] sm:$0xff]  ;;  %v479_v10 = vld [vmem:[%s6947_s21 + $0x28] sm:$0xff]  ;;  %v6735_v21 = vmov 839922192   ;;  %v11400_v29 = vmov 0.0  }
  0x69   : > { %v588_v11 = vpack.c.bf16 %v477_v8, %v476_v7  ;;  %v589_v12 = vpack.c.bf16 %v479_v10, %v478_v9  ;;  %v480_v13 = vld [vmem:[%s6947_s21 + $0x30] sm:$0xff]  ;;  %v481_v14 = vld [vmem:[%s6947_s21 + $0x38] sm:$0xff]  ;;  %v6981_v17 = vshrl.u32 %v482_v16, 7  ;;  %v854_v22 = vunpack.c.l.s4 %v6735_v21  ;;  %s6739_s23 = smov 16   ;;  %s11874_s4 = sld [smem:[#allocation180_spill]] }
  0x6a   : > { %6411 = vmatprep.mubr.msk.bf16.mxu0 %vm623_vm0, %v587_v5  ;;  %v590_v15 = vpack.c.bf16 %v481_v14, %v480_v13  ;;  %v6736_v23 = vmov 1985246804   ;;  %v11402_v32 = vmov 0   ;;  %vm1009_vm6 = vsmask.f32 256  ;;  %s11875_s5 = sld [smem:[#allocation181_spill]] }
  0x6b   : > { %v484_v18 = vadd.s32 8, %v6981_v17  ;;  %v6985_v19 = vand.u32 7, %v6981_v17  ;;  %v861_v24 = vunpack.c.l.s4 %v6736_v23  ;;  %v855_v25 = vunpack.c.0.s8 %v854_v22  ;;  %741 = vst.msk [vmem:[#allocation2 + $0x4] sm:$0xf] %vm739_vm3, %v11402_v32  ;;  %740 = vst.msk [vmem:[#allocation2] sm:$0xf] %vm739_vm3, %v11402_v32  ;;  %2162 = vmatprep.subr.bf16.mxu1 %v11402_v32  ;;  %6527 = vset.pattern.permute.xlu1 %v11402_v32 }
  0x6c   : > { %v485_v27 = vadd.s32 16, %v6981_v17  ;;  %v486_v28 = vadd.s32 24, %v6981_v17  ;;  %742 = vst.msk [vmem:[#allocation2 + $0x28] sm:$0xf] %vm739_vm3, %v11402_v32  ;;  %743 = vst.msk [vmem:[#allocation2 + $0x2c] sm:$0xf] %vm739_vm3, %v11402_v32  ;;  %6533 = vset.pattern.permute.xlu0 %v11402_v32 }
  0x6d   : > { %v6549_v0 = vld [vmem:[%s11862_s1 + $0x18] sm:$0xff]   ;;  %v6550_v1 = vld [vmem:[%s11862_s1 + $0x10] sm:$0xff]   ;;  %v6551_v2 = vld [vmem:[%s11862_s1 + $0x8] sm:$0xff]   ;;  %v6987_v20 = vand.u32 7, %v484_v18  ;;  %v862_v26 = vunpack.c.0.s8 %v861_v24  ;;  %vm812_vm1 = vcmp.le.s32.totalorder %v6985_v19, 6  ;;  %v7004_v34 = vsub.s32 %v855_v25, %v6981_v17  ;;  %s6740_s13 = smov 112  }
  0x6e   : > { %6403 = vmatprep.subr.bf16.mxu0 %v6549_v0  ;;  %v6552_v6 = vld [vmem:[%s11862_s1] sm:$0xff]   ;;  %v6166_v30 = vsel %vm812_vm1, 1.0, %v11400_v29  ;;  %v7015_v37 = vand.u32 7, %v485_v27  ;;  %v7017_v38 = vand.u32 7, %v486_v28  ;;  %v487_v40 = vadd.s32 32, %v6981_v17  ;;  %s6741_s14 = smov 64  }
  0x6f   : > { %6404 = vmatpush3.bf16.msra.mxu0 %v6549_v0  ;;  %11863 = vst [vmem:[#allocation26_spill] sm:$0xff] %v6987_v20  ;;  %vm813_vm2 = vcmp.le.s32.totalorder %v6987_v20, 6  ;;  %v7009_v35 = vsub.s32 %v862_v26, %v6981_v17  ;;  %v488_v43 = vadd.s32 40, %v6981_v17  ;;  %vm1010_vm8 = vsmask.f32 4368  ;;  %s6742_s17 = smov 32  }
  0x70   : > { %6405 = vmatprep.subr.bf16.mxu0 %v6550_v1  ;;  %v6167_v31 = vsel %vm813_vm2, 1.0, %v11400_v29  ;;  %11864 = vst [vmem:[#allocation27_spill] sm:$0xff] %v7015_v37  ;;  %11865 = vst [vmem:[#allocation28_spill] sm:$0xff] %v7017_v38  ;;  %vm814_vm4 = vcmp.le.s32.totalorder %v7015_v37, 6  ;;  %vm815_vm5 = vcmp.le.s32.totalorder %v7017_v38, 6  ;;  %v7029_v50 = vand.u32 7, %v487_v40 }
  0x71   : > { %v836_v33 = vpack.c.bf16 %v6167_v31, %v6166_v30  ;;  %v6168_v44 = vsel %vm814_vm4, 1.0, %v11400_v29  ;;  %v6169_v46 = vsel %vm815_vm5, 1.0, %v11400_v29  ;;  %v7032_v53 = vand.u32 7, %v488_v43  ;;  %vm7037_vm9 = vmor %vm1009_vm6, %vm1010_vm8  ;;  %s11877_s2 = sld [smem:[#allocation178_spill]]  ;;  %s6743_s16 = smov 48  }
  0x72   : > { %v1104_v47 = vld [vmem:[#allocation2 + $0x4] sm:$0xf]  ;;  %11866 = vst [vmem:[#allocation29_spill] sm:$0xff] %v7029_v50  ;;  %v837_v51 = vpack.c.bf16 %v6169_v46, %v6168_v44  ;;  %vm816_vm7 = vcmp.le.s32.totalorder %v7029_v50, 6  ;;  %vm786_vm11 = vcmp.ge.s32.totalorder %v7015_v37, 1  ;;  %vm787_vm12 = vcmp.ge.s32.totalorder %v7017_v38, 1 }
  0x73   : > { %6406 = vmatpush3.bf16.msra.mxu0 %v6550_v1  ;;  %v7013_v36 = vrot.slane %v836_v33, %v7004_v34  ;;  %v1179_v39 = vrot.slane %v836_v33, %v7009_v35  ;;  %1120 = vrot.lane.b32.xlu0 %v1104_v47, %s6739_s23  ;;  %11867 = vst [vmem:[#allocation30_spill] sm:$0xff] %v7032_v53  ;;  %vm817_vm10 = vcmp.le.s32.totalorder %v7032_v53, 6  ;;  %v6170_v58 = vsel %vm816_vm7, 1.0, %v11400_v29  ;;  %s6744_s22 = smov 80   ;;  %s6745_s30 = smov 96  }
  0x74   : > { %6407 = vmatprep.subr.bf16.mxu0 %v6551_v2  ;;  %v1186_v55 = vrot.slane %v837_v51, %v7004_v34  ;;  %v6171_v59 = vsel %vm817_vm10, 1.0, %v11400_v29  ;;  %v1193_v60 = vrot.slane %v837_v51, %v7009_v35  ;;  %v6160_v14 = vsel %vm786_vm11, 1.0, %v11400_v29  ;;  %s11890_s3 = sld [smem:[#allocation179_spill]] }
  0x75   : > { %v1223_v41 = vshrl.u32 %v7013_v36, 16  ;;  %v1231_v42 = vshrl.u32 %v1179_v39, 16  ;;  %v1234_v49 = vshll.u32 %v1179_v39, 16  ;;  %v838_v61 = vpack.c.bf16 %v6171_v59, %v6170_v58  ;;  %s11892_s6 = sld [smem:[#allocation182_spill]] }
  0x76   : > { %v1240_v62 = vshrl.u32 %v1186_v55, 16  ;;  %v1249_v63 = vshrl.u32 %v1193_v60, 16  ;;  %v1252_v0 = vshll.u32 %v1193_v60, 16  ;;  %v1243_v4 = vshll.u32 %v1186_v55, 16  ;;  %s11893_s7 = sld [smem:[#allocation183_spill]] }
  0x77   : > { %6408 = vmatpush3.bf16.msra.mxu0 %v6551_v2  ;;  %v7026_v45 = vrot.slane %v1223_v41, 7  ;;  %v1233_v48 = vrot.slane %v1231_v42, 7  ;;  %v1200_v1 = vrot.slane %v838_v61, %v7004_v34  ;;  %v6161_v18 = vsel %vm787_vm12, 1.0, %v11400_v29  ;;  %s11894_s10 = sld [smem:[#allocation186_spill]] }
  0x78   : > { %6409 = vmatprep.subr.bf16.mxu0 %v6552_v6  ;;  %v1242_v2 = vrot.slane %v1240_v62, 7  ;;  %v1251_v3 = vrot.slane %v1249_v63, 7  ;;  %v809_v21 = vpack.c.bf16 %v6161_v18, %v6160_v14  ;;  %vm788_vm13 = vcmp.ge.s32.totalorder %v7029_v50, 1  ;;  %s11895_s8 = sld [smem:[#allocation184_spill]] }
  0x79   : > { %v1236_v52 = vor.u32 %v1234_v49, %v1233_v48  ;;  %v1229_v54 = vrot.slane %v7026_v45, 4  ;;  %v1258_v5 = vshrl.u32 %v1200_v1, 16  ;;  %vm789_vm14 = vcmp.ge.s32.totalorder %v7032_v53, 1  ;;  %s11896_s9 = sld [smem:[#allocation185_spill]] }
  0x7a   : > { %v1247_v7 = vrot.slane %v1242_v2, 4  ;;  %v1254_v8 = vor.u32 %v1252_v0, %v1251_v3  ;;  %v1256_v9 = vrot.slane %v1251_v3, 4  ;;  %v873_v23 = vrot.slane %v809_v21, %v7004_v34  ;;  %s11897_s11 = sld [smem:[#allocation187_spill]] }
  0x7b   : > { %6410 = vmatpush3.bf16.msra.mxu0 %v6552_v6  ;;  %v7044_v57 = vsel %vm7037_vm9, %v1229_v54, %v1236_v52  ;;  %v1261_v6 = vshll.u32 %v1200_v1, 16  ;;  %v7051_v10 = vrot.slane %v1258_v5, 7  ;;  %v880_v24 = vrot.slane %v809_v21, %v7009_v35  ;;  %s6261_s18 = sld [smem:[#allocation10 + $0x3]] }
  0x7c   : > { %v7055_v13 = vsel %vm7037_vm9, %v1247_v7, %v1254_v8  ;;  %v932_v25 = vshll.u32 %v873_v23, 16  ;;  %v936_v26 = vshrl.u32 %v873_v23, 16  ;;  %v6162_v28 = vsel %vm788_vm13, 1.0, %v11400_v29  ;;  %s8090_s20 = sld [smem:[#allocation10 + $0x4]] }
  0x7d   : > { %v942_v27 = vshll.u32 %v880_v24, 16  ;;  %vm909_vm15 = vsmask.f32 3328  ;;  %vm910_vm1 = vsmask.f32 7440  ;;  %v6163_v30 = vsel %vm789_vm14, 1.0, %v11400_v29 }
  0x7e   : > { %6412 = vmatmul.mubr.msk.bf16.vlgmr.msra.gmra.mxu0 %vm623_vm0, %v588_v11  ;;  %v1238_v11 = vrot.slane %v1233_v48, 4  ;;  %v946_v31 = vshrl.u32 %v880_v24, 16  ;;  %v7075_v33 = vrot.slane %v932_v25, 5  ;;  %v938_v39 = vrot.slane %v936_v26, 4  ;;  %vm7079_vm2 = vmor %vm909_vm15, %vm910_vm1  ;;  %s6263_s12 = sld [smem:[#allocation10 + $0x5]] }
  0x7f   : > { %6415 = vmatprep.mubr.msk.bf16.mxu0 %vm623_vm0, %v589_v12  ;;  %v1245_v12 = vor.u32 %v1243_v4, %v1242_v2  ;;  %v944_v40 = vrot.slane %v942_v27, 5  ;;  %v810_v41 = vpack.c.bf16 %v6163_v30, %v6162_v28  ;;  %v489_v58 = vadd.s32 48, %v6981_v17  ;;  %s8101_s25 = sld [smem:[#allocation10 + $0x6]] }
  0x80   : > { %v948_v42 = vrot.slane %v946_v31, 4  ;;  %v939_v43 = vor.u32 %v938_v39, %v7075_v33  ;;  %v490_v59 = vadd.s32 56, %v6981_v17  ;;  %v1207_v2 = vrot.slane %v838_v61, %v7009_v35  ;;  %s8120_s19 = sld [smem:[#allocation10 + $0x9]] }
  0x81   : > { %v7062_v16 = vsel %vm7037_vm9, %v1238_v11, %v1245_v12  ;;  %v887_v44 = vrot.slane %v810_v41, %v7004_v34  ;;  %v7093_v62 = vand.u32 7, %v489_v58  ;;  %v894_v0 = vrot.slane %v810_v41, %v7009_v35  ;;  %s8130_s24 = sld [smem:[#allocation10 + $0xa]] }
  0x82   : > { %v949_v47 = vor.u32 %v948_v42, %v944_v40  ;;  %v940_v48 = vrot.slane %v939_v43, 4  ;;  %v7095_v63 = vand.u32 7, %v490_v59  ;;  %v1267_v7 = vshrl.u32 %v1207_v2, 16  ;;  %s8304_s15 = sld [smem:[#allocation10 + $0x1d]] }
  0x83   : > { %v952_v49 = vshll.u32 %v887_v44, 16  ;;  %v956_v60 = vshrl.u32 %v887_v44, 16  ;;  %11872 = vst [vmem:[#allocation31_spill] sm:$0xff] %v7093_v62  ;;  %vm818_vm4 = vcmp.le.s32.totalorder %v7093_v62, 6  ;;  %v1270_v14 = vshll.u32 %v1207_v2, 16  ;;  %s8332_s0 = sld [smem:[#allocation10 + $0x20]] }
  0x84   : > { %v950_v51 = vrot.slane %v949_v47, 4  ;;  %v7085_v52 = vsel %vm7079_vm2, %v940_v48, %v944_v40  ;;  %11873 = vst [vmem:[#allocation32_spill] sm:$0xff] %v7095_v63  ;;  %vm819_vm5 = vcmp.le.s32.totalorder %v7095_v63, 6  ;;  %v6172_v4 = vsel %vm818_vm4, 1.0, %v11400_v29  ;;  %s8344_s1 = sld [smem:[#allocation10 + $0x23]] }
  0x85   : > { %v954_v54 = vrot.slane %v952_v49, 5  ;;  %v958_v1 = vrot.slane %v956_v60, 4  ;;  %v6173_v5 = vsel %vm819_vm5, 1.0, %v11400_v29  ;;  %v1269_v12 = vrot.slane %v1267_v7, 7  ;;  %s8466_s26 = sld [smem:[#allocation10 + $0x38]] }
  0x86   : > { %6416 = vmatmul.mubr.msk.bf16.gmra.mxu0 %vm623_vm0, %v590_v15  ;;  %v1263_v15 = vor.u32 %v1261_v6, %v7051_v10  ;;  %v962_v6 = vshll.u32 %v894_v0, 16  ;;  %v839_v8 = vpack.c.bf16 %v6173_v5, %v6172_v4  ;;  %vm790_vm6 = vcmp.ge.s32.totalorder %v7093_v62, 1  ;;  %s8470_s28 = sld [smem:[#allocation10 + $0x39]] }
  0x87   : > { %v7089_v55 = vsel %vm7079_vm2, %v950_v51, %v954_v54  ;;  %v959_v3 = vor.u32 %v958_v1, %v954_v54  ;;  %vm791_vm7 = vcmp.ge.s32.totalorder %v7095_v63, 1  ;;  %v1265_v18 = vrot.slane %v7051_v10, 4  ;;  %s8484_s29 = sld [smem:[#allocation10 + $0x3c]] }
  0x88   : > { %v7067_v22 = vsel %vm7037_vm9, %v1256_v9, %v1263_v15  ;;  %v964_v11 = vrot.slane %v962_v6, 5  ;;  %v1214_v15 = vrot.slane %v839_v8, %v7004_v34  ;;  %v1272_v21 = vor.u32 %v1270_v14, %v1269_v12  ;;  %s8495_s27 = sld [smem:[#allocation10 + $0x3f]] }
  0x89   : > { %v960_v9 = vrot.slane %v959_v3, 4  ;;  %v6164_v24 = vsel %vm790_vm6, 1.0, %v11400_v29  ;;  %v6165_v25 = vsel %vm791_vm7, 1.0, %v11400_v29  ;;  %v966_v40 = vshrl.u32 %v894_v0, 16  ;;  %s8497_s21 = sld [smem:[#allocation10 + $0x40]] }
  0x8a   : > { %v1276_v23 = vshrl.u32 %v1214_v15, 16  ;;  %v7115_v26 = vsel %vm7037_vm9, %v1265_v18, %v1272_v21  ;;  %v811_v27 = vpack.c.bf16 %v6165_v25, %v6164_v24  ;;  %v1279_v39 = vshll.u32 %v1214_v15, 16  ;;  %v1923_v18 = vld [vmem:[#allocation2 + $0x2c] sm:$0x1] }
  0x8b   : > { %v7106_v61 = vsel %vm7079_vm2, %v960_v9, %v964_v11  ;;  %v1221_v42 = vrot.slane %v839_v8, %v7009_v35  ;;  %v1274_v43 = vrot.slane %v1269_v12, 4  ;;  %v968_v47 = vrot.slane %v966_v40, 4  ;;  %v1922_v9 = vld [vmem:[#allocation2 + $0x28] sm:$0xf] }
  0x8c   : > { %v1278_v28 = vrot.slane %v1276_v23, 7  ;;  %v901_v30 = vrot.slane %v811_v27, %v7004_v34  ;;  %v7119_v31 = vrot.slane %v811_v27, %v7009_v35  ;;  %vm784_vm8 = vcmp.ge.s32.totalorder %v6985_v19, 1 }
  0x8d   : > { %v969_v58 = vor.u32 %v968_v47, %v964_v11  ;;  %v1285_v60 = vshrl.u32 %v1221_v42, 16  ;;  %v1288_v6 = vshll.u32 %v1221_v42, 16  ;;  %vm785_vm10 = vcmp.ge.s32.totalorder %v6987_v20, 1  ;;  %11946 = sst [smem:[#allocation79_spill]] %s8484_s29 }
  0x8e   : > { %v972_v10 = vshll.u32 %v901_v30, 16  ;;  %v976_v41 = vshrl.u32 %v901_v30, 16  ;;  %v1281_v44 = vor.u32 %v1279_v39, %v1278_v28  ;;  %v982_v51 = vshll.u32 %v7119_v31, 16  ;;  %11948 = sst [smem:[#allocation81_spill]] %s8495_s27 }
  0x8f   : > { %v970_v1 = vrot.slane %v969_v58, 4  ;;  %v1287_v5 = vrot.slane %v1285_v60, 7  ;;  %v1283_v7 = vrot.slane %v1278_v28, 4  ;;  %v6158_v23 = vsel %vm784_vm8, 1.0, %v11400_v29  ;;  %11949 = sst [smem:[#allocation82_spill]] %s8497_s21 }
  0x90   : > { %v974_v48 = vrot.slane %v972_v10, 5  ;;  %v978_v49 = vrot.slane %v976_v41, 4  ;;  %v7125_v54 = vsel %vm7037_vm9, %v1274_v43, %v1281_v44  ;;  %v7127_v2 = vrot.slane %v982_v51, 5  ;;  %s8500_s29 = sld [smem:[#allocation10 + $0x41]] }
  0x91   : > { %v1290_v8 = vor.u32 %v1288_v6, %v1287_v5  ;;  %v7145_v15 = vrot.slane %v1287_v5, 4  ;;  %v6159_v24 = vsel %vm785_vm10, 1.0, %v11400_v29  ;;  %v1226_v6 = vshll.u32 %v7013_v36, 16  ;;  %v7184_v36 = vld [vmem:[%s11875_s5] ss:$0 sm:$0xff]  ;;  %s8400_s5 = sld [smem:[#allocation10 + $0x2b]] }
  0x92   : > { %v979_v59 = vor.u32 %v978_v49, %v974_v48  ;;  %v7131_v3 = vsel %vm7079_vm2, %v970_v1, %v974_v48  ;;  %v808_v39 = vpack.c.bf16 %v6159_v24, %v6158_v23  ;;  %vm1144_vm11 = vcmask 257152   ;;  %s8512_s21 = sld [smem:[#allocation10 + $0x43]] }
  0x93   : > { %v7140_v11 = vsel %vm7037_vm9, %v1283_v7, %v1290_v8  ;;  %v1932_v25 = vmul.bf16 %v1923_v18, %v7145_v15  ;;  %v7171_v8 = vor.u32 %v1226_v6, %v7026_v45  ;;  %vm1595_vm12 = vcmask 650752   ;;  %s8514_s27 = sld [smem:[#allocation10 + $0x44]] }
  0x94   : > { %v980_v0 = vrot.slane %v979_v59, 4  ;;  %v1931_v12 = vmul.bf16 %v1922_v9, %v7140_v11  ;;  %v859_v41 = vrot.slane %v808_v39, %v7004_v34  ;;  %v866_v51 = vrot.slane %v808_v39, %v7009_v35  ;;  %v1153_v35 = vld [vmem:[#allocation2 + $0x4] sm:$0xf]  ;;  %v840_v9 = vld [vmem:[#allocation2] sm:$0x8] }
  0x95   : > { %v2013_v30 = vshll.u32 %v1932_v25, 16  ;;  %v1302_v45 = vmul.bf16 %v7171_v8, %v1153_v35  ;;  %vm1730_vm13 = vcmask 781952   ;;  %vm1857_vm14 = vcmask 913152  }
  0x96   : > { %v7136_v4 = vsel %vm7079_vm2, %v980_v0, %v7127_v2  ;;  %v2003_v14 = vshll.u32 %v1931_v12, 16  ;;  %v2007_v21 = vshrl.u32 %v1931_v12, 16  ;;  %v913_v44 = vshll.u32 %v859_v41, 16  ;;  %v841_v0 = vld [vmem:[#allocation2 + $0x4] sm:$0xf] }
  0x97   : > { %v2015_v10 = vrot.slane %v2013_v30, 5  ;;  %v916_v47 = vshrl.u32 %v859_v41, 16  ;;  %v922_v59 = vshll.u32 %v866_v51, 16  ;;  %vm1906_vm15 = vcmask 1044352  }
  0x98   : > { %v7150_v27 = vrot.slane %v2003_v14, 5  ;;  %v2009_v28 = vrot.slane %v2007_v21, 4  ;;  %v7157_v48 = vrot.slane %v913_v44, 5  ;;  %v7176_v14 = vld [vmem:[%s11874_s4] ss:$0 sm:$0xff]  ;;  %vm2149_vm1 = vcmask 130048  }
  0x99   : > { %v918_v49 = vrot.slane %v916_v47, 4  ;;  %v7161_v1 = vrot.slane %v922_v59, 5  ;;  %vm2428_vm4 = vcmp.eq.s32.totalorder %v6981_v17, 0  ;;  %vm2517_vm5 = vcmask 1043456   ;;  %s8371_s4 = sld [smem:[#allocation10 + $0x26]] }
  0x9a   : > { %v2010_v40 = vor.u32 %v2009_v28, %v7150_v27  ;;  %v1000_v18 = vmul.bf16 %v7157_v48, %v840_v9  ;;  %vm2513_vm6 = vcmask 31744   ;;  %vm2617_vm7 = vcmask 7168   ;;  %11952 = sst [smem:[#allocation85_spill]] %s8514_s27 }
  0x9b   : > { %v919_v58 = vor.u32 %v918_v49, %v7157_v48  ;;  %s8535_s27 = sld [smem:[#allocation10 + $0x47]] }
  0x9c   : > { %v2011_v42 = vrot.slane %v2010_v40, 4  ;;  %v1013_v24 = vshrl.u32 %v1000_v18, 16 }
  0x9d   : > { %v920_v60 = vrot.slane %v919_v58, 4 }
  0x9e   : > { %v2016_v43 = vsel %vm7079_vm2, %v2011_v42, %v2015_v10  ;;  %v6174_v39 = vrot.slane %v1013_v24, 11  ;;  %v1312_v42 = vshrl.u32 %v1302_v45, 16 }
  0x9f   : > { %2032 = vst.msk [vmem:[#allocation3 + $0x3c] sm:$0xf] %vm739_vm3, %v2016_v43  ;;  %v7166_v34 = vsel %vm7079_vm2, %v920_v60, %v7161_v1  ;;  %v1315_v43 = vshll.u32 %v1302_v45, 16 }
  0xa0   : > { %v1001_v5 = vmul.bf16 %v7166_v34, %v841_v0  ;;  %v926_v0 = vshrl.u32 %v866_v51, 16  ;;  %v1314_v18 = vrot.slane %v1312_v42, 4  ;;  %v1428_v42 = vld [vmem:[#allocation2 + $0x4] sm:$0x8] }
  0xa2   : > { %v1018_v7 = vshrl.u32 %v1001_v5, 16  ;;  %v1021_v12 = vshll.u32 %v1001_v5, 16  ;;  %v986_v5 = vshrl.u32 %v7119_v31, 16 }
  0xa4   : > { %v7179_v21 = vrot.slane %v1018_v7, 7 }
  0xa6   : > { %v1023_v25 = vor.u32 %v1021_v12, %v7179_v21 }
  0xa8   : > { %v1024_v44 = vsel %vm7037_vm9, %v6174_v39, %v1023_v25 }
  0xa9   : > { %1096 = vst.msk [vmem:[#allocation3] sm:$0xf] %vm739_vm3, %v1024_v44 }
  0xe5   : > { %v1121_v59 = vpop.permute.xlu0 %1120 }
  0xe6   : > { %1145 = vst.msk [vmem:[#allocation3] sm:$0xf] %vm1144_vm11, %v1121_v59 }
 0x13e   : > { %v6413_v23 = vpop.f32.mrf.mxu0 }
 0x13f   : > { %v710_v28 = vmul.f32 %v6413_v23, %v7176_v14  ;;  %v1317_v23 = vrot.slane %v1315_v43, 5 }
 0x140   : > { %v670_v30 = vpop.f32.mrf.mxu0 }
 0x141   : > { %v725_v40 = vadd.f32 %v7184_v36, %v710_v28  ;;  %v708_v10 = vmul.f32 %v7176_v14, %v670_v30  ;;  %v928_v28 = vrot.slane %v926_v0, 4  ;;  %v988_v30 = vrot.slane %v986_v5, 4 }
 0x142   : > { %v6414_v41 = vpop.f32.mrf.mxu0  ;;  %v1318_v44 = vor.u32 %v1317_v23, %v1314_v18  ;;  %v1437_v0 = vmul.bf16 %v1428_v42, %v7157_v48 }
 0x143   : > { %v733_v47 = vmax.f32 %v725_v40, 0.0  ;;  %v723_v49 = vadd.f32 %v7184_v36, %v708_v10  ;;  %v711_v58 = vmul.f32 %v6414_v41, %v7176_v14  ;;  %v929_v5 = vor.u32 %v928_v28, %v7161_v1 }
 0x144   : > { %v673_v60 = vpop.f32.mrf.mxu0 }
 0x145   : > { %v6372_v6 = vpack.c.bf16 %v733_v47, %v733_v47  ;;  %v731_v7 = vmax.f32 %v723_v49, 0.0  ;;  %v726_v35 = vadd.f32 %v7184_v36, %v711_v58  ;;  %v709_v9 = vmul.f32 %v7176_v14, %v673_v60 }
 0x146   : > { %v6417_v12 = vpop.f32.mrf.mxu0  ;;  %v930_v28 = vrot.slane %v929_v5, 4 }
 0x147   : > { %778 = vst.msk [vmem:[#allocation2 + $0x10] sm:$0xf] %vm739_vm3, %v6372_v6  ;;  %v6370_v45 = vpack.c.bf16 %v731_v7, %v731_v7  ;;  %v734_v24 = vmax.f32 %v726_v35, 0.0  ;;  %v724_v25 = vadd.f32 %v7184_v36, %v709_v9  ;;  %v714_v51 = vmul.f32 %v6417_v12, %v7176_v14 }
 0x148   : > { %v686_v31 = vpop.f32.mrf.mxu0  ;;  %v989_v6 = vor.u32 %v988_v30, %v7127_v2  ;;  %v7219_v2 = vrot.slane %v1318_v44, 4  ;;  %v1747_v30 = vld [vmem:[#allocation2 + $0x28] sm:$0xf] }
 0x149   : > { %776 = vst.msk [vmem:[#allocation2 + $0x8] sm:$0xf] %vm739_vm3, %v6370_v45  ;;  %v6373_v39 = vpack.c.bf16 %v734_v24, %v734_v24  ;;  %v732_v40 = vmax.f32 %v724_v25, 0.0  ;;  %v729_v10 = vadd.f32 %v7184_v36, %v714_v51  ;;  %v712_v41 = vmul.f32 %v7176_v14, %v686_v31 }
 0x14a   : > { %v6418_v43 = vpop.f32.mrf.mxu0  ;;  %v7222_v31 = vshrl.u32 %v1437_v0, 16  ;;  %v7228_v42 = vrot.slane %v989_v6, 4 }
 0x14b   : > { %779 = vst.msk [vmem:[#allocation2 + $0x14] sm:$0xf] %vm739_vm3, %v6373_v39  ;;  %v6371_v47 = vpack.c.bf16 %v732_v40, %v732_v40  ;;  %v737_v49 = vmax.f32 %v729_v10, 0.0  ;;  %v727_v58 = vadd.f32 %v7184_v36, %v712_v41  ;;  %v715_v59 = vmul.f32 %v6418_v43, %v7176_v14 }
 0x14c   : > { %v689_v60 = vpop.f32.mrf.mxu0 }
 0x14d   : > { %777 = vst.msk [vmem:[#allocation2 + $0xc] sm:$0xf] %vm739_vm3, %v6371_v47  ;;  %v6376_v7 = vpack.c.bf16 %v737_v49, %v737_v49  ;;  %v735_v35 = vmax.f32 %v727_v58, 0.0  ;;  %v730_v9 = vadd.f32 %v7184_v36, %v715_v59  ;;  %v713_v12 = vmul.f32 %v7176_v14, %v689_v60 }
 0x14e   : > { %v1867_v18 = vld [vmem:[#allocation2 + $0x10] sm:$0xf] }
 0x14f   : > { %v1557_v23 = vld [vmem:[#allocation2 + $0x10] sm:$0xf]  ;;  %782 = vst.msk [vmem:[#allocation2 + $0x20] sm:$0xf] %vm739_vm3, %v6376_v7  ;;  %v6374_v45 = vpack.c.bf16 %v735_v35, %v735_v35  ;;  %v738_v24 = vmax.f32 %v730_v9, 0.0  ;;  %v728_v25 = vadd.f32 %v7184_v36, %v713_v12  ;;  %1884 = vrot.lane.b32.xlu1 %v1867_v18, %s6740_s13  ;;  %v7239_v7 = vmul.bf16 %v1747_v30, %v7228_v42 }
 0x150   : > { %1575 = vrot.lane.b32.xlu0 %v1557_v23, %s6741_s14  ;;  %v1916_v1 = vld [vmem:[#allocation2 + $0x10] sm:$0xf]  ;;  %v1154_v51 = vld [vmem:[#allocation2 + $0x8] sm:$0xf] }
 0x151   : > { %v1925_v14 = vmul.bf16 %v1916_v1, %v7044_v57  ;;  %780 = vst.msk [vmem:[#allocation2 + $0x18] sm:$0xf] %vm739_vm3, %v6374_v45  ;;  %v6377_v39 = vpack.c.bf16 %v738_v24, %v738_v24  ;;  %v736_v36 = vmax.f32 %v728_v25, 0.0  ;;  %v7226_v40 = vmul.bf16 %v7044_v57, %v1154_v51  ;;  %v1429_v10 = vld [vmem:[#allocation2 + $0x8] sm:$0xf] }
 0x152   : > { %v1156_v41 = vld [vmem:[#allocation2 + $0x10] sm:$0xf]  ;;  %v1105_v44 = vld [vmem:[#allocation2 + $0x8] sm:$0xf]  ;;  %v7231_v47 = vmul.bf16 %v1429_v10, %v7166_v34  ;;  %v1157_v5 = vld [vmem:[#allocation2 + $0x14] sm:$0xf] }
 0x153   : > { %v1107_v43 = vld [vmem:[#allocation2 + $0x10] sm:$0xf]  ;;  %783 = vst.msk [vmem:[#allocation2 + $0x24] sm:$0xf] %vm739_vm3, %v6377_v39  ;;  %v6375_v58 = vpack.c.bf16 %v736_v36, %v736_v36  ;;  %v1321_v59 = vshll.u32 %v7226_v40, 16  ;;  %v1943_v60 = vshll.u32 %v1925_v14, 16  ;;  %v1305_v6 = vmul.bf16 %v7055_v13, %v1156_v41 }
 0x154   : > { %v1606_v49 = vld [vmem:[#allocation2 + $0x10] sm:$0xf]  ;;  %1126 = vrot.lane.b32.xlu1 %v1107_v43, %s6739_s23  ;;  %1122 = vrot.lane.b32.xlu0 %v1105_v44, %s6739_s23  ;;  %v1947_v0 = vshrl.u32 %v1925_v14, 16  ;;  %v1915_v9 = vld [vmem:[#allocation2 + $0xc] sm:$0xf]  ;;  %v1452_v23 = vshrl.u32 %v7231_v47, 16  ;;  %v7249_v1 = vmul.bf16 %v7067_v22, %v1157_v5  ;;  %v7263_v41 = vsel %vm7079_vm2, %v930_v28, %v7075_v33 }
 0x155   : > { %781 = vst.msk [vmem:[#allocation2 + $0x1c] sm:$0xf] %vm739_vm3, %v6375_v58  ;;  %v7242_v35 = vrot.slane %v1321_v59, 5  ;;  %v7244_v12 = vrot.slane %v1943_v60, 5  ;;  %v1555_v45 = vld [vmem:[#allocation2 + $0x8] sm:$0xf]  ;;  %v1924_v25 = vmul.bf16 %v1915_v9, %v7171_v8  ;;  %v1615_v51 = vmul.bf16 %v1606_v49, %v7062_v16 }
 0x156   : > { %v1949_v18 = vrot.slane %v1947_v0, 4  ;;  %v1558_v24 = vld [vmem:[#allocation2 + $0x14] sm:$0xf]  ;;  %v7265_v49 = vrot.slane %v1452_v23, 7  ;;  %v1556_v60 = vld [vmem:[#allocation2 + $0xc] sm:$0xf] }
 0x157   : > { %v1607_v36 = vld [vmem:[#allocation2 + $0x14] sm:$0xf]  ;;  %v1934_v43 = vshrl.u32 %v1924_v25, 16  ;;  %v1937_v44 = vshll.u32 %v1924_v25, 16  ;;  %v1341_v0 = vshll.u32 %v1305_v6, 16  ;;  %v1345_v5 = vshrl.u32 %v1305_v6, 16 }
 0x158   : > { %1571 = vrot.lane.b32.xlu0 %v1555_v45, %s6741_s14  ;;  %1577 = vrot.lane.b32.xlu1 %v1558_v24, %s6741_s14  ;;  %v1950_v30 = vor.u32 %v1949_v18, %v7244_v12  ;;  %v1917_v10 = vld [vmem:[#allocation2 + $0x14] sm:$0xf]  ;;  %v7269_v9 = vmul.bf16 %v1607_v36, %v7055_v13  ;;  %v1351_v33 = vshll.u32 %v7249_v1, 16  ;;  %v1918_v28 = vld [vmem:[#allocation2 + $0x18] sm:$0xf]  ;;  %v1642_v29 = vshll.u32 %v1615_v51, 16 }
 0x159   : > { %v1868_v59 = vld [vmem:[#allocation2 + $0x14] sm:$0xf]  ;;  %v1926_v18 = vmul.bf16 %v1917_v10, %v7062_v16  ;;  %v1936_v45 = vrot.slane %v1934_v43, 4  ;;  %v1939_v24 = vrot.slane %v1937_v44, 5  ;;  %v1871_v23 = vld [vmem:[#allocation2 + $0x20] sm:$0xf]  ;;  %v1927_v36 = vmul.bf16 %v1918_v28, %v7055_v13 }
 0x15a   : > { %v1951_v25 = vrot.slane %v1950_v30, 4  ;;  %v7275_v39 = vrot.slane %v1341_v0, 5  ;;  %v1347_v6 = vrot.slane %v1345_v5, 4  ;;  %v7278_v32 = vrot.slane %v1351_v33, 5  ;;  %v1108_v62 = vld [vmem:[#allocation2 + $0x14] sm:$0xf] }
 0x15b   : > { %v1940_v58 = vor.u32 %v1939_v24, %v1936_v45  ;;  %v7280_v43 = vrot.slane %v1642_v29, 5  ;;  %v1646_v44 = vshrl.u32 %v1615_v51, 16  ;;  %v1963_v63 = vshll.u32 %v1927_v36, 16  ;;  %v1604_v24 = vld [vmem:[#allocation2 + $0x8] sm:$0xf] }
 0x15c   : > { %1886 = vrot.lane.b32.xlu0 %v1868_v59, %s6740_s13  ;;  %1573 = vrot.lane.b32.xlu1 %v1556_v60, %s6741_s14  ;;  %v1919_v10 = vld [vmem:[#allocation2 + $0x1c] sm:$0xf]  ;;  %v1348_v14 = vor.u32 %v1347_v6, %v7275_v39  ;;  %v1967_v59 = vshrl.u32 %v1927_v36, 16  ;;  %v1652_v5 = vshll.u32 %v7269_v9, 16  ;;  %v1953_v53 = vshll.u32 %v1926_v18, 16 }
 0x15d   : > { %v1928_v60 = vmul.bf16 %v1919_v10, %v7067_v22  ;;  %v1941_v30 = vrot.slane %v1940_v58, 4  ;;  %v1648_v0 = vrot.slane %v1646_v44, 4  ;;  %v7289_v29 = vrot.slane %v1963_v63, 5  ;;  %v1155_v36 = vld [vmem:[#allocation2 + $0xc] sm:$0xf] }
 0x15e   : > { %v7287_v13 = vrot.slane %v1348_v14, 4  ;;  %v1969_v51 = vrot.slane %v1967_v59, 4  ;;  %v1455_v58 = vshll.u32 %v7231_v47, 16  ;;  %v7296_v6 = vrot.slane %v1652_v5, 5  ;;  %v1111_v44 = vld [vmem:[#allocation2 + $0x20] sm:$0xf] }
 0x15f   : > { %v1973_v45 = vshll.u32 %v1928_v60, 16  ;;  %v1946_v33 = vsel %vm7079_vm2, %v1941_v30, %v7244_v12  ;;  %v1649_v28 = vor.u32 %v1648_v0, %v7280_v43  ;;  %v1977_v10 = vshrl.u32 %v1928_v60, 16  ;;  %v1106_v60 = vld [vmem:[#allocation2 + $0xc] sm:$0xf]  ;;  %v1608_v20 = vld [vmem:[#allocation2 + $0x18] sm:$0xf] }
 0x160   : > { %1128 = vrot.lane.b32.xlu0 %v1108_v62, %s6739_s23  ;;  %1892 = vrot.lane.b32.xlu1 %v1871_v23, %s6740_s13  ;;  %v1605_v62 = vld [vmem:[#allocation2 + $0xc] sm:$0xf]  ;;  %2025 = vst.msk [vmem:[#allocation3 + $0x4] sm:$0xf] %vm739_vm3, %v1946_v33  ;;  %v1970_v14 = vor.u32 %v1969_v51, %v7289_v29  ;;  %v1955_v12 = vrot.slane %v1953_v53, 5  ;;  %v1957_v30 = vshrl.u32 %v1926_v18, 16  ;;  %v1613_v0 = vmul.bf16 %v1604_v24, %v7171_v8 }
 0x161   : > { %v1866_v23 = vld [vmem:[#allocation2 + $0xc] sm:$0xf]  ;;  %v7304_v47 = vrot.slane %v1973_v45, 5  ;;  %v7306_v59 = vrot.slane %v1649_v28, 4  ;;  %v7314_v51 = vmul.bf16 %v1605_v62, %v7044_v57  ;;  %v7317_v53 = vmul.bf16 %v7062_v16, %v1155_v36  ;;  %v1742_v28 = vld [vmem:[#allocation2 + $0x14] sm:$0xf] }
 0x162   : > { %v1971_v5 = vrot.slane %v1970_v14, 4  ;;  %v1956_v33 = vsel %vm7079_vm2, %v1951_v25, %v1955_v12  ;;  %v7320_v45 = vor.u32 %v1455_v58, %v7265_v49  ;;  %v1959_v18 = vrot.slane %v1957_v30, 4  ;;  %v1741_v25 = vld [vmem:[#allocation2 + $0x10] sm:$0xf] }
 0x163   : > { %2026 = vst.msk [vmem:[#allocation3 + $0xc] sm:$0xf] %vm739_vm3, %v1956_v33  ;;  %v1623_v24 = vshrl.u32 %v1613_v0, 16  ;;  %v1626_v16 = vshll.u32 %v1613_v0, 16  ;;  %v1632_v62 = vshll.u32 %v7314_v51, 16  ;;  %v1325_v58 = vshrl.u32 %v7226_v40, 16 }
 0x164   : > { %1882 = vrot.lane.b32.xlu0 %v1866_v23, %s6740_s13  ;;  %1134 = vrot.lane.b32.xlu1 %v1111_v44, %s6739_s23  ;;  %v1976_v57 = vsel %vm7079_vm2, %v1971_v5, %v7304_v47  ;;  %v1431_v36 = vld [vmem:[#allocation2 + $0x10] sm:$0xf]  ;;  %v7332_v23 = vrot.slane %v1977_v10, 4  ;;  %v1960_v14 = vor.u32 %v1959_v18, %v1955_v12  ;;  %v1331_v30 = vshll.u32 %v7317_v53, 16  ;;  %v1432_v33 = vld [vmem:[#allocation2 + $0x14] sm:$0xf] }
 0x165   : > { %2028 = vst.msk [vmem:[#allocation3 + $0x1c] sm:$0xf] %vm739_vm3, %v1976_v57  ;;  %v1625_v44 = vrot.slane %v1623_v24, 4  ;;  %v11876_v0 = vsel %vm7079_vm2, %v7219_v2, %v7242_v35  ;;  %v1628_v40 = vrot.slane %v1626_v16, 5  ;;  %v7343_v10 = vrot.slane %v1632_v62, 5 }
 0x166   : > { %v1327_v5 = vrot.slane %v1325_v58, 4  ;;  %v7346_v12 = vmul.bf16 %v1741_v25, %v7263_v41  ;;  %v1961_v18 = vrot.slane %v1960_v14, 4  ;;  %v7348_v24 = vrot.slane %v1331_v30, 5  ;;  %v1430_v62 = vld [vmem:[#allocation2 + $0xc] sm:$0xf]  ;;  %v6553_v25 = vld [vmem:[%s11877_s2 + $0x38] sm:$0xff]  }
 0x167   : > { %v7352_v57 = vmul.bf16 %v1431_v36, %v7085_v52  ;;  %v1629_v8 = vor.u32 %v1628_v40, %v1625_v44  ;;  %v1441_v16 = vmul.bf16 %v1432_v33, %v7089_v55  ;;  %v1561_v58 = vld [vmem:[#allocation2 + $0x20] sm:$0xf]  ;;  %v1869_v14 = vld [vmem:[#allocation2 + $0x18] sm:$0xf]  ;;  %2163 = vmatpush1.bf16.msra.mxu1 %v6553_v25  ;;  %v1636_v37 = vshrl.u32 %v7314_v51, 16 }
 0x168   : > { %1124 = vrot.lane.b32.xlu0 %v1106_v60, %s6739_s23  ;;  %1395 = vrot.lane.b32.xlu1 %v11876_v0, %s6742_s17  ;;  %v1751_v60 = vmul.bf16 %v1742_v28, %v7085_v52  ;;  %v1328_v63 = vor.u32 %v1327_v5, %v7242_v35  ;;  %v1772_v2 = vshrl.u32 %v7346_v12, 16  ;;  %v1980_v28 = vor.u32 %v7332_v23, %v7304_v47 }
 0x169   : > { %v1966_v36 = vsel %vm7079_vm2, %v1961_v18, %v7289_v29  ;;  %v1470_v35 = vshrl.u32 %v7352_v57, 16  ;;  %v7369_v30 = vrot.slane %v1629_v8, 4  ;;  %v1479_v40 = vshrl.u32 %v1441_v16, 16  ;;  %v1740_v18 = vld [vmem:[#allocation2 + $0xc] sm:$0xf] }
 0x16a   : > { %v1781_v44 = vshrl.u32 %v1751_v60, 16  ;;  %2027 = vst.msk [vmem:[#allocation3 + $0x14] sm:$0xf] %vm739_vm3, %v1966_v36  ;;  %v7371_v33 = vrot.slane %v1328_v63, 4  ;;  %v1774_v0 = vrot.slane %v1772_v2, 7  ;;  %v1784_v23 = vshll.u32 %v1751_v60, 16 }
 0x16b   : > { %v1472_v5 = vrot.slane %v1470_v35, 7  ;;  %v7376_v29 = vmul.bf16 %v1430_v62, %v7263_v41  ;;  %v7386_v2 = vrot.slane %v1479_v40, 7  ;;  %v1482_v60 = vshll.u32 %v1441_v16, 16  ;;  %v1109_v62 = vld [vmem:[#allocation2 + $0x18] sm:$0xf]  ;;  %v6554_v35 = vld [vmem:[%s11877_s2 + $0x30] sm:$0xff]  }
 0x16c   : > { %1583 = vrot.lane.b32.xlu0 %v1561_v58, %s6741_s14  ;;  %1888 = vrot.lane.b32.xlu1 %v1869_v14, %s6740_s13  ;;  %v7373_v47 = vrot.slane %v1781_v44, 7  ;;  %v1559_v58 = vld [vmem:[#allocation2 + $0x18] sm:$0xf]  ;;  %v11878_v14 = vmov 0   ;;  %v1779_v36 = vrot.slane %v1774_v0, 4  ;;  %v7398_v16 = vmul.bf16 %v1740_v18, %v7166_v34 }
 0x16d   : > { %2164 = vmatprep.subr.bf16.mxu1 %v11878_v14  ;;  %v1461_v44 = vshrl.u32 %v7376_v29, 16  ;;  %v1477_v63 = vrot.slane %v1472_v5, 4  ;;  %v1484_v40 = vor.u32 %v1482_v60, %v7386_v2  ;;  %v1739_v8 = vld [vmem:[#allocation2 + $0x8] sm:$0x8]  ;;  %v11880_v34 = vrot.slane %v7222_v31, 11 }
 0x16e   : > { %v1786_v25 = vor.u32 %v1784_v23, %v7373_v47  ;;  %2165 = vmatpush1.bf16.msra.mxu1 %v6554_v35  ;;  %v7415_v60 = vrot.slane %v1980_v28, 4  ;;  %v1763_v51 = vshrl.u32 %v7398_v16, 16  ;;  %v1638_v35 = vrot.slane %v1636_v37, 4 }
 0x16f   : > { %v1463_v38 = vrot.slane %v1461_v44, 7  ;;  %v1458_v18 = vsel %vm7037_vm9, %v11880_v34, %v7320_v45  ;;  %2166 = vmatprep.subr.bf16.mxu1 %v11878_v14  ;;  %v1748_v44 = vmul.bf16 %v1739_v8, %v7157_v48  ;;  %v11881_v31 = vsel %vm7079_vm2, %v7287_v13, %v7278_v32  ;;  %v1743_v48 = vld [vmem:[#allocation2 + $0x18] sm:$0xf]  ;;  %v6555_v8 = vld [vmem:[%s11877_s2 + $0x28] sm:$0xff]  }
 0x170   : > { %1579 = vrot.lane.b32.xlu0 %v1559_v58, %s6741_s14  ;;  %1130 = vrot.lane.b32.xlu1 %v1109_v62, %s6739_s23  ;;  %v7403_v23 = vsel %vm7037_vm9, %v1779_v36, %v1786_v25  ;;  %v11879_v58 = vshrl.u32 %v7239_v7, 16  ;;  %v7419_v36 = vsel %vm7037_vm9, %v1477_v63, %v1484_v40  ;;  %v1775_v25 = vshll.u32 %v7346_v12, 16 }
 0x171   : > { %v7432_v45 = vrot.slane %v1763_v51, 7  ;;  %v1473_v28 = vshll.u32 %v7352_v57, 16  ;;  %v7436_v12 = vmul.bf16 %v1608_v20, %v7067_v22  ;;  %v1656_v37 = vshrl.u32 %v7269_v9, 16 }
 0x172   : > { %v7408_v62 = vrot.slane %v11879_v58, 7  ;;  %v1468_v58 = vrot.slane %v1463_v38, 4  ;;  %v1464_v40 = vshll.u32 %v7376_v29, 16  ;;  %v1639_v13 = vor.u32 %v1638_v35, %v7343_v10  ;;  %2167 = vmatpush1.bf16.msra.mxu1 %v6555_v8  ;;  %v1158_v29 = vld [vmem:[#allocation2 + $0x18] sm:$0xf] }
 0x173   : > { %v1335_v34 = vshrl.u32 %v7317_v53, 16  ;;  %v7446_v57 = vor.u32 %v1775_v25, %v1774_v0  ;;  %v1766_v20 = vshll.u32 %v7398_v16, 16  ;;  %v1475_v22 = vor.u32 %v1473_v28, %v1472_v5  ;;  %2168 = vmatprep.subr.bf16.mxu1 %v11878_v14  ;;  %v6556_v53 = vld [vmem:[%s11877_s2 + $0x20] sm:$0xff]  }
 0x174   : > { %1522 = vrot.lane.b32.xlu0 %v1458_v18, %s6743_s16  ;;  %1401 = vrot.lane.b32.xlu1 %v11881_v31, %s6742_s17  ;;  %v1562_v18 = vld [vmem:[#allocation2 + $0x24] sm:$0xf]  ;;  %v1658_v9 = vrot.slane %v1656_v37, 4  ;;  %v7449_v51 = vrot.slane %v1639_v13, 4  ;;  %v1662_v31 = vshll.u32 %v7436_v12, 16  ;;  %v1752_v63 = vmul.bf16 %v1743_v48, %v7089_v55 }
 0x175   : > { %v1337_v50 = vrot.slane %v1335_v34, 4  ;;  %v11882_v0 = vsel %vm7079_vm2, %v7306_v59, %v7296_v6  ;;  %v1466_v5 = vor.u32 %v1464_v40, %v1463_v38  ;;  %v1770_v16 = vrot.slane %v7432_v45, 4  ;;  %v1920_v28 = vld [vmem:[#allocation2 + $0x20] sm:$0xf] }
 0x176   : > { %v1758_v25 = vshrl.u32 %v1748_v44, 16  ;;  %v7467_v35 = vsel %vm7037_vm9, %v1468_v58, %v1475_v22  ;;  %v1160_v37 = vld [vmem:[#allocation2 + $0x20] sm:$0xf]  ;;  %v1645_v48 = vsel %vm7079_vm2, %v7449_v51, %v7280_v43  ;;  %v1659_v59 = vor.u32 %v1658_v9, %v7296_v6  ;;  %2169 = vmatpush1.bf16.msra.mxu1 %v6556_v53  ;;  %v6557_v53 = vld [vmem:[%s11877_s2 + $0x18] sm:$0xff]  }
 0x177   : > { %v7474_v8 = vrot.slane %v1662_v31, 5  ;;  %v1338_v38 = vor.u32 %v1337_v50, %v7348_v24  ;;  %v1790_v40 = vshrl.u32 %v1752_v63, 16  ;;  %v1793_v13 = vshll.u32 %v1752_v63, 16  ;;  %2170 = vmatprep.subr.bf16.mxu1 %v11878_v14 }
 0x178   : > { %1710 = vrot.lane.b32.xlu0 %v11882_v0, %s6744_s22  ;;  %1585 = vrot.lane.b32.xlu1 %v1562_v18, %s6741_s14  ;;  %v7478_v44 = vmul.bf16 %v7115_v26, %v1158_v29  ;;  %v1355_v58 = vshrl.u32 %v7249_v1, 16  ;;  %v7481_v34 = vrot.slane %v1659_v59, 4  ;;  %v1929_v22 = vmul.bf16 %v1920_v28, %v7115_v26 }
 0x179   : > { %v7483_v18 = vrot.slane %v1338_v38, 4  ;;  %v7487_v6 = vmul.bf16 %v7140_v11, %v1160_v37  ;;  %v11883_v50 = vsel %vm7079_vm2, %v7369_v30, %v7343_v10  ;;  %v11884_v1 = vsel %vm7079_vm2, %v7371_v33, %v7348_v24 }
 0x17a   : > { %v1768_v63 = vor.u32 %v1766_v20, %v7432_v45  ;;  %v7503_v9 = vrot.slane %v1790_v40, 7  ;;  %v1357_v31 = vrot.slane %v1355_v58, 4  ;;  %v1361_v29 = vshll.u32 %v7478_v44, 16  ;;  %v1433_v45 = vld [vmem:[#allocation2 + $0x18] sm:$0xf]  ;;  %2171 = vmatpush1.bf16.msra.mxu1 %v6557_v53 }
 0x17b   : > { %v1665_v10 = vsel %vm7079_vm2, %v7481_v34, %v7474_v8  ;;  %v1983_v30 = vshll.u32 %v1929_v22, 16  ;;  %v1987_v33 = vshrl.u32 %v1929_v22, 16  ;;  %v1788_v20 = vrot.slane %v7373_v47, 4  ;;  %v7522_v58 = vld [vmem:[#allocation2 + $0x24] sm:$0x1]  ;;  %2172 = vmatprep.subr.bf16.mxu1 %v11878_v14 }
 0x17c   : > { %1706 = vrot.lane.b32.xlu0 %v11883_v50, %s6744_s22  ;;  %1397 = vrot.lane.b32.xlu1 %v11884_v1, %s6742_s17  ;;  %v1795_v0 = vor.u32 %v1793_v13, %v7503_v9  ;;  %v1358_v28 = vor.u32 %v1357_v31, %v7278_v32  ;;  %v7520_v37 = vrot.slane %v1361_v29, 5  ;;  %v6176_v59 = vrot.slane %v1758_v25, 11  ;;  %v1159_v1 = vld [vmem:[#allocation2 + $0x1c] sm:$0xf]  ;;  %v1921_v29 = vld [vmem:[#allocation2 + $0x24] sm:$0xf] }
 0x17d   : > { %v1985_v38 = vrot.slane %v1983_v30, 5  ;;  %v1989_v40 = vrot.slane %v1987_v33, 4  ;;  %v1381_v50 = vshll.u32 %v7487_v6, 16  ;;  %v11885_v32 = vrot.slane %v7265_v49, 4  ;;  %v1610_v53 = vld [vmem:[#allocation2 + $0x20] sm:$0xf] }
 0x17e   : > { %v7536_v25 = vsel %vm7037_vm9, %v1788_v20, %v1795_v0  ;;  %v7538_v13 = vrot.slane %v1358_v28, 4  ;;  %v1442_v22 = vmul.bf16 %v1433_v45, %v7106_v61  ;;  %v7547_v49 = vsel %vm7037_vm9, %v1770_v16, %v7446_v57  ;;  %v1870_v30 = vld [vmem:[#allocation2 + $0x1c] sm:$0xf]  ;;  %v1435_v45 = vld [vmem:[#allocation2 + $0x20] sm:$0xf] }
 0x17f   : > { %v1467_v47 = vsel %vm7037_vm9, %v11885_v32, %v1466_v5  ;;  %v1986_v5 = vsel %vm7079_vm2, %v7415_v60, %v1985_v38  ;;  %v1990_v31 = vor.u32 %v1989_v40, %v1985_v38  ;;  %v1310_v57 = vmul.bf16 %v7145_v15, %v7522_v58  ;;  %v1560_v20 = vld [vmem:[#allocation2 + $0x1c] sm:$0xf] }
 0x180   : > { %1837 = vrot.lane.b32.xlu0 %v7403_v23, %s6745_s30  ;;  %1528 = vrot.lane.b32.xlu1 %v7419_v36, %s6743_s16  ;;  %v6558_v23 = vld [vmem:[%s11877_s2 + $0x10] sm:$0xff]   ;;  %v7551_v36 = vsel %vm7037_vm9, %v6176_v59, %v1768_v63  ;;  %2029 = vst.msk [vmem:[#allocation3 + $0x24] sm:$0xf] %vm739_vm3, %v1986_v5  ;;  %v1488_v16 = vshrl.u32 %v1442_v22, 16  ;;  %v1491_v63 = vshll.u32 %v1442_v22, 16  ;;  %v7563_v60 = vrot.slane %v1381_v50, 5 }
 0x181   : > { %2173 = vmatpush1.bf16.msra.mxu1 %v6558_v23  ;;  %v1385_v0 = vshrl.u32 %v7487_v6, 16  ;;  %v7567_v28 = vmul.bf16 %v7125_v54, %v1159_v1  ;;  %v1365_v59 = vshrl.u32 %v7478_v44, 16  ;;  %v1486_v38 = vrot.slane %v7386_v2, 4  ;;  %v1611_v50 = vld [vmem:[#allocation2 + $0x24] sm:$0xf]  ;;  %v6559_v23 = vld [vmem:[%s11877_s2 + $0x8] sm:$0xff]  }
 0x182   : > { %2174 = vmatprep.subr.bf16.mxu1 %v11878_v14  ;;  %v7574_v40 = vrot.slane %v1488_v16, 7  ;;  %v1930_v58 = vmul.bf16 %v1921_v29, %v7125_v54  ;;  %v1619_v6 = vmul.bf16 %v1610_v53, %v7125_v54  ;;  %v1991_v32 = vrot.slane %v1990_v31, 4  ;;  %v1436_v29 = vld [vmem:[#allocation2 + $0x24] sm:$0xf] }
 0x183   : > { %v1367_v22 = vrot.slane %v1365_v59, 4  ;;  %v1371_v1 = vshll.u32 %v7567_v28, 16  ;;  %v7580_v44 = vmul.bf16 %v1435_v45, %v7136_v4  ;;  %v7586_v33 = vrot.slane %v1385_v0, 4  ;;  %v1609_v45 = vld [vmem:[#allocation2 + $0x1c] sm:$0xf] }
 0x184   : > { %1890 = vrot.lane.b32.xlu0 %v1870_v30, %s6740_s13  ;;  %1581 = vrot.lane.b32.xlu1 %v1560_v20, %s6741_s14  ;;  %v1493_v2 = vor.u32 %v1491_v63, %v7574_v40  ;;  %v1993_v5 = vshll.u32 %v1930_v58, 16  ;;  %v1997_v30 = vshrl.u32 %v1930_v58, 16  ;;  %v1682_v16 = vshll.u32 %v1619_v6, 16  ;;  %v1110_v20 = vld [vmem:[#allocation2 + $0x1c] sm:$0xf]  ;;  %s8112_s14 = sld [smem:[#allocation10 + $0x8]] }
 0x185   : > { %v1368_v54 = vor.u32 %v1367_v22, %v7520_v37  ;;  %v7590_v31 = vmul.bf16 %v1611_v50, %v7140_v11  ;;  %v1686_v53 = vshrl.u32 %v1619_v6, 16  ;;  %2175 = vmatpush1.bf16.msra.mxu1 %v6559_v23  ;;  %v7598_v59 = vrot.slane %v1371_v1, 5  ;;  %v1434_v23 = vld [vmem:[#allocation2 + $0x1c] sm:$0xf] }
 0x186   : > { %v7596_v63 = vsel %vm7037_vm9, %v1486_v38, %v1493_v2  ;;  %v1995_v0 = vrot.slane %v1993_v5, 5  ;;  %v1999_v58 = vrot.slane %v1997_v30, 4  ;;  %v7602_v22 = vrot.slane %v1682_v16, 5  ;;  %2176 = vmatprep.subr.bf16.mxu1 %v11878_v14 }
 0x187   : > { %v7600_v24 = vrot.slane %v1368_v54, 4  ;;  %v7604_v11 = vrot.slane %v1686_v53, 4  ;;  %v1445_v50 = vmul.bf16 %v1436_v29, %v7228_v42  ;;  %v1506_v38 = vshrl.u32 %v7580_v44, 16 }
 0x188   : > { %1524 = vrot.lane.b32.xlu1 %v1467_v47, %s6743_s16  ;;  %1132 = vrot.lane.b32.xlu0 %v1110_v20, %s6739_s23  ;;  %v1996_v47 = vsel %vm7079_vm2, %v1991_v32, %v1995_v0  ;;  %v2000_v6 = vor.u32 %v1999_v58, %v1995_v0  ;;  %v1618_v1 = vmul.bf16 %v1609_v45, %v7115_v26  ;;  %v7614_v5 = vshll.u32 %v1310_v57, 16  ;;  %v6560_v20 = vld [vmem:[%s11877_s2] sm:$0xff]   ;;  %v1744_v58 = vld [vmem:[#allocation2 + $0x1c] sm:$0xf]  ;;  %s8106_s23 = sld [smem:[#allocation10 + $0x7]] }
 0x189   : > { %v1388_v2 = vor.u32 %v7586_v33, %v7563_v60  ;;  %2030 = vst.msk [vmem:[#allocation3 + $0x2c] sm:$0xf] %vm739_vm3, %v1996_v47  ;;  %v1515_v16 = vshrl.u32 %v1445_v50, 16  ;;  %v1508_v32 = vrot.slane %v1506_v38, 7  ;;  %v1518_v29 = vshll.u32 %v1445_v50, 16  ;;  %2177 = vmatpush1.bf16.msra.mxu1 %v6560_v20 }
 0x18a   : > { %v2001_v26 = vrot.slane %v2000_v6, 4  ;;  %v1666_v57 = vshrl.u32 %v7436_v12, 16  ;;  %v1692_v54 = vshll.u32 %v7590_v31, 16  ;;  %v1672_v45 = vshll.u32 %v1618_v1, 16  ;;  %v1745_v47 = vld [vmem:[#allocation2 + $0x20] sm:$0xf]  ;;  %2192 = vmatprep.subr.bf16.mxu1 %v11878_v14 }
 0x18b   : > { %v1517_v53 = vrot.slane %v1515_v16, 7  ;;  %v1443_v0 = vmul.bf16 %v1434_v23, %v7131_v3  ;;  %v1513_v50 = vrot.slane %v1508_v32, 4  ;;  %v6561_v6 = vld [vmem:[%s11877_s2 + $0x40] sm:$0xff]   ;;  %v1495_v16 = vrot.slane %v7574_v40, 4  ;;  %s8350_s2 = sld [smem:[#allocation10 + $0x24]] }
 0x18c   : > { %1835 = vrot.lane.b32.xlu1 %v7547_v49, %s6745_s30  ;;  %1833 = vrot.lane.b32.xlu0 %v7551_v36, %s6745_s30  ;;  %v2006_v49 = vsel %vm7079_vm2, %v2001_v26, %v7150_v27  ;;  %v1689_v36 = vor.u32 %v7604_v11, %v7602_v22  ;;  %v1668_v12 = vrot.slane %v1666_v57, 4  ;;  %v7640_v23 = vrot.slane %v1672_v45, 5 }
 0x18d   : > { %2031 = vst.msk [vmem:[#allocation3 + $0x34] sm:$0xf] %vm739_vm3, %v2006_v49  ;;  %v1520_v38 = vor.u32 %v1518_v29, %v1517_v53  ;;  %v1497_v30 = vshrl.u32 %v1443_v0, 16  ;;  %v1500_v11 = vshll.u32 %v1443_v0, 16  ;;  %v1753_v26 = vmul.bf16 %v1744_v58, %v7106_v61  ;;  %2193 = vmatpush2.bf16.msra.mxu1 %v6561_v6 }
 0x18e   : > { %v1669_v27 = vor.u32 %v1668_v12, %v7474_v8  ;;  %v1797_v40 = vrot.slane %v7503_v9, 4  ;;  %v1754_v57 = vmul.bf16 %v1745_v47, %v7131_v3  ;;  %v1509_v43 = vshll.u32 %v7580_v44, 16 }
 0x18f   : > { %v7657_v14 = vsel %vm7037_vm9, %v1513_v50, %v1520_v38  ;;  %v1499_v29 = vrot.slane %v1497_v30, 7  ;;  %v1676_v20 = vshrl.u32 %v1618_v1, 16  ;;  %v11886_v9 = vsel %vm7079_vm2, %v7483_v18, %v7275_v39  ;;  %v1746_v50 = vld [vmem:[#allocation2 + $0x24] sm:$0xf] }
 0x190   : > { %1708 = vrot.lane.b32.xlu1 %v1645_v48, %s6744_s22  ;;  %1526 = vrot.lane.b32.xlu0 %v7467_v35, %s6743_s16  ;;  %v7661_v51 = vrot.slane %v1669_v27, 4  ;;  %v1799_v48 = vshrl.u32 %v1753_v26, 16  ;;  %v1802_v35 = vshll.u32 %v1753_v26, 16  ;;  %v1808_v45 = vshrl.u32 %v1754_v57, 16 }
 0x191   : > { %v1502_v53 = vor.u32 %v1500_v11, %v1499_v29  ;;  %v1811_v0 = vshll.u32 %v1754_v57, 16  ;;  %v1504_v58 = vrot.slane %v1499_v29, 4  ;;  %v1511_v30 = vor.u32 %v1509_v43, %v1508_v32  ;;  %v842_v29 = vld [vmem:[#allocation2 + $0x8] sm:$0xf] }
 0x192   : > { %v1675_v44 = vsel %vm7079_vm2, %v7661_v51, %v7640_v23  ;;  %v1801_v1 = vrot.slane %v1799_v48, 7  ;;  %v1678_v49 = vrot.slane %v1676_v20, 4  ;;  %v1393_v12 = vrot.slane %v7614_v5, 5 }
 0x193   : > { %v7682_v8 = vsel %vm7037_vm9, %v1495_v16, %v1502_v53  ;;  %v1810_v34 = vrot.slane %v1808_v45, 7  ;;  %v11887_v39 = vshll.u32 %v7239_v7, 16  ;;  %v7689_v38 = vsel %vm7037_vm9, %v1504_v58, %v1511_v30  ;;  %v844_v7 = vld [vmem:[#allocation2 + $0x10] sm:$0xf] }
 0x194   : > { %1712 = vrot.lane.b32.xlu1 %v1665_v10, %s6744_s22  ;;  %1399 = vrot.lane.b32.xlu0 %v11886_v9, %s6742_s17  ;;  %v843_v10 = vld [vmem:[#allocation2 + $0xc] sm:$0xf]  ;;  %v1804_v47 = vor.u32 %v1802_v35, %v1801_v1  ;;  %v1806_v6 = vrot.slane %v1801_v1, 4  ;;  %v1679_v32 = vor.u32 %v1678_v49, %v7640_v23  ;;  %v1389_v5 = vrot.slane %v1388_v2, 4 }
 0x195   : > { %v1831_v18 = vor.u32 %v11887_v39, %v7408_v62  ;;  %v7695_v16 = vrot.slane %v1692_v54, 5  ;;  %v1813_v27 = vor.u32 %v1811_v0, %v1810_v34  ;;  %v1755_v11 = vmul.bf16 %v1746_v50, %v7136_v4 }
 0x196   : > { %v11888_v62 = vsel %vm7079_vm2, %v7538_v13, %v7520_v37  ;;  %v1690_v26 = vrot.slane %v1689_v36, 4  ;;  %v7708_v33 = vsel %vm7037_vm9, %v1797_v40, %v1804_v47  ;;  %v7710_v2 = vrot.slane %v1679_v32, 4  ;;  %v845_v13 = vld [vmem:[#allocation2 + $0x14] sm:$0xf] }
 0x197   : > { %v1003_v54 = vmul.bf16 %v7085_v52, %v843_v10  ;;  %v1375_v57 = vshrl.u32 %v7567_v28, 16  ;;  %v1817_v43 = vshrl.u32 %v1755_v11, 16  ;;  %v1025_v37 = vrot.slane %v7179_v21, 4 }
 0x198   : > { %1839 = vrot.lane.b32.xlu1 %v7536_v25, %s6745_s30  ;;  %1403 = vrot.lane.b32.xlu0 %v11888_v62, %s6742_s17  ;;  %v7715_v25 = vsel %vm7037_vm9, %v1806_v6, %v1813_v27  ;;  %v1685_v36 = vsel %vm7079_vm2, %v7710_v2, %v7602_v22  ;;  %v1820_v40 = vshll.u32 %v1755_v11, 16  ;;  %v1004_v48 = vmul.bf16 %v7089_v55, %v844_v7 }
 0x199   : > { %v1036_v52 = vshrl.u32 %v1003_v54, 16  ;;  %v1394_v35 = vsel %vm7079_vm2, %v1389_v5, %v1393_v12  ;;  %v1815_v20 = vrot.slane %v1810_v34, 4  ;;  %v1819_v53 = vrot.slane %v1817_v43, 7 }
 0x19a   : > { %v1002_v28 = vmul.bf16 %v7263_v41, %v842_v29  ;;  %v1695_v21 = vsel %vm7079_vm2, %v1690_v26, %v7695_v16  ;;  %v1045_v0 = vshrl.u32 %v1004_v48, 16  ;;  %v1005_v55 = vmul.bf16 %v7106_v61, %v845_v13  ;;  %v847_v41 = vld [vmem:[#allocation2 + $0x1c] sm:$0xf]  ;;  %v846_v26 = vld [vmem:[#allocation2 + $0x18] sm:$0xf] }
 0x19b   : > { %v1038_v45 = vrot.slane %v1036_v52, 7  ;;  %v7734_v58 = vrot.slane %v1375_v57, 4  ;;  %v1696_v9 = vshrl.u32 %v7590_v31, 16  ;;  %v1822_v1 = vor.u32 %v1820_v40, %v1819_v53  ;;  %v1612_v13 = vld [vmem:[#allocation2 + $0x28] sm:$0x1] }
 0x19c   : > { %1409 = vrot.lane.b32.xlu1 %v1394_v35, %s6742_s17  ;;  %1530 = vrot.lane.b32.xlu0 %v7596_v63, %s6743_s16  ;;  %v1824_v30 = vrot.slane %v1819_v53, 4  ;;  %v1047_v50 = vrot.slane %v1045_v0, 7  ;;  %v1048_v12 = vshll.u32 %v1004_v48, 16  ;;  %v1027_v34 = vshrl.u32 %v1002_v28, 16  ;;  %v848_v63 = vld [vmem:[#allocation2 + $0x20] sm:$0xf] }
 0x19d   : > { %v1043_v49 = vrot.slane %v1038_v45, 4  ;;  %v7739_v39 = vsel %vm7037_vm9, %v1815_v20, %v1822_v1  ;;  %v1030_v61 = vshll.u32 %v1002_v28, 16  ;;  %v1054_v47 = vshrl.u32 %v1005_v55, 16 }
 0x19e   : > { %v7743_v10 = vsel %vm7037_vm9, %v1824_v30, %v1831_v18  ;;  %v11889_v31 = vsel %vm7079_vm2, %v7600_v24, %v7598_v59  ;;  %v1050_v6 = vor.u32 %v1048_v12, %v1047_v50  ;;  %v1029_v32 = vrot.slane %v1027_v34, 7 }
 0x19f   : > { %v1057_v5 = vshll.u32 %v1005_v55, 16  ;;  %v1007_v27 = vmul.bf16 %v7136_v4, %v847_v41  ;;  %v1052_v11 = vrot.slane %v1047_v50, 4  ;;  %v1056_v7 = vrot.slane %v1054_v47, 7 }
 0x1a0   : > { %1405 = vrot.lane.b32.xlu1 %v11889_v31, %s6742_s17  ;;  %1718 = vrot.lane.b32.xlu0 %v1695_v21, %s6744_s22  ;;  %v1008_v18 = vmul.bf16 %v7228_v42, %v848_v63  ;;  %v1039_v62 = vshll.u32 %v1003_v54, 16  ;;  %v1051_v29 = vsel %vm7037_vm9, %v1043_v49, %v1050_v6  ;;  %v1032_v57 = vor.u32 %v1030_v61, %v1029_v32 }
 0x1a1   : > { %v1072_v43 = vshrl.u32 %v1007_v27, 16  ;;  %v1034_v24 = vrot.slane %v1029_v32, 4  ;;  %1099 = vst.msk [vmem:[#allocation3 + $0x18] sm:$0xf] %vm739_vm3, %v1051_v29  ;;  %v1059_v40 = vor.u32 %v1057_v5, %v1056_v7  ;;  %v1006_v54 = vmul.bf16 %v7131_v3, %v846_v26 }
 0x1a2   : > { %v1081_v48 = vshrl.u32 %v1008_v18, 16  ;;  %v1084_v52 = vshll.u32 %v1008_v18, 16  ;;  %v1041_v35 = vor.u32 %v1039_v62, %v1038_v45  ;;  %v1033_v4 = vsel %vm7037_vm9, %v1025_v37, %v1032_v57 }
 0x1a3   : > { %v1074_v42 = vrot.slane %v1072_v43, 7  ;;  %1097 = vst.msk [vmem:[#allocation3 + $0x8] sm:$0xf] %vm739_vm3, %v1033_v4  ;;  %v1060_v20 = vsel %vm7037_vm9, %v1052_v11, %v1059_v40  ;;  %v1621_v28 = vmul.bf16 %v1612_v13, %v7145_v15  ;;  %v1063_v51 = vshrl.u32 %v1006_v54, 16 }
 0x1a4   : > { %1536 = vrot.lane.b32.xlu1 %v7657_v14, %s6743_s16  ;;  %1714 = vrot.lane.b32.xlu0 %v1675_v44, %s6744_s22  ;;  %v1083_v53 = vrot.slane %v1081_v48, 7  ;;  %v1042_v14 = vsel %vm7037_vm9, %v1034_v24, %v1041_v35  ;;  %1100 = vst.msk [vmem:[#allocation3 + $0x20] sm:$0xf] %vm739_vm3, %v1060_v20  ;;  %v1066_v44 = vshll.u32 %v1006_v54, 16  ;;  %v1378_v3 = vor.u32 %v7734_v58, %v7598_v59 }
 0x1a5   : > { %v1079_v23 = vrot.slane %v1074_v42, 4  ;;  %1098 = vst.msk [vmem:[#allocation3 + $0x10] sm:$0xf] %vm739_vm3, %v1042_v14  ;;  %v1698_v37 = vrot.slane %v1696_v9, 4  ;;  %v1075_v45 = vshll.u32 %v1007_v27, 16  ;;  %v1065_v15 = vrot.slane %v1063_v51, 7 }
 0x1a6   : > { %v1086_v21 = vor.u32 %v1084_v52, %v1083_v53  ;;  %v1061_v1 = vrot.slane %v1056_v7, 4  ;;  %v1379_v59 = vrot.slane %v1378_v3, 4  ;;  %v1702_v9 = vshll.u32 %v1621_v28, 16  ;;  %v6564_v51 = vld [vmem:[#allocation3 + $0x4] ss:$8 sps:$4 sm:$0xff]  }
 0x1a7   : > { %v1077_v55 = vor.u32 %v1075_v45, %v1074_v42  ;;  %v1068_v30 = vor.u32 %v1066_v44, %v1065_v15  ;;  %v1070_v41 = vrot.slane %v1065_v15, 4  ;;  %v1699_v58 = vor.u32 %v1698_v37, %v7695_v16  ;;  %6194 = vmatprep.mubr.msk.bf16.mxu1 %vm2149_vm1, %v6564_v51 }
 0x1a8   : > { %1532 = vrot.lane.b32.xlu1 %v7682_v8, %s6743_s16  ;;  %1841 = vrot.lane.b32.xlu0 %v7708_v33, %s6745_s30  ;;  %v1087_v0 = vsel %vm7037_vm9, %v1079_v23, %v1086_v21  ;;  %v1384_v16 = vsel %vm7079_vm2, %v1379_v59, %v7563_v60  ;;  %v1704_v50 = vrot.slane %v1702_v9, 5  ;;  %v1872_v60 = vld [vmem:[#allocation2 + $0x24] sm:$0xf] }
 0x1a9   : > { %1103 = vst.msk [vmem:[#allocation3 + $0x38] sm:$0xf] %vm739_vm3, %v1087_v0  ;;  %v1069_v8 = vsel %vm7037_vm9, %v1061_v1, %v1068_v30  ;;  %v1078_v33 = vsel %vm7037_vm9, %v1070_v41, %v1077_v55  ;;  %v1700_v49 = vrot.slane %v1699_v58, 4  ;;  %vm1546_vm9 = vcmask 519552   ;;  %v6565_v0 = vld [vmem:[#allocation3 + $0x14] ss:$8 sps:$4 sm:$0xff]  }
 0x1aa   : > { %1101 = vst.msk [vmem:[#allocation3 + $0x28] sm:$0xf] %vm739_vm3, %v1069_v8  ;;  %1102 = vst.msk [vmem:[#allocation3 + $0x30] sm:$0xf] %vm739_vm3, %v1078_v33  ;;  %vm1419_vm3 = vcmask 388352  }
 0x1ab   : > { %v1705_v56 = vsel %vm7079_vm2, %v1700_v49, %v1704_v50  ;;  %vm6746_vm2 = vmmov 0  }
 0x1ac   : > { %1843 = vrot.lane.b32.xlu1 %v7715_v25, %s6745_s30  ;;  %1534 = vrot.lane.b32.xlu0 %v7689_v38, %s6743_s16  ;;  %v1873_v38 = vld [vmem:[#allocation2 + $0x28] sm:$0xf]  ;;  %s3010_s16 = sld [smem:[#allocation10]] }
 0x1b0   : > { %1716 = vrot.lane.b32.xlu1 %v1685_v36, %s6744_s22  ;;  %1407 = vrot.lane.b32.xlu0 %v1384_v16, %s6742_s17  ;;  %s8143_s17 = sld [smem:[#allocation10 + $0xc]] }
 0x1b4   : > { %1720 = vrot.lane.b32.xlu1 %v1705_v56, %s6744_s22  ;;  %1845 = vrot.lane.b32.xlu0 %v7739_v39, %s6745_s30  ;;  %s6259_s22 = sld [smem:[#allocation10 + $0x1]] }
 0x1b8   : > { %1847 = vrot.lane.b32.xlu1 %v7743_v10, %s6745_s30  ;;  %1894 = vrot.lane.b32.xlu0 %v1872_v60, %s6740_s13  ;;  %v6567_v60 = vld [vmem:[#allocation3 + $0x24] ss:$8 sps:$4 sm:$0xff]   ;;  %s6260_s30 = sld [smem:[#allocation10 + $0x2]] }
 0x1bc   : > { %1896 = vrot.lane.b32.xlu1 %v1873_v38, %s6740_s13  ;;  %s8138_s13 = sld [smem:[#allocation10 + $0xb]] }
 0x1c1   : > { %v1885_v22 = vpop.permute.xlu1 %1884 }
 0x1c2   : > { %v7815_v2 = vpop.permute.xlu0 %1575 }
 0x1c6   : > { %v1127_v25 = vpop.permute.xlu1 %1126  ;;  %v1123_v46 = vpop.permute.xlu0 %1122 }
 0x1c7   : > { %1148 = vst.msk [vmem:[#allocation3 + $0x18] sm:$0xf] %vm1144_vm11, %v1127_v25  ;;  %1146 = vst.msk [vmem:[#allocation3 + $0x8] sm:$0xf] %vm1144_vm11, %v1123_v46  ;;  %v6573_v46 = vld [vmem:[%s11890_s3] sm:$0xff]   ;;  %s8359_s3 = sld [smem:[#allocation10 + $0x25]] }
 0x1c8   : > { %6419 = vmatprep.subr.bf16.mxu0 %v6573_v46 }
 0x1c9   : > { %6420 = vmatpush3.bf16.msra.mxu0 %v6573_v46 }
 0x1ca   : > { %v1572_v36 = vpop.permute.xlu0 %1571  ;;  %v1578_v12 = vpop.permute.xlu1 %1577 }
 0x1ce   : > { %v7819_v34 = vpop.permute.xlu0 %1886  ;;  %v1574_v63 = vpop.permute.xlu1 %1573 }
 0x1d2   : > { %v1129_v39 = vpop.permute.xlu0 %1128  ;;  %v7821_v10 = vpop.permute.xlu1 %1892 }
 0x1d3   : > { %1149 = vst.msk [vmem:[#allocation3 + $0x20] sm:$0xf] %vm1144_vm11, %v1129_v39  ;;  %v6199_v39 = vld [vmem:[%s11893_s7] ss:$0 sm:$0xff]  ;;  %s8423_s7 = sld [smem:[#allocation10 + $0x2f]] }
 0x1d6   : > { %v1883_v61 = vpop.permute.xlu0 %1882  ;;  %v1135_v47 = vpop.permute.xlu1 %1134 }
 0x1d7   : > { %1152 = vst.msk [vmem:[#allocation3 + $0x38] sm:$0xf] %vm1144_vm11, %v1135_v47 }
 0x1da   : > { %v1125_v31 = vpop.permute.xlu0 %1124  ;;  %v1396_v6 = vpop.permute.xlu1 %1395 }
 0x1db   : > { %1147 = vst.msk [vmem:[#allocation3 + $0x10] sm:$0xf] %vm1144_vm11, %v1125_v31 }
 0x1dc   : > { %1420 = vst.msk [vmem:[#allocation3] sm:$0xf] %vm1419_vm3, %v1396_v6 }
 0x1de   : > { %v7827_v32 = vpop.permute.xlu0 %1583  ;;  %v1889_v5 = vpop.permute.xlu1 %1888 }
 0x1e2   : > { %v1580_v27 = vpop.permute.xlu0 %1579  ;;  %v1131_v11 = vpop.permute.xlu1 %1130 }
 0x1e3   : > { %1150 = vst.msk [vmem:[#allocation3 + $0x28] sm:$0xf] %vm1144_vm11, %v1131_v11 }
 0x1e6   : > { %v1523_v7 = vpop.permute.xlu0 %1522  ;;  %v1402_v18 = vpop.permute.xlu1 %1401 }
 0x1e7   : > { %1547 = vst.msk [vmem:[#allocation3] sm:$0xf] %vm1546_vm9, %v1523_v7 }
 0x1e8   : > { %1423 = vst.msk [vmem:[#allocation3 + $0x18] sm:$0xf] %vm1419_vm3, %v1402_v18 }
 0x1e9   : > { %1596 = vst.msk [vmem:[#allocation3] sm:$0xf] %vm1595_vm12, %v1572_v36  ;;  %v11891_v36 = vmov 0.0  }
 0x1ea   : > { %v1711_v62 = vpop.permute.xlu0 %1710  ;;  %v7833_v26 = vpop.permute.xlu1 %1585  ;;  %6429 = vmatprep.subr.mxu0 %v11891_v36  ;;  %2618 = vst.msk [vmem:[#allocation4] sm:$0xff] %vm2617_vm7, %v11891_v36  ;;  %2619 = vst.msk [vmem:[#allocation4 + $0x8] sm:$0xff] %vm2617_vm7, %v11891_v36 }
 0x1eb   : > { %2620 = vst.msk [vmem:[#allocation4 + $0x10] sm:$0xff] %vm2617_vm7, %v11891_v36  ;;  %2621 = vst.msk [vmem:[#allocation4 + $0x18] sm:$0xff] %vm2617_vm7, %v11891_v36 }
 0x1ec   : > { %2622 = vst.msk [vmem:[#allocation4 + $0x60] sm:$0xff] %vm2617_vm7, %v11891_v36  ;;  %2623 = vst.msk [vmem:[#allocation4 + $0x68] sm:$0xff] %vm2617_vm7, %v11891_v36 }
 0x1ed   : > { %2624 = vst.msk [vmem:[#allocation4 + $0x70] sm:$0xff] %vm2617_vm7, %v11891_v36  ;;  %2625 = vst.msk [vmem:[#allocation4 + $0x78] sm:$0xff] %vm2617_vm7, %v11891_v36 }
 0x1ee   : > { %v1707_v29 = vpop.permute.xlu0 %1706  ;;  %v1398_v57 = vpop.permute.xlu1 %1397  ;;  %2626 = vst.msk [vmem:[#allocation5] sm:$0xff] %vm2617_vm7, %v11891_v36  ;;  %2627 = vst.msk [vmem:[#allocation5 + $0x8] sm:$0xff] %vm2617_vm7, %v11891_v36 }
 0x1ef   : > { %1731 = vst.msk [vmem:[#allocation3] sm:$0xf] %vm1730_vm13, %v1707_v29 }
 0x1f0   : > { %1421 = vst.msk [vmem:[#allocation3 + $0x8] sm:$0xf] %vm1419_vm3, %v1398_v57 }
 0x1f1   : > { %2628 = vst.msk [vmem:[#allocation5 + $0x10] sm:$0xff] %vm2617_vm7, %v11891_v36  ;;  %2629 = vst.msk [vmem:[#allocation5 + $0x18] sm:$0xff] %vm2617_vm7, %v11891_v36 }
 0x1f2   : > { %v1838_v43 = vpop.permute.xlu0 %1837  ;;  %v1529_v24 = vpop.permute.xlu1 %1528  ;;  %2630 = vst.msk [vmem:[#allocation5 + $0x60] sm:$0xff] %vm2617_vm7, %v11891_v36  ;;  %2631 = vst.msk [vmem:[#allocation5 + $0x68] sm:$0xff] %vm2617_vm7, %v11891_v36 }
 0x1f3   : > { %1550 = vst.msk [vmem:[#allocation3 + $0x18] sm:$0xf] %vm1546_vm9, %v1529_v24 }
 0x1f4   : > { %1599 = vst.msk [vmem:[#allocation3 + $0x18] sm:$0xf] %vm1595_vm12, %v1578_v12  ;;  %v6198_v12 = vld [vmem:[%s11892_s6] ss:$0 sm:$0xff]  ;;  %s8421_s6 = sld [smem:[#allocation10 + $0x2e]] }
 0x1f5   : > { %2632 = vst.msk [vmem:[#allocation5 + $0x70] sm:$0xff] %vm2617_vm7, %v11891_v36  ;;  %2633 = vst.msk [vmem:[#allocation5 + $0x78] sm:$0xff] %vm2617_vm7, %v11891_v36 }
 0x1f6   : > { %v1891_v13 = vpop.permute.xlu0 %1890  ;;  %v1582_v40 = vpop.permute.xlu1 %1581 }
 0x1fa   : > { %v1525_v48 = vpop.permute.xlu1 %1524  ;;  %v1133_v52 = vpop.permute.xlu0 %1132 }
 0x1fb   : > { %1548 = vst.msk [vmem:[#allocation3 + $0x8] sm:$0xf] %vm1546_vm9, %v1525_v48 }
 0x1fc   : > { %1151 = vst.msk [vmem:[#allocation3 + $0x30] sm:$0xf] %vm1144_vm11, %v1133_v52 }
 0x1fd   : > { %1597 = vst.msk [vmem:[#allocation3 + $0x8] sm:$0xf] %vm1595_vm12, %v1574_v63 }
 0x1fe   : > { %v1836_v35 = vpop.permute.xlu1 %1835  ;;  %v1834_v4 = vpop.permute.xlu0 %1833 }
 0x1ff   : > { %1858 = vst.msk [vmem:[#allocation3] sm:$0xf] %vm1857_vm14, %v1834_v4 }
 0x200   : > { %1907 = vst.msk [vmem:[#allocation3] sm:$0xf] %vm1906_vm15, %v1883_v61 }
 0x202   : > { %v1709_v42 = vpop.permute.xlu1 %1708  ;;  %v1527_v54 = vpop.permute.xlu0 %1526 }
 0x203   : > { %1732 = vst.msk [vmem:[#allocation3 + $0x8] sm:$0xf] %vm1730_vm13, %v1709_v42 }
 0x204   : > { %1859 = vst.msk [vmem:[#allocation3 + $0x8] sm:$0xf] %vm1857_vm14, %v1836_v35 }
 0x205   : > { %1908 = vst.msk [vmem:[#allocation3 + $0x8] sm:$0xf] %vm1906_vm15, %v1885_v22 }
 0x206   : > { %v1713_v20 = vpop.permute.xlu1 %1712  ;;  %v1400_v53 = vpop.permute.xlu0 %1399 }
 0x207   : > { %1734 = vst.msk [vmem:[#allocation3 + $0x18] sm:$0xf] %vm1730_vm13, %v1713_v20 }
 0x208   : > { %1422 = vst.msk [vmem:[#allocation3 + $0x10] sm:$0xf] %vm1419_vm3, %v1400_v53 }
 0x209   : > { %1549 = vst.msk [vmem:[#allocation3 + $0x10] sm:$0xf] %vm1546_vm9, %v1527_v54 }
 0x20a   : > { %1598 = vst.msk [vmem:[#allocation3 + $0x10] sm:$0xf] %vm1595_vm12, %v7815_v2  ;;  %v1840_v14 = vpop.permute.xlu1 %1839  ;;  %v1404_v28 = vpop.permute.xlu0 %1403  ;;  %v6570_v2 = vld [vmem:[#allocation3 + $0x34] ss:$8 sps:$4 sm:$0xff]  }
 0x20b   : > { %1733 = vst.msk [vmem:[#allocation3 + $0x10] sm:$0xf] %vm1730_vm13, %v1711_v62 }
 0x20c   : > { %1860 = vst.msk [vmem:[#allocation3 + $0x10] sm:$0xf] %vm1857_vm14, %v1838_v43  ;;  %1861 = vst.msk [vmem:[#allocation3 + $0x18] sm:$0xf] %vm1857_vm14, %v1840_v14  ;;  %v6562_v23 = vld [vmem:[#allocation3] ss:$8 sps:$4 sm:$0xff]  }
 0x20d   : > { %1424 = vst.msk [vmem:[#allocation3 + $0x20] sm:$0xf] %vm1419_vm3, %v1404_v28  ;;  %2195 = vmatmul.mubr.bf16.vlgmr.msra.gmra.mxu1 %v6562_v23 }
 0x20e   : > { %1909 = vst.msk [vmem:[#allocation3 + $0x10] sm:$0xf] %vm1906_vm15, %v7819_v34  ;;  %1910 = vst.msk [vmem:[#allocation3 + $0x18] sm:$0xf] %vm1906_vm15, %v1889_v5  ;;  %v1410_v44 = vpop.permute.xlu1 %1409  ;;  %v1531_v3 = vpop.permute.xlu0 %1530  ;;  %6195 = vmatprep.mubr.msk.bf16.mxu1 %vm2149_vm1, %v6565_v0 }
 0x20f   : > { %1427 = vst.msk [vmem:[#allocation3 + $0x38] sm:$0xf] %vm1419_vm3, %v1410_v44 }
 0x210   : > { %1551 = vst.msk [vmem:[#allocation3 + $0x20] sm:$0xf] %vm1546_vm9, %v1531_v3 }
 0x211   : > { %1600 = vst.msk [vmem:[#allocation3 + $0x20] sm:$0xf] %vm1595_vm12, %v1580_v27 }
 0x212   : > { %v1406_v37 = vpop.permute.xlu1 %1405  ;;  %v1719_v21 = vpop.permute.xlu0 %1718 }
 0x213   : > { %1425 = vst.msk [vmem:[#allocation3 + $0x28] sm:$0xf] %vm1419_vm3, %v1406_v37 }
 0x215   : > { %v2035_v45 = vld [vmem:[#allocation3 + $0x10] sm:$0xff]  ;;  %v2036_v15 = vld [vmem:[#allocation3 + $0x18] sm:$0xff] }
 0x216   : > { %v6179_v55 = vcombine.low %v2035_v45, %v2036_v15  ;;  %v1537_v1 = vpop.permute.xlu1 %1536  ;;  %v1715_v30 = vpop.permute.xlu0 %1714 }
 0x217   : > { %1554 = vst.msk [vmem:[#allocation3 + $0x38] sm:$0xf] %vm1546_vm9, %v1537_v1 }
 0x218   : > { %1735 = vst.msk [vmem:[#allocation3 + $0x20] sm:$0xf] %vm1730_vm13, %v1715_v30  ;;  %2203 = vmatmul.mubr.bf16.gmra.mxu1 %v6179_v55 }
 0x219   : > { %1603 = vst.msk [vmem:[#allocation3 + $0x38] sm:$0xf] %vm1595_vm12, %v7833_v26  ;;  %6196 = vmatprep.mubr.msk.bf16.mxu1 %vm2149_vm1, %v6567_v60 }
 0x21a   : > { %v1533_v41 = vpop.permute.xlu1 %1532  ;;  %v1842_v59 = vpop.permute.xlu0 %1841 }
 0x21b   : > { %1552 = vst.msk [vmem:[#allocation3 + $0x28] sm:$0xf] %vm1546_vm9, %v1533_v41 }
 0x21c   : > { %1862 = vst.msk [vmem:[#allocation3 + $0x20] sm:$0xf] %vm1857_vm14, %v1842_v59  ;;  %v2437_v59 = vld [vmem:[%s11894_s10 + $0x38] sm:$0xff] }
 0x21d   : > { %1601 = vst.msk [vmem:[#allocation3 + $0x28] sm:$0xf] %vm1595_vm12, %v1582_v40 }
 0x21e   : > { %1911 = vst.msk [vmem:[#allocation3 + $0x20] sm:$0xf] %vm1906_vm15, %v1891_v13  ;;  %v1844_v58 = vpop.permute.xlu1 %1843  ;;  %v1535_v9 = vpop.permute.xlu0 %1534 }
 0x222   : > { %v1717_v8 = vpop.permute.xlu1 %1716  ;;  %v1408_v33 = vpop.permute.xlu0 %1407 }
 0x223   : > { %1736 = vst.msk [vmem:[#allocation3 + $0x28] sm:$0xf] %vm1730_vm13, %v1717_v8  ;;  %v2434_v8 = vld [vmem:[%s11894_s10 + $0x20] sm:$0xff] }
 0x224   : > { %1426 = vst.msk [vmem:[#allocation3 + $0x30] sm:$0xf] %vm1419_vm3, %v1408_v33  ;;  %v2433_v33 = vld [vmem:[%s11894_s10 + $0x18] sm:$0xff] }
 0x225   : > { %1863 = vst.msk [vmem:[#allocation3 + $0x28] sm:$0xf] %vm1857_vm14, %v1844_v58  ;;  %v2436_v58 = vld [vmem:[%s11894_s10 + $0x30] sm:$0xff] }
 0x226   : > { %1553 = vst.msk [vmem:[#allocation3 + $0x30] sm:$0xf] %vm1546_vm9, %v1535_v9  ;;  %v1721_v16 = vpop.permute.xlu1 %1720  ;;  %v1846_v49 = vpop.permute.xlu0 %1845  ;;  %v2435_v9 = vld [vmem:[%s11894_s10 + $0x28] sm:$0xff] }
 0x227   : > { %1912 = vst.msk [vmem:[#allocation3 + $0x28] sm:$0xf] %vm1906_vm15, %v7821_v10 }
 0x228   : > { %1602 = vst.msk [vmem:[#allocation3 + $0x30] sm:$0xf] %vm1595_vm12, %v7827_v32 }
 0x229   : > { %1737 = vst.msk [vmem:[#allocation3 + $0x30] sm:$0xf] %vm1730_vm13, %v1719_v21  ;;  %1738 = vst.msk [vmem:[#allocation3 + $0x38] sm:$0xf] %vm1730_vm13, %v1721_v16  ;;  %v2432_v16 = vld [vmem:[%s11894_s10 + $0x10] sm:$0xff] }
 0x22a   : > { %1864 = vst.msk [vmem:[#allocation3 + $0x30] sm:$0xf] %vm1857_vm14, %v1846_v49  ;;  %v1848_v50 = vpop.permute.xlu1 %1847  ;;  %v1895_v56 = vpop.permute.xlu0 %1894  ;;  %v2431_v49 = vld [vmem:[%s11894_s10 + $0x8] sm:$0xff] }
 0x22b   : > { %1865 = vst.msk [vmem:[#allocation3 + $0x38] sm:$0xf] %vm1857_vm14, %v1848_v50  ;;  %v2430_v50 = vld [vmem:[%s11894_s10] sm:$0xff]  ;;  %s8447_s10 = sld [smem:[#allocation10 + $0x34]] }
 0x22c   : > { %1913 = vst.msk [vmem:[#allocation3 + $0x30] sm:$0xf] %vm1906_vm15, %v1895_v56 }
 0x22e   : > { %v6569_v38 = vld [vmem:[#allocation3 + $0x20] ss:$8 sps:$4 sm:$0xff]   ;;  %v1897_v22 = vpop.permute.xlu1 %1896 }
 0x22f   : > { %1914 = vst.msk [vmem:[#allocation3 + $0x38] sm:$0xf] %vm1906_vm15, %v1897_v22  ;;  %2211 = vmatmul.mubr.bf16.gmra.mxu1 %v6569_v38 }
 0x230   : > { %6197 = vmatprep.mubr.msk.bf16.mxu1 %vm2149_vm1, %v6570_v2  ;;  %v6205_v2 = vld [vmem:[%s11895_s8] ss:$0 sm:$0xff]  ;;  %s8426_s8 = sld [smem:[#allocation10 + $0x30]] }
 0x236   : > { %v6572_v25 = vld [vmem:[#allocation3 + $0x30] ss:$8 sps:$4 sm:$0xff]  }
 0x237   : > { %2219 = vmatmul.mubr.bf16.gmra.mxu1 %v6572_v25 }
 0x2cd   : > { %v2196_v34 = vpop.f32.mrf.mxu1 }
 0x2ce   : > { %v2234_v63 = vmul.f32 %v6198_v12, %v2196_v34 }
 0x2cf   : > { %v2198_v10 = vpop.f32.mrf.mxu1 }
 0x2d0   : > { %v2249_v47 = vadd.f32 %v6199_v39, %v2234_v63 }
 0x2d1   : > { %v2199_v61 = vpop.f32.mrf.mxu1 }
 0x2d2   : > { %v2235_v31 = vmul.f32 %v6198_v12, %v2199_v61  ;;  %v2257_v27 = vmax.f32 %v2249_v47, 0.0 }
 0x2d3   : > { %v2201_v6 = vpop.f32.mrf.mxu1 }
 0x2d4   : > { %v2250_v32 = vadd.f32 %v6199_v39, %v2235_v31 }
 0x2d6   : > { %v2258_v11 = vmax.f32 %v2250_v32, 0.0 }
 0x2d8   : > { %v2204_v5 = vpop.f32.mrf.mxu1  ;;  %v2265_v62 = vpack.c.bf16 %v2258_v11, %v2257_v27 }
 0x2d9   : > { %v2236_v7 = vmul.f32 %v6198_v12, %v2204_v5 }
 0x2da   : > { %v2206_v18 = vpop.f32.mrf.mxu1  ;;  %6421 = vmatprep.mubr.msk.bf16.mxu0 %vm2149_vm1, %v2265_v62 }
 0x2db   : > { %v2251_v29 = vadd.f32 %v6199_v39, %v2236_v7 }
 0x2dc   : > { %v2207_v26 = vpop.f32.mrf.mxu1 }
 0x2dd   : > { %v2237_v57 = vmul.f32 %v6198_v12, %v2207_v26  ;;  %v2259_v13 = vmax.f32 %v2251_v29, 0.0 }
 0x2de   : > { %v2209_v43 = vpop.f32.mrf.mxu1 }
 0x2df   : > { %v2252_v24 = vadd.f32 %v6199_v39, %v2237_v57 }
 0x2e1   : > { %v2260_v40 = vmax.f32 %v2252_v24, 0.0 }
 0x2e3   : > { %v2266_v48 = vpack.c.bf16 %v2260_v40, %v2259_v13 }
 0x2e5   : > { %6422 = vmatmul.mubr.msk.bf16.vlgmr.msra.gmra.mxu0 %vm2149_vm1, %v2266_v48 }
 0x2e6   : > { %6430 = vmatpush3.msra.mxu0 %v2437_v59 }
 0x2e7   : > { %6431 = vmatprep.subr.mxu0 %v11891_v36 }
 0x2e8   : > { %6432 = vmatpush3.msra.mxu0 %v2436_v58 }
 0x2e9   : > { %6433 = vmatprep.subr.mxu0 %v11891_v36 }
 0x2ea   : > { %6434 = vmatpush3.msra.mxu0 %v2435_v9 }
 0x2eb   : > { %6435 = vmatprep.subr.mxu0 %v11891_v36 }
 0x2ec   : > { %6436 = vmatpush3.msra.mxu0 %v2434_v8 }
 0x2ed   : > { %6437 = vmatprep.subr.mxu0 %v11891_v36 }
 0x2ee   : > { %6438 = vmatpush3.msra.mxu0 %v2433_v33 }
 0x2ef   : > { %v2212_v52 = vpop.f32.mrf.mxu1  ;;  %6439 = vmatprep.subr.mxu0 %v11891_v36 }
 0x2f0   : > { %v2238_v35 = vmul.f32 %v6198_v12, %v2212_v52  ;;  %6440 = vmatpush3.msra.mxu0 %v2432_v16 }
 0x2f1   : > { %v2214_v4 = vpop.f32.mrf.mxu1  ;;  %6441 = vmatprep.subr.mxu0 %v11891_v36 }
 0x2f2   : > { %v2253_v54 = vadd.f32 %v6199_v39, %v2238_v35  ;;  %6442 = vmatpush3.msra.mxu0 %v2431_v49 }
 0x2f3   : > { %v2215_v42 = vpop.f32.mrf.mxu1  ;;  %6443 = vmatprep.subr.mxu0 %v11891_v36 }
 0x2f4   : > { %v2239_v20 = vmul.f32 %v6198_v12, %v2215_v42  ;;  %v2261_v28 = vmax.f32 %v2253_v54, 0.0  ;;  %6444 = vmatpush3.msra.mxu0 %v2430_v50 }
 0x2f5   : > { %v2217_v53 = vpop.f32.mrf.mxu1  ;;  %6448 = vmatprep.subr.mxu0 %v11891_v36 }
 0x2f6   : > { %v2254_v14 = vadd.f32 %v6199_v39, %v2239_v20 }
 0x2f7   : > { %v2220_v51 = vpop.f32.mrf.mxu1 }
 0x2f8   : > { %v2262_v23 = vmax.f32 %v2254_v14, 0.0  ;;  %v2240_v3 = vmul.f32 %v6198_v12, %v2220_v51 }
 0x2f9   : > { %v2222_v37 = vpop.f32.mrf.mxu1 }
 0x2fa   : > { %v2267_v44 = vpack.c.bf16 %v2262_v23, %v2261_v28  ;;  %v2255_v45 = vadd.f32 %v6199_v39, %v2240_v3 }
 0x2fb   : > { %v2223_v21 = vpop.f32.mrf.mxu1 }
 0x2fc   : > { %6425 = vmatprep.mubr.msk.bf16.mxu0 %vm2149_vm1, %v2267_v44  ;;  %v2241_v15 = vmul.f32 %v6198_v12, %v2223_v21  ;;  %v2263_v1 = vmax.f32 %v2255_v45, 0.0  ;;  %v6206_v12 = vld [vmem:[%s11896_s9] ss:$0 sm:$0xff]  ;;  %s8443_s9 = sld [smem:[#allocation10 + $0x33]] }
 0x2fd   : > { %v2225_v0 = vpop.f32.mrf.mxu1 }
 0x2fe   : > { %v2256_v55 = vadd.f32 %v6199_v39, %v2241_v15 }
 0x300   : > { %v2264_v30 = vmax.f32 %v2256_v55, 0.0 }
 0x302   : > { %v2268_v41 = vpack.c.bf16 %v2264_v30, %v2263_v1 }
 0x304   : > { %6426 = vmatmul.mubr.msk.bf16.gmra.mxu0 %vm2149_vm1, %v2268_v41 }
 0x305   : > { %6445 = vmatprep.mubr.msk.f32.mxu0 %vm6746_vm2, %v11891_v36 }
 0x3a5   : > { %v6423_v56 = vpop.f32.mrf.mxu0 }
 0x3a6   : > { %v2363_v63 = vmul.f32 %v6423_v56, %v6205_v2 }
 0x3a7   : > { %v2323_v60 = vpop.f32.mrf.mxu0 }
 0x3a8   : > { %v2361_v46 = vmul.f32 %v6205_v2, %v2323_v60  ;;  %v7949_v61 = vadd.f32 %v6206_v12, %v2363_v63  ;;  %v2512_v63 = vld [vmem:[%s11897_s11] sm:$0xf]  ;;  %s8463_s11 = sld [smem:[#allocation10 + $0x37]] }
 0x3a9   : > { %v6424_v38 = vpop.f32.mrf.mxu0 }
 0x3aa   : > { %v7945_v39 = vadd.f32 %v6206_v12, %v2361_v46  ;;  %v2364_v31 = vmul.f32 %v6424_v38, %v6205_v2  ;;  %v2387_v11 = vsel %vm623_vm0, %v7949_v61, 0.0  ;;  %v2409_v14 = vsel %vm623_vm0, %v7949_v61, -inf }
 0x3ab   : > { %v2326_v22 = vpop.f32.mrf.mxu0 }
 0x3ac   : > { %v2362_v25 = vmul.f32 %v6205_v2, %v2326_v22  ;;  %v2384_v47 = vsel %vm623_vm0, %v7945_v39, 0.0  ;;  %v7955_v7 = vadd.f32 %v6206_v12, %v2364_v31  ;;  %v2407_v51 = vsel %vm623_vm0, %v7945_v39, -inf }
 0x3ae   : > { %v7943_v34 = vadd.f32 %v6206_v12, %v2362_v25  ;;  %v2389_v13 = vsel %vm623_vm0, %v7955_v7, 0.0  ;;  %v2410_v35 = vsel %vm623_vm0, %v7955_v7, -inf }
 0x3b0   : > { %v2385_v10 = vsel %vm623_vm0, %v7943_v34, 0.0  ;;  %v2408_v44 = vsel %vm623_vm0, %v7943_v34, -inf }
 0x3b1   : > { %v2386_v6 = vadd.f32 %v2385_v10, %v2384_v47 }
 0x3b3   : > { %v2388_v62 = vadd.f32 %v2387_v11, %v2386_v6 }
 0x3b5   : > { %v2390_v4 = vadd.f32 %v2389_v13, %v2388_v62  ;;  %v11419_v13 = vmov 0.5  }
 0x3c4   : > { %v6427_v32 = vpop.f32.mrf.mxu0 }
 0x3c5   : > { %v2367_v5 = vmul.f32 %v6427_v32, %v6205_v2 }
 0x3c6   : > { %v2339_v27 = vpop.f32.mrf.mxu0 }
 0x3c7   : > { %v2365_v18 = vmul.f32 %v6205_v2, %v2339_v27  ;;  %v7957_v29 = vadd.f32 %v6206_v12, %v2367_v5 }
 0x3c8   : > { %v6428_v26 = vpop.f32.mrf.mxu0 }
 0x3c9   : > { %v7959_v57 = vadd.f32 %v6206_v12, %v2365_v18  ;;  %v2368_v43 = vmul.f32 %v6428_v26, %v6205_v2  ;;  %v2415_v42 = vsel %vm623_vm0, %v7957_v29, -inf  ;;  %v2395_v55 = vsel %vm623_vm0, %v7957_v29, 0.0 }
 0x3ca   : > { %v2342_v24 = vpop.f32.mrf.mxu0  ;;  %v2416_v21 = vmax.f32 %v2409_v14, %v2415_v42 }
 0x3cb   : > { %v2391_v40 = vsel %vm623_vm0, %v7959_v57, 0.0  ;;  %v7965_v48 = vadd.f32 %v6206_v12, %v2368_v43  ;;  %v2366_v52 = vmul.f32 %v6205_v2, %v2342_v24  ;;  %v2411_v54 = vsel %vm623_vm0, %v7959_v57, -inf }
 0x3cc   : > { %v2392_v28 = vadd.f32 %v2391_v40, %v2390_v4  ;;  %v2412_v45 = vmax.f32 %v2407_v51, %v2411_v54  ;;  %v2607_v24 = vsub.s32 0, %v6981_v17 }
 0x3cd   : > { %v2417_v20 = vsel %vm623_vm0, %v7965_v48, -inf  ;;  %v7975_v53 = vadd.f32 %v6206_v12, %v2366_v52  ;;  %v2397_v59 = vsel %vm623_vm0, %v7965_v48, 0.0 }
 0x3ce   : > { %v2418_v23 = vmax.f32 %v2410_v35, %v2417_v20 }
 0x3cf   : > { %v2393_v3 = vsel %vm623_vm0, %v7975_v53, 0.0  ;;  %v2413_v37 = vsel %vm623_vm0, %v7975_v53, -inf }
 0x3d0   : > { %v2394_v15 = vadd.f32 %v2393_v3, %v2392_v28  ;;  %v2414_v0 = vmax.f32 %v2408_v44, %v2413_v37  ;;  %v2420_v1 = vmax.f32 %v2416_v21, %v2418_v23 }
 0x3d2   : > { %v2396_v30 = vadd.f32 %v2395_v55, %v2394_v15  ;;  %v2419_v41 = vmax.f32 %v2412_v45, %v2414_v0 }
 0x3d4   : > { %v2398_v58 = vadd.f32 %v2397_v59, %v2396_v30  ;;  %v2421_v9 = vmax.f32 %v2419_v41, %v2420_v1  ;;  %v2754_v1 = vadd.s32 4294967294, %v6985_v19  ;;  %v2994_v30 = vld [vmem:[#allocation4 + $0x5] sm:$0xff]  ;;  %v8092_v59 = vstv %s3010_s16  ;;  %s8154_s16 = sld [smem:[#allocation10 + $0xd]] }
 0x3d5   : > { %v3002_v41 = vld [vmem:[#allocation5 + $0x5] sm:$0xff]  ;;  %11906 = vst [vmem:[#allocation41_spill] sm:$0xff] %v8092_v59 }
 0x3d6   : > { %v2399_v8 = vrot.slane %v2398_v58, 4  ;;  %v2422_v33 = vrot.slane %v2421_v9, 4  ;;  %vm2762_vm3 = vcmp.ge.s32.totalorder %v2754_v1, 0 }
 0x3d8   : > { %v2400_v16 = vadd.f32 %v2399_v8, %v2398_v58  ;;  %v2423_v49 = vmax.f32 %v2421_v9, %v2422_v33  ;;  %v8094_v58 = vstv %s6259_s22  ;;  %v3054_v9 = vld [vmem:[#allocation4 + $0x6] sm:$0xff]  ;;  %s8167_s22 = sld [smem:[#allocation10 + $0xe]] }
 0x3d9   : > { %11907 = vst [vmem:[#allocation42_spill] sm:$0xff] %v8094_v58  ;;  %v11908_v8 = vld [vmem:[#allocation26_spill] sm:$0xff] }
 0x3da   : > { %v2401_v50 = vrot.slane %v2400_v16, 2  ;;  %v2424_v56 = vrot.slane %v2423_v49, 2  ;;  %v8097_v33 = vadd.s32 4294967293, %v11908_v8 }
 0x3dc   : > { %v2402_v60 = vadd.f32 %v2401_v50, %v2400_v16  ;;  %v2425_v38 = vmax.f32 %v2423_v49, %v2424_v56  ;;  %v3012_v16 = vmul.f32 %v8092_v59, %v2994_v30  ;;  %v3022_v49 = vmul.f32 %v8094_v58, %v3002_v41  ;;  %v3062_v56 = vld [vmem:[#allocation5 + $0x6] sm:$0xff] }
 0x3dd   : > { %v2802_v50 = vadd.s32 4294967295, %v6985_v19  ;;  %vm2715_vm9 = vcmp.ge.s32.totalorder %v8097_v33, 0  ;;  %v3286_v41 = vld [vmem:[#allocation4 + $0xa] sm:$0xff]  ;;  %v8211_v33 = vstv %s8130_s24  ;;  %s8247_s24 = sld [smem:[#allocation10 + $0x17]] }
 0x3de   : > { %v2403_v22 = vrot.slane %v2402_v60, 1  ;;  %v2426_v2 = vrot.slane %v2425_v38, 1  ;;  %11920 = vst [vmem:[#allocation53_spill] sm:$0xff] %v8211_v33 }
 0x3df   : > { %vm2810_vm12 = vcmp.ge.s32.totalorder %v2802_v50, 0 }
 0x3e0   : > { %v2404_v25 = vadd.f32 %v2403_v22, %v2402_v60  ;;  %v2427_v12 = vmax.f32 %v2425_v38, %v2426_v2  ;;  %v8104_v60 = vstv %s6260_s30  ;;  %v8109_v38 = vadd.s32 4294967294, %v11908_v8  ;;  %s8174_s30 = sld [smem:[#allocation10 + $0xf]] }
 0x3e1   : > { %11909 = vst [vmem:[#allocation26_spill] sm:$0xff] %v8104_v60  ;;  %v3030_v22 = vadd.f32 %v3022_v49, %v3012_v16  ;;  %v3072_v2 = vmul.f32 %v8104_v60, %v3054_v9  ;;  %v8196_v9 = vsel %vm2715_vm9, 1.0, %v11891_v36  ;;  %v8202_v49 = vld [vmem:[#allocation4 + $0xf] sm:$0xff] }
 0x3e2   : > { %v2406_v46 = vmul.f32 0.015625, %v2404_v25  ;;  %vm2763_vm13 = vcmp.ge.s32.totalorder %v8109_v38, 0 }
 0x3e4   : > { %v2429_v10 = vsel %vm2428_vm4, %v2406_v46, %v2427_v12  ;;  %v2850_v46 = vadd.s32 1, %v6985_v19  ;;  %v8118_v12 = vstv %s6261_s18  ;;  %s8184_s18 = sld [smem:[#allocation10 + $0x10]] }
 0x3e5   : > { %6446 = vmatmul.mubr.msk.f32.vlgmr.msra.gmra.mxu0 %vm623_vm0, %v2429_v10  ;;  %11911 = vst [vmem:[#allocation44_spill] sm:$0xff] %v8118_v12  ;;  %v8124_v10 = vsel %vm2762_vm3, 1.0, %v11891_v36 }
 0x3e6   : > { %6449 = vmatpush3.msk.msra.mxu0 %vm2517_vm5, %v2512_v63  ;;  %6450 = vmatprep.mubr.msk.f32.mxu0 %vm6746_vm2, %v11891_v36  ;;  %v3114_v63 = vld [vmem:[#allocation4 + $0x7] sm:$0xff]  ;;  %11912 = vst [vmem:[#allocation45_spill] sm:$0xff] %v8124_v10  ;;  %vm2866_vm14 = vcmp.lt.s32.totalorder %v2850_v46, 8 }
 0x3e7   : > { %v8200_v16 = vsel %vm2866_vm14, 1.0, %v11891_v36 }
 0x4a5   : > { %v2507_v47 = vpop.f32.mrf.mxu0 }
 0x4a6   : > { %v2511_v31 = vmax.f32 %v2507_v47, 0.0  ;;  %v8127_v47 = vadd.s32 4294967295, %v11908_v8 }
 0x4a7   : > { %v6447_v6 = vpop.f32.mrf.mxu0 }
 0x4a8   : > { %6451 = vmatmul.mubr.msk.f32.vlgmr.msra.gmra.mxu0 %vm2513_vm6, %v2511_v31  ;;  %v3082_v31 = vmul.f32 %v8118_v12, %v3062_v56  ;;  %v3122_v6 = vld [vmem:[#allocation5 + $0x7] sm:$0xff]  ;;  %vm2811_vm2 = vcmp.ge.s32.totalorder %v8127_v47, 0  ;;  %v8292_v47 = vstv %s8184_s18  ;;  %s8311_s18 = sld [smem:[#allocation10 + $0x1e]] }
 0x4a9   : > { %11928 = vst [vmem:[#allocation61_spill] sm:$0xff] %v8292_v47 }
 0x568   : > { %v2587_v32 = vpop.f32.mrf.mxu0 }
 0x569   : > { %v2592_v5 = vrot.slane %v2587_v32, 1 }
 0x56a   : > { %v6452_v27 = vpop.f32.mrf.mxu0 }
 0x56b   : > { %v2594_v11 = vadd.f32 %v2592_v5, %v2587_v32  ;;  %v2898_v32 = vadd.s32 2, %v6985_v19  ;;  %v8134_v5 = vstv %s8090_s20  ;;  %v8136_v27 = vstv %s6263_s12  ;;  %s8191_s20 = sld [smem:[#allocation10 + $0x11]] }
 0x56c   : > { %11913 = vst [vmem:[#allocation46_spill] sm:$0xff] %v8134_v5  ;;  %11914 = vst [vmem:[#allocation47_spill] sm:$0xff] %v8136_v27  ;;  %s8206_s12 = sld [smem:[#allocation10 + $0x12]] }
 0x56d   : > { %v6210_v18 = vmul.f32 -1.442695, %v2594_v11  ;;  %v3174_v11 = vld [vmem:[#allocation4 + $0x8] sm:$0xff]  ;;  %vm2914_vm15 = vcmp.lt.s32.totalorder %v2898_v32, 8 }
 0x56e   : > { %v8220_v46 = vsel %vm2914_vm15, 1.0, %v11891_v36 }
 0x56f   : > { %6574 = vpow2.f32 %v6210_v18  ;;  %11922 = vst [vmem:[#allocation55_spill] sm:$0xff] %v8220_v46 }
 0x57c   : > { %v6575_v62 = vpop.eup %6574 }
 0x57d   : > { %v2598_v26 = vadd.f32 1.0, %v6575_v62  ;;  %v3090_v62 = vadd.f32 %v3082_v31, %v3072_v2  ;;  %v8208_v2 = vld [vmem:[#allocation5 + $0xf] sm:$0xff]  ;;  %v8214_v31 = vstv %s8138_s13  ;;  %s8255_s13 = sld [smem:[#allocation10 + $0x18]] }
 0x57e   : > { %11921 = vst [vmem:[#allocation54_spill] sm:$0xff] %v8214_v31  ;;  %v3143_v32 = vmul.f32 %v8136_v27, %v8208_v2 }
 0x57f   : > { %6576 = vrcp.f32 %v2598_v26  ;;  %v3132_v26 = vmul.f32 %v8134_v5, %v3114_v63 }
 0x58c   : > { %v6577_v43 = vpop.eup %6576 }
 0x58d   : > { %vm2601_vm8 = vcmp.gt.f32.partialorder %v6577_v43, 0.05  ;;  %vm2602_vm10 = vcmp.lt.f32.partialorder %v6577_v43, 0.05  ;;  %v3182_v43 = vld [vmem:[#allocation5 + $0x8] sm:$0xff] }
 0x58e   : > { %v2603_v40 = vsel %vm2602_vm10, 0.0, %v11419_v13 }
 0x58f   : > { %v2604_v52 = vsel %vm2601_vm8, 1.0, %v2603_v40  ;;  %v3142_v40 = vmul.f32 %v8136_v27, %v3122_v6 }
 0x590   : > { %v2608_v35 = vrot.slane %v2604_v52, %v2607_v24  ;;  %v8145_v24 = vld [vmem:[#allocation4 + $0xd] sm:$0xff]  ;;  %v8149_v52 = vstv %s8101_s25  ;;  %s8216_s25 = sld [smem:[#allocation10 + $0x13]] }
 0x591   : > { %11915 = vst [vmem:[#allocation48_spill] sm:$0xff] %v8149_v52 }
 0x592   : > { %v8033_v4 = vmul.f32 %v2608_v35, %v7943_v34  ;;  %v8036_v42 = vmul.f32 %v2608_v35, %v7945_v39  ;;  %v8043_v17 = vmul.f32 %v2608_v35, %v7959_v57  ;;  %v8046_v14 = vmul.f32 %v2608_v35, %v7949_v61 }
 0x593   : > { %v8053_v28 = vmul.f32 %v2608_v35, %v7955_v7  ;;  %v8064_v44 = vmul.f32 %v2608_v35, %v7975_v53  ;;  %v8071_v37 = vmul.f32 %v2608_v35, %v7957_v29  ;;  %v8078_v45 = vmul.f32 %v2608_v35, %v7965_v48 }
 0x594   : > { %11898 = vst [vmem:[#allocation33_spill] sm:$0xff] %v8033_v4  ;;  %11899 = vst [vmem:[#allocation34_spill] sm:$0xff] %v8036_v42  ;;  %v2637_v54 = vsel %vm623_vm0, %v8033_v4, 0.0  ;;  %v2634_v20 = vsel %vm623_vm0, %v8036_v42, 0.0  ;;  %v2646_v34 = vsel %vm623_vm0, %v8043_v17, 0.0  ;;  %v2640_v39 = vsel %vm623_vm0, %v8046_v14, 0.0 }
 0x595   : > { %11900 = vst [vmem:[#allocation35_spill] sm:$0xff] %v8043_v17  ;;  %11901 = vst [vmem:[#allocation36_spill] sm:$0xff] %v8046_v14  ;;  %2638 = vadd.xlane.f32.xlu1 %v2637_v54  ;;  %2635 = vadd.xlane.f32.xlu0 %v2634_v20  ;;  %v2677_v57 = vsel %vm623_vm0, %v8033_v4, -inf  ;;  %v2643_v61 = vsel %vm623_vm0, %v8053_v28, 0.0  ;;  %v2683_v23 = vsel %vm623_vm0, %v8053_v28, -inf  ;;  %v2674_v51 = vsel %vm623_vm0, %v8036_v42, -inf }
 0x596   : > { %11902 = vst [vmem:[#allocation37_spill] sm:$0xff] %v8053_v28  ;;  %11903 = vst [vmem:[#allocation38_spill] sm:$0xff] %v8064_v44  ;;  %v2649_v7 = vsel %vm623_vm0, %v8064_v44, 0.0  ;;  %v2680_v3 = vsel %vm623_vm0, %v8046_v14, -inf  ;;  %v2652_v21 = vsel %vm623_vm0, %v8071_v37, 0.0  ;;  %v2686_v53 = vsel %vm623_vm0, %v8043_v17, -inf }
 0x597   : > { %11904 = vst [vmem:[#allocation39_spill] sm:$0xff] %v8071_v37  ;;  %11905 = vst [vmem:[#allocation40_spill] sm:$0xff] %v8078_v45  ;;  %v2655_v15 = vsel %vm623_vm0, %v8078_v45, 0.0  ;;  %v2689_v29 = vsel %vm623_vm0, %v8064_v44, -inf  ;;  %v2692_v0 = vsel %vm623_vm0, %v8071_v37, -inf  ;;  %v2695_v55 = vsel %vm623_vm0, %v8078_v45, -inf }
 0x598   : > { %v2706_v48 = vadd.s32 4294967293, %v6985_v19  ;;  %v8152_v35 = vstv %s8106_s23  ;;  %v8158_v54 = vsel %vm2810_vm12, 1.0, %v11891_v36  ;;  %v2946_v20 = vadd.s32 3, %v6985_v19  ;;  %s8223_s23 = sld [smem:[#allocation10 + $0x14]] }
 0x599   : > { %2647 = vadd.xlane.f32.xlu1 %v2646_v34  ;;  %2641 = vadd.xlane.f32.xlu0 %v2640_v39  ;;  %11916 = vst [vmem:[#allocation49_spill] sm:$0xff] %v8152_v35  ;;  %11917 = vst [vmem:[#allocation50_spill] sm:$0xff] %v8158_v54  ;;  %v8161_v34 = vld [vmem:[#allocation4 + $0xe] sm:$0xff]  ;;  %v3202_v19 = vmul.f32 %v8152_v35, %v3182_v43  ;;  %v3133_v43 = vmul.f32 %v8134_v5, %v8202_v49 }
 0x59a   : > { %vm2714_vm11 = vcmp.ge.s32.totalorder %v2706_v48, 0  ;;  %v8163_v39 = vld [vmem:[#allocation5 + $0xe] sm:$0xff]  ;;  %vm2962_vm1 = vcmp.lt.s32.totalorder %v2946_v20, 8 }
 0x59b   : > { %v8115_v25 = vsel %vm2714_vm11, 1.0, %v11891_v36  ;;  %v3083_v48 = vmul.f32 %v8118_v12, %v8163_v39 }
 0x59c   : > { %11910 = vst [vmem:[#allocation43_spill] sm:$0xff] %v8115_v25  ;;  %v3038_v18 = vmul.f32 %v8115_v25, %v3030_v22  ;;  %v3294_v22 = vld [vmem:[#allocation5 + $0xa] sm:$0xff] }
 0x59d   : > { %2678 = vmax.xlane.f32.xlu1 %v2677_v57  ;;  %2644 = vadd.xlane.f32.xlu0 %v2643_v61  ;;  %v3098_v57 = vmul.f32 %v8124_v10, %v3090_v62  ;;  %v3192_v61 = vmul.f32 %v8149_v52, %v3174_v11  ;;  %v3346_v62 = vld [vmem:[#allocation4 + $0xb] sm:$0xff] }
 0x59f   : > { %v3210_v30 = vadd.f32 %v3202_v19, %v3192_v61  ;;  %v3354_v61 = vld [vmem:[#allocation5 + $0xb] sm:$0xff]  ;;  %v8237_v19 = vstv %s8154_s16  ;;  %s8272_s16 = sld [smem:[#allocation10 + $0x1a]] }
 0x5a0   : > { %11924 = vst [vmem:[#allocation57_spill] sm:$0xff] %v8237_v19 }
 0x5a1   : > { %2684 = vmax.xlane.f32.xlu1 %v2683_v23  ;;  %2675 = vmax.xlane.f32.xlu0 %v2674_v51  ;;  %v8169_v23 = vld [vmem:[#allocation5 + $0xd] sm:$0xff]  ;;  %v3013_v51 = vmul.f32 %v8092_v59, %v8145_v24 }
 0x5a5   : > { %2650 = vadd.xlane.f32.xlu1 %v2649_v7  ;;  %2681 = vmax.xlane.f32.xlu0 %v2680_v3  ;;  %v3150_v7 = vadd.f32 %v3142_v40, %v3132_v26  ;;  %v3226_v3 = vld [vmem:[#allocation4 + $0x9] sm:$0xff] }
 0x5a7   : > { %v3158_v1 = vmul.f32 %v8158_v54, %v3150_v7  ;;  %v8234_v7 = vstv %s8143_s17  ;;  %s8265_s17 = sld [smem:[#allocation10 + $0x19]] }
 0x5a8   : > { %11923 = vst [vmem:[#allocation56_spill] sm:$0xff] %v8234_v7 }
 0x5a9   : > { %2653 = vadd.xlane.f32.xlu1 %v2652_v21  ;;  %2687 = vmax.xlane.f32.xlu0 %v2686_v53  ;;  %v3234_v21 = vld [vmem:[#allocation5 + $0x9] sm:$0xff]  ;;  %v3023_v53 = vmul.f32 %v8094_v58, %v8169_v23 }
 0x5ab   : > { %v3031_v6 = vadd.f32 %v3023_v53, %v3013_v51  ;;  %v3364_v53 = vmul.f32 %v8234_v7, %v3346_v62 }
 0x5ad   : > { %2656 = vadd.xlane.f32.xlu1 %v2655_v15  ;;  %2690 = vmax.xlane.f32.xlu0 %v2689_v29  ;;  %v3106_v15 = vadd.f32 %v3098_v57, %v3038_v18  ;;  %v8179_v29 = vstv %s8112_s14  ;;  %v3304_v18 = vmul.f32 %v8211_v33, %v3286_v41  ;;  %v3314_v57 = vmul.f32 %v8214_v31, %v3294_v22  ;;  %s8228_s14 = sld [smem:[#allocation10 + $0x15]] }
 0x5ae   : > { %11918 = vst [vmem:[#allocation51_spill] sm:$0xff] %v8179_v29  ;;  %v3244_v50 = vmul.f32 %v8179_v29, %v3226_v3  ;;  %v8244_v3 = vsel %vm2763_vm13, 1.0, %v11891_v36  ;;  %v3039_v38 = vmul.f32 %v8196_v9, %v3031_v6  ;;  %v8263_v41 = vstv %s8174_s30  ;;  %s8297_s30 = sld [smem:[#allocation10 + $0x1c]] }
 0x5af   : > { %v3166_v63 = vadd.f32 %v3158_v1, %v3106_v15  ;;  %v8252_v15 = vsel %vm2962_vm1, 1.0, %v11891_v36  ;;  %11927 = vst [vmem:[#allocation60_spill] sm:$0xff] %v8263_v41  ;;  %v8277_v6 = vsel %vm2811_vm2, 1.0, %v11891_v36  ;;  %v3434_v62 = vmul.f32 %v8263_v41, %v8169_v23 }
 0x5b0   : > { %11925 = vst [vmem:[#allocation58_spill] sm:$0xff] %v8252_v15 }
 0x5b1   : > { %2693 = vmax.xlane.f32.xlu0 %v2692_v0  ;;  %v8182_v0 = vstv %s8120_s19  ;;  %v3218_v40 = vadd.f32 %v3210_v30, %v3166_v63  ;;  %s8239_s19 = sld [smem:[#allocation10 + $0x16]]  ;;  %v8260_v30 = vstv %s8167_s22 }
 0x5b2   : > { %11919 = vst [vmem:[#allocation52_spill] sm:$0xff] %v8182_v0  ;;  %v3254_v56 = vmul.f32 %v8182_v0, %v3234_v21  ;;  %v3322_v21 = vadd.f32 %v3314_v57, %v3304_v18  ;;  %11926 = vst [vmem:[#allocation59_spill] sm:$0xff] %v8260_v30  ;;  %v3424_v63 = vmul.f32 %v8260_v30, %v8145_v24  ;;  %v8280_v18 = vld [vmem:[#allocation5 + $0x10] sm:$0xff]  ;;  %s8284_s22 = sld [smem:[#allocation10 + $0x1b]]  ;;  %v8295_v57 = vstv %s8191_s20 }
 0x5b3   : > { %11929 = vst [vmem:[#allocation62_spill] sm:$0xff] %v8295_v57  ;;  %s8323_s20 = sld [smem:[#allocation10 + $0x1f]] }
 0x5b4   : > { %v3262_v11 = vadd.f32 %v3254_v56, %v3244_v50  ;;  %v3330_v1 = vmul.f32 %v8220_v46, %v3322_v21  ;;  %v3151_v50 = vadd.f32 %v3143_v32, %v3133_v43  ;;  %v8268_v56 = vld [vmem:[#allocation4 + $0x10] sm:$0xff]  ;;  %v3442_v32 = vadd.f32 %v3434_v62, %v3424_v63 }
 0x5b5   : > { %2696 = vmax.xlane.f32.xlu0 %v2695_v55  ;;  %v3073_v55 = vmul.f32 %v8104_v60, %v8161_v34  ;;  %v8288_v43 = vld [vmem:[#allocation5 + $0x11] sm:$0xff]  ;;  %v3193_v23 = vmul.f32 %v8149_v52, %v8268_v56  ;;  %v8321_v63 = vstv %s8216_s25  ;;  %s8338_s25 = sld [smem:[#allocation10 + $0x22]] }
 0x5b6   : > { %v3270_v51 = vmul.f32 %v8200_v16, %v3262_v11  ;;  %v2851_v11 = vadd.s32 1, %v11908_v8  ;;  %11931 = vst [vmem:[#allocation64_spill] sm:$0xff] %v8321_v63  ;;  %v3554_v37 = vmul.f32 %v8321_v63, %v8208_v2 }
 0x5b7   : > { %v3091_v26 = vadd.f32 %v3083_v48, %v3073_v55  ;;  %v3374_v48 = vmul.f32 %v8237_v19, %v3354_v61  ;;  %v2899_v61 = vadd.s32 2, %v11908_v8  ;;  %v8366_v44 = vstv %s8239_s19  ;;  %s8389_s19 = sld [smem:[#allocation10 + $0x29]] }
 0x5b8   : > { %v3278_v55 = vadd.f32 %v3270_v51, %v3218_v40  ;;  %v3484_v51 = vmul.f32 %v8292_v47, %v8161_v34  ;;  %v8318_v34 = vstv %s8206_s12  ;;  %vm2867_vm4 = vcmp.lt.s32.totalorder %v2851_v11, 8  ;;  %s8336_s12 = sld [smem:[#allocation10 + $0x21]]  ;;  %v3347_v11 = vld [vmem:[#allocation4 + $0x13] sm:$0xff]  ;;  %11934 = vst [vmem:[#allocation67_spill] sm:$0xff] %v8366_v44 }
 0x5b9   : > { %v3099_v20 = vmul.f32 %v8244_v3, %v3091_v26  ;;  %v3382_v22 = vadd.f32 %v3374_v48, %v3364_v53  ;;  %v8286_v26 = vld [vmem:[#allocation4 + $0x11] sm:$0xff]  ;;  %v3159_v53 = vmul.f32 %v8277_v6, %v3151_v50  ;;  %v3494_v48 = vmul.f32 %v8295_v57, %v8163_v39  ;;  %11930 = vst [vmem:[#allocation63_spill] sm:$0xff] %v8318_v34 }
 0x5ba   : > { %v3338_v24 = vadd.f32 %v3330_v1, %v3278_v55  ;;  %v3203_v55 = vmul.f32 %v8152_v35, %v8280_v18  ;;  %v3245_v1 = vmul.f32 %v8179_v29, %v8286_v26  ;;  %v3450_v39 = vmul.f32 %v8115_v25, %v3442_v32  ;;  %v3124_v29 = vld [vmem:[#allocation5 + $0x17] sm:$0xff] }
 0x5bb   : > { %v3390_v40 = vmul.f32 %v8252_v15, %v3382_v22  ;;  %v3107_v21 = vadd.f32 %v3099_v20, %v3039_v38  ;;  %v3255_v22 = vmul.f32 %v8182_v0, %v8288_v43  ;;  %v8325_v38 = vld [vmem:[#allocation4 + $0x12] sm:$0xff]  ;;  %v3502_v62 = vadd.f32 %v3494_v48, %v3484_v51 }
 0x5bc   : > { %v8327_v20 = vld [vmem:[#allocation5 + $0x12] sm:$0xff]  ;;  %v3544_v13 = vmul.f32 %v8318_v34, %v8202_v49  ;;  %v3211_v17 = vadd.f32 %v3203_v55, %v3193_v23  ;;  %vm2915_vm5 = vcmp.lt.s32.totalorder %v2899_v61, 8  ;;  %v8347_v2 = vsel %vm2867_vm4, 1.0, %v11891_v36 }
 0x5bd   : > { %v3398_v50 = vadd.f32 %v3390_v40, %v3338_v24  ;;  %v3167_v45 = vadd.f32 %v3159_v53, %v3107_v21  ;;  %v3263_v24 = vadd.f32 %v3255_v22, %v3245_v1  ;;  %v3305_v40 = vmul.f32 %v8211_v33, %v8325_v38  ;;  %v3355_v23 = vld [vmem:[#allocation5 + $0x13] sm:$0xff] }
 0x5be   : > { %v3315_v49 = vmul.f32 %v8214_v31, %v8327_v20  ;;  %v3510_v51 = vmul.f32 %v8124_v10, %v3502_v62  ;;  %v3562_v21 = vadd.f32 %v3554_v37, %v3544_v13  ;;  %v2947_v53 = vadd.s32 3, %v11908_v8  ;;  %v3116_v0 = vld [vmem:[#allocation4 + $0x17] sm:$0xff] }
 0x5bf   : > { %v3458_v32 = vadd.f32 %v3450_v39, %v3398_v50  ;;  %v8354_v55 = vstv %s8223_s23  ;;  %v8357_v48 = vstv %s8228_s14  ;;  %v8363_v1 = vsel %vm2915_vm5, 1.0, %v11891_v36  ;;  %s8376_s23 = sld [smem:[#allocation10 + $0x27]] }
 0x5c0   : > { %11932 = vst [vmem:[#allocation65_spill] sm:$0xff] %v8354_v55  ;;  %11933 = vst [vmem:[#allocation66_spill] sm:$0xff] %v8357_v48  ;;  %v3219_v22 = vadd.f32 %v3211_v17, %v3167_v45  ;;  %v8369_v50 = vstv %s8247_s24  ;;  %v3271_v13 = vmul.f32 %v8347_v2, %v3263_v24  ;;  %v3323_v37 = vadd.f32 %v3315_v49, %v3305_v40  ;;  %s8383_s14 = sld [smem:[#allocation10 + $0x28]]  ;;  %v3407_v24 = vld [vmem:[#allocation4 + $0x15] sm:$0xff] }
 0x5c1   : > { %11935 = vst [vmem:[#allocation68_spill] sm:$0xff] %v8369_v50  ;;  %v3365_v8 = vmul.f32 %v8234_v7, %v3347_v11  ;;  %v3375_v39 = vmul.f32 %v8237_v19, %v3355_v23  ;;  %v3518_v61 = vadd.f32 %v3510_v51, %v3458_v32  ;;  %v3570_v17 = vmul.f32 %v8158_v54, %v3562_v21  ;;  %v3415_v40 = vld [vmem:[#allocation5 + $0x15] sm:$0xff]  ;;  %s8397_s24 = sld [smem:[#allocation10 + $0x2a]] }
 0x5c2   : > { %v3604_v45 = vmul.f32 %v8354_v55, %v8268_v56  ;;  %v3614_v62 = vmul.f32 %v8357_v48, %v8280_v18  ;;  %v3656_v49 = vmul.f32 %v8366_v44, %v8286_v26  ;;  %v3666_v14 = vmul.f32 %v8369_v50, %v8288_v43 }
 0x5c3   : > { %vm2963_vm6 = vcmp.lt.s32.totalorder %v2947_v53, 8  ;;  %v8392_v32 = vstv %s8255_s13  ;;  %v8395_v51 = vstv %s8265_s17  ;;  %v3279_v56 = vadd.f32 %v3271_v13, %v3219_v22  ;;  %s8404_s13 = sld [smem:[#allocation10 + $0x2c]] }
 0x5c4   : > { %11936 = vst [vmem:[#allocation69_spill] sm:$0xff] %v8392_v32  ;;  %11937 = vst [vmem:[#allocation70_spill] sm:$0xff] %v8395_v51  ;;  %v3331_v18 = vmul.f32 %v8363_v1, %v3323_v37  ;;  %v3383_v21 = vadd.f32 %v3375_v39, %v3365_v8  ;;  %v3425_v26 = vmul.f32 %v8260_v30, %v3407_v24  ;;  %v8407_v42 = vsel %vm2963_vm6, 1.0, %v11891_v36  ;;  %s8413_s17 = sld [smem:[#allocation10 + $0x2d]]  ;;  %v3467_v39 = vld [vmem:[#allocation4 + $0x16] sm:$0xff] }
 0x5c5   : > { %v3435_v43 = vmul.f32 %v8263_v41, %v3415_v40  ;;  %v3578_v28 = vadd.f32 %v3570_v17, %v3518_v61  ;;  %v3622_v53 = vadd.f32 %v3614_v62, %v3604_v45  ;;  %v3674_v4 = vadd.f32 %v3666_v14, %v3656_v49  ;;  %v3475_v61 = vld [vmem:[#allocation5 + $0x16] sm:$0xff] }
 0x5c6   : > { %v3716_v22 = vmul.f32 %v8392_v32, %v8325_v38  ;;  %v3726_v13 = vmul.f32 %v8395_v51, %v8327_v20  ;;  %v8416_v37 = vstv %s8272_s16  ;;  %v8419_v8 = vstv %s8284_s22  ;;  %s8431_s16 = sld [smem:[#allocation10 + $0x31]] }
 0x5c7   : > { %11938 = vst [vmem:[#allocation71_spill] sm:$0xff] %v8416_v37  ;;  %11939 = vst [vmem:[#allocation72_spill] sm:$0xff] %v8419_v8  ;;  %v3339_v14 = vadd.f32 %v3331_v18, %v3279_v56  ;;  %v3391_v38 = vmul.f32 %v8407_v42, %v3383_v21  ;;  %v3443_v17 = vadd.f32 %v3435_v43, %v3425_v26  ;;  %v8436_v18 = vstv %s8304_s15  ;;  %s8438_s22 = sld [smem:[#allocation10 + $0x32]]  ;;  %v3535_v21 = vld [vmem:[#allocation5 + $0x17] sm:$0xff] }
 0x5c8   : > { %v3630_v45 = vadd.f32 %v3622_v53, %v3578_v28  ;;  %v3682_v20 = vmul.f32 %v8200_v16, %v3674_v4  ;;  %v3734_v62 = vadd.f32 %v3726_v13, %v3716_v22  ;;  %v3776_v49 = vmul.f32 %v8416_v37, %v3347_v11  ;;  %11940 = vst [vmem:[#allocation73_spill] sm:$0xff] %v8436_v18  ;;  %v3527_v28 = vld [vmem:[#allocation4 + $0x17] sm:$0xff]  ;;  %s8451_s15 = sld [smem:[#allocation10 + $0x35]] }
 0x5c9   : > { %v3786_v41 = vmul.f32 %v8419_v8, %v3355_v23  ;;  %v3485_v30 = vmul.f32 %v8292_v47, %v3467_v39  ;;  %v3495_v56 = vmul.f32 %v8295_v57, %v3475_v61  ;;  %v8441_v26 = vstv %s8297_s30  ;;  %s8458_s30 = sld [smem:[#allocation10 + $0x36]] }
 0x5ca   : > { %11941 = vst [vmem:[#allocation74_spill] sm:$0xff] %v8441_v26  ;;  %v3399_v4 = vadd.f32 %v3391_v38, %v3339_v14  ;;  %v3451_v11 = vmul.f32 %v8196_v9, %v3443_v17  ;;  %v3836_v23 = vmul.f32 %v8441_v26, %v3407_v24  ;;  %v3690_v43 = vadd.f32 %v3682_v20, %v3630_v45 }
 0x5cb   : > { %v3742_v53 = vmul.f32 %v8220_v46, %v3734_v62  ;;  %v3794_v22 = vadd.f32 %v3786_v41, %v3776_v49  ;;  %v3846_v13 = vmul.f32 %v8436_v18, %v3415_v40  ;;  %v3503_v57 = vadd.f32 %v3495_v56, %v3485_v30  ;;  %v3176_v46 = vld [vmem:[#allocation4 + $0x18] sm:$0xff] }
 0x5cc   : > { %v3545_v47 = vmul.f32 %v8318_v34, %v3527_v28  ;;  %v3555_v14 = vmul.f32 %v8321_v63, %v3535_v21  ;;  %v8456_v38 = vstv %s8323_s20  ;;  %v8461_v24 = vstv %s8311_s18  ;;  %s8476_s18 = sld [smem:[#allocation10 + $0x3a]]  ;;  %v3587_v63 = vld [vmem:[#allocation4 + $0x18] sm:$0xff] }
 0x5cd   : > { %11942 = vst [vmem:[#allocation75_spill] sm:$0xff] %v8456_v38  ;;  %11943 = vst [vmem:[#allocation76_spill] sm:$0xff] %v8461_v24  ;;  %v3896_v41 = vmul.f32 %v8461_v24, %v3467_v39  ;;  %v3750_v40 = vadd.f32 %v3742_v53, %v3690_v43  ;;  %v3802_v30 = vmul.f32 %v8252_v15, %v3794_v22  ;;  %v8474_v56 = vstv %s8336_s12  ;;  %v3595_v39 = vld [vmem:[#allocation5 + $0x18] sm:$0xff]  ;;  %s8481_s20 = sld [smem:[#allocation10 + $0x3b]] }
 0x5ce   : > { %v3854_v17 = vadd.f32 %v3846_v13, %v3836_v23  ;;  %v3906_v45 = vmul.f32 %v8456_v38, %v3475_v61  ;;  %v3459_v20 = vadd.f32 %v3451_v11, %v3399_v4  ;;  %v3511_v62 = vmul.f32 %v8244_v3, %v3503_v57  ;;  %11944 = vst [vmem:[#allocation77_spill] sm:$0xff] %v8474_v56  ;;  %s8488_s12 = sld [smem:[#allocation10 + $0x3d]] }
 0x5cf   : > { %v3563_v49 = vadd.f32 %v3555_v14, %v3545_v47  ;;  %v8479_v34 = vstv %s8332_s0  ;;  %v3810_v61 = vadd.f32 %v3802_v30, %v3750_v40  ;;  %v3966_v47 = vmul.f32 %v8474_v56, %v3535_v21  ;;  %s8493_s0 = sld [smem:[#allocation10 + $0x3e]] }
 0x5d0   : > { %11945 = vst [vmem:[#allocation78_spill] sm:$0xff] %v8479_v34  ;;  %v3956_v23 = vmul.f32 %v8479_v34, %v3527_v28  ;;  %v3862_v4 = vmul.f32 %v8115_v25, %v3854_v17  ;;  %v3914_v11 = vadd.f32 %v3906_v45, %v3896_v41  ;;  %v3519_v57 = vadd.f32 %v3511_v62, %v3459_v20 }
 0x5d1   : > { %v3571_v43 = vmul.f32 %v8277_v6, %v3563_v49  ;;  %v3605_v53 = vmul.f32 %v8354_v55, %v3587_v63  ;;  %v3615_v22 = vmul.f32 %v8357_v48, %v3595_v39  ;;  %v8503_v40 = vstv %s8338_s25  ;;  %s8517_s25 = sld [smem:[#allocation10 + $0x45]] }
 0x5d2   : > { %v3870_v28 = vadd.f32 %v3862_v4, %v3810_v61  ;;  %v3922_v13 = vmul.f32 %v8124_v10, %v3914_v11  ;;  %v3974_v21 = vadd.f32 %v3966_v47, %v3956_v23  ;;  %11950 = vst [vmem:[#allocation83_spill] sm:$0xff] %v8503_v40  ;;  %v8506_v30 = vstv %s8344_s1  ;;  %s8524_s1 = sld [smem:[#allocation10 + $0x46]]  ;;  %v3004_v47 = vld [vmem:[#allocation5 + $0x15] sm:$0xff] }
 0x5d3   : > { %v3579_v14 = vadd.f32 %v3571_v43, %v3519_v57  ;;  %v3623_v41 = vadd.f32 %v3615_v22, %v3605_v53  ;;  %11951 = vst [vmem:[#allocation84_spill] sm:$0xff] %v8506_v30  ;;  %v4016_v17 = vmul.f32 %v8503_v40, %v3587_v63  ;;  %v4026_v45 = vmul.f32 %v8506_v30, %v3595_v39  ;;  %v2996_v63 = vld [vmem:[#allocation4 + $0x15] sm:$0xff] }
 0x5d4   : > { %v3930_v20 = vadd.f32 %v3922_v13, %v3870_v28  ;;  %v3982_v62 = vmul.f32 %v8158_v54, %v3974_v21  ;;  %v8522_v23 = vstv %s8350_s2  ;;  %v8527_v61 = vstv %s8359_s3  ;;  %v3056_v57 = vld [vmem:[#allocation4 + $0x16] sm:$0xff]  ;;  %s8543_s2 = sld [smem:[#allocation10 + $0x48]]  ;;  %v11959_v28 = vld [vmem:[#allocation27_spill] sm:$0xff] }
 0x5d5   : > { %11947 = sst [smem:[#allocation80_spill]] %s8493_s0  ;;  %v8519_v49 = vadd.f32 %v3623_v41, %v3579_v14  ;;  %11953 = vst [vmem:[#allocation86_spill] sm:$0xff] %v8522_v23  ;;  %v4034_v39 = vadd.f32 %v4026_v45, %v4016_v17  ;;  %11954 = vst [vmem:[#allocation87_spill] sm:$0xff] %v8527_v61  ;;  %v8530_v4 = vstv %s8371_s4  ;;  %v8533_v11 = vstv %s8376_s23  ;;  %v3064_v43 = vld [vmem:[#allocation5 + $0x16] sm:$0xff] }
 0x5d6   : > { %s8508_s0 = sld [smem:[#allocation10 + $0x42]]  ;;  %11955 = vst [vmem:[#allocation88_spill] sm:$0xff] %v8530_v4  ;;  %11956 = vst [vmem:[#allocation89_spill] sm:$0xff] %v8533_v11  ;;  %v8538_v53 = vstv %s8383_s14  ;;  %v8541_v22 = vstv %s8389_s19  ;;  %v2708_v13 = vadd.s32 4294967293, %v11959_v28  ;;  %v2756_v21 = vadd.s32 4294967294, %v11959_v28 }
 0x5d7   : > { %11957 = vst [vmem:[#allocation90_spill] sm:$0xff] %v8538_v53  ;;  %11958 = vst [vmem:[#allocation91_spill] sm:$0xff] %v8541_v22  ;;  %v3990_v14 = vadd.f32 %v3982_v62, %v3930_v20  ;;  %v8548_v41 = vstv %s8397_s24  ;;  %v8551_v17 = vstv %s8400_s5  ;;  %v8554_v45 = vstv %s8404_s13  ;;  %s8556_s3 = sld [smem:[#allocation10 + $0x49]] }
 0x5d8   : > { %11960 = vst [vmem:[#allocation27_spill] sm:$0xff] %v8548_v41  ;;  %11961 = vst [vmem:[#allocation92_spill] sm:$0xff] %v8551_v17  ;;  %s8558_s4 = sld [smem:[#allocation10 + $0x4a]]  ;;  %v3014_v48 = vmul.f32 %v8092_v59, %v2996_v63  ;;  %v3024_v55 = vmul.f32 %v8094_v58, %v3004_v47  ;;  %v3074_v19 = vmul.f32 %v8104_v60, %v3056_v57  ;;  %v8565_v20 = vstv %s8413_s17 }
 0x5d9   : > { %11962 = vst [vmem:[#allocation93_spill] sm:$0xff] %v8554_v45  ;;  %v3084_v7 = vmul.f32 %v8118_v12, %v3064_v43  ;;  %11963 = vst [vmem:[#allocation94_spill] sm:$0xff] %v8565_v20  ;;  %v8568_v62 = vstv %s8421_s6  ;;  %v8571_v31 = vstv %s8423_s7  ;;  %v8574_v33 = vstv %s8426_s8  ;;  %s8576_s5 = sld [smem:[#allocation10 + $0x4b]]  ;;  %v11969_v43 = vld [vmem:[#allocation28_spill] sm:$0xff] }
 0x5da   : > { %11964 = vst [vmem:[#allocation95_spill] sm:$0xff] %v8568_v62  ;;  %11965 = vst [vmem:[#allocation96_spill] sm:$0xff] %v8571_v31  ;;  %v8579_v63 = vstv %s8431_s16  ;;  %s8581_s23 = sld [smem:[#allocation10 + $0x4c]]  ;;  %vm2716_vm8 = vcmp.ge.s32.totalorder %v2708_v13, 0  ;;  %vm2764_vm10 = vcmp.ge.s32.totalorder %v2756_v21, 0  ;;  %v2804_v47 = vadd.s32 4294967295, %v11959_v28 }
 0x5db   : > { %11966 = vst [vmem:[#allocation97_spill] sm:$0xff] %v8574_v33  ;;  %11967 = vst [vmem:[#allocation98_spill] sm:$0xff] %v8579_v63  ;;  %v8584_v57 = vadd.f32 %v4034_v39, %v3990_v14  ;;  %s8586_s6 = sld [smem:[#allocation10 + $0x4d]]  ;;  %v2709_v12 = vadd.s32 4294967293, %v11969_v43  ;;  %v2757_v60 = vadd.s32 4294967294, %v11969_v43  ;;  %v2805_v58 = vadd.s32 4294967295, %v11969_v43 }
 0x5dc   : > { %s8591_s7 = sld [smem:[#allocation10 + $0x4e]]  ;;  %v3032_v59 = vadd.f32 %v3024_v55, %v3014_v48  ;;  %v3092_v54 = vadd.f32 %v3084_v7, %v3074_v19  ;;  %v3134_v10 = vmul.f32 %v8134_v5, %v3116_v0  ;;  %v3144_v31 = vmul.f32 %v8136_v27, %v3124_v29 }
 0x5dd   : > { %11968 = vst [vmem:[#allocation99_spill] sm:$0xff] %v8584_v57  ;;  %v8596_v20 = vstv %s8438_s22  ;;  %v8599_v39 = vstv %s8443_s9  ;;  %s8601_s8 = sld [smem:[#allocation10 + $0x4f]]  ;;  %v8605_v14 = vsel %vm2716_vm8, 1.0, %v11891_v36  ;;  %v8609_v25 = vsel %vm2764_vm10, 1.0, %v11891_v36  ;;  %v3184_v57 = vld [vmem:[#allocation5 + $0x18] sm:$0xff] }
 0x5de   : > { %11970 = vst [vmem:[#allocation28_spill] sm:$0xff] %v8596_v20  ;;  %11971 = vst [vmem:[#allocation100_spill] sm:$0xff] %v8599_v39  ;;  %v8612_v7 = vstv %s8447_s10  ;;  %s8614_s14 = sld [smem:[#allocation10 + $0x50]]  ;;  %vm2812_vm11 = vcmp.ge.s32.totalorder %v2804_v47, 0  ;;  %v2852_v29 = vadd.s32 1, %v11959_v28  ;;  %v2853_v0 = vadd.s32 1, %v11969_v43 }
 0x5df   : > { %11972 = vst [vmem:[#allocation101_spill] sm:$0xff] %v8605_v14  ;;  %11973 = vst [vmem:[#allocation102_spill] sm:$0xff] %v8609_v25  ;;  %s8618_s9 = sld [smem:[#allocation10 + $0x51]]  ;;  %vm2717_vm3 = vcmp.ge.s32.totalorder %v2709_v12, 0  ;;  %vm2765_vm9 = vcmp.ge.s32.totalorder %v2757_v60, 0  ;;  %v2900_v19 = vadd.s32 2, %v11959_v28  ;;  %v3040_v48 = vmul.f32 %v8605_v14, %v3032_v59 }
 0x5e0   : > { %11974 = vst [vmem:[#allocation103_spill] sm:$0xff] %v8612_v7  ;;  %v2901_v55 = vadd.s32 2, %v11969_v43  ;;  %s8622_s19 = sld [smem:[#allocation10 + $0x52]]  ;;  %vm2813_vm12 = vcmp.ge.s32.totalorder %v2805_v58, 0  ;;  %v3100_v13 = vmul.f32 %v8609_v25, %v3092_v54  ;;  %v3152_v21 = vadd.f32 %v3144_v31, %v3134_v10 }
 0x5e1   : > { %v8627_v27 = vstv %s8451_s15  ;;  %v8630_v5 = vstv %s8458_s30  ;;  %s8632_s10 = sld [smem:[#allocation10 + $0x53]]  ;;  %v8636_v39 = vsel %vm2812_vm11, 1.0, %v11891_v36  ;;  %v2948_v15 = vadd.s32 3, %v11959_v28 }
 0x5e2   : > { %11975 = vst [vmem:[#allocation104_spill] sm:$0xff] %v8627_v27  ;;  %11976 = vst [vmem:[#allocation105_spill] sm:$0xff] %v8630_v5  ;;  %s8639_s24 = sld [smem:[#allocation10 + $0x54]]  ;;  %v8643_v59 = vsel %vm2717_vm3, 1.0, %v11891_v36  ;;  %v8647_v10 = vsel %vm2765_vm9, 1.0, %v11891_v36  ;;  %vm2868_vm13 = vcmp.lt.s32.totalorder %v2852_v29, 8  ;;  %v8651_v31 = vstv %s8463_s11 }
 0x5e3   : > { %11977 = vst [vmem:[#allocation106_spill] sm:$0xff] %v8636_v39  ;;  %11978 = vst [vmem:[#allocation107_spill] sm:$0xff] %v8643_v59  ;;  %v2949_v54 = vadd.s32 3, %v11969_v43  ;;  %s8653_s13 = sld [smem:[#allocation10 + $0x55]]  ;;  %vm2869_vm14 = vcmp.lt.s32.totalorder %v2853_v0, 8  ;;  %vm2916_vm15 = vcmp.lt.s32.totalorder %v2900_v19, 8  ;;  %v3108_v12 = vadd.f32 %v3100_v13, %v3040_v48 }
 0x5e4   : > { %11979 = vst [vmem:[#allocation108_spill] sm:$0xff] %v8647_v10  ;;  %11980 = vst [vmem:[#allocation109_spill] sm:$0xff] %v8651_v31  ;;  %vm2917_vm1 = vcmp.lt.s32.totalorder %v2901_v55, 8  ;;  %s8655_s17 = sld [smem:[#allocation10 + $0x56]]  ;;  %v3160_v60 = vmul.f32 %v8636_v39, %v3152_v21  ;;  %v3194_v28 = vmul.f32 %v8149_v52, %v3176_v46  ;;  %v3204_v47 = vmul.f32 %v8152_v35, %v3184_v57 }
 0x5e5   : > { %s11981_s16 = sld [smem:[#allocation79_spill]]  ;;  %v8661_v43 = vstv %s8466_s26  ;;  %v8667_v29 = vsel %vm2813_vm12, 1.0, %v11891_v36  ;;  %v8670_v25 = vsel %vm2868_vm13, 1.0, %v11891_v36  ;;  %vm2964_vm2 = vcmp.lt.s32.totalorder %v2948_v15, 8 }
 0x5e6   : > { %11982 = vst [vmem:[#allocation110_spill] sm:$0xff] %v8661_v43  ;;  %s8663_s11 = sld [smem:[#allocation10 + $0x57]]  ;;  %11983 = vst [vmem:[#allocation111_spill] sm:$0xff] %v8667_v29  ;;  %v8673_v48 = vstv %s8470_s28  ;;  %v8676_v13 = vstv %s8476_s18  ;;  %v8682_v46 = vsel %vm2869_vm14, 1.0, %v11891_v36  ;;  %vm2965_vm4 = vcmp.lt.s32.totalorder %v2949_v54, 8 }
 0x5e7   : > { %11984 = vst [vmem:[#allocation112_spill] sm:$0xff] %v8670_v25  ;;  %11985 = vst [vmem:[#allocation113_spill] sm:$0xff] %v8673_v48  ;;  %s8678_s22 = sld [smem:[#allocation10 + $0x58]]  ;;  %v8685_v58 = vstv %s8481_s20  ;;  %v8694_v15 = vsel %vm2916_vm15, 1.0, %v11891_v36  ;;  %v8698_v0 = vsel %vm2917_vm1, 1.0, %v11891_v36  ;;  %v8701_v14 = vstv %s8488_s12 }
 0x5e8   : > { %11986 = vst [vmem:[#allocation114_spill] sm:$0xff] %v8676_v13  ;;  %11987 = vst [vmem:[#allocation115_spill] sm:$0xff] %v8682_v46  ;;  %s11988_s26 = sld [smem:[#allocation80_spill]]  ;;  %v8706_v46 = vsel %vm2964_vm2, 1.0, %v11891_v36  ;;  %v3168_v19 = vadd.f32 %v3160_v60, %v3108_v12  ;;  %v8724_v12 = vstv %s8500_s29  ;;  %v8727_v60 = vstv %s8508_s0 }
 0x5e9   : > { %11989 = vst [vmem:[#allocation116_spill] sm:$0xff] %v8685_v58  ;;  %s11991_s15 = sld [smem:[#allocation81_spill]]  ;;  %11993 = vst [vmem:[#allocation118_spill] sm:$0xff] %v8694_v15  ;;  %v3212_v15 = vadd.f32 %v3204_v47, %v3194_v28  ;;  %v8740_v28 = vstv %s8517_s25  ;;  %v8743_v47 = vstv %s8524_s1 }
 0x5ea   : > { %s8690_s30 = sld [smem:[#allocation10 + $0x59]]  ;;  %11994 = vst [vmem:[#allocation119_spill] sm:$0xff] %v8698_v0  ;;  %11995 = vst [vmem:[#allocation120_spill] sm:$0xff] %v8701_v14  ;;  %v8715_v0 = vsel %vm2965_vm4, 1.0, %v11891_v36  ;;  %v8748_v36 = vstv %s8535_s27 }
 0x5eb   : > { %v8688_v57 = vstv %s11981_s16  ;;  %s11992_s28 = sld [smem:[#allocation82_spill]]  ;;  %11996 = vst [vmem:[#allocation121_spill] sm:$0xff] %v8706_v46  ;;  %11999 = vst [vmem:[#allocation123_spill] sm:$0xff] %v8715_v0  ;;  %v8754_v0 = vstv %s8556_s3  ;;  %v8758_v35 = vadd.f32 %v3212_v15, %v3168_v19  ;;  %v8781_v15 = vstv %s8614_s14 }
 0x5ec   : > { %11990 = vst [vmem:[#allocation117_spill] sm:$0xff] %v8688_v57  ;;  %s8703_s18 = sld [smem:[#allocation10 + $0x5a]]  ;;  %12002 = vst [vmem:[#allocation126_spill] sm:$0xff] %v8724_v12  ;;  %v8784_v19 = vstv %s8618_s9 }
 0x5ed   : > { %s11997_s20 = sld [smem:[#allocation85_spill]]  ;;  %12003 = vst [vmem:[#allocation127_spill] sm:$0xff] %v8727_v60  ;;  %12006 = vst [vmem:[#allocation130_spill] sm:$0xff] %v8740_v28  ;;  %v8764_v28 = vstv %s8576_s5 }
 0x5ee   : > { %v8709_v29 = vstv %s11988_s26  ;;  %s8711_s16 = sld [smem:[#allocation10 + $0x5b]]  ;;  %12007 = vst [vmem:[#allocation131_spill] sm:$0xff] %v8743_v47  ;;  %12008 = vst [vmem:[#allocation132_spill] sm:$0xff] %v8748_v36  ;;  %v8761_v47 = vstv %s8558_s4  ;;  %v8767_v36 = vstv %s8581_s23 }
 0x5ef   : > { %11998 = vst [vmem:[#allocation122_spill] sm:$0xff] %v8709_v29  ;;  %v8718_v10 = vstv %s11991_s15  ;;  %s8729_s12 = sld [smem:[#allocation10 + $0x5c]]  ;;  %12010 = vst [vmem:[#allocation134_spill] sm:$0xff] %v8754_v0  ;;  %v8773_v0 = vstv %s8591_s7 }
 0x5f0   : > { %12000 = vst [vmem:[#allocation124_spill] sm:$0xff] %v8718_v10  ;;  %s8745_s29 = sld [smem:[#allocation10 + $0x5d]]  ;;  %12011 = vst [vmem:[#allocation135_spill] sm:$0xff] %v8758_v35 }
 0x5f1   : > { %v8721_v46 = vstv %s11992_s28  ;;  %12012 = vst [vmem:[#allocation136_spill] sm:$0xff] %v8761_v47  ;;  %12013 = vst [vmem:[#allocation137_spill] sm:$0xff] %v8764_v28  ;;  %s9289_s27 = sld [smem:[#allocation10 + $0x5f]] }
 0x5f2   : > { %12001 = vst [vmem:[#allocation125_spill] sm:$0xff] %v8721_v46  ;;  %12014 = vst [vmem:[#allocation138_spill] sm:$0xff] %v8767_v36  ;;  %s9295_s0 = sld [smem:[#allocation10 + $0x60]] }
 0x5f3   : > { %v8737_v54 = vstv %s11997_s20  ;;  %12016 = vst [vmem:[#allocation140_spill] sm:$0xff] %v8773_v0  ;;  %12018 = vst [vmem:[#allocation142_spill] sm:$0xff] %v8781_v15  ;;  %v8809_v15 = vstv %s8690_s30  ;;  %s9309_s25 = sld [smem:[#allocation10 + $0x61]] }
 0x5f4   : > { %12005 = vst [vmem:[#allocation129_spill] sm:$0xff] %v8737_v54  ;;  %v8776_v54 = vstv %s8601_s8  ;;  %12019 = vst [vmem:[#allocation143_spill] sm:$0xff] %v8784_v19  ;;  %s12404_s1 = sld [smem:[#allocation25_spill]] }
 0x5f5   : > { %12017 = vst [vmem:[#allocation141_spill] sm:$0xff] %v8776_v54  ;;  %v8793_v54 = vstv %s8639_s24  ;;  %12027 = vst [vmem:[#allocation151_spill] sm:$0xff] %v8809_v15  ;;  %s12413_s5 = sld [smem:[#allocation19_spill]] }
 0x5f6   : > { %12022 = vst [vmem:[#allocation146_spill] sm:$0xff] %v8793_v54  ;;  %v8818_v54 = vstv %s8729_s12  ;;  %s12416_s23 = sld [smem:[#allocation22_spill]] }
 0x5f7   : > { %12030 = vst [vmem:[#allocation154_spill] sm:$0xff] %v8818_v54  ;;  %s12417_s9 = sld [smem:[#allocation189_spill]] }
 0x5fc   : > { %p12418_p0 = scmp.ne.s32.totalorder %s12416_s23, 0 }
 0x61e   : > { %v2639_v21 = vpop.xlane.xlu1 %2638  ;;  %v2636_v39 = vpop.xlane.xlu0 %2635 }
 0x61f   : > { %v2659_v55 = vmul.f32 0.015625, %v2639_v21  ;;  %v2658_v25 = vmul.f32 0.015625, %v2636_v39  ;;  %v8734_v39 = vstv %s8512_s21  ;;  %s8756_s21 = sld [smem:[#allocation10 + $0x5e]] }
 0x620   : > { %12004 = vst [vmem:[#allocation128_spill] sm:$0xff] %v8734_v39  ;;  %v8815_v39 = vstv %s8711_s16 }
 0x621   : > { %2667 = vst.msk [vmem:[#allocation4 + $0x28] sm:$0xff] %vm2617_vm7, %v2659_v55  ;;  %2666 = vst.msk [vmem:[#allocation4 + $0x20] sm:$0xff] %vm2617_vm7, %v2658_v25  ;;  %v8751_v25 = vstv %s8543_s2  ;;  %s12407_s2 = sld [smem:[#allocation24_spill]] }
 0x622   : > { %v2648_v21 = vpop.xlane.xlu1 %2647  ;;  %v2642_v55 = vpop.xlane.xlu0 %2641  ;;  %12009 = vst [vmem:[#allocation133_spill] sm:$0xff] %v8751_v25  ;;  %v8770_v25 = vstv %s8586_s6  ;;  %12029 = vst [vmem:[#allocation153_spill] sm:$0xff] %v8815_v39  ;;  %s6378_s6 = sshll.u32 %s12413_s5, 10 }
 0x623   : > { %v2662_v52 = vmul.f32 0.015625, %v2648_v21  ;;  %v2660_v59 = vmul.f32 0.015625, %v2642_v55  ;;  %12015 = vst [vmem:[#allocation139_spill] sm:$0xff] %v8770_v25  ;;  %v8787_v21 = vstv %s8622_s19  ;;  %v8790_v55 = vstv %s8632_s10  ;;  %s11325_s19 = scalar_lea.hbm %s12417_s9, %s6378_s6 }
 0x624   : > { %12020 = vst [vmem:[#allocation144_spill] sm:$0xff] %v8787_v21  ;;  %12021 = vst [vmem:[#allocation145_spill] sm:$0xff] %v8790_v55  ;;  %v8799_v25 = vstv %s8655_s17  ;;  %v8806_v21 = vstv %s8678_s22  ;;  %v8812_v55 = vstv %s8703_s18 }
 0x625   : > { %2670 = vst.msk [vmem:[#allocation4 + $0x40] sm:$0xff] %vm2617_vm7, %v2662_v52  ;;  %2668 = vst.msk [vmem:[#allocation4 + $0x30] sm:$0xff] %vm2617_vm7, %v2660_v59  ;;  %v8796_v52 = vstv %s8653_s13  ;;  %v8802_v59 = vstv %s8663_s11  ;;  %s6748_s13 = smov [#allocation11]  }
 0x626   : > { %v2679_v35 = vpop.xlane.xlu1 %2678  ;;  %v2645_v0 = vpop.xlane.xlu0 %2644  ;;  %12023 = vst [vmem:[#allocation147_spill] sm:$0xff] %v8796_v52  ;;  %12024 = vst [vmem:[#allocation148_spill] sm:$0xff] %v8799_v25  ;;  %v8821_v52 = vstv %s8745_s29  ;;  %v8824_v25 = vstv %s8756_s21  ;;  %s6665_s17 = sshll.u32 %s6748_s13, 4  ;;  %s6666_s17 = int_to_ptr.vmem [resolvable:$false] %s6665_s17 }
 0x627   : > { %12025 = vst [vmem:[#allocation149_spill] sm:$0xff] %v8802_v59  ;;  %2699 = vst.msk [vmem:[#allocation5 + $0x28] sm:$0xff] %vm2617_vm7, %v2679_v35  ;;  %v2661_v19 = vmul.f32 0.015625, %v2645_v0  ;;  %s12410_s3 = sshll.u32 %s12407_s2, 6  ;;  %s6031_s10 = scalar_lea.sflag [#allocation8], %s12407_s2 }
 0x628   : > { %12026 = vst [vmem:[#allocation150_spill] sm:$0xff] %v8806_v21  ;;  %12028 = vst [vmem:[#allocation152_spill] sm:$0xff] %v8812_v55  ;;  %v3639_v36 = vld [vmem:[#allocation4 + $0x19] sm:$0xff]  ;;  %v4111_v60 = vld [vmem:[#allocation4 + $0x22] sm:$0xff]  ;;  %s11296_s4 = scalar_lea.vmem [#allocation11], %s12410_s3  ;;  %s6667_s11 = scalar_lea.vmem %s6666_s17, 2048 }
 0x629   : > { %v3699_v28 = vld [vmem:[#allocation4 + $0x1a] sm:$0xff]  ;;  %12031 = vst [vmem:[#allocation155_spill] sm:$0xff] %v8821_v52  ;;  %12032 = vst [vmem:[#allocation156_spill] sm:$0xff] %v8824_v25  ;;  %v8828_v35 = vmul.f32 %v8366_v44, %v3639_v36  ;;  %v8837_v54 = vmul.f32 %v8522_v23, %v3639_v36  ;;  %v4231_v58 = vld [vmem:[#allocation4 + $0x25] sm:$0xff]  ;;  %s6044_s7 = sshll.u32 %s11296_s4, 4  ;;  %s11327_s7 = int_to_ptr.vmem [resolvable:$true] %s6044_s7 }
 0x62a   : > { %v3759_v47 = vld [vmem:[#allocation4 + $0x1b] sm:$0xff]  ;;  %2669 = vst.msk [vmem:[#allocation4 + $0x38] sm:$0xff] %vm2617_vm7, %v2661_v19  ;;  %v8831_v0 = vmul.f32 %v8392_v32, %v3699_v28  ;;  %v2685_v52 = vpop.xlane.xlu1 %2684  ;;  %v2676_v59 = vpop.xlane.xlu0 %2675  ;;  %v8849_v12 = vmul.f32 %v8530_v4, %v3699_v28  ;;  %v4291_v28 = vld [vmem:[#allocation4 + $0x26] sm:$0xff]  ;;  %s6661_s24 = scalar_lea.vmem %s11327_s7, 1024  ;;  %p6668_p8 = scmp.lt.s32.totalorder %s11327_s7, %s6666_s17 }
 0x62b   : > { %v8834_v55 = vmul.f32 %v8416_v37, %v3759_v47  ;;  %v3819_v15 = vld [vmem:[#allocation4 + $0x1d] sm:$0xff]  ;;  %2701 = vst.msk [vmem:[#allocation5 + $0x38] sm:$0xff] %vm2617_vm7, %v2685_v52  ;;  %2698 = vst.msk [vmem:[#allocation5 + $0x20] sm:$0xff] %vm2617_vm7, %v2676_v59  ;;  %v8863_v14 = vmul.f32 %v8538_v53, %v3759_v47  ;;  %v8872_v59 = vmul.f32 %v8548_v41, %v4231_v58  ;;  %p6662_p12 = scmp.ne.s32.totalorder %s11327_s7, %s6661_s24  ;;  %p6669_p9 = scmp.lt.s32.totalorder %s6667_s11, %s6661_s24 }
 0x62c   : > { %v3879_v21 = vld [vmem:[#allocation4 + $0x1e] sm:$0xff]  ;;  %v8840_v25 = vmul.f32 %v8441_v26, %v3819_v15  ;;  %v8869_v52 = vmul.f32 %v8548_v41, %v3819_v15  ;;  %v4463_v31 = vld [vmem:[#allocation4 + $0x29] sm:$0xff]  ;;  %v8878_v47 = vmul.f32 %v8554_v45, %v4291_v28 }
 0x62d   : > { %v3939_v39 = vld [vmem:[#allocation4 + $0x1f] sm:$0xff]  ;;  %v8843_v19 = vmul.f32 %v8461_v24, %v3879_v21  ;;  %v8860_v24 = vmul.f32 %v8530_v4, %v4111_v60  ;;  %12035 = vst [vmem:[#allocation159_spill] sm:$0xff] %v8872_v59  ;;  %v4351_v4 = vld [vmem:[#allocation4 + $0x27] sm:$0xff]  ;;  %p6663_p2 = pnand %p6662_p12, %p12418_p0  ;;  %p6670_p10 = por %p6669_p9, %p6668_p8 }
 0x62e   : > { %v8846_v32 = vmul.f32 %v8479_v34, %v3939_v39  ;;  %v3999_v44 = vld [vmem:[#allocation4 + $0x20] sm:$0xff]  ;;  %12034 = vst [vmem:[#allocation158_spill] sm:$0xff] %v8869_v52  ;;  %12037 = vst [vmem:[#allocation161_spill] sm:$0xff] %v8878_v47  ;;  %v8881_v27 = vmul.f32 %v8568_v62, %v3939_v39  ;;  %v8889_v41 = vld [vmem:[#allocation4 + $0x2a] sm:$0xff]  ;;  %v2682_v52 = vpop.xlane.xlu0 %2681 }
 0x62f   : > { %v4051_v37 = vld [vmem:[#allocation4 + $0x21] sm:$0xff]  ;;  %v8854_v36 = vmul.f32 %v8503_v40, %v3999_v44  ;;  %v8887_v15 = vmul.f32 %v8574_v33, %v3999_v44  ;;  %12041 = vst [vmem:[#allocation165_spill] sm:$0xff] %v8889_v41  ;;  %v8891_v59 = vld [vmem:[#allocation4 + $0x2b] sm:$0xff]  ;;  %v8903_v44 = vmul.f32 %v8612_v7, %v4111_v60  ;;  %2700 = vst.msk [vmem:[#allocation5 + $0x30] sm:$0xff] %vm2617_vm7, %v2682_v52  ;;  %p6664_p7 = pneg %p6663_p2 }
 0x630   : > { %v8857_v26 = vmul.f32 %v8522_v23, %v4051_v37  ;;  %v4171_v34 = vld [vmem:[#allocation4 + $0x23] sm:$0xff]  ;;  %v8875_v23 = vmul.f32 %v8554_v45, %v3879_v21  ;;  %12038 = vst [vmem:[#allocation162_spill] sm:$0xff] %v8881_v27  ;;  %12042 = vst [vmem:[#allocation166_spill] sm:$0xff] %v8891_v59  ;;  %v8893_v21 = vld [vmem:[#allocation4 + $0x2d] sm:$0xff]  ;;  %v8897_v39 = vmul.f32 %v8596_v20, %v4051_v37 }
 0x631   : > { %v8866_v48 = vmul.f32 %v8538_v53, %v4171_v34  ;;  %v4411_v40 = vld [vmem:[#allocation4 + $0x28] sm:$0xff]  ;;  %v8884_v53 = vmul.f32 %v8568_v62, %v4351_v4  ;;  %12040 = vst [vmem:[#allocation164_spill] sm:$0xff] %v8887_v15  ;;  %12043 = vst [vmem:[#allocation167_spill] sm:$0xff] %v8893_v21  ;;  %v8900_v62 = vmul.f32 %v8596_v20, %v4463_v31  ;;  %v8918_v20 = vld [vmem:[#allocation4 + $0x30] sm:$0xff]  ;;  %p6671_p1 = pnand %p6670_p10, %p6664_p7 }
 0x632   : > { %12036 = vst [vmem:[#allocation160_spill] sm:$0xff] %v8875_v23  ;;  %v2651_v23 = vpop.xlane.xlu1 %2650  ;;  %v4429_v45 = vmul.f32 %v8574_v33, %v4411_v40  ;;  %12044 = vst [vmem:[#allocation168_spill] sm:$0xff] %v8903_v44  ;;  %v8905_v15 = vld [vmem:[#allocation4 + $0x2e] sm:$0xff]  ;;  %v8913_v33 = vmul.f32 %v8612_v7, %v8889_v41  ;;  %v8916_v37 = vmul.f32 %v8630_v5, %v4171_v34  ;;  %v3767_v41 = vld [vmem:[#allocation5 + $0x1b] sm:$0xff] }
 0x633   : > { %12033 = vst [vmem:[#allocation157_spill] sm:$0xff] %v8866_v48  ;;  %12039 = vst [vmem:[#allocation163_spill] sm:$0xff] %v8884_v53  ;;  %v4419_v48 = vld [vmem:[#allocation5 + $0x28] sm:$0xff]  ;;  %v2663_v27 = vmul.f32 0.015625, %v2651_v23  ;;  %v8922_v60 = vmul.f32 %v8630_v5, %v8891_v59  ;;  %v8925_v44 = vmul.f32 %v8661_v43, %v4231_v58  ;;  %v8929_v23 = vmul.f32 %v8661_v43, %v8893_v21  ;;  %v2688_v21 = vpop.xlane.xlu0 %2687  ;;  %v3647_v59 = vld [vmem:[#allocation5 + $0x19] sm:$0xff] }
 0x634   : > { %12045 = vst [vmem:[#allocation169_spill] sm:$0xff] %v8905_v15  ;;  %v8907_v53 = vld [vmem:[#allocation4 + $0x2f] sm:$0xff]  ;;  %v4439_v47 = vmul.f32 %v8579_v63, %v4419_v48  ;;  %12047 = vst [vmem:[#allocation171_spill] sm:$0xff] %v8918_v20  ;;  %v8932_v52 = vmul.f32 %v8676_v13, %v4291_v28  ;;  %v8939_v7 = vmul.f32 %v8676_v13, %v8905_v15  ;;  %v3707_v28 = vld [vmem:[#allocation5 + $0x1a] sm:$0xff] }
 0x635   : > { %12046 = vst [vmem:[#allocation170_spill] sm:$0xff] %v8907_v53  ;;  %2671 = vst.msk [vmem:[#allocation4 + $0x48] sm:$0xff] %vm2617_vm7, %v2663_v27  ;;  %v8942_v5 = vmul.f32 %v8688_v57, %v4351_v4  ;;  %v8946_v58 = vmul.f32 %v8688_v57, %v8907_v53  ;;  %v8949_v27 = vmul.f32 %v8709_v29, %v4411_v40  ;;  %v3827_v15 = vld [vmem:[#allocation5 + $0x1d] sm:$0xff] }
 0x636   : > { %v8935_v34 = vadd.f32 %v4439_v47, %v4429_v45  ;;  %v2654_v43 = vpop.xlane.xlu1 %2653  ;;  %v8953_v45 = vmul.f32 %v8709_v29, %v8918_v20  ;;  %v8956_v47 = vmul.f32 %v8718_v10, %v4419_v48  ;;  %v8959_v4 = vmul.f32 %v8721_v46, %v4463_v31  ;;  %2702 = vst.msk [vmem:[#allocation5 + $0x40] sm:$0xff] %vm2617_vm7, %v2688_v21  ;;  %v8967_v29 = vld [vmem:[#allocation5 + $0x1f] sm:$0xff] }
 0x637   : > { %v2664_v57 = vmul.f32 0.015625, %v2654_v43  ;;  %v3667_v13 = vmul.f32 %v8369_v50, %v3647_v59  ;;  %v3727_v53 = vmul.f32 %v8395_v51, %v3707_v28  ;;  %v3787_v40 = vmul.f32 %v8419_v8, %v3767_v41  ;;  %v8974_v21 = vld [vmem:[#allocation5 + $0x20] sm:$0xff]  ;;  %v2691_v46 = vpop.xlane.xlu0 %2690 }
 0x638   : > { %12048 = vst [vmem:[#allocation172_spill] sm:$0xff] %v8935_v34  ;;  %12049 = vst [vmem:[#allocation173_spill] sm:$0xff] %v8953_v45  ;;  %v8965_v34 = vld [vmem:[#allocation5 + $0x1e] sm:$0xff]  ;;  %v3847_v48 = vmul.f32 %v8436_v18, %v3827_v15  ;;  %v3967_v43 = vmul.f32 %v8474_v56, %v8967_v29  ;;  %v4078_v51 = vmul.f32 %v8527_v61, %v3647_v59 }
 0x639   : > { %12050 = vst [vmem:[#allocation174_spill] sm:$0xff] %v8956_v47  ;;  %12051 = vst [vmem:[#allocation175_spill] sm:$0xff] %v8959_v4  ;;  %v3907_v31 = vmul.f32 %v8456_v38, %v8965_v34  ;;  %v8976_v50 = vld [vmem:[#allocation5 + $0x21] sm:$0xff]  ;;  %v3675_v8 = vadd.f32 %v3667_v13, %v8828_v35  ;;  %v3735_v20 = vadd.f32 %v3727_v53, %v8831_v0 }
 0x63a   : > { %2672 = vst.msk [vmem:[#allocation4 + $0x50] sm:$0xff] %vm2617_vm7, %v2664_v57  ;;  %v3795_v18 = vadd.f32 %v3787_v40, %v8834_v55  ;;  %v4027_v38 = vmul.f32 %v8506_v30, %v8974_v21  ;;  %v2657_v4 = vpop.xlane.xlu1 %2656  ;;  %v3855_v56 = vadd.f32 %v3847_v48, %v8840_v25  ;;  %v3975_v47 = vadd.f32 %v3967_v43, %v8846_v32  ;;  %v8994_v35 = vld [vmem:[#allocation5 + $0x22] sm:$0xff] }
 0x63b   : > { %v3915_v45 = vadd.f32 %v3907_v31, %v8843_v19  ;;  %v4079_v57 = vmul.f32 %v8527_v61, %v8976_v50  ;;  %v2665_v59 = vmul.f32 0.015625, %v2657_v4  ;;  %2703 = vst.msk [vmem:[#allocation5 + $0x48] sm:$0xff] %vm2617_vm7, %v2691_v46  ;;  %v3683_v53 = vmul.f32 %v8347_v2, %v3675_v8  ;;  %v8996_v0 = vld [vmem:[#allocation5 + $0x23] sm:$0xff]  ;;  %v2694_v48 = vpop.xlane.xlu0 %2693  ;;  %v12052_v31 = vld [vmem:[#allocation157_spill] sm:$0xff] }
 0x63c   : > { %v3743_v13 = vmul.f32 %v8363_v1, %v3735_v20  ;;  %v3803_v55 = vmul.f32 %v8407_v42, %v3795_v18  ;;  %v3863_v25 = vmul.f32 %v8196_v9, %v3855_v56  ;;  %v3983_v19 = vmul.f32 %v8277_v6, %v3975_v47  ;;  %v9007_v40 = vld [vmem:[#allocation5 + $0x25] sm:$0xff]  ;;  %2704 = vst.msk [vmem:[#allocation5 + $0x50] sm:$0xff] %vm2617_vm7, %v2694_v48 }
 0x63d   : > { %v3923_v32 = vmul.f32 %v8244_v3, %v3915_v45  ;;  %v4035_v4 = vadd.f32 %v4027_v38, %v8854_v36  ;;  %2673 = vst.msk [vmem:[#allocation4 + $0x58] sm:$0xff] %vm2617_vm7, %v2665_v59  ;;  %v3691_v8 = vadd.f32 %v3683_v53, %v8519_v49  ;;  %v4086_v20 = vadd.f32 %v4078_v51, %v8837_v54  ;;  %v12054_v53 = vld [vmem:[#allocation55_spill] sm:$0xff] }
 0x63e   : > { %v4087_v18 = vadd.f32 %v4079_v57, %v8857_v26  ;;  %v4138_v46 = vmul.f32 %v8533_v11, %v3707_v28  ;;  %v4139_v56 = vmul.f32 %v8533_v11, %v8994_v35  ;;  %v4198_v45 = vmul.f32 %v8541_v22, %v3767_v41  ;;  %v9027_v48 = vld [vmem:[#allocation5 + $0x26] sm:$0xff] }
 0x63f   : > { %v4199_v38 = vmul.f32 %v8541_v22, %v8996_v0  ;;  %v4258_v36 = vmul.f32 %v8551_v17, %v3827_v15  ;;  %v3751_v51 = vadd.f32 %v3743_v13, %v3691_v8  ;;  %v4094_v26 = vmul.f32 %v8200_v16, %v4086_v20  ;;  %v12053_v15 = vld [vmem:[#allocation99_spill] sm:$0xff]  ;;  %v12055_v8 = vld [vmem:[#allocation158_spill] sm:$0xff] }
 0x640   : > { %v4095_v49 = vmul.f32 %v8347_v2, %v4087_v18  ;;  %v4146_v54 = vadd.f32 %v4138_v46, %v8849_v12  ;;  %v4147_v28 = vadd.f32 %v4139_v56, %v8860_v24  ;;  %v4206_v47 = vadd.f32 %v4198_v45, %v8863_v14  ;;  %v9029_v18 = vld [vmem:[#allocation5 + $0x27] sm:$0xff]  ;;  %v2697_v12 = vpop.xlane.xlu0 %2696 }
 0x641   : > { %v4207_v41 = vadd.f32 %v4199_v38, %v12052_v31  ;;  %v4259_v43 = vmul.f32 %v8551_v17, %v9007_v40  ;;  %v3811_v57 = vadd.f32 %v3803_v55, %v3751_v51  ;;  %v4102_v59 = vadd.f32 %v4094_v26, %v12053_v15  ;;  %v12056_v14 = vld [vmem:[#allocation58_spill] sm:$0xff]  ;;  %2705 = vst.msk [vmem:[#allocation5 + $0x58] sm:$0xff] %vm2617_vm7, %v2697_v12  ;;  %v12058_v26 = vld [vmem:[#allocation43_spill] sm:$0xff] }
 0x642   : > { %v4154_v13 = vmul.f32 %v12054_v53, %v4146_v54  ;;  %v4266_v20 = vadd.f32 %v4258_v36, %v12055_v8  ;;  %v4155_v24 = vmul.f32 %v8363_v1, %v4147_v28  ;;  %v4214_v46 = vmul.f32 %v12056_v14, %v4206_v47  ;;  %v12057_v45 = vld [vmem:[#allocation159_spill] sm:$0xff]  ;;  %v12059_v36 = vld [vmem:[#allocation94_spill] sm:$0xff]  ;;  %v12060_v47 = vld [vmem:[#allocation96_spill] sm:$0xff] }
 0x643   : > { %v4215_v56 = vmul.f32 %v8407_v42, %v4207_v41  ;;  %v4267_v38 = vadd.f32 %v4259_v43, %v12057_v45  ;;  %v3871_v55 = vadd.f32 %v3863_v25, %v3811_v57  ;;  %v4318_v31 = vmul.f32 %v12059_v36, %v8965_v34  ;;  %v12061_v25 = vld [vmem:[#allocation160_spill] sm:$0xff]  ;;  %v12062_v34 = vld [vmem:[#allocation161_spill] sm:$0xff]  ;;  %v12063_v45 = vld [vmem:[#allocation162_spill] sm:$0xff] }
 0x644   : > { %v4162_v51 = vadd.f32 %v4154_v13, %v4102_v59  ;;  %v4274_v54 = vmul.f32 %v12058_v26, %v4266_v20  ;;  %v4319_v28 = vmul.f32 %v12059_v36, %v9027_v48  ;;  %v4378_v8 = vmul.f32 %v12060_v47, %v8967_v29  ;;  %v9049_v13 = vld [vmem:[#allocation5 + $0x29] sm:$0xff]  ;;  %v12064_v36 = vld [vmem:[#allocation163_spill] sm:$0xff] }
 0x645   : > { %v4275_v15 = vmul.f32 %v8196_v9, %v4267_v38  ;;  %v4379_v41 = vmul.f32 %v12060_v47, %v9029_v18  ;;  %v3931_v43 = vadd.f32 %v3923_v32, %v3871_v55  ;;  %v4326_v57 = vadd.f32 %v4318_v31, %v12061_v25  ;;  %v12065_v29 = vld [vmem:[#allocation100_spill] sm:$0xff]  ;;  %v12066_v32 = vld [vmem:[#allocation45_spill] sm:$0xff] }
 0x646   : > { %v4222_v12 = vadd.f32 %v4214_v46, %v4162_v51  ;;  %v4438_v59 = vmul.f32 %v8579_v63, %v8974_v21  ;;  %v4327_v20 = vadd.f32 %v4319_v28, %v12062_v34  ;;  %v4386_v38 = vadd.f32 %v4378_v8, %v12063_v45  ;;  %v12067_v55 = vld [vmem:[#allocation164_spill] sm:$0xff]  ;;  %v12068_v28 = vld [vmem:[#allocation50_spill] sm:$0xff] }
 0x647   : > { %v4387_v17 = vadd.f32 %v4379_v41, %v12064_v36  ;;  %v4490_v22 = vmul.f32 %v12065_v29, %v8976_v50  ;;  %v3991_v11 = vadd.f32 %v3983_v19, %v3931_v43  ;;  %v4334_v46 = vmul.f32 %v12066_v32, %v4326_v57  ;;  %v9058_v31 = vld [vmem:[#allocation5 + $0x2a] sm:$0xff] }
 0x648   : > { %v4282_v47 = vadd.f32 %v4274_v54, %v4222_v12  ;;  %v4446_v51 = vadd.f32 %v4438_v59, %v12067_v55  ;;  %v9060_v21 = vld [vmem:[#allocation5 + $0x2b] sm:$0xff]  ;;  %v4335_v25 = vmul.f32 %v8244_v3, %v4327_v20  ;;  %v4394_v34 = vmul.f32 %v12068_v28, %v4386_v38 }
 0x649   : > { %v4395_v8 = vmul.f32 %v8277_v6, %v4387_v17  ;;  %v4491_v36 = vmul.f32 %v12065_v29, %v9049_v13  ;;  %v4043_v50 = vadd.f32 %v4035_v4, %v3991_v11  ;;  %v4498_v54 = vadd.f32 %v4490_v22, %v8897_v39  ;;  %v12069_v41 = vld [vmem:[#allocation104_spill] sm:$0xff]  ;;  %v12070_v59 = vld [vmem:[#allocation109_spill] sm:$0xff] }
 0x64a   : > { %v4342_v19 = vadd.f32 %v4334_v46, %v4282_v47  ;;  %v4550_v43 = vmul.f32 %v12069_v41, %v8994_v35  ;;  %v4551_v57 = vmul.f32 %v12069_v41, %v9058_v31  ;;  %v4610_v20 = vmul.f32 %v12070_v59, %v8996_v0  ;;  %v12071_v4 = vld [vmem:[#allocation168_spill] sm:$0xff] }
 0x64b   : > { %v4499_v12 = vadd.f32 %v4491_v36, %v8900_v62  ;;  %v4611_v17 = vmul.f32 %v12070_v59, %v9060_v21  ;;  %v4103_v45 = vadd.f32 %v4095_v49, %v4043_v50  ;;  %v4506_v11 = vmul.f32 %v8200_v16, %v4498_v54  ;;  %v9079_v39 = vld [vmem:[#allocation5 + $0x2d] sm:$0xff] }
 0x64c   : > { %v4402_v38 = vadd.f32 %v4394_v34, %v4342_v19  ;;  %v4558_v22 = vadd.f32 %v4550_v43, %v12071_v4  ;;  %v4559_v62 = vadd.f32 %v4551_v57, %v8913_v33  ;;  %v4618_v47 = vadd.f32 %v4610_v20, %v8916_v37  ;;  %v12072_v49 = vld [vmem:[#allocation113_spill] sm:$0xff] }
 0x64d   : > { %v4507_v35 = vmul.f32 %v8347_v2, %v4499_v12  ;;  %v4619_v46 = vadd.f32 %v4611_v17, %v8922_v60  ;;  %v4163_v0 = vadd.f32 %v4155_v24, %v4103_v45  ;;  %v4670_v34 = vmul.f32 %v12072_v49, %v9007_v40  ;;  %v9088_v50 = vld [vmem:[#allocation5 + $0x2e] sm:$0xff] }
 0x64e   : > { %v4454_v55 = vadd.f32 %v4446_v51, %v4402_v38  ;;  %v4566_v36 = vmul.f32 %v12054_v53, %v4558_v22  ;;  %v9090_v19 = vld [vmem:[#allocation5 + $0x2f] sm:$0xff]  ;;  %v4567_v54 = vmul.f32 %v8363_v1, %v4559_v62  ;;  %v4626_v43 = vmul.f32 %v12056_v14, %v4618_v47 }
 0x64f   : > { %v9095_v33 = vmul.f32 %v8407_v42, %v4619_v46  ;;  %v4671_v37 = vmul.f32 %v12072_v49, %v9079_v39  ;;  %v4223_v60 = vadd.f32 %v4215_v56, %v4163_v0  ;;  %v4678_v51 = vadd.f32 %v4670_v34, %v8925_v44  ;;  %v12073_v40 = vld [vmem:[#allocation116_spill] sm:$0xff]  ;;  %v9109_v4 = vld [vmem:[#allocation5 + $0x30] sm:$0xff] }
 0x650   : > { %v4514_v24 = vadd.f32 %v4506_v11, %v4454_v55  ;;  %v4730_v12 = vmul.f32 %v12073_v40, %v9027_v48  ;;  %v4731_v20 = vmul.f32 %v12073_v40, %v9088_v50  ;;  %v12074_v17 = vld [vmem:[#allocation120_spill] sm:$0xff]  ;;  %v9119_v47 = vld [vmem:[#allocation4 + $0x31] sm:$0xff]  ;;  %v4851_v55 = vmul.f32 %v8718_v10, %v9109_v4  ;;  %v12096_v40 = vld [vmem:[#allocation171_spill] sm:$0xff] }
 0x651   : > { %v4679_v57 = vadd.f32 %v4671_v37, %v8929_v23  ;;  %v4790_v45 = vmul.f32 %v12074_v17, %v9029_v18  ;;  %v4791_v38 = vmul.f32 %v12074_v17, %v9090_v19  ;;  %v4283_v56 = vadd.f32 %v4275_v15, %v4223_v60  ;;  %v12086_v17 = vld [vmem:[#allocation130_spill] sm:$0xff] }
 0x652   : > { %v4574_v11 = vadd.f32 %v4566_v36, %v4514_v24  ;;  %v4686_v44 = vmul.f32 %v12058_v26, %v4678_v51  ;;  %v4738_v22 = vadd.f32 %v4730_v12, %v8932_v52  ;;  %v4739_v23 = vadd.f32 %v4731_v20, %v8939_v7  ;;  %v9124_v36 = vld [vmem:[#allocation5 + $0x31] sm:$0xff] }
 0x653   : > { %v9114_v48 = vmul.f32 %v8196_v9, %v4679_v57  ;;  %v4798_v62 = vadd.f32 %v4790_v45, %v8942_v5  ;;  %v4799_v18 = vadd.f32 %v4791_v38, %v8946_v58  ;;  %v4343_v46 = vadd.f32 %v4335_v25, %v4283_v56  ;;  %v9126_v52 = vld [vmem:[#allocation4 + $0x32] sm:$0xff] }
 0x654   : > { %v4634_v0 = vadd.f32 %v4626_v43, %v4574_v11  ;;  %v4746_v15 = vmul.f32 %v12066_v32, %v4738_v22  ;;  %v4747_v34 = vmul.f32 %v8244_v3, %v4739_v23  ;;  %v12075_v58 = vld [vmem:[#allocation174_spill] sm:$0xff]  ;;  %v12076_v24 = vld [vmem:[#allocation173_spill] sm:$0xff] }
 0x655   : > { %v4806_v7 = vmul.f32 %v12068_v28, %v4798_v62  ;;  %v9131_v5 = vmul.f32 %v8277_v6, %v4799_v18  ;;  %v4858_v25 = vadd.f32 %v12075_v58, %v8949_v27  ;;  %v9135_v43 = vld [vmem:[#allocation5 + $0x32] sm:$0xff]  ;;  %v4403_v37 = vadd.f32 %v4395_v8, %v4343_v46  ;;  %v12080_v27 = vld [vmem:[#allocation127_spill] sm:$0xff]  ;;  %v12082_v18 = vld [vmem:[#allocation128_spill] sm:$0xff] }
 0x656   : > { %v4694_v60 = vadd.f32 %v4686_v44, %v4634_v0  ;;  %v9138_v51 = vadd.f32 %v4851_v55, %v12076_v24  ;;  %v12077_v12 = vld [vmem:[#allocation125_spill] sm:$0xff]  ;;  %v12078_v45 = vld [vmem:[#allocation126_spill] sm:$0xff]  ;;  %v4953_v8 = vmul.f32 %v12080_v27, %v9126_v52  ;;  %v12081_v44 = vld [vmem:[#allocation172_spill] sm:$0xff]  ;;  %v4962_v46 = vmul.f32 %v12082_v18, %v9058_v31 }
 0x657   : > { %v4893_v57 = vmul.f32 %v12077_v12, %v9119_v47  ;;  %v9142_v20 = vld [vmem:[#allocation4 + $0x33] sm:$0xff]  ;;  %v4902_v38 = vmul.f32 %v12078_v45, %v9049_v13  ;;  %v4903_v56 = vmul.f32 %v12078_v45, %v9124_v36  ;;  %v4455_v23 = vadd.f32 %v12081_v44, %v4403_v37  ;;  %v12083_v13 = vld [vmem:[#allocation175_spill] sm:$0xff] }
 0x658   : > { %v12079_v11 = vld [vmem:[#allocation165_spill] sm:$0xff]  ;;  %v4754_v62 = vadd.f32 %v4746_v15, %v4694_v60  ;;  %v4963_v0 = vmul.f32 %v12082_v18, %v9135_v43  ;;  %v12084_v45 = vld [vmem:[#allocation166_spill] sm:$0xff] }
 0x659   : > { %v4952_v22 = vmul.f32 %v12080_v27, %v12079_v11  ;;  %v9157_v55 = vld [vmem:[#allocation5 + $0x33] sm:$0xff]  ;;  %v4910_v58 = vadd.f32 %v4902_v38, %v12083_v13  ;;  %v4911_v24 = vadd.f32 %v4903_v56, %v4893_v57  ;;  %v4515_v10 = vadd.f32 %v4507_v35, %v4455_v23 }
 0x65a   : > { %v12085_v12 = vld [vmem:[#allocation129_spill] sm:$0xff]  ;;  %v4814_v37 = vadd.f32 %v4806_v7, %v4754_v62  ;;  %v4971_v60 = vadd.f32 %v4963_v0, %v4953_v8  ;;  %v5022_v38 = vmul.f32 %v12086_v17, %v9060_v21  ;;  %v5023_v57 = vmul.f32 %v12086_v17, %v9157_v55  ;;  %v12087_v62 = vld [vmem:[#allocation167_spill] sm:$0xff]  ;;  %v12094_v17 = vld [vmem:[#allocation136_spill] sm:$0xff] }
 0x65b   : > { %v5012_v11 = vmul.f32 %v12085_v12, %v12084_v45  ;;  %v5013_v27 = vmul.f32 %v12085_v12, %v9142_v20  ;;  %v4970_v15 = vadd.f32 %v4962_v46, %v4952_v22  ;;  %v9164_v44 = vld [vmem:[#allocation4 + $0x35] sm:$0xff]  ;;  %v4918_v31 = vmul.f32 %v8200_v16, %v4910_v58  ;;  %v12088_v46 = vld [vmem:[#allocation131_spill] sm:$0xff] }
 0x65c   : > { %v4919_v18 = vmul.f32 %v8347_v2, %v4911_v24  ;;  %v9172_v45 = vld [vmem:[#allocation5 + $0x35] sm:$0xff]  ;;  %v4575_v56 = vadd.f32 %v4567_v54, %v4515_v10  ;;  %v4866_v13 = vadd.f32 %v4858_v25, %v4814_v37  ;;  %v9176_v7 = vmul.f32 %v8363_v1, %v4971_v60  ;;  %v12089_v10 = vld [vmem:[#allocation132_spill] sm:$0xff] }
 0x65d   : > { %v4978_v35 = vmul.f32 %v12054_v53, %v4970_v15  ;;  %v9178_v22 = vld [vmem:[#allocation4 + $0x36] sm:$0xff]  ;;  %v5030_v8 = vadd.f32 %v5022_v38, %v5012_v11  ;;  %v5031_v23 = vadd.f32 %v5023_v57, %v5013_v27  ;;  %v5072_v0 = vmul.f32 %v12088_v46, %v12087_v62 }
 0x65e   : > { %v5073_v21 = vmul.f32 %v12088_v46, %v9164_v44  ;;  %v4635_v58 = vadd.f32 %v9095_v33, %v4575_v56  ;;  %v4926_v24 = vadd.f32 %v4918_v31, %v4866_v13  ;;  %v5082_v54 = vmul.f32 %v12089_v10, %v9079_v39  ;;  %v9189_v37 = vld [vmem:[#allocation5 + $0x36] sm:$0xff] }
 0x65f   : > { %v5083_v25 = vmul.f32 %v12089_v10, %v9172_v45  ;;  %v9191_v15 = vld [vmem:[#allocation4 + $0x37] sm:$0xff]  ;;  %v5038_v27 = vmul.f32 %v12056_v14, %v5030_v8  ;;  %v5039_v11 = vmul.f32 %v8407_v42, %v5031_v23 }
 0x660   : > { %v12090_v60 = vld [vmem:[#allocation169_spill] sm:$0xff]  ;;  %v4695_v31 = vadd.f32 %v9114_v48, %v4635_v58  ;;  %v4986_v39 = vadd.f32 %v4978_v35, %v4926_v24  ;;  %v5090_v56 = vadd.f32 %v5082_v54, %v5072_v0  ;;  %v12092_v10 = vld [vmem:[#allocation134_spill] sm:$0xff] }
 0x661   : > { %v12091_v38 = vld [vmem:[#allocation133_spill] sm:$0xff]  ;;  %v5091_v13 = vadd.f32 %v5083_v25, %v5073_v21  ;;  %v5142_v46 = vmul.f32 %v12092_v10, %v9088_v50  ;;  %v5143_v8 = vmul.f32 %v12092_v10, %v9189_v37  ;;  %v12093_v23 = vld [vmem:[#allocation170_spill] sm:$0xff] }
 0x662   : > { %v5132_v57 = vmul.f32 %v12091_v38, %v12090_v60  ;;  %v5133_v33 = vmul.f32 %v12091_v38, %v9178_v22  ;;  %v9200_v62 = vld [vmem:[#allocation5 + $0x37] sm:$0xff]  ;;  %v5192_v12 = vmul.f32 %v12094_v17, %v12093_v23  ;;  %v5193_v60 = vmul.f32 %v12094_v17, %v9191_v15 }
 0x663   : > { %v9210_v38 = vld [vmem:[#allocation4 + $0x38] sm:$0xff]  ;;  %v4755_v48 = vadd.f32 %v4747_v34, %v4695_v31  ;;  %v5046_v35 = vadd.f32 %v5038_v27, %v4986_v39  ;;  %v5098_v0 = vmul.f32 %v12058_v26, %v5090_v56  ;;  %v5099_v21 = vmul.f32 %v8196_v9, %v5091_v13  ;;  %v12095_v50 = vld [vmem:[#allocation137_spill] sm:$0xff]  ;;  %v12098_v13 = vld [vmem:[#allocation139_spill] sm:$0xff] }
 0x664   : > { %v5150_v58 = vadd.f32 %v5142_v46, %v5132_v57  ;;  %v5151_v24 = vadd.f32 %v5143_v8, %v5133_v33  ;;  %v5202_v54 = vmul.f32 %v12095_v50, %v9090_v19  ;;  %v5203_v25 = vmul.f32 %v12095_v50, %v9200_v62  ;;  %v9218_v23 = vld [vmem:[#allocation5 + $0x38] sm:$0xff] }
 0x665   : > { %v4815_v17 = vadd.f32 %v9131_v5, %v4755_v48  ;;  %v5106_v10 = vadd.f32 %v5098_v0, %v5046_v35  ;;  %v12097_v34 = vld [vmem:[#allocation138_spill] sm:$0xff]  ;;  %v5262_v5 = vmul.f32 %v12098_v13, %v9109_v4  ;;  %v5263_v8 = vmul.f32 %v12098_v13, %v9218_v23  ;;  %v12099_v48 = vld [vmem:[#allocation140_spill] sm:$0xff] }
 0x666   : > { %v5252_v27 = vmul.f32 %v12097_v34, %v12096_v40  ;;  %v5253_v31 = vmul.f32 %v12097_v34, %v9210_v38  ;;  %v9225_v39 = vld [vmem:[#allocation4 + $0x39] sm:$0xff]  ;;  %v5158_v46 = vmul.f32 %v12066_v32, %v5150_v58  ;;  %v5159_v19 = vmul.f32 %v8244_v3, %v5151_v24 }
 0x667   : > { %v5210_v57 = vadd.f32 %v5202_v54, %v5192_v12  ;;  %v5211_v33 = vadd.f32 %v5203_v25, %v5193_v60  ;;  %v4867_v56 = vadd.f32 %v9138_v51, %v4815_v17  ;;  %v9234_v40 = vld [vmem:[#allocation5 + $0x39] sm:$0xff]  ;;  %v5304_v35 = vmul.f32 %v12099_v48, %v9119_v47  ;;  %v12100_v25 = vld [vmem:[#allocation141_spill] sm:$0xff] }
 0x668   : > { %v9238_v0 = vld [vmem:[#allocation4 + $0x3a] sm:$0xff]  ;;  %v5166_v58 = vadd.f32 %v5158_v46, %v5106_v10  ;;  %v5305_v17 = vmul.f32 %v12099_v48, %v9225_v39  ;;  %v5270_v60 = vadd.f32 %v5262_v5, %v5252_v27  ;;  %v5271_v54 = vadd.f32 %v5263_v8, %v5253_v31 }
 0x669   : > { %v5218_v24 = vmul.f32 %v12068_v28, %v5210_v57  ;;  %v5219_v12 = vmul.f32 %v8277_v6, %v5211_v33  ;;  %v9244_v51 = vld [vmem:[#allocation5 + $0x3a] sm:$0xff]  ;;  %v4927_v4 = vadd.f32 %v4919_v18, %v4867_v56  ;;  %v5314_v13 = vmul.f32 %v12100_v25, %v9124_v36 }
 0x66a   : > { %v9248_v34 = vld [vmem:[#allocation4 + $0x3b] sm:$0xff]  ;;  %v5315_v10 = vmul.f32 %v12100_v25, %v9234_v40 }
 0x66b   : > { %v5226_v47 = vadd.f32 %v5218_v24, %v5166_v58  ;;  %v12101_v46 = vld [vmem:[#allocation142_spill] sm:$0xff]  ;;  %v4987_v48 = vadd.f32 %v9176_v7, %v4927_v4  ;;  %v5322_v18 = vadd.f32 %v5314_v13, %v5304_v35  ;;  %v12102_v27 = vld [vmem:[#allocation143_spill] sm:$0xff]  ;;  %v12103_v58 = vld [vmem:[#allocation144_spill] sm:$0xff] }
 0x66c   : > { %v5364_v57 = vmul.f32 %v12101_v46, %v9126_v52  ;;  %v5365_v33 = vmul.f32 %v12101_v46, %v9238_v0  ;;  %v5374_v31 = vmul.f32 %v12102_v27, %v9135_v43  ;;  %v5375_v36 = vmul.f32 %v12102_v27, %v9244_v51  ;;  %v9261_v56 = vld [vmem:[#allocation5 + $0x3b] sm:$0xff]  ;;  %v12104_v27 = vld [vmem:[#allocation145_spill] sm:$0xff] }
 0x66d   : > { %v5278_v5 = vadd.f32 %v5270_v60, %v5226_v47  ;;  %v5323_v8 = vadd.f32 %v5315_v10, %v5305_v17  ;;  %v5424_v24 = vmul.f32 %v12103_v58, %v9142_v20  ;;  %v5425_v52 = vmul.f32 %v12103_v58, %v9248_v34  ;;  %v5467_v4 = vld [vmem:[#allocation4 + $0x3d] sm:$0xff] }
 0x66e   : > { %v5047_v46 = vadd.f32 %v5039_v11, %v4987_v48  ;;  %v5330_v7 = vmul.f32 %v8200_v16, %v5322_v18  ;;  %v5382_v13 = vadd.f32 %v5374_v31, %v5364_v57  ;;  %v5383_v35 = vadd.f32 %v5375_v36, %v5365_v33  ;;  %v5475_v60 = vld [vmem:[#allocation5 + $0x3d] sm:$0xff] }
 0x66f   : > { %v5331_v43 = vmul.f32 %v8347_v2, %v5323_v8  ;;  %v5434_v25 = vmul.f32 %v12104_v27, %v9157_v55  ;;  %v5435_v17 = vmul.f32 %v12104_v27, %v9261_v56  ;;  %v12105_v20 = vld [vmem:[#allocation146_spill] sm:$0xff]  ;;  %v12106_v55 = vld [vmem:[#allocation147_spill] sm:$0xff] }
 0x670   : > { %v5484_v47 = vmul.f32 %v12105_v20, %v9164_v44  ;;  %v5107_v10 = vadd.f32 %v5099_v21, %v5047_v46  ;;  %v5338_v58 = vadd.f32 %v5330_v7, %v5278_v5  ;;  %v5390_v11 = vmul.f32 %v12054_v53, %v5382_v13  ;;  %v5527_v57 = vld [vmem:[#allocation4 + $0x3e] sm:$0xff]  ;;  %v12107_v44 = vld [vmem:[#allocation148_spill] sm:$0xff] }
 0x671   : > { %v5391_v48 = vmul.f32 %v8363_v1, %v5383_v35  ;;  %v5442_v33 = vadd.f32 %v5434_v25, %v5424_v24  ;;  %v5443_v18 = vadd.f32 %v5435_v17, %v5425_v52  ;;  %v5485_v31 = vmul.f32 %v12105_v20, %v5467_v4  ;;  %v5535_v8 = vld [vmem:[#allocation5 + $0x3e] sm:$0xff] }
 0x672   : > { %v5494_v36 = vmul.f32 %v12106_v55, %v9172_v45  ;;  %v5167_v27 = vadd.f32 %v5159_v19, %v5107_v10  ;;  %v5398_v50 = vadd.f32 %v5390_v11, %v5338_v58  ;;  %v5495_v49 = vmul.f32 %v12106_v55, %v5475_v60  ;;  %v5587_v46 = vld [vmem:[#allocation4 + $0x3f] sm:$0xff]  ;;  %v12108_v45 = vld [vmem:[#allocation149_spill] sm:$0xff] }
 0x673   : > { %v5544_v21 = vmul.f32 %v12107_v44, %v9178_v22  ;;  %v5450_v5 = vmul.f32 %v12056_v14, %v5442_v33  ;;  %v5451_v7 = vmul.f32 %v8407_v42, %v5443_v18  ;;  %v5545_v24 = vmul.f32 %v12107_v44, %v5527_v57  ;;  %v5595_v58 = vld [vmem:[#allocation5 + $0x3f] sm:$0xff]  ;;  %v12111_v18 = vld [vmem:[#allocation152_spill] sm:$0xff] }
 0x674   : > { %v5502_v25 = vadd.f32 %v5494_v36, %v5484_v47  ;;  %v5227_v52 = vadd.f32 %v5219_v12, %v5167_v27  ;;  %v5503_v13 = vadd.f32 %v5495_v49, %v5485_v31  ;;  %v5554_v35 = vmul.f32 %v12108_v45, %v9189_v37  ;;  %v12109_v17 = vld [vmem:[#allocation150_spill] sm:$0xff]  ;;  %v5647_v10 = vld [vmem:[#allocation4 + $0x40] sm:$0xff] }
 0x675   : > { %v5555_v19 = vmul.f32 %v12108_v45, %v5535_v8  ;;  %v5458_v4 = vadd.f32 %v5450_v5, %v5398_v50  ;;  %v5604_v60 = vmul.f32 %v12109_v17, %v9191_v15  ;;  %v5605_v47 = vmul.f32 %v12109_v17, %v5587_v46  ;;  %v5655_v11 = vld [vmem:[#allocation5 + $0x40] sm:$0xff]  ;;  %v12112_v5 = vld [vmem:[#allocation153_spill] sm:$0xff] }
 0x676   : > { %v5510_v22 = vmul.f32 %v12058_v26, %v5502_v25  ;;  %v5279_v49 = vadd.f32 %v5271_v54, %v5227_v52  ;;  %v5511_v12 = vmul.f32 %v8196_v9, %v5503_v13  ;;  %v5562_v37 = vadd.f32 %v5554_v35, %v5544_v21  ;;  %v12110_v33 = vld [vmem:[#allocation151_spill] sm:$0xff] }
 0x677   : > { %v5563_v27 = vadd.f32 %v5555_v19, %v5545_v24  ;;  %v5614_v50 = vmul.f32 %v12110_v33, %v9200_v62  ;;  %v5615_v26 = vmul.f32 %v12110_v33, %v5595_v58  ;;  %v5664_v15 = vmul.f32 %v12111_v18, %v9210_v38  ;;  %v5699_v31 = vld [vmem:[#allocation4 + $0x41] sm:$0xff] }
 0x678   : > { %v5518_v57 = vadd.f32 %v5510_v22, %v5458_v4  ;;  %v5339_v36 = vadd.f32 %v5331_v43, %v5279_v49  ;;  %v5570_v8 = vmul.f32 %v12066_v32, %v5562_v37  ;;  %v5665_v9 = vmul.f32 %v12111_v18, %v5647_v10  ;;  %v5707_v24 = vld [vmem:[#allocation5 + $0x41] sm:$0xff]  ;;  %v12113_v43 = vld [vmem:[#allocation154_spill] sm:$0xff] }
 0x679   : > { %v5571_v54 = vmul.f32 %v8244_v3, %v5563_v27  ;;  %v5622_v21 = vadd.f32 %v5614_v50, %v5604_v60  ;;  %v5623_v46 = vadd.f32 %v5615_v26, %v5605_v47  ;;  %v5674_v25 = vmul.f32 %v12112_v5, %v9218_v23  ;;  %v5759_v13 = vld [vmem:[#allocation4 + $0x42] sm:$0xff]  ;;  %v12156_v18 = vld [vmem:[#allocation69_spill] sm:$0xff] }
 0x67a   : > { %v5675_v62 = vmul.f32 %v12112_v5, %v5655_v11  ;;  %v5399_v52 = vadd.f32 %v5391_v48, %v5339_v36  ;;  %v5578_v38 = vadd.f32 %v5570_v8, %v5518_v57  ;;  %v5716_v32 = vmul.f32 %v12113_v43, %v9225_v39  ;;  %v12114_v22 = vld [vmem:[#allocation155_spill] sm:$0xff]  ;;  %v12115_v10 = vld [vmem:[#allocation156_spill] sm:$0xff] }
 0x67b   : > { %v5717_v3 = vmul.f32 %v12113_v43, %v5699_v31  ;;  %v5630_v35 = vmul.f32 %v12068_v28, %v5622_v21  ;;  %v5631_v19 = vmul.f32 %v8277_v6, %v5623_v46  ;;  %v5682_v23 = vadd.f32 %v5674_v25, %v5664_v15  ;;  %v5767_v47 = vld [vmem:[#allocation5 + $0x42] sm:$0xff] }
 0x67c   : > { %v5683_v58 = vadd.f32 %v5675_v62, %v5665_v9  ;;  %v5459_v4 = vadd.f32 %v5451_v7, %v5399_v52  ;;  %v5726_v60 = vmul.f32 %v12114_v22, %v9234_v40  ;;  %v5727_v48 = vmul.f32 %v12114_v22, %v5707_v24  ;;  %v5819_v49 = vld [vmem:[#allocation4 + $0x43] sm:$0xff]  ;;  %v12119_v24 = vld [vmem:[#allocation41_spill] sm:$0xff] }
 0x67d   : > { %v5776_v39 = vmul.f32 %v12115_v10, %v9238_v0  ;;  %v5638_v37 = vadd.f32 %v5630_v35, %v5578_v38  ;;  %v5777_v27 = vmul.f32 %v12115_v10, %v5759_v13  ;;  %v9323_v11 = vstv %s9289_s27  ;;  %v9330_v50 = vld [vmem:[#allocation4 + $0x1d] sm:$0xff] }
 0x67e   : > { %12116 = vst [vmem:[#allocation157_spill] sm:$0xff] %v9323_v11  ;;  %v9326_v28 = vstv %s9295_s0  ;;  %v5519_v6 = vadd.f32 %v5511_v12, %v5459_v4  ;;  %v5734_v57 = vadd.f32 %v5726_v60, %v5716_v32  ;;  %v5735_v7 = vadd.f32 %v5727_v48, %v5717_v3  ;;  %v9332_v26 = vld [vmem:[#allocation5 + $0x1d] sm:$0xff] }
 0x67f   : > { %12117 = vst [vmem:[#allocation99_spill] sm:$0xff] %v9326_v28  ;;  %v5786_v40 = vmul.f32 %v9323_v11, %v9244_v51  ;;  %v5690_v0 = vadd.f32 %v5682_v23, %v5638_v37  ;;  %v5787_v15 = vmul.f32 %v9323_v11, %v5767_v47  ;;  %v5836_v31 = vmul.f32 %v9326_v28, %v9248_v34  ;;  %v5827_v46 = vld [vmem:[#allocation5 + $0x43] sm:$0xff]  ;;  %v12122_v37 = vld [vmem:[#allocation44_spill] sm:$0xff] }
 0x680   : > { %v5837_v36 = vmul.f32 %v9326_v28, %v5819_v49  ;;  %v5579_v8 = vadd.f32 %v5571_v54, %v5519_v6  ;;  %v5742_v12 = vmul.f32 %v8200_v16, %v5734_v57  ;;  %v5743_v9 = vmul.f32 %v8347_v2, %v5735_v7  ;;  %v9340_v51 = vld [vmem:[#allocation4 + $0x1e] sm:$0xff]  ;;  %v9450_v11 = vld [vmem:[#allocation4 + $0x28] sm:$0xff] }
 0x681   : > { %v5794_v21 = vadd.f32 %v5786_v40, %v5776_v39  ;;  %v5795_v25 = vadd.f32 %v5787_v15, %v5777_v27  ;;  %v9343_v62 = vstv %s9309_s25  ;;  %v3015_v52 = vmul.f32 %v12119_v24, %v9330_v50  ;;  %v12120_v38 = vld [vmem:[#allocation42_spill] sm:$0xff]  ;;  %v12125_v15 = vld [vmem:[#allocation47_spill] sm:$0xff]  ;;  %v12139_v24 = vld [vmem:[#allocation57_spill] sm:$0xff] }
 0x682   : > { %12118 = vst [vmem:[#allocation55_spill] sm:$0xff] %v9343_v62  ;;  %v3025_v34 = vmul.f32 %v12120_v38, %v9332_v26  ;;  %v9349_v32 = vld [vmem:[#allocation5 + $0x1e] sm:$0xff]  ;;  %v5639_v54 = vadd.f32 %v5631_v19, %v5579_v8  ;;  %v5750_v3 = vadd.f32 %v5742_v12, %v5690_v0  ;;  %v5846_v2 = vmul.f32 %v9343_v62, %v9261_v56 }
 0x683   : > { %v5802_v16 = vmul.f32 %v12054_v53, %v5794_v21  ;;  %v9354_v13 = vld [vmem:[#allocation4 + $0x1f] sm:$0xff]  ;;  %v5803_v23 = vmul.f32 %v8363_v1, %v5795_v25  ;;  %v5847_v4 = vmul.f32 %v9343_v62, %v5827_v46  ;;  %v3085_v56 = vmul.f32 %v12122_v37, %v9349_v32  ;;  %v12126_v46 = vld [vmem:[#allocation48_spill] sm:$0xff] }
 0x684   : > { %v9356_v35 = vld [vmem:[#allocation5 + $0x1f] sm:$0xff]  ;;  %v3033_v60 = vadd.f32 %v3025_v34, %v3015_v52  ;;  %v5691_v19 = vadd.f32 %v5683_v58, %v5639_v54  ;;  %v5854_v53 = vadd.f32 %v5846_v2, %v5836_v31  ;;  %v12128_v2 = vld [vmem:[#allocation51_spill] sm:$0xff] }
 0x685   : > { %v12121_v48 = vld [vmem:[#allocation26_spill] sm:$0xff]  ;;  %v5810_v49 = vadd.f32 %v5802_v16, %v5750_v3  ;;  %v5855_v57 = vadd.f32 %v5847_v4, %v5837_v36  ;;  %v3145_v8 = vmul.f32 %v12125_v15, %v9356_v35  ;;  %v12127_v3 = vld [vmem:[#allocation49_spill] sm:$0xff] }
 0x686   : > { %v3075_v47 = vmul.f32 %v12121_v48, %v9340_v51  ;;  %v9362_v39 = vld [vmem:[#allocation4 + $0x20] sm:$0xff]  ;;  %v5751_v58 = vadd.f32 %v5743_v9, %v5691_v19  ;;  %v5862_v31 = vmul.f32 %v12056_v14, %v5854_v53  ;;  %v12129_v19 = vld [vmem:[#allocation108_spill] sm:$0xff] }
 0x687   : > { %v9366_v27 = vld [vmem:[#allocation5 + $0x20] sm:$0xff]  ;;  %v3195_v25 = vmul.f32 %v12126_v46, %v9362_v39  ;;  %v5863_v36 = vmul.f32 %v8407_v42, %v5855_v57  ;;  %v12131_v57 = vld [vmem:[#allocation52_spill] sm:$0xff] }
 0x688   : > { %v3228_v6 = vld [vmem:[#allocation4 + $0x19] sm:$0xff]  ;;  %v9373_v12 = vld [vmem:[#allocation4 + $0x21] sm:$0xff]  ;;  %v3093_v21 = vadd.f32 %v3085_v56, %v3075_v47  ;;  %v3205_v16 = vmul.f32 %v12127_v3, %v9366_v27  ;;  %v5811_v15 = vadd.f32 %v5803_v23, %v5751_v58  ;;  %v5870_v9 = vadd.f32 %v5862_v31, %v5810_v49 }
 0x689   : > { %v12123_v7 = vld [vmem:[#allocation107_spill] sm:$0xff]  ;;  %v3246_v4 = vmul.f32 %v12128_v2, %v3228_v6  ;;  %v3247_v47 = vmul.f32 %v12128_v2, %v9373_v12  ;;  %v12132_v31 = vld [vmem:[#allocation53_spill] sm:$0xff] }
 0x68a   : > { %v3041_v1 = vmul.f32 %v12123_v7, %v3033_v60  ;;  %v12124_v40 = vld [vmem:[#allocation46_spill] sm:$0xff]  ;;  %v3101_v14 = vmul.f32 %v12129_v19, %v3093_v21  ;;  %v3213_v42 = vadd.f32 %v3205_v16, %v3195_v25  ;;  %v5871_v23 = vadd.f32 %v5863_v36, %v5811_v15 }
 0x68b   : > { %v3135_v0 = vmul.f32 %v12124_v40, %v9354_v13  ;;  %v3236_v52 = vld [vmem:[#allocation5 + $0x19] sm:$0xff]  ;;  %v9378_v34 = vld [vmem:[#allocation5 + $0x21] sm:$0xff]  ;;  %v6356_v49 = vmul.f32 -1.442695, %v5870_v9 }
 0x68c   : > { %v3288_v60 = vld [vmem:[#allocation4 + $0x1a] sm:$0xff]  ;;  %v9387_v53 = vld [vmem:[#allocation4 + $0x22] sm:$0xff]  ;;  %v3109_v58 = vadd.f32 %v3101_v14, %v3041_v1 }
 0x68d   : > { %v3153_v54 = vadd.f32 %v3145_v8, %v3135_v0  ;;  %v3296_v56 = vld [vmem:[#allocation5 + $0x1a] sm:$0xff]  ;;  %v3256_v0 = vmul.f32 %v12131_v57, %v3236_v52  ;;  %v3257_v8 = vmul.f32 %v12131_v57, %v9378_v34  ;;  %v9393_v6 = vld [vmem:[#allocation5 + $0x22] sm:$0xff]  ;;  %v3306_v21 = vmul.f32 %v12132_v31, %v3288_v60 }
 0x68e   : > { %v12130_v46 = vld [vmem:[#allocation111_spill] sm:$0xff]  ;;  %v3307_v48 = vmul.f32 %v12132_v31, %v9387_v53  ;;  %6578 = vpow2.f32 %v6356_v49  ;;  %v6357_v52 = vmul.f32 -1.442695, %v5871_v23  ;;  %v12134_v60 = vld [vmem:[#allocation112_spill] sm:$0xff] }
 0x68f   : > { %v3161_v40 = vmul.f32 %v12130_v46, %v3153_v54  ;;  %v3348_v3 = vld [vmem:[#allocation4 + $0x1b] sm:$0xff]  ;;  %v3264_v2 = vadd.f32 %v3256_v0, %v3246_v4  ;;  %v3265_v37 = vadd.f32 %v3257_v8, %v3247_v47  ;;  %v9399_v16 = vld [vmem:[#allocation4 + $0x23] sm:$0xff]  ;;  %v12136_v0 = vld [vmem:[#allocation56_spill] sm:$0xff] }
 0x690   : > { %v12133_v54 = vld [vmem:[#allocation54_spill] sm:$0xff]  ;;  %v3366_v8 = vmul.f32 %v12136_v0, %v3348_v3  ;;  %6580 = vpow2.f32 %v6357_v52 }
 0x691   : > { %v3316_v25 = vmul.f32 %v12133_v54, %v3296_v56  ;;  %v3169_v57 = vadd.f32 %v3161_v40, %v3109_v58  ;;  %v3317_v15 = vmul.f32 %v12133_v54, %v9393_v6  ;;  %v3356_v36 = vld [vmem:[#allocation5 + $0x1b] sm:$0xff]  ;;  %v9403_v1 = vld [vmem:[#allocation5 + $0x23] sm:$0xff]  ;;  %v3272_v9 = vmul.f32 %v12134_v60, %v3264_v2 }
 0x692   : > { %v12135_v4 = vld [vmem:[#allocation115_spill] sm:$0xff]  ;;  %v3367_v40 = vmul.f32 %v12136_v0, %v9399_v16  ;;  %v12138_v54 = vld [vmem:[#allocation118_spill] sm:$0xff]  ;;  %v3376_v62 = vmul.f32 %v12139_v24, %v3356_v36  ;;  %v12142_v36 = vld [vmem:[#allocation60_spill] sm:$0xff] }
 0x693   : > { %v3273_v14 = vmul.f32 %v12135_v4, %v3265_v37  ;;  %v3324_v47 = vadd.f32 %v3316_v25, %v3306_v21  ;;  %v9408_v31 = vld [vmem:[#allocation4 + $0x25] sm:$0xff]  ;;  %v3221_v56 = vadd.f32 %v3213_v42, %v3169_v57  ;;  %v3325_v49 = vadd.f32 %v3317_v15, %v3307_v48 }
 0x694   : > { %v12137_v23 = vld [vmem:[#allocation135_spill] sm:$0xff]  ;;  %v3377_v37 = vmul.f32 %v12139_v24, %v9403_v1  ;;  %v12141_v48 = vld [vmem:[#allocation59_spill] sm:$0xff] }
 0x695   : > { %v3280_v58 = vadd.f32 %v3272_v9, %v12137_v23  ;;  %v3332_v38 = vmul.f32 %v12138_v54, %v3324_v47  ;;  %v9417_v2 = vld [vmem:[#allocation5 + $0x25] sm:$0xff]  ;;  %v3281_v21 = vadd.f32 %v3273_v14, %v3221_v56  ;;  %v3426_v57 = vmul.f32 %v12141_v48, %v9330_v50  ;;  %v12143_v56 = vld [vmem:[#allocation61_spill] sm:$0xff] }
 0x696   : > { %v9419_v3 = vld [vmem:[#allocation4 + $0x26] sm:$0xff]  ;;  %v3427_v52 = vmul.f32 %v12141_v48, %v9408_v31  ;;  %v3384_v9 = vadd.f32 %v3376_v62, %v3366_v8  ;;  %v3385_v47 = vadd.f32 %v3377_v37, %v3367_v40  ;;  %v3436_v23 = vmul.f32 %v12142_v36, %v9332_v26 }
 0x697   : > { %v12140_v25 = vld [vmem:[#allocation119_spill] sm:$0xff]  ;;  %v3340_v15 = vadd.f32 %v3332_v38, %v3280_v58  ;;  %v3437_v14 = vmul.f32 %v12142_v36, %v9417_v2  ;;  %v3486_v50 = vmul.f32 %v12143_v56, %v9340_v51  ;;  %v12144_v38 = vld [vmem:[#allocation121_spill] sm:$0xff]  ;;  %v12147_v36 = vld [vmem:[#allocation63_spill] sm:$0xff] }
 0x698   : > { %v3333_v42 = vmul.f32 %v12140_v25, %v3325_v49  ;;  %v9428_v24 = vld [vmem:[#allocation5 + $0x26] sm:$0xff]  ;;  %v3487_v49 = vmul.f32 %v12143_v56, %v9419_v3  ;;  %v3392_v62 = vmul.f32 %v12144_v38, %v3384_v9  ;;  %v3444_v58 = vadd.f32 %v3436_v23, %v3426_v57  ;;  %v12148_v57 = vld [vmem:[#allocation101_spill] sm:$0xff] }
 0x699   : > { %v9430_v0 = vld [vmem:[#allocation4 + $0x27] sm:$0xff]  ;;  %v3546_v51 = vmul.f32 %v12147_v36, %v9354_v13 }
 0x69a   : > { %v3341_v28 = vadd.f32 %v3333_v42, %v3281_v21  ;;  %v12145_v8 = vld [vmem:[#allocation123_spill] sm:$0xff]  ;;  %v3445_v21 = vadd.f32 %v3437_v14, %v3427_v52  ;;  %v3547_v56 = vmul.f32 %v12147_v36, %v9430_v0  ;;  %v3400_v9 = vadd.f32 %v3392_v62, %v3340_v15  ;;  %v12149_v52 = vld [vmem:[#allocation64_spill] sm:$0xff]  ;;  %v9458_v13 = vld [vmem:[#allocation5 + $0x28] sm:$0xff] }
 0x69b   : > { %v3393_v40 = vmul.f32 %v12145_v8, %v3385_v47  ;;  %v12146_v26 = vld [vmem:[#allocation62_spill] sm:$0xff]  ;;  %v3452_v23 = vmul.f32 %v12148_v57, %v3444_v58  ;;  %v3556_v14 = vmul.f32 %v12149_v52, %v9356_v35  ;;  %v12150_v36 = vld [vmem:[#allocation102_spill] sm:$0xff]  ;;  %v9466_v35 = vld [vmem:[#allocation4 + $0x29] sm:$0xff] }
 0x69c   : > { %v3496_v37 = vmul.f32 %v12146_v26, %v9349_v32  ;;  %v9442_v48 = vld [vmem:[#allocation5 + $0x27] sm:$0xff]  ;;  %v3497_v42 = vmul.f32 %v12146_v26, %v9428_v24  ;;  %v3453_v32 = vmul.f32 %v12123_v7, %v3445_v21  ;;  %v12151_v15 = vld [vmem:[#allocation65_spill] sm:$0xff] }
 0x69d   : > { %v3401_v47 = vadd.f32 %v3393_v40, %v3341_v28  ;;  %v3557_v26 = vmul.f32 %v12149_v52, %v9442_v48  ;;  %v3460_v43 = vadd.f32 %v3452_v23, %v3400_v9  ;;  %v3606_v28 = vmul.f32 %v12151_v15, %v9362_v39  ;;  %v12153_v39 = vld [vmem:[#allocation67_spill] sm:$0xff] }
 0x69e   : > { %v3504_v10 = vadd.f32 %v3496_v37, %v3486_v50  ;;  %v3505_v22 = vadd.f32 %v3497_v42, %v3487_v49  ;;  %v3607_v50 = vmul.f32 %v12151_v15, %v9450_v11  ;;  %v3564_v40 = vadd.f32 %v3556_v14, %v3546_v51  ;;  %v6579_v37 = vpop.eup %6578  ;;  %v12152_v42 = vld [vmem:[#allocation66_spill] sm:$0xff]  ;;  %v12155_v14 = vld [vmem:[#allocation68_spill] sm:$0xff] }
 0x69f   : > { %v3461_v62 = vadd.f32 %v3453_v32, %v3401_v47  ;;  %v3565_v58 = vadd.f32 %v3557_v26, %v3547_v56  ;;  %v3616_v9 = vmul.f32 %v12152_v42, %v9366_v27  ;;  %v3658_v23 = vmul.f32 %v12153_v39, %v9373_v12  ;;  %v12154_v47 = vld [vmem:[#allocation106_spill] sm:$0xff]  ;;  %v9476_v56 = vld [vmem:[#allocation5 + $0x29] sm:$0xff] }
 0x6a0   : > { %v3512_v5 = vmul.f32 %v12150_v36, %v3504_v10  ;;  %v3513_v49 = vmul.f32 %v12129_v19, %v3505_v22  ;;  %v3617_v10 = vmul.f32 %v12152_v42, %v9458_v13  ;;  %v5902_v52 = vadd.f32 1.0, %v6579_v37  ;;  %v9478_v26 = vld [vmem:[#allocation4 + $0x2a] sm:$0xff] }
 0x6a1   : > { %v3572_v32 = vmul.f32 %v12154_v47, %v3564_v40  ;;  %v3573_v22 = vmul.f32 %v12130_v46, %v3565_v58  ;;  %v3659_v27 = vmul.f32 %v12153_v39, %v9466_v35  ;;  %v3668_v42 = vmul.f32 %v12155_v14, %v9378_v34  ;;  %v9484_v40 = vld [vmem:[#allocation5 + $0x2a] sm:$0xff]  ;;  %v12161_v39 = vld [vmem:[#allocation73_spill] sm:$0xff] }
 0x6a2   : > { %v3520_v21 = vadd.f32 %v3512_v5, %v3460_v43  ;;  %v3521_v15 = vadd.f32 %v3513_v49, %v3461_v62  ;;  %v6581_v5 = vpop.eup %6580  ;;  %v3624_v43 = vadd.f32 %v3616_v9, %v3606_v28  ;;  %v3625_v51 = vadd.f32 %v3617_v10, %v3607_v50  ;;  %v9492_v9 = vld [vmem:[#allocation4 + $0x2b] sm:$0xff] }
 0x6a3   : > { %v5903_v12 = vadd.f32 1.0, %v6581_v5  ;;  %6582 = vrcp.f32 %v5902_v52  ;;  %v3669_v58 = vmul.f32 %v12155_v14, %v9476_v56  ;;  %v3676_v37 = vadd.f32 %v3668_v42, %v3658_v23  ;;  %v9494_v10 = vld [vmem:[#allocation5 + $0x2b] sm:$0xff] }
 0x6a4   : > { %v3580_v62 = vadd.f32 %v3572_v32, %v3520_v21  ;;  %v3581_v49 = vadd.f32 %v3573_v22, %v3521_v15  ;;  %v3718_v28 = vmul.f32 %v12156_v18, %v9387_v53  ;;  %v3719_v50 = vmul.f32 %v12156_v18, %v9478_v26  ;;  %v12157_v15 = vld [vmem:[#allocation70_spill] sm:$0xff]  ;;  %v12158_v53 = vld [vmem:[#allocation71_spill] sm:$0xff] }
 0x6a5   : > { %6584 = vrcp.f32 %v5903_v12  ;;  %v3728_v21 = vmul.f32 %v12157_v15, %v9393_v6  ;;  %v3677_v32 = vadd.f32 %v3669_v58, %v3659_v27  ;;  %v3684_v22 = vmul.f32 %v12134_v60, %v3676_v37  ;;  %v9503_v5 = vld [vmem:[#allocation4 + $0x2d] sm:$0xff] }
 0x6a6   : > { %v3632_v34 = vadd.f32 %v3624_v43, %v3580_v62  ;;  %v3633_v52 = vadd.f32 %v3625_v51, %v3581_v49  ;;  %v3729_v42 = vmul.f32 %v12157_v15, %v9484_v40  ;;  %v3778_v23 = vmul.f32 %v12158_v53, %v9399_v16  ;;  %v12159_v43 = vld [vmem:[#allocation72_spill] sm:$0xff]  ;;  %v12160_v16 = vld [vmem:[#allocation74_spill] sm:$0xff] }
 0x6a7   : > { %v3736_v18 = vadd.f32 %v3728_v21, %v3718_v28  ;;  %v3779_v12 = vmul.f32 %v12158_v53, %v9492_v9  ;;  %v3788_v51 = vmul.f32 %v12159_v43, %v9403_v1  ;;  %v3789_v6 = vmul.f32 %v12159_v43, %v9494_v10  ;;  %v9511_v27 = vld [vmem:[#allocation5 + $0x2d] sm:$0xff] }
 0x6a8   : > { %v3685_v62 = vmul.f32 %v12135_v4, %v3677_v32  ;;  %v3692_v49 = vadd.f32 %v3684_v22, %v3632_v34  ;;  %v3737_v58 = vadd.f32 %v3729_v42, %v3719_v50  ;;  %v3838_v37 = vmul.f32 %v12160_v16, %v9408_v31  ;;  %v9519_v1 = vld [vmem:[#allocation4 + $0x2e] sm:$0xff] }
 0x6a9   : > { %v3744_v28 = vmul.f32 %v12138_v54, %v3736_v18  ;;  %v3796_v21 = vadd.f32 %v3788_v51, %v3778_v23  ;;  %v3797_v15 = vadd.f32 %v3789_v6, %v3779_v12  ;;  %v3839_v53 = vmul.f32 %v12160_v16, %v9503_v5  ;;  %v9526_v34 = vld [vmem:[#allocation5 + $0x2e] sm:$0xff] }
 0x6aa   : > { %v3693_v14 = vadd.f32 %v3685_v62, %v3633_v52  ;;  %v3745_v43 = vmul.f32 %v12140_v25, %v3737_v58  ;;  %v3848_v32 = vmul.f32 %v12161_v39, %v9417_v2  ;;  %v3849_v50 = vmul.f32 %v12161_v39, %v9511_v27  ;;  %v12162_v42 = vld [vmem:[#allocation76_spill] sm:$0xff] }
 0x6ab   : > { %v3752_v31 = vadd.f32 %v3744_v28, %v3692_v49  ;;  %v3804_v18 = vmul.f32 %v12144_v38, %v3796_v21  ;;  %v3805_v22 = vmul.f32 %v12145_v8, %v3797_v15  ;;  %v3898_v23 = vmul.f32 %v12162_v42, %v9419_v3  ;;  %v9532_v12 = vld [vmem:[#allocation4 + $0x2f] sm:$0xff]  ;;  %v12164_v21 = vld [vmem:[#allocation78_spill] sm:$0xff] }
 0x6ac   : > { %v3753_v52 = vadd.f32 %v3745_v43, %v3693_v14  ;;  %v3856_v51 = vadd.f32 %v3848_v32, %v3838_v37  ;;  %v3857_v6 = vadd.f32 %v3849_v50, %v3839_v53  ;;  %v3899_v2 = vmul.f32 %v12162_v42, %v9519_v1  ;;  %v9536_v62 = vld [vmem:[#allocation5 + $0x2f] sm:$0xff] }
 0x6ad   : > { %v3812_v58 = vadd.f32 %v3804_v18, %v3752_v31  ;;  %v12163_v49 = vld [vmem:[#allocation75_spill] sm:$0xff]  ;;  %v3958_v3 = vmul.f32 %v12164_v21, %v9430_v0  ;;  %v9544_v39 = vld [vmem:[#allocation4 + $0x30] sm:$0xff]  ;;  %v3959_v37 = vmul.f32 %v12164_v21, %v9532_v12 }
 0x6ae   : > { %v3908_v28 = vmul.f32 %v12163_v49, %v9428_v24  ;;  %v3909_v15 = vmul.f32 %v12163_v49, %v9526_v34  ;;  %v3813_v14 = vadd.f32 %v3805_v22, %v3753_v52  ;;  %v3864_v53 = vmul.f32 %v12148_v57, %v3856_v51  ;;  %v12165_v24 = vld [vmem:[#allocation77_spill] sm:$0xff]  ;;  %v12166_v22 = vld [vmem:[#allocation83_spill] sm:$0xff]  ;;  %v9561_v21 = vld [vmem:[#allocation5 + $0x30] sm:$0xff] }
 0x6af   : > { %v3865_v43 = vmul.f32 %v12123_v7, %v3857_v6  ;;  %v3968_v31 = vmul.f32 %v12165_v24, %v9442_v48  ;;  %v3969_v18 = vmul.f32 %v12165_v24, %v9536_v62  ;;  %v4018_v52 = vmul.f32 %v12166_v22, %v9450_v11 }
 0x6b0   : > { %v3916_v32 = vadd.f32 %v3908_v28, %v3898_v23  ;;  %v3917_v50 = vadd.f32 %v3909_v15, %v3899_v2  ;;  %v6583_v49 = vpop.eup %6582  ;;  %v3872_v0 = vadd.f32 %v3864_v53, %v3812_v58  ;;  %v4019_v51 = vmul.f32 %v12166_v22, %v9544_v39  ;;  %v9565_v53 = vld [vmem:[#allocation4 + $0x31] sm:$0xff] }
 0x6b1   : > { %v3873_v42 = vadd.f32 %v3865_v43, %v3813_v14  ;;  %vm5926_vm7 = vcmp.gt.f32.partialorder %v6583_v49, 0.05  ;;  %vm5934_vm5 = vcmp.lt.f32.partialorder %v6583_v49, 0.05  ;;  %v12167_v48 = vmov 0.5  }
 0x6b2   : > { %v3924_v23 = vmul.f32 %v12150_v36, %v3916_v32  ;;  %v3925_v6 = vmul.f32 %v12129_v19, %v3917_v50  ;;  %v6585_v2 = vpop.eup %6584  ;;  %v5942_v28 = vsel %vm5934_vm5, 0.0, %v12167_v48  ;;  %v3976_v15 = vadd.f32 %v3968_v31, %v3958_v3  ;;  %v9570_v3 = vld [vmem:[#allocation5 + $0x31] sm:$0xff] }
 0x6b3   : > { %v3977_v24 = vadd.f32 %v3969_v18, %v3959_v37  ;;  %v4028_v58 = vmul.f32 %v8506_v30, %v9458_v13  ;;  %vm5927_vm6 = vcmp.gt.f32.partialorder %v6585_v2, 0.05  ;;  %vm5935_vm8 = vcmp.lt.f32.partialorder %v6585_v2, 0.05  ;;  %v12168_v18 = vld [vmem:[#allocation86_spill] sm:$0xff] }
 0x6b4   : > { %v5950_v11 = vsel %vm5926_vm7, 1.0, %v5942_v28  ;;  %v3932_v14 = vadd.f32 %v3924_v23, %v3872_v0  ;;  %v5943_v49 = vsel %vm5935_vm8, 0.0, %v12167_v48  ;;  %v3933_v43 = vadd.f32 %v3925_v6, %v3873_v42  ;;  %v9576_v0 = vld [vmem:[#allocation4 + $0x32] sm:$0xff] }
 0x6b5   : > { %v3984_v32 = vmul.f32 %v12154_v47, %v3976_v15  ;;  %v3985_v50 = vmul.f32 %v12130_v46, %v3977_v24  ;;  %v5951_v37 = vsel %vm5927_vm6, 1.0, %v5943_v49  ;;  %v4029_v31 = vmul.f32 %v8506_v30, %v9561_v21  ;;  %v9578_v23 = vld [vmem:[#allocation5 + $0x32] sm:$0xff] }
 0x6b6   : > { %v4036_v13 = vadd.f32 %v4028_v58, %v4018_v52  ;;  %v4070_v2 = vmul.f32 %v12168_v18, %v9466_v35  ;;  %v6528_v28 = vpack.i.bf16 %v5951_v37, %v5950_v11  ;;  %v4071_v24 = vmul.f32 %v12168_v18, %v9565_v53  ;;  %v12169_v58 = vld [vmem:[#allocation88_spill] sm:$0xff]  ;;  %v9588_v30 = vld [vmem:[#allocation4 + $0x33] sm:$0xff] }
 0x6b7   : > { %v3992_v42 = vadd.f32 %v3984_v32, %v3932_v14  ;;  %v3993_v6 = vadd.f32 %v3985_v50, %v3933_v43  ;;  %v4037_v15 = vadd.f32 %v4029_v31, %v4019_v51  ;;  %v4080_v49 = vmul.f32 %v8527_v61, %v9476_v56  ;;  %v12170_v14 = vld [vmem:[#allocation89_spill] sm:$0xff] }
 0x6b8   : > { %v4081_v52 = vmul.f32 %v8527_v61, %v9570_v3  ;;  %v4130_v35 = vmul.f32 %v12169_v58, %v9478_v26  ;;  %6529 = vperm.xlu1 %6527, %v6528_v28   ;;  %v4131_v11 = vmul.f32 %v12169_v58, %v9576_v0  ;;  %v4140_v43 = vmul.f32 %v12170_v14, %v9484_v40  ;;  %v9596_v56 = vld [vmem:[#allocation5 + $0x33] sm:$0xff]  ;;  %v12172_v40 = vld [vmem:[#allocation91_spill] sm:$0xff] }
 0x6b9   : > { %v4044_v22 = vadd.f32 %v4036_v13, %v3992_v42  ;;  %v4141_v51 = vmul.f32 %v12170_v14, %v9578_v23  ;;  %v4045_v32 = vadd.f32 %v4037_v15, %v3993_v6  ;;  %v4088_v50 = vadd.f32 %v4080_v49, %v4070_v2  ;;  %v12171_v26 = vld [vmem:[#allocation90_spill] sm:$0xff] }
 0x6ba   : > { %v4089_v37 = vadd.f32 %v4081_v52, %v4071_v24  ;;  %v4190_v31 = vmul.f32 %v12171_v26, %v9492_v9  ;;  %v9600_v61 = vld [vmem:[#allocation4 + $0x35] sm:$0xff]  ;;  %v4148_v13 = vadd.f32 %v4140_v43, %v4130_v35  ;;  %v4191_v42 = vmul.f32 %v12171_v26, %v9588_v30  ;;  %v12173_v9 = vld [vmem:[#allocation27_spill] sm:$0xff] }
 0x6bb   : > { %v4149_v28 = vadd.f32 %v4141_v51, %v4131_v11  ;;  %v4200_v58 = vmul.f32 %v12172_v40, %v9494_v10  ;;  %v4096_v14 = vmul.f32 %v12134_v60, %v4088_v50  ;;  %v4201_v2 = vmul.f32 %v12172_v40, %v9596_v56  ;;  %v9610_v6 = vld [vmem:[#allocation5 + $0x35] sm:$0xff]  ;;  %v12174_v50 = vld [vmem:[#allocation92_spill] sm:$0xff] }
 0x6bc   : > { %v4097_v18 = vmul.f32 %v12135_v4, %v4089_v37  ;;  %v4250_v24 = vmul.f32 %v12173_v9, %v9503_v5  ;;  %v9614_v15 = vld [vmem:[#allocation4 + $0x36] sm:$0xff]  ;;  %v4156_v49 = vmul.f32 %v12138_v54, %v4148_v13  ;;  %v4251_v10 = vmul.f32 %v12173_v9, %v9600_v61 }
 0x6bd   : > { %v4157_v52 = vmul.f32 %v12140_v25, %v4149_v28  ;;  %v4208_v35 = vadd.f32 %v4200_v58, %v4190_v31  ;;  %v4104_v11 = vadd.f32 %v4096_v14, %v4044_v22  ;;  %v4209_v51 = vadd.f32 %v4201_v2, %v4191_v42  ;;  %v9622_v40 = vld [vmem:[#allocation5 + $0x36] sm:$0xff] }
 0x6be   : > { %v4105_v43 = vadd.f32 %v4097_v18, %v4045_v32  ;;  %v4260_v37 = vmul.f32 %v12174_v50, %v9511_v27  ;;  %v4261_v26 = vmul.f32 %v12174_v50, %v9610_v6  ;;  %v12175_v13 = vld [vmem:[#allocation93_spill] sm:$0xff]  ;;  %v12176_v42 = vld [vmem:[#allocation94_spill] sm:$0xff] }
 0x6bf   : > { %v4216_v5 = vmul.f32 %v12144_v38, %v4208_v35  ;;  %v4310_v28 = vmul.f32 %v12175_v13, %v9519_v1  ;;  %v4311_v58 = vmul.f32 %v12175_v13, %v9614_v15  ;;  %v9631_v31 = vld [vmem:[#allocation4 + $0x37] sm:$0xff]  ;;  %v4164_v22 = vadd.f32 %v4156_v49, %v4104_v11  ;;  %v12177_v1 = vld [vmem:[#allocation95_spill] sm:$0xff]  ;;  %v12178_v11 = vld [vmem:[#allocation96_spill] sm:$0xff] }
 0x6c0   : > { %v4165_v18 = vadd.f32 %v4157_v52, %v4105_v43  ;;  %v4217_v14 = vmul.f32 %v12145_v8, %v4209_v51  ;;  %v4268_v27 = vadd.f32 %v4260_v37, %v4250_v24  ;;  %v4269_v32 = vadd.f32 %v4261_v26, %v4251_v10  ;;  %v9638_v50 = vld [vmem:[#allocation5 + $0x37] sm:$0xff] }
 0x6c1   : > { %v4320_v2 = vmul.f32 %v12176_v42, %v9526_v34  ;;  %v4321_v35 = vmul.f32 %v12176_v42, %v9622_v40  ;;  %v4370_v9 = vmul.f32 %v12177_v1, %v9532_v12  ;;  %v9642_v13 = vld [vmem:[#allocation4 + $0x38] sm:$0xff]  ;;  %v4224_v16 = vadd.f32 %v4216_v5, %v4164_v22  ;;  %v12179_v5 = vld [vmem:[#allocation97_spill] sm:$0xff] }
 0x6c2   : > { %v4225_v49 = vadd.f32 %v4217_v14, %v4165_v18  ;;  %v4276_v52 = vmul.f32 %v12148_v57, %v4268_v27  ;;  %v4371_v26 = vmul.f32 %v12177_v1, %v9631_v31  ;;  %v4277_v24 = vmul.f32 %v12123_v7, %v4269_v32  ;;  %v9650_v51 = vld [vmem:[#allocation5 + $0x38] sm:$0xff] }
 0x6c3   : > { %v4328_v34 = vadd.f32 %v4320_v2, %v4310_v28  ;;  %v4329_v10 = vadd.f32 %v4321_v35, %v4311_v58  ;;  %v4380_v43 = vmul.f32 %v12178_v11, %v9536_v62  ;;  %v4381_v12 = vmul.f32 %v12178_v11, %v9638_v50  ;;  %v9658_v14 = vld [vmem:[#allocation4 + $0x39] sm:$0xff] }
 0x6c4   : > { %v4284_v37 = vadd.f32 %v4276_v52, %v4224_v16  ;;  %v4430_v22 = vmul.f32 %v12179_v5, %v9544_v39  ;;  %v4431_v18 = vmul.f32 %v12179_v5, %v9642_v13  ;;  %v4285_v27 = vadd.f32 %v4277_v24, %v4225_v49  ;;  %v9666_v35 = vld [vmem:[#allocation5 + $0x39] sm:$0xff]  ;;  %v12180_v39 = vld [vmem:[#allocation28_spill] sm:$0xff] }
 0x6c5   : > { %v4336_v28 = vmul.f32 %v12150_v36, %v4328_v34  ;;  %v4337_v58 = vmul.f32 %v12129_v19, %v4329_v10  ;;  %v4388_v62 = vadd.f32 %v4380_v43, %v4370_v9  ;;  %v4389_v32 = vadd.f32 %v4381_v12, %v4371_v26  ;;  %v9670_v5 = vld [vmem:[#allocation4 + $0x3a] sm:$0xff] }
 0x6c6   : > { %v4440_v16 = vmul.f32 %v8579_v63, %v9561_v21  ;;  %v4441_v2 = vmul.f32 %v8579_v63, %v9650_v51  ;;  %v4482_v52 = vmul.f32 %v12180_v39, %v9565_v53  ;;  %v4483_v9 = vmul.f32 %v12180_v39, %v9658_v14  ;;  %v9675_v26 = vld [vmem:[#allocation5 + $0x3a] sm:$0xff] }
 0x6c7   : > { %v4344_v49 = vadd.f32 %v4336_v28, %v4284_v37  ;;  %v4345_v24 = vadd.f32 %v4337_v58, %v4285_v27  ;;  %v4396_v34 = vmul.f32 %v12154_v47, %v4388_v62  ;;  %v4397_v21 = vmul.f32 %v12130_v46, %v4389_v32  ;;  %v9680_v63 = vld [vmem:[#allocation4 + $0x3b] sm:$0xff] }
 0x6c8   : > { %v4448_v10 = vadd.f32 %v4440_v16, %v4430_v22  ;;  %v4449_v43 = vadd.f32 %v4441_v2, %v4431_v18  ;;  %v4492_v12 = vmul.f32 %v12065_v29, %v9570_v3  ;;  %v4493_v37 = vmul.f32 %v12065_v29, %v9666_v35  ;;  %v12181_v27 = vld [vmem:[#allocation103_spill] sm:$0xff]  ;;  %v12182_v2 = vld [vmem:[#allocation105_spill] sm:$0xff] }
 0x6c9   : > { %v4404_v53 = vadd.f32 %v4396_v34, %v4344_v49  ;;  %v4542_v28 = vmul.f32 %v12181_v27, %v9576_v0  ;;  %v4543_v58 = vmul.f32 %v12181_v27, %v9670_v5  ;;  %v4405_v62 = vadd.f32 %v4397_v21, %v4345_v24  ;;  %v9692_v18 = vld [vmem:[#allocation5 + $0x3b] sm:$0xff] }
 0x6ca   : > { %v4500_v39 = vadd.f32 %v4492_v12, %v4482_v52  ;;  %v4552_v22 = vmul.f32 %v12069_v41, %v9578_v23  ;;  %v4553_v3 = vmul.f32 %v12069_v41, %v9675_v26  ;;  %v4501_v16 = vadd.f32 %v4493_v37, %v4483_v9  ;;  %v9698_v34 = vld [vmem:[#allocation4 + $0x3d] sm:$0xff] }
 0x6cb   : > { %v4456_v32 = vadd.f32 %v4448_v10, %v4404_v53  ;;  %v4602_v49 = vmul.f32 %v12182_v2, %v9588_v30  ;;  %v4603_v0 = vmul.f32 %v12182_v2, %v9680_v63  ;;  %v4457_v24 = vadd.f32 %v4449_v43, %v4405_v62  ;;  %v9706_v10 = vld [vmem:[#allocation5 + $0x3d] sm:$0xff] }
 0x6cc   : > { %v4508_v52 = vmul.f32 %v12134_v60, %v4500_v39  ;;  %v4560_v21 = vadd.f32 %v4552_v22, %v4542_v28  ;;  %v4561_v23 = vadd.f32 %v4553_v3, %v4543_v58  ;;  %v4509_v12 = vmul.f32 %v12135_v4, %v4501_v16  ;;  %v12183_v30 = vld [vmem:[#allocation110_spill] sm:$0xff]  ;;  %v12184_v3 = vld [vmem:[#allocation113_spill] sm:$0xff] }
 0x6cd   : > { %v4612_v41 = vmul.f32 %v12070_v59, %v9596_v56  ;;  %v4613_v9 = vmul.f32 %v12070_v59, %v9692_v18  ;;  %v4662_v53 = vmul.f32 %v12183_v30, %v9600_v61  ;;  %v9710_v37 = vld [vmem:[#allocation4 + $0x3e] sm:$0xff]  ;;  %v4663_v58 = vmul.f32 %v12183_v30, %v9698_v34 }
 0x6ce   : > { %v4516_v43 = vadd.f32 %v4508_v52, %v4456_v32  ;;  %v4568_v39 = vmul.f32 %v12138_v54, %v4560_v21  ;;  %v4569_v28 = vmul.f32 %v12140_v25, %v4561_v23  ;;  %v4517_v62 = vadd.f32 %v4509_v12, %v4457_v24  ;;  %v9718_v59 = vld [vmem:[#allocation5 + $0x3e] sm:$0xff]  ;;  %v12186_v12 = vld [vmem:[#allocation116_spill] sm:$0xff] }
 0x6cf   : > { %v4620_v56 = vadd.f32 %v4612_v41, %v4602_v49  ;;  %v4621_v22 = vadd.f32 %v4613_v9, %v4603_v0  ;;  %v4672_v16 = vmul.f32 %v12184_v3, %v9610_v6  ;;  %v4673_v61 = vmul.f32 %v12184_v3, %v9706_v10  ;;  %v12185_v32 = vld [vmem:[#allocation114_spill] sm:$0xff]  ;;  %v9738_v3 = vld [vmem:[#allocation4 + $0x40] sm:$0xff] }
 0x6d0   : > { %v4576_v2 = vadd.f32 %v4568_v39, %v4516_v43  ;;  %v4722_v52 = vmul.f32 %v12185_v32, %v9614_v15  ;;  %v4723_v21 = vmul.f32 %v12185_v32, %v9710_v37  ;;  %v9726_v23 = vld [vmem:[#allocation4 + $0x3f] sm:$0xff]  ;;  %v4577_v24 = vadd.f32 %v4569_v28, %v4517_v62  ;;  %v12187_v15 = vld [vmem:[#allocation117_spill] sm:$0xff] }
 0x6d1   : > { %v4628_v41 = vmul.f32 %v12144_v38, %v4620_v56  ;;  %v4629_v49 = vmul.f32 %v12145_v8, %v4621_v22  ;;  %v4680_v6 = vadd.f32 %v4672_v16, %v4662_v53  ;;  %v4681_v0 = vadd.f32 %v4673_v61, %v4663_v58  ;;  %v9734_v39 = vld [vmem:[#allocation5 + $0x3f] sm:$0xff]  ;;  %v12188_v16 = vld [vmem:[#allocation120_spill] sm:$0xff] }
 0x6d2   : > { %v4732_v9 = vmul.f32 %v12186_v12, %v9622_v40  ;;  %v4733_v43 = vmul.f32 %v12186_v12, %v9718_v59  ;;  %v4782_v32 = vmul.f32 %v12187_v15, %v9631_v31  ;;  %v4783_v53 = vmul.f32 %v12187_v15, %v9726_v23  ;;  %v9746_v12 = vld [vmem:[#allocation5 + $0x40] sm:$0xff] }
 0x6d3   : > { %v4636_v28 = vadd.f32 %v4628_v41, %v4576_v2  ;;  %v4637_v62 = vadd.f32 %v4629_v49, %v4577_v24  ;;  %v4688_v56 = vmul.f32 %v12148_v57, %v4680_v6  ;;  %v4689_v58 = vmul.f32 %v12123_v7, %v4681_v0  ;;  %v12189_v2 = vld [vmem:[#allocation122_spill] sm:$0xff]  ;;  %v9754_v49 = vld [vmem:[#allocation4 + $0x41] sm:$0xff] }
 0x6d4   : > { %v4740_v40 = vadd.f32 %v4732_v9, %v4722_v52  ;;  %v4741_v22 = vadd.f32 %v4733_v43, %v4723_v21  ;;  %v4792_v61 = vmul.f32 %v12188_v16, %v9638_v50  ;;  %v4793_v31 = vmul.f32 %v12188_v16, %v9734_v39  ;;  %v12190_v9 = vld [vmem:[#allocation124_spill] sm:$0xff] }
 0x6d5   : > { %v4696_v30 = vadd.f32 %v4688_v56, %v4636_v28  ;;  %v4842_v24 = vmul.f32 %v12189_v2, %v9642_v13  ;;  %v4843_v41 = vmul.f32 %v12189_v2, %v9738_v3  ;;  %v4697_v6 = vadd.f32 %v4689_v58, %v4637_v62  ;;  %v9762_v56 = vld [vmem:[#allocation5 + $0x41] sm:$0xff]  ;;  %v12191_v13 = vld [vmem:[#allocation125_spill] sm:$0xff] }
 0x6d6   : > { %v4748_v52 = vmul.f32 %v12150_v36, %v4740_v40  ;;  %v4749_v21 = vmul.f32 %v12129_v19, %v4741_v22  ;;  %v4800_v50 = vadd.f32 %v4792_v61, %v4782_v32  ;;  %v4801_v0 = vadd.f32 %v4793_v31, %v4783_v53  ;;  %v9766_v16 = vld [vmem:[#allocation4 + $0x42] sm:$0xff]  ;;  %v12192_v31 = vld [vmem:[#allocation126_spill] sm:$0xff] }
 0x6d7   : > { %v4852_v43 = vmul.f32 %v12190_v9, %v9650_v51  ;;  %v4853_v28 = vmul.f32 %v12190_v9, %v9746_v12  ;;  %v4894_v2 = vmul.f32 %v12191_v13, %v9658_v14  ;;  %v4895_v32 = vmul.f32 %v12191_v13, %v9754_v49  ;;  %v9771_v53 = vld [vmem:[#allocation5 + $0x42] sm:$0xff] }
 0x6d8   : > { %v4756_v62 = vadd.f32 %v4748_v52, %v4696_v30  ;;  %v4757_v58 = vadd.f32 %v4749_v21, %v4697_v6  ;;  %v4808_v40 = vmul.f32 %v12154_v47, %v4800_v50  ;;  %v4809_v51 = vmul.f32 %v12130_v46, %v4801_v0  ;;  %v9776_v15 = vld [vmem:[#allocation4 + $0x43] sm:$0xff] }
 0x6d9   : > { %v4860_v22 = vadd.f32 %v4852_v43, %v4842_v24  ;;  %v4861_v61 = vadd.f32 %v4853_v28, %v4843_v41  ;;  %v4904_v9 = vmul.f32 %v12192_v31, %v9666_v35  ;;  %v4905_v30 = vmul.f32 %v12192_v31, %v9762_v56  ;;  %v12193_v6 = vld [vmem:[#allocation127_spill] sm:$0xff]  ;;  %v12194_v24 = vld [vmem:[#allocation128_spill] sm:$0xff] }
 0x6da   : > { %v4816_v14 = vadd.f32 %v4808_v40, %v4756_v62  ;;  %v4954_v52 = vmul.f32 %v12193_v6, %v9670_v5  ;;  %v4955_v21 = vmul.f32 %v12193_v6, %v9766_v16  ;;  %v4817_v50 = vadd.f32 %v4809_v51, %v4757_v58  ;;  %v9788_v0 = vld [vmem:[#allocation5 + $0x43] sm:$0xff]  ;;  %v12195_v62 = vld [vmem:[#allocation129_spill] sm:$0xff] }
 0x6db   : > { %v4912_v13 = vadd.f32 %v4904_v9, %v4894_v2  ;;  %v4964_v41 = vmul.f32 %v12194_v24, %v9675_v26  ;;  %v4965_v35 = vmul.f32 %v12194_v24, %v9771_v53  ;;  %v4913_v28 = vadd.f32 %v4905_v30, %v4895_v32  ;;  %v9794_v31 = vld [vmem:[#allocation4 + $0x45] sm:$0xff]  ;;  %v12196_v24 = vld [vmem:[#allocation130_spill] sm:$0xff] }
 0x6dc   : > { %v4868_v43 = vadd.f32 %v4860_v22, %v4816_v14  ;;  %v5014_v40 = vmul.f32 %v12195_v62, %v9680_v63  ;;  %v5015_v5 = vmul.f32 %v12195_v62, %v9776_v15  ;;  %v4869_v58 = vadd.f32 %v4861_v61, %v4817_v50  ;;  %v9802_v22 = vld [vmem:[#allocation5 + $0x45] sm:$0xff] }
 0x6dd   : > { %v4920_v2 = vmul.f32 %v12134_v60, %v4912_v13  ;;  %v4972_v9 = vadd.f32 %v4964_v41, %v4954_v52  ;;  %v4973_v26 = vadd.f32 %v4965_v35, %v4955_v21  ;;  %v4921_v51 = vmul.f32 %v12135_v4, %v4913_v28  ;;  %v12197_v63 = vld [vmem:[#allocation131_spill] sm:$0xff]  ;;  %v12198_v35 = vld [vmem:[#allocation132_spill] sm:$0xff] }
 0x6de   : > { %v5024_v6 = vmul.f32 %v12196_v24, %v9692_v18  ;;  %v5025_v32 = vmul.f32 %v12196_v24, %v9788_v0  ;;  %v5074_v14 = vmul.f32 %v12197_v63, %v9698_v34  ;;  %v9806_v30 = vld [vmem:[#allocation4 + $0x46] sm:$0xff]  ;;  %v5075_v21 = vmul.f32 %v12197_v63, %v9794_v31 }
 0x6df   : > { %v4928_v61 = vadd.f32 %v4920_v2, %v4868_v43  ;;  %v4980_v13 = vmul.f32 %v12138_v54, %v4972_v9  ;;  %v4981_v52 = vmul.f32 %v12140_v25, %v4973_v26  ;;  %v4929_v50 = vadd.f32 %v4921_v51, %v4869_v58  ;;  %v9814_v24 = vld [vmem:[#allocation5 + $0x46] sm:$0xff]  ;;  %v12199_v43 = vld [vmem:[#allocation133_spill] sm:$0xff]  ;;  %v12200_v51 = vld [vmem:[#allocation134_spill] sm:$0xff] }
 0x6e0   : > { %v5032_v18 = vadd.f32 %v5024_v6, %v5014_v40  ;;  %v5033_v41 = vadd.f32 %v5025_v32, %v5015_v5  ;;  %v5084_v28 = vmul.f32 %v12198_v35, %v9706_v10  ;;  %v5085_v34 = vmul.f32 %v12198_v35, %v9802_v22  ;;  %v9822_v26 = vld [vmem:[#allocation4 + $0x47] sm:$0xff] }
 0x6e1   : > { %v4988_v62 = vadd.f32 %v4980_v13, %v4928_v61  ;;  %v5134_v2 = vmul.f32 %v12199_v43, %v9710_v37  ;;  %v5135_v9 = vmul.f32 %v12199_v43, %v9806_v30  ;;  %v4989_v58 = vadd.f32 %v4981_v52, %v4929_v50  ;;  %v9830_v13 = vld [vmem:[#allocation5 + $0x47] sm:$0xff] }
 0x6e2   : > { %v5040_v6 = vmul.f32 %v12144_v38, %v5032_v18  ;;  %v5041_v40 = vmul.f32 %v12145_v8, %v5033_v41  ;;  %v5092_v10 = vadd.f32 %v5084_v28, %v5074_v14  ;;  %v5093_v5 = vadd.f32 %v5085_v34, %v5075_v21  ;;  %v12201_v37 = vld [vmem:[#allocation136_spill] sm:$0xff]  ;;  %v12202_v28 = vld [vmem:[#allocation137_spill] sm:$0xff] }
 0x6e3   : > { %v5144_v32 = vmul.f32 %v12200_v51, %v9718_v59  ;;  %v5145_v61 = vmul.f32 %v12200_v51, %v9814_v24  ;;  %v5194_v43 = vmul.f32 %v12201_v37, %v9726_v23  ;;  %v9834_v35 = vld [vmem:[#allocation4 + $0x48] sm:$0xff]  ;;  %v5195_v14 = vmul.f32 %v12201_v37, %v9822_v26 }
 0x6e4   : > { %v5048_v52 = vadd.f32 %v5040_v6, %v4988_v62  ;;  %v5049_v50 = vadd.f32 %v5041_v40, %v4989_v58  ;;  %v5100_v18 = vmul.f32 %v12148_v57, %v5092_v10  ;;  %v5101_v21 = vmul.f32 %v12123_v7, %v5093_v5  ;;  %v9842_v51 = vld [vmem:[#allocation5 + $0x48] sm:$0xff]  ;;  %v12203_v62 = vld [vmem:[#allocation138_spill] sm:$0xff] }
 0x6e5   : > { %v5152_v59 = vadd.f32 %v5144_v32, %v5134_v2  ;;  %v5153_v41 = vadd.f32 %v5145_v61, %v5135_v9  ;;  %v5204_v34 = vmul.f32 %v12202_v28, %v9734_v39  ;;  %v5205_v23 = vmul.f32 %v12202_v28, %v9830_v13  ;;  %v9850_v40 = vld [vmem:[#allocation4 + $0x49] sm:$0xff]  ;;  %v12204_v32 = vld [vmem:[#allocation139_spill] sm:$0xff] }
 0x6e6   : > { %v5108_v63 = vadd.f32 %v5100_v18, %v5048_v52  ;;  %v5254_v58 = vmul.f32 %v12203_v62, %v9738_v3  ;;  %v5255_v6 = vmul.f32 %v12203_v62, %v9834_v35  ;;  %v5109_v10 = vadd.f32 %v5101_v21, %v5049_v50  ;;  %v9858_v18 = vld [vmem:[#allocation5 + $0x49] sm:$0xff] }
 0x6e7   : > { %v5160_v2 = vmul.f32 %v12150_v36, %v5152_v59  ;;  %v5161_v9 = vmul.f32 %v12129_v19, %v5153_v41  ;;  %v5212_v39 = vadd.f32 %v5204_v34, %v5194_v43  ;;  %v5213_v5 = vadd.f32 %v5205_v23, %v5195_v14  ;;  %v12205_v3 = vld [vmem:[#allocation140_spill] sm:$0xff]  ;;  %v12206_v23 = vld [vmem:[#allocation141_spill] sm:$0xff] }
 0x6e8   : > { %v5264_v61 = vmul.f32 %v12204_v32, %v9746_v12  ;;  %v5265_v52 = vmul.f32 %v12204_v32, %v9842_v51  ;;  %v5306_v62 = vmul.f32 %v12205_v3, %v9754_v49  ;;  %v9862_v28 = vld [vmem:[#allocation4 + $0x4a] sm:$0xff]  ;;  %v5307_v43 = vmul.f32 %v12205_v3, %v9850_v40 }
 0x6e9   : > { %v5168_v50 = vadd.f32 %v5160_v2, %v5108_v63  ;;  %v5169_v21 = vadd.f32 %v5161_v9, %v5109_v10  ;;  %v5220_v59 = vmul.f32 %v12154_v47, %v5212_v39  ;;  %v9867_v14 = vld [vmem:[#allocation5 + $0x4a] sm:$0xff]  ;;  %v5221_v12 = vmul.f32 %v12130_v46, %v5213_v5  ;;  %v12207_v10 = vld [vmem:[#allocation142_spill] sm:$0xff] }
 0x6ea   : > { %v5272_v41 = vadd.f32 %v5264_v61, %v5254_v58  ;;  %v5273_v34 = vadd.f32 %v5265_v52, %v5255_v6  ;;  %v5316_v32 = vmul.f32 %v12206_v23, %v9762_v56  ;;  %v9872_v37 = vld [vmem:[#allocation4 + $0x4b] sm:$0xff]  ;;  %v5317_v63 = vmul.f32 %v12206_v23, %v9858_v18  ;;  %v12208_v58 = vld [vmem:[#allocation143_spill] sm:$0xff] }
 0x6eb   : > { %v5228_v49 = vadd.f32 %v5220_v59, %v5168_v50  ;;  %v5366_v2 = vmul.f32 %v12207_v10, %v9766_v16  ;;  %v5367_v9 = vmul.f32 %v12207_v10, %v9862_v28  ;;  %v5229_v39 = vadd.f32 %v5221_v12, %v5169_v21  ;;  %v9884_v5 = vld [vmem:[#allocation5 + $0x4b] sm:$0xff] }
 0x6ec   : > { %v5324_v3 = vadd.f32 %v5316_v32, %v5306_v62  ;;  %v5376_v6 = vmul.f32 %v12208_v58, %v9771_v53  ;;  %v5377_v56 = vmul.f32 %v12208_v58, %v9867_v14  ;;  %v5325_v52 = vadd.f32 %v5317_v63, %v5307_v43  ;;  %v12209_v50 = vld [vmem:[#allocation144_spill] sm:$0xff]  ;;  %v12210_v12 = vld [vmem:[#allocation145_spill] sm:$0xff] }
 0x6ed   : > { %v5280_v61 = vadd.f32 %v5272_v41, %v5228_v49  ;;  %v5426_v59 = vmul.f32 %v12209_v50, %v9776_v15  ;;  %v5427_v16 = vmul.f32 %v12209_v50, %v9872_v37  ;;  %v5469_v23 = vld [vmem:[#allocation4 + $0x4d] sm:$0xff]  ;;  %v5281_v10 = vadd.f32 %v5273_v34, %v5229_v39 }
 0x6ee   : > { %v5332_v62 = vmul.f32 %v12134_v60, %v5324_v3  ;;  %v5384_v32 = vadd.f32 %v5376_v6, %v5366_v2  ;;  %v5385_v21 = vadd.f32 %v5377_v56, %v5367_v9  ;;  %v5333_v53 = vmul.f32 %v12135_v4, %v5325_v52  ;;  %v5477_v41 = vld [vmem:[#allocation5 + $0x4d] sm:$0xff] }
 0x6ef   : > { %v5436_v58 = vmul.f32 %v12210_v12, %v9788_v0  ;;  %v5437_v43 = vmul.f32 %v12210_v12, %v9884_v5  ;;  %v5486_v15 = vmul.f32 %v12105_v20, %v9794_v31  ;;  %v5529_v49 = vld [vmem:[#allocation4 + $0x4e] sm:$0xff]  ;;  %v5487_v2 = vmul.f32 %v12105_v20, %v5469_v23 }
 0x6f0   : > { %v5340_v63 = vadd.f32 %v5332_v62, %v5280_v61  ;;  %v5392_v34 = vmul.f32 %v12138_v54, %v5384_v32  ;;  %v5393_v3 = vmul.f32 %v12140_v25, %v5385_v21  ;;  %v5341_v9 = vadd.f32 %v5333_v53, %v5281_v10  ;;  %v5537_v56 = vld [vmem:[#allocation5 + $0x4e] sm:$0xff] }
 0x6f1   : > { %v5444_v39 = vadd.f32 %v5436_v58, %v5426_v59  ;;  %v5445_v6 = vadd.f32 %v5437_v43, %v5427_v16  ;;  %v5496_v0 = vmul.f32 %v12106_v55, %v9802_v22  ;;  %v5497_v12 = vmul.f32 %v12106_v55, %v5477_v41  ;;  %v5589_v62 = vld [vmem:[#allocation4 + $0x4f] sm:$0xff] }
 0x6f2   : > { %v5400_v52 = vadd.f32 %v5392_v34, %v5340_v63  ;;  %v5546_v31 = vmul.f32 %v12107_v44, %v9806_v30  ;;  %v5547_v61 = vmul.f32 %v12107_v44, %v5529_v49  ;;  %v5401_v32 = vadd.f32 %v5393_v3, %v5341_v9  ;;  %v5597_v16 = vld [vmem:[#allocation5 + $0x4f] sm:$0xff] }
 0x6f3   : > { %v5452_v21 = vmul.f32 %v12144_v38, %v5444_v39  ;;  %v5453_v23 = vmul.f32 %v12145_v8, %v5445_v6  ;;  %v5504_v10 = vadd.f32 %v5496_v0, %v5486_v15  ;;  %v5505_v58 = vadd.f32 %v5497_v12, %v5487_v2  ;;  %v5649_v30 = vld [vmem:[#allocation4 + $0x50] sm:$0xff] }
 0x6f4   : > { %v5556_v22 = vmul.f32 %v12108_v45, %v9814_v24  ;;  %v5557_v59 = vmul.f32 %v12108_v45, %v5537_v56  ;;  %v5606_v53 = vmul.f32 %v12109_v17, %v9822_v26  ;;  %v5607_v63 = vmul.f32 %v12109_v17, %v5589_v62  ;;  %v5657_v3 = vld [vmem:[#allocation5 + $0x50] sm:$0xff]  ;;  %v12211_v26 = vld [vmem:[#allocation152_spill] sm:$0xff] }
 0x6f5   : > { %v5460_v43 = vadd.f32 %v5452_v21, %v5400_v52  ;;  %v5461_v41 = vadd.f32 %v5453_v23, %v5401_v32  ;;  %v5512_v49 = vmul.f32 %v12148_v57, %v5504_v10  ;;  %v5513_v34 = vmul.f32 %v12123_v7, %v5505_v58  ;;  %v5701_v0 = vld [vmem:[#allocation4 + $0x51] sm:$0xff] }
 0x6f6   : > { %v5564_v15 = vadd.f32 %v5556_v22, %v5546_v31  ;;  %v5565_v12 = vadd.f32 %v5557_v59, %v5547_v61  ;;  %v5616_v24 = vmul.f32 %v12110_v33, %v9830_v13  ;;  %v5617_v9 = vmul.f32 %v12110_v33, %v5597_v16  ;;  %v12212_v61 = vld [vmem:[#allocation153_spill] sm:$0xff]  ;;  %v12213_v21 = vld [vmem:[#allocation154_spill] sm:$0xff] }
 0x6f7   : > { %v5520_v2 = vadd.f32 %v5512_v49, %v5460_v43  ;;  %v5666_v39 = vmul.f32 %v12211_v26, %v9834_v35  ;;  %v5667_v6 = vmul.f32 %v12211_v26, %v5649_v30  ;;  %v5521_v57 = vadd.f32 %v5513_v34, %v5461_v41  ;;  %v5709_v32 = vld [vmem:[#allocation5 + $0x51] sm:$0xff] }
 0x6f8   : > { %v5572_v56 = vmul.f32 %v12150_v36, %v5564_v15  ;;  %v5573_v7 = vmul.f32 %v12129_v19, %v5565_v12  ;;  %v5624_v52 = vadd.f32 %v5616_v24, %v5606_v53  ;;  %v5625_v31 = vadd.f32 %v5617_v9, %v5607_v63  ;;  %v5761_v35 = vld [vmem:[#allocation4 + $0x52] sm:$0xff] }
 0x6f9   : > { %v5676_v13 = vmul.f32 %v12212_v61, %v9842_v51  ;;  %v5677_v62 = vmul.f32 %v12212_v61, %v5657_v3  ;;  %v5718_v23 = vmul.f32 %v12213_v21, %v9850_v40  ;;  %v5719_v36 = vmul.f32 %v12213_v21, %v5701_v0  ;;  %v5769_v59 = vld [vmem:[#allocation5 + $0x52] sm:$0xff]  ;;  %v12214_v51 = vld [vmem:[#allocation155_spill] sm:$0xff]  ;;  %v12215_v40 = vld [vmem:[#allocation156_spill] sm:$0xff] }
 0x6fa   : > { %v5580_v10 = vadd.f32 %v5572_v56, %v5520_v2  ;;  %v5581_v58 = vadd.f32 %v5573_v7, %v5521_v57  ;;  %v5632_v22 = vmul.f32 %v12154_v47, %v5624_v52  ;;  %v5633_v19 = vmul.f32 %v12130_v46, %v5625_v31  ;;  %v5821_v43 = vld [vmem:[#allocation4 + $0x53] sm:$0xff]  ;;  %v12218_v52 = vld [vmem:[#allocation55_spill] sm:$0xff] }
 0x6fb   : > { %v5684_v16 = vadd.f32 %v5676_v13, %v5666_v39  ;;  %v5685_v53 = vadd.f32 %v5677_v62, %v5667_v6  ;;  %v5728_v30 = vmul.f32 %v12214_v51, %v9858_v18  ;;  %v5729_v49 = vmul.f32 %v12214_v51, %v5709_v32  ;;  %v12216_v12 = vld [vmem:[#allocation157_spill] sm:$0xff]  ;;  %v12217_v18 = vld [vmem:[#allocation99_spill] sm:$0xff]  ;;  %v12219_v13 = vld [vmem:[#allocation29_spill] sm:$0xff] }
 0x6fc   : > { %v5640_v41 = vadd.f32 %v5632_v22, %v5580_v10  ;;  %v5778_v63 = vmul.f32 %v12215_v40, %v9862_v28  ;;  %v5779_v34 = vmul.f32 %v12215_v40, %v5761_v35  ;;  %v5641_v47 = vadd.f32 %v5633_v19, %v5581_v58  ;;  %v5829_v3 = vld [vmem:[#allocation5 + $0x53] sm:$0xff]  ;;  %v12220_v35 = vld [vmem:[#allocation30_spill] sm:$0xff] }
 0x6fd   : > { %v5736_v15 = vadd.f32 %v5728_v30, %v5718_v23  ;;  %v5788_v24 = vmul.f32 %v12216_v12, %v9867_v14  ;;  %v5789_v46 = vmul.f32 %v12216_v12, %v5769_v59  ;;  %v5737_v9 = vadd.f32 %v5729_v49, %v5719_v36  ;;  %v10057_v40 = vld [vmem:[#allocation5 + $0x32] sm:$0xff] }
 0x6fe   : > { %v5692_v2 = vadd.f32 %v5684_v16, %v5640_v41  ;;  %v5838_v39 = vmul.f32 %v12217_v18, %v9872_v37  ;;  %v5839_v6 = vmul.f32 %v12217_v18, %v5821_v43  ;;  %v5693_v0 = vadd.f32 %v5685_v53, %v5641_v47  ;;  %v3290_v18 = vld [vmem:[#allocation4 + $0x2a] sm:$0xff] }
 0x6ff   : > { %v5744_v28 = vmul.f32 %v12134_v60, %v5736_v15  ;;  %v5796_v57 = vadd.f32 %v5788_v24, %v5778_v63  ;;  %v5797_v56 = vadd.f32 %v5789_v46, %v5779_v34  ;;  %v5745_v7 = vmul.f32 %v12135_v4, %v5737_v9  ;;  %v9981_v9 = vld [vmem:[#allocation4 + $0x2d] sm:$0xff] }
 0x700   : > { %v5848_v14 = vmul.f32 %v12218_v52, %v9884_v5  ;;  %v5849_v31 = vmul.f32 %v12218_v52, %v5829_v3  ;;  %v2710_v62 = vadd.s32 4294967293, %v12219_v13  ;;  %v2711_v10 = vadd.s32 4294967293, %v12220_v35  ;;  %v10046_v52 = vld [vmem:[#allocation5 + $0x31] sm:$0xff] }
 0x701   : > { %v5752_v32 = vadd.f32 %v5744_v28, %v5692_v2  ;;  %v5804_v23 = vmul.f32 %v12138_v54, %v5796_v57  ;;  %v5805_v37 = vmul.f32 %v12140_v25, %v5797_v56  ;;  %v5753_v58 = vadd.f32 %v5745_v7, %v5693_v0  ;;  %v2998_v2 = vld [vmem:[#allocation4 + $0x25] sm:$0xff]  ;;  %v9992_v7 = vld [vmem:[#allocation5 + $0x2d] sm:$0xff] }
 0x702   : > { %v5856_v60 = vadd.f32 %v5848_v14, %v5838_v39  ;;  %v5857_v22 = vadd.f32 %v5849_v31, %v5839_v6  ;;  %vm2718_vm10 = vcmp.ge.s32.totalorder %v2710_v62, 0  ;;  %vm2719_vm11 = vcmp.ge.s32.totalorder %v2711_v10, 0  ;;  %v3006_v28 = vld [vmem:[#allocation5 + $0x25] sm:$0xff]  ;;  %v12222_v62 = vld [vmem:[#allocation41_spill] sm:$0xff] }
 0x703   : > { %v5812_v36 = vadd.f32 %v5804_v23, %v5752_v32  ;;  %v12221_v4 = vmov 0.0   ;;  %v2758_v5 = vadd.s32 4294967294, %v12219_v13  ;;  %v5813_v19 = vadd.f32 %v5805_v37, %v5753_v58  ;;  %v3058_v14 = vld [vmem:[#allocation4 + $0x26] sm:$0xff]  ;;  %v10000_v37 = vld [vmem:[#allocation4 + $0x2e] sm:$0xff] }
 0x704   : > { %v9955_v59 = vsel %vm2718_vm10, 1.0, %v12221_v4  ;;  %v5864_v16 = vmul.f32 %v12144_v38, %v5856_v60  ;;  %v5865_v54 = vmul.f32 %v12145_v8, %v5857_v22  ;;  %v9961_v25 = vsel %vm2719_vm11, 1.0, %v12221_v4  ;;  %v3066_v10 = vld [vmem:[#allocation5 + $0x26] sm:$0xff]  ;;  %v10002_v58 = vld [vmem:[#allocation5 + $0x2e] sm:$0xff] }
 0x705   : > { %v2759_v53 = vadd.s32 4294967294, %v12220_v35  ;;  %vm2766_vm3 = vcmp.ge.s32.totalorder %v2758_v5, 0  ;;  %v2806_v30 = vadd.s32 4294967295, %v12219_v13  ;;  %v2807_v43 = vadd.s32 4294967295, %v12220_v35  ;;  %v3118_v22 = vld [vmem:[#allocation4 + $0x27] sm:$0xff] }
 0x706   : > { %v5872_v41 = vadd.f32 %v5864_v16, %v5812_v36  ;;  %v5873_v49 = vadd.f32 %v5865_v54, %v5813_v19  ;;  %v9967_v63 = vsel %vm2766_vm3, 1.0, %v12221_v4  ;;  %v2854_v34 = vadd.s32 1, %v12219_v13  ;;  %v10008_v36 = vld [vmem:[#allocation4 + $0x2f] sm:$0xff]  ;;  %v3126_v5 = vld [vmem:[#allocation5 + $0x27] sm:$0xff] }
 0x707   : > { %vm2767_vm9 = vcmp.ge.s32.totalorder %v2759_v53, 0  ;;  %vm2814_vm12 = vcmp.ge.s32.totalorder %v2806_v30, 0  ;;  %vm2815_vm13 = vcmp.ge.s32.totalorder %v2807_v43, 0  ;;  %v2855_v38 = vadd.s32 1, %v12220_v35  ;;  %v12224_v53 = vld [vmem:[#allocation26_spill] sm:$0xff]  ;;  %v10019_v43 = vld [vmem:[#allocation5 + $0x2f] sm:$0xff] }
 0x708   : > { %v6358_v8 = vmul.f32 -1.442695, %v5872_v41  ;;  %v6359_v47 = vmul.f32 -1.442695, %v5873_v49  ;;  %v9972_v15 = vsel %vm2767_vm9, 1.0, %v12221_v4  ;;  %v9975_v24 = vsel %vm2814_vm12, 1.0, %v12221_v4 }
 0x709   : > { %v9978_v46 = vsel %vm2815_vm13, 1.0, %v12221_v4  ;;  %vm2870_vm14 = vcmp.lt.s32.totalorder %v2854_v34, 8  ;;  %vm2871_vm15 = vcmp.lt.s32.totalorder %v2855_v38, 8  ;;  %v2902_v3 = vadd.s32 2, %v12219_v13  ;;  %v12225_v34 = vld [vmem:[#allocation44_spill] sm:$0xff] }
 0x70a   : > { %6586 = vpow2.f32 %v6358_v8  ;;  %v9984_v39 = vsel %vm2870_vm14, 1.0, %v12221_v4  ;;  %v9987_v6 = vsel %vm2871_vm15, 1.0, %v12221_v4  ;;  %v2903_v0 = vadd.s32 2, %v12220_v35 }
 0x70b   : > { %6588 = vpow2.f32 %v6359_v47  ;;  %vm2918_vm1 = vcmp.lt.s32.totalorder %v2902_v3, 8  ;;  %v2950_v57 = vadd.s32 3, %v12219_v13  ;;  %v2951_v56 = vadd.s32 3, %v12220_v35  ;;  %v12223_v35 = vld [vmem:[#allocation42_spill] sm:$0xff]  ;;  %v3178_v47 = vld [vmem:[#allocation4 + $0x28] sm:$0xff]  ;;  %v10026_v3 = vld [vmem:[#allocation4 + $0x30] sm:$0xff] }
 0x70c   : > { %vm2919_vm2 = vcmp.lt.s32.totalorder %v2903_v0, 8  ;;  %v9995_v31 = vsel %vm2918_vm1, 1.0, %v12221_v4  ;;  %v3016_v32 = vmul.f32 %v12222_v62, %v2998_v2  ;;  %v3017_v23 = vmul.f32 %v12222_v62, %v9981_v9  ;;  %v12226_v0 = vld [vmem:[#allocation46_spill] sm:$0xff]  ;;  %v3230_v62 = vld [vmem:[#allocation4 + $0x29] sm:$0xff] }
 0x70d   : > { %v10005_v13 = vsel %vm2919_vm2, 1.0, %v12221_v4  ;;  %vm2966_vm4 = vcmp.lt.s32.totalorder %v2950_v57, 8  ;;  %vm2967_vm7 = vcmp.lt.s32.totalorder %v2951_v56, 8  ;;  %v3026_v60 = vmul.f32 %v12223_v35, %v3006_v28  ;;  %v12227_v56 = vld [vmem:[#allocation47_spill] sm:$0xff] }
 0x70e   : > { %v10011_v19 = vsel %vm2966_vm4, 1.0, %v12221_v4  ;;  %v10014_v16 = vsel %vm2967_vm7, 1.0, %v12221_v4  ;;  %v3027_v54 = vmul.f32 %v12223_v35, %v9992_v7  ;;  %v3076_v30 = vmul.f32 %v12224_v53, %v3058_v14  ;;  %v10037_v4 = vld [vmem:[#allocation4 + $0x31] sm:$0xff] }
 0x70f   : > { %v3034_v41 = vadd.f32 %v3026_v60, %v3016_v32  ;;  %v3077_v49 = vmul.f32 %v12224_v53, %v10000_v37  ;;  %v3086_v38 = vmul.f32 %v12225_v34, %v3066_v10  ;;  %v3087_v8 = vmul.f32 %v12225_v34, %v10002_v58  ;;  %v3186_v32 = vld [vmem:[#allocation5 + $0x28] sm:$0xff]  ;;  %v10035_v34 = vld [vmem:[#allocation5 + $0x30] sm:$0xff] }
 0x710   : > { %v3035_v2 = vadd.f32 %v3027_v54, %v3017_v23  ;;  %v3136_v28 = vmul.f32 %v12226_v0, %v3118_v22  ;;  %v3137_v57 = vmul.f32 %v12226_v0, %v10008_v36  ;;  %v3146_v14 = vmul.f32 %v12227_v56, %v3126_v5  ;;  %v12228_v54 = vld [vmem:[#allocation48_spill] sm:$0xff] }
 0x711   : > { %v3042_v60 = vmul.f32 %v9955_v59, %v3034_v41  ;;  %v3094_v53 = vadd.f32 %v3086_v38, %v3076_v30  ;;  %v3095_v35 = vadd.f32 %v3087_v8, %v3077_v49  ;;  %v3147_v10 = vmul.f32 %v12227_v56, %v10019_v43  ;;  %v12229_v38 = vld [vmem:[#allocation49_spill] sm:$0xff]  ;;  %v3238_v56 = vld [vmem:[#allocation5 + $0x29] sm:$0xff] }
 0x712   : > { %v3043_v23 = vmul.f32 %v9961_v25, %v3035_v2  ;;  %v3154_v22 = vadd.f32 %v3146_v14, %v3136_v28  ;;  %v3196_v0 = vmul.f32 %v12228_v54, %v3178_v47  ;;  %v3197_v5 = vmul.f32 %v12228_v54, %v10026_v3  ;;  %v12230_v47 = vld [vmem:[#allocation51_spill] sm:$0xff] }
 0x713   : > { %v3102_v41 = vmul.f32 %v9967_v63, %v3094_v53  ;;  %v3103_v30 = vmul.f32 %v9972_v15, %v3095_v35  ;;  %v3155_v49 = vadd.f32 %v3147_v10, %v3137_v57  ;;  %v3206_v8 = vmul.f32 %v12229_v38, %v3186_v32  ;;  %v10054_v53 = vld [vmem:[#allocation4 + $0x32] sm:$0xff]  ;;  %v3298_v35 = vld [vmem:[#allocation5 + $0x2a] sm:$0xff] }
 0x714   : > { %v3162_v12 = vmul.f32 %v9975_v24, %v3154_v22  ;;  %v3207_v2 = vmul.f32 %v12229_v38, %v10035_v34  ;;  %v3248_v28 = vmul.f32 %v12230_v47, %v3230_v62  ;;  %v3249_v14 = vmul.f32 %v12230_v47, %v10037_v4  ;;  %v12231_v22 = vld [vmem:[#allocation52_spill] sm:$0xff]  ;;  %v12232_v62 = vld [vmem:[#allocation53_spill] sm:$0xff] }
 0x715   : > { %v3110_v57 = vadd.f32 %v3102_v41, %v3042_v60  ;;  %v3111_v10 = vadd.f32 %v3103_v30, %v3043_v23  ;;  %v3163_v32 = vmul.f32 %v9978_v46, %v3155_v49  ;;  %v3214_v54 = vadd.f32 %v3206_v8, %v3196_v0  ;;  %v12233_v23 = vld [vmem:[#allocation54_spill] sm:$0xff] }
 0x716   : > { %v3215_v51 = vadd.f32 %v3207_v2, %v3197_v5  ;;  %v3258_v21 = vmul.f32 %v12231_v22, %v3238_v56  ;;  %v3259_v38 = vmul.f32 %v12231_v22, %v10046_v52  ;;  %v3308_v61 = vmul.f32 %v12232_v62, %v3290_v18  ;;  %v3350_v5 = vld [vmem:[#allocation4 + $0x2b] sm:$0xff]  ;;  %v10068_v2 = vld [vmem:[#allocation4 + $0x33] sm:$0xff] }
 0x717   : > { %v6587_v26 = vpop.eup %6586  ;;  %v3170_v47 = vadd.f32 %v3162_v12, %v3110_v57  ;;  %v3171_v33 = vadd.f32 %v3163_v32, %v3111_v10  ;;  %v3309_v60 = vmul.f32 %v12232_v62, %v10054_v53  ;;  %v3318_v41 = vmul.f32 %v12233_v23, %v3298_v35  ;;  %v3358_v57 = vld [vmem:[#allocation5 + $0x2b] sm:$0xff] }
 0x718   : > { %v6589_v30 = vpop.eup %6588  ;;  %v5904_v0 = vadd.f32 1.0, %v6587_v26  ;;  %v3266_v49 = vadd.f32 %v3258_v21, %v3248_v28  ;;  %v3267_v8 = vadd.f32 %v3259_v38, %v3249_v14  ;;  %v3319_v56 = vmul.f32 %v12233_v23, %v10057_v40  ;;  %v10072_v26 = vld [vmem:[#allocation5 + $0x33] sm:$0xff] }
 0x719   : > { %v5905_v22 = vadd.f32 1.0, %v6589_v30  ;;  %v3222_v18 = vadd.f32 %v3214_v54, %v3170_v47  ;;  %v3223_v17 = vadd.f32 %v3215_v51, %v3171_v33  ;;  %v3326_v12 = vadd.f32 %v3318_v41, %v3308_v61  ;;  %v10074_v21 = vld [vmem:[#allocation4 + $0x35] sm:$0xff] }
 0x71a   : > { %6590 = vrcp.f32 %v5904_v0  ;;  %v3274_v10 = vmul.f32 %v9984_v39, %v3266_v49  ;;  %v3275_v35 = vmul.f32 %v9987_v6, %v3267_v8  ;;  %v3327_v32 = vadd.f32 %v3319_v56, %v3309_v60  ;;  %v12234_v28 = vld [vmem:[#allocation56_spill] sm:$0xff]  ;;  %v12235_v41 = vld [vmem:[#allocation57_spill] sm:$0xff]  ;;  %v12236_v0 = vld [vmem:[#allocation59_spill] sm:$0xff] }
 0x71b   : > { %6592 = vrcp.f32 %v5905_v22  ;;  %v3334_v38 = vmul.f32 %v9995_v31, %v3326_v12  ;;  %v3368_v14 = vmul.f32 %v12234_v28, %v3350_v5  ;;  %v3369_v33 = vmul.f32 %v12234_v28, %v10068_v2  ;;  %v10080_v61 = vld [vmem:[#allocation5 + $0x35] sm:$0xff] }
 0x71c   : > { %v3282_v51 = vadd.f32 %v3274_v10, %v3222_v18  ;;  %v3283_v54 = vadd.f32 %v3275_v35, %v3223_v17  ;;  %v3335_v47 = vmul.f32 %v10005_v13, %v3327_v32  ;;  %v3378_v60 = vmul.f32 %v12235_v41, %v3358_v57  ;;  %v10084_v30 = vld [vmem:[#allocation4 + $0x36] sm:$0xff] }
 0x71d   : > { %v3379_v22 = vmul.f32 %v12235_v41, %v10072_v26  ;;  %v3428_v49 = vmul.f32 %v12236_v0, %v9981_v9  ;;  %v3429_v8 = vmul.f32 %v12236_v0, %v10074_v21  ;;  %v12237_v56 = vld [vmem:[#allocation60_spill] sm:$0xff]  ;;  %v12238_v9 = vld [vmem:[#allocation61_spill] sm:$0xff] }
 0x71e   : > { %v3438_v5 = vmul.f32 %v12237_v56, %v9992_v7  ;;  %v10094_v18 = vld [vmem:[#allocation5 + $0x36] sm:$0xff]  ;;  %v3342_v17 = vadd.f32 %v3334_v38, %v3282_v51  ;;  %v3343_v12 = vadd.f32 %v3335_v47, %v3283_v54  ;;  %v3386_v10 = vadd.f32 %v3378_v60, %v3368_v14  ;;  %v12239_v38 = vld [vmem:[#allocation62_spill] sm:$0xff] }
 0x71f   : > { %v3439_v57 = vmul.f32 %v12237_v56, %v10080_v61  ;;  %v10098_v35 = vld [vmem:[#allocation4 + $0x37] sm:$0xff]  ;;  %v3387_v32 = vadd.f32 %v3379_v22, %v3369_v33  ;;  %v3488_v28 = vmul.f32 %v12238_v9, %v10000_v37  ;;  %v3489_v0 = vmul.f32 %v12238_v9, %v10084_v30  ;;  %v12240_v37 = vld [vmem:[#allocation63_spill] sm:$0xff] }
 0x720   : > { %v3446_v41 = vadd.f32 %v3438_v5, %v3428_v49  ;;  %v3394_v7 = vmul.f32 %v10011_v19, %v3386_v10  ;;  %v3498_v51 = vmul.f32 %v12239_v38, %v10002_v58  ;;  %v3499_v14 = vmul.f32 %v12239_v38, %v10094_v18  ;;  %v10109_v54 = vld [vmem:[#allocation5 + $0x37] sm:$0xff] }
 0x721   : > { %v3447_v23 = vadd.f32 %v3439_v57, %v3429_v8  ;;  %v3395_v33 = vmul.f32 %v10014_v16, %v3387_v32  ;;  %v3548_v60 = vmul.f32 %v12240_v37, %v10008_v36  ;;  %v3549_v22 = vmul.f32 %v12240_v37, %v10098_v35  ;;  %v10117_v49 = vld [vmem:[#allocation4 + $0x38] sm:$0xff]  ;;  %v12241_v38 = vld [vmem:[#allocation64_spill] sm:$0xff] }
 0x722   : > { %v3454_v47 = vmul.f32 %v9955_v59, %v3446_v41  ;;  %v3402_v8 = vadd.f32 %v3394_v7, %v3342_v17  ;;  %v3506_v5 = vadd.f32 %v3498_v51, %v3488_v28  ;;  %v3507_v10 = vadd.f32 %v3499_v14, %v3489_v0  ;;  %v10124_v32 = vld [vmem:[#allocation5 + $0x38] sm:$0xff]  ;;  %v12243_v7 = vld [vmem:[#allocation66_spill] sm:$0xff] }
 0x723   : > { %v3455_v58 = vmul.f32 %v9961_v25, %v3447_v23  ;;  %v3403_v57 = vadd.f32 %v3395_v33, %v3343_v12  ;;  %v3558_v9 = vmul.f32 %v12241_v38, %v10019_v43  ;;  %v3559_v41 = vmul.f32 %v12241_v38, %v10109_v54  ;;  %v12242_v36 = vld [vmem:[#allocation65_spill] sm:$0xff]  ;;  %v12244_v33 = vld [vmem:[#allocation67_spill] sm:$0xff] }
 0x724   : > { %v3608_v56 = vmul.f32 %v12242_v36, %v10026_v3  ;;  %v10128_v37 = vld [vmem:[#allocation4 + $0x39] sm:$0xff]  ;;  %v3462_v62 = vadd.f32 %v3454_v47, %v3402_v8  ;;  %v3514_v17 = vmul.f32 %v9967_v63, %v3506_v5  ;;  %v3515_v23 = vmul.f32 %v9972_v15, %v3507_v10 }
 0x725   : > { %v3609_v28 = vmul.f32 %v12242_v36, %v10117_v49  ;;  %v3463_v0 = vadd.f32 %v3455_v58, %v3403_v57  ;;  %v3566_v43 = vadd.f32 %v3558_v9, %v3548_v60  ;;  %v3567_v12 = vadd.f32 %v3559_v41, %v3549_v22  ;;  %v10144_v22 = vld [vmem:[#allocation5 + $0x39] sm:$0xff]  ;;  %v12245_v58 = vld [vmem:[#allocation68_spill] sm:$0xff] }
 0x726   : > { %v3618_v51 = vmul.f32 %v12243_v7, %v10035_v34  ;;  %v3522_v14 = vadd.f32 %v3514_v17, %v3462_v62  ;;  %v3619_v3 = vmul.f32 %v12243_v7, %v10124_v32  ;;  %v3660_v47 = vmul.f32 %v12244_v33, %v10037_v4  ;;  %v10149_v17 = vld [vmem:[#allocation4 + $0x3a] sm:$0xff] }
 0x727   : > { %v3661_v8 = vmul.f32 %v12244_v33, %v10128_v37  ;;  %v6591_v5 = vpop.eup %6590  ;;  %v3523_v10 = vadd.f32 %v3515_v23, %v3463_v0  ;;  %v3574_v36 = vmul.f32 %v9975_v24, %v3566_v43  ;;  %v3575_v9 = vmul.f32 %v9978_v46, %v3567_v12  ;;  %v10154_v12 = vld [vmem:[#allocation5 + $0x3a] sm:$0xff] }
 0x728   : > { %v3626_v60 = vadd.f32 %v3618_v51, %v3608_v56  ;;  %v6593_v34 = vpop.eup %6592  ;;  %vm5928_vm5 = vcmp.gt.f32.partialorder %v6591_v5, 0.05  ;;  %vm5936_vm6 = vcmp.lt.f32.partialorder %v6591_v5, 0.05  ;;  %v3627_v62 = vadd.f32 %v3619_v3, %v3609_v28  ;;  %v12251_v7 = vld [vmem:[#allocation73_spill] sm:$0xff] }
 0x729   : > { %v3670_v57 = vmul.f32 %v12245_v58, %v10046_v52  ;;  %vm5929_vm8 = vcmp.gt.f32.partialorder %v6593_v34, 0.05  ;;  %vm5937_vm10 = vcmp.lt.f32.partialorder %v6593_v34, 0.05  ;;  %v5944_v4 = vsel %vm5936_vm6, 0.0, %v12167_v48  ;;  %v12246_v52 = vld [vmem:[#allocation69_spill] sm:$0xff] }
 0x72a   : > { %v3582_v41 = vadd.f32 %v3574_v36, %v3522_v14  ;;  %v5945_v23 = vsel %vm5937_vm10, 0.0, %v12167_v48  ;;  %v5952_v0 = vsel %vm5928_vm5, 1.0, %v5944_v4  ;;  %v3583_v56 = vadd.f32 %v3575_v9, %v3523_v10  ;;  %v10158_v34 = vld [vmem:[#allocation4 + $0x3b] sm:$0xff] }
 0x72b   : > { %v3671_v43 = vmul.f32 %v12245_v58, %v10144_v22  ;;  %v5953_v28 = vsel %vm5929_vm8, 1.0, %v5945_v23  ;;  %v3678_v3 = vadd.f32 %v3670_v57, %v3660_v47  ;;  %v3720_v5 = vmul.f32 %v12246_v52, %v10054_v53  ;;  %v10160_v36 = vld [vmem:[#allocation5 + $0x3b] sm:$0xff]  ;;  %v12248_v53 = vld [vmem:[#allocation71_spill] sm:$0xff] }
 0x72c   : > { %v3634_v51 = vadd.f32 %v3626_v60, %v3582_v41  ;;  %v6534_v14 = vpack.i.bf16 %v5953_v28, %v5952_v0  ;;  %v3635_v33 = vadd.f32 %v3627_v62, %v3583_v56  ;;  %v3721_v10 = vmul.f32 %v12246_v52, %v10149_v17  ;;  %v12247_v4 = vld [vmem:[#allocation70_spill] sm:$0xff]  ;;  %v12249_v41 = vld [vmem:[#allocation72_spill] sm:$0xff] }
 0x72d   : > { %v3679_v48 = vadd.f32 %v3671_v43, %v3661_v8  ;;  %v3686_v9 = vmul.f32 %v9984_v39, %v3678_v3  ;;  %v3730_v23 = vmul.f32 %v12247_v4, %v10057_v40  ;;  %v3731_v47 = vmul.f32 %v12247_v4, %v10154_v12  ;;  %v10171_v57 = vld [vmem:[#allocation4 + $0x3d] sm:$0xff] }
 0x72e   : > { %v3780_v60 = vmul.f32 %v12248_v53, %v10068_v2  ;;  %6535 = vperm.xlu0 %6533, %v6534_v14   ;;  %v3781_v8 = vmul.f32 %v12248_v53, %v10158_v34  ;;  %v3790_v0 = vmul.f32 %v12249_v41, %v10072_v26  ;;  %v3791_v40 = vmul.f32 %v12249_v41, %v10160_v36  ;;  %v10180_v56 = vld [vmem:[#allocation5 + $0x3d] sm:$0xff] }
 0x72f   : > { %v3687_v62 = vmul.f32 %v9987_v6, %v3679_v48  ;;  %v3694_v43 = vadd.f32 %v3686_v9, %v3634_v51  ;;  %v3738_v28 = vadd.f32 %v3730_v23, %v3720_v5  ;;  %v3739_v3 = vadd.f32 %v3731_v47, %v3721_v10  ;;  %v12250_v2 = vld [vmem:[#allocation74_spill] sm:$0xff]  ;;  %v12252_v23 = vld [vmem:[#allocation76_spill] sm:$0xff] }
 0x730   : > { %v3840_v4 = vmul.f32 %v12250_v2, %v10074_v21  ;;  %v10184_v14 = vld [vmem:[#allocation4 + $0x3e] sm:$0xff]  ;;  %v3798_v52 = vadd.f32 %v3790_v0, %v3780_v60  ;;  %v3799_v58 = vadd.f32 %v3791_v40, %v3781_v8  ;;  %v3841_v53 = vmul.f32 %v12250_v2, %v10171_v57 }
 0x731   : > { %v3695_v48 = vadd.f32 %v3687_v62, %v3635_v33  ;;  %v3746_v26 = vmul.f32 %v9995_v31, %v3738_v28  ;;  %v3747_v41 = vmul.f32 %v10005_v13, %v3739_v3  ;;  %v3850_v51 = vmul.f32 %v12251_v7, %v10080_v61  ;;  %v10194_v10 = vld [vmem:[#allocation5 + $0x3e] sm:$0xff]  ;;  %v12253_v28 = vld [vmem:[#allocation75_spill] sm:$0xff] }
 0x732   : > { %v3851_v5 = vmul.f32 %v12251_v7, %v10180_v56  ;;  %v10196_v21 = vld [vmem:[#allocation4 + $0x3f] sm:$0xff]  ;;  %v3806_v33 = vmul.f32 %v10011_v19, %v3798_v52  ;;  %v3807_v9 = vmul.f32 %v10014_v16, %v3799_v58  ;;  %v3900_v47 = vmul.f32 %v12252_v23, %v10084_v30 }
 0x733   : > { %v3901_v60 = vmul.f32 %v12252_v23, %v10184_v14  ;;  %v3754_v62 = vadd.f32 %v3746_v26, %v3694_v43  ;;  %v3755_v8 = vadd.f32 %v3747_v41, %v3695_v48  ;;  %v3858_v61 = vadd.f32 %v3850_v51, %v3840_v4  ;;  %v10204_v40 = vld [vmem:[#allocation5 + $0x3f] sm:$0xff] }
 0x734   : > { %v3859_v0 = vadd.f32 %v3851_v5, %v3841_v53  ;;  %v3910_v3 = vmul.f32 %v12253_v28, %v10094_v18  ;;  %v3911_v52 = vmul.f32 %v12253_v28, %v10194_v10  ;;  %v12254_v58 = vld [vmem:[#allocation78_spill] sm:$0xff]  ;;  %v12255_v18 = vld [vmem:[#allocation77_spill] sm:$0xff] }
 0x735   : > { %v3960_v7 = vmul.f32 %v12254_v58, %v10098_v35  ;;  %v3961_v30 = vmul.f32 %v12254_v58, %v10196_v21  ;;  %v10214_v2 = vld [vmem:[#allocation4 + $0x40] sm:$0xff]  ;;  %v3814_v43 = vadd.f32 %v3806_v33, %v3754_v62  ;;  %v3815_v41 = vadd.f32 %v3807_v9, %v3755_v8  ;;  %v12256_v33 = vld [vmem:[#allocation83_spill] sm:$0xff] }
 0x736   : > { %v3866_v4 = vmul.f32 %v9955_v59, %v3858_v61  ;;  %v3867_v53 = vmul.f32 %v9961_v25, %v3859_v0  ;;  %v3918_v48 = vadd.f32 %v3910_v3, %v3900_v47  ;;  %v3919_v26 = vadd.f32 %v3911_v52, %v3901_v60  ;;  %v10222_v35 = vld [vmem:[#allocation5 + $0x40] sm:$0xff]  ;;  %v12257_v0 = vld [vmem:[#allocation84_spill] sm:$0xff] }
 0x737   : > { %v3970_v51 = vmul.f32 %v12255_v18, %v10109_v54  ;;  %v3971_v5 = vmul.f32 %v12255_v18, %v10204_v40  ;;  %v10224_v28 = vld [vmem:[#allocation4 + $0x41] sm:$0xff]  ;;  %v4020_v9 = vmul.f32 %v12256_v33, %v10117_v49  ;;  %v4021_v62 = vmul.f32 %v12256_v33, %v10214_v2 }
 0x738   : > { %v3874_v58 = vadd.f32 %v3866_v4, %v3814_v43  ;;  %v3875_v23 = vadd.f32 %v3867_v53, %v3815_v41  ;;  %v3926_v47 = vmul.f32 %v9967_v63, %v3918_v48  ;;  %v3927_v60 = vmul.f32 %v9972_v15, %v3919_v26  ;;  %v10232_v61 = vld [vmem:[#allocation5 + $0x41] sm:$0xff]  ;;  %v12258_v43 = vld [vmem:[#allocation86_spill] sm:$0xff] }
 0x739   : > { %v3978_v54 = vadd.f32 %v3970_v51, %v3960_v7  ;;  %v3979_v8 = vadd.f32 %v3971_v5, %v3961_v30  ;;  %v4030_v3 = vmul.f32 %v12257_v0, %v10124_v32  ;;  %v4031_v52 = vmul.f32 %v12257_v0, %v10222_v35  ;;  %v10242_v4 = vld [vmem:[#allocation4 + $0x42] sm:$0xff] }
 0x73a   : > { %v4072_v49 = vmul.f32 %v12258_v43, %v10128_v37  ;;  %v4073_v41 = vmul.f32 %v12258_v43, %v10224_v28  ;;  %v3934_v53 = vadd.f32 %v3926_v47, %v3874_v58  ;;  %v3935_v48 = vadd.f32 %v3927_v60, %v3875_v23  ;;  %v10246_v26 = vld [vmem:[#allocation5 + $0x42] sm:$0xff] }
 0x73b   : > { %v3986_v7 = vmul.f32 %v9975_v24, %v3978_v54  ;;  %v3987_v30 = vmul.f32 %v9978_v46, %v3979_v8  ;;  %v4038_v32 = vadd.f32 %v4030_v3, %v4020_v9  ;;  %v4039_v51 = vadd.f32 %v4031_v52, %v4021_v62  ;;  %v12259_v5 = vld [vmem:[#allocation87_spill] sm:$0xff]  ;;  %v12260_v23 = vld [vmem:[#allocation88_spill] sm:$0xff]  ;;  %v12261_v9 = vld [vmem:[#allocation89_spill] sm:$0xff] }
 0x73c   : > { %v4082_v0 = vmul.f32 %v12259_v5, %v10144_v22  ;;  %v4083_v37 = vmul.f32 %v12259_v5, %v10232_v61  ;;  %v10252_v33 = vld [vmem:[#allocation4 + $0x43] sm:$0xff]  ;;  %v4132_v58 = vmul.f32 %v12260_v23, %v10149_v17  ;;  %v4133_v47 = vmul.f32 %v12260_v23, %v10242_v4 }
 0x73d   : > { %v3994_v43 = vadd.f32 %v3986_v7, %v3934_v53  ;;  %v3995_v18 = vadd.f32 %v3987_v30, %v3935_v48  ;;  %v4142_v62 = vmul.f32 %v12261_v9, %v10154_v12  ;;  %v4143_v22 = vmul.f32 %v12261_v9, %v10246_v26  ;;  %v10262_v8 = vld [vmem:[#allocation5 + $0x43] sm:$0xff]  ;;  %v12262_v48 = vld [vmem:[#allocation90_spill] sm:$0xff] }
 0x73e   : > { %v4090_v60 = vadd.f32 %v4082_v0, %v4072_v49  ;;  %v4091_v54 = vadd.f32 %v4083_v37, %v4073_v41  ;;  %v10264_v3 = vld [vmem:[#allocation4 + $0x45] sm:$0xff]  ;;  %v4192_v17 = vmul.f32 %v12262_v48, %v10158_v34  ;;  %v4193_v7 = vmul.f32 %v12262_v48, %v10252_v33 }
 0x73f   : > { %v4046_v52 = vadd.f32 %v4038_v32, %v3994_v43  ;;  %v4047_v53 = vadd.f32 %v4039_v51, %v3995_v18  ;;  %v4150_v12 = vadd.f32 %v4142_v62, %v4132_v58  ;;  %v4151_v41 = vadd.f32 %v4143_v22, %v4133_v47  ;;  %v10272_v30 = vld [vmem:[#allocation5 + $0x45] sm:$0xff] }
 0x740   : > { %v4098_v0 = vmul.f32 %v9984_v39, %v4090_v60  ;;  %v4099_v49 = vmul.f32 %v9987_v6, %v4091_v54  ;;  %v12263_v37 = vld [vmem:[#allocation91_spill] sm:$0xff]  ;;  %v12264_v43 = vld [vmem:[#allocation27_spill] sm:$0xff] }
 0x741   : > { %v4202_v9 = vmul.f32 %v12263_v37, %v10160_v36  ;;  %v4203_v18 = vmul.f32 %v12263_v37, %v10262_v8  ;;  %v4252_v34 = vmul.f32 %v12264_v43, %v10171_v57  ;;  %v4253_v32 = vmul.f32 %v12264_v43, %v10264_v3  ;;  %v10282_v51 = vld [vmem:[#allocation4 + $0x46] sm:$0xff] }
 0x742   : > { %v4106_v60 = vadd.f32 %v4098_v0, %v4046_v52  ;;  %v4107_v54 = vadd.f32 %v4099_v49, %v4047_v53  ;;  %v4158_v58 = vmul.f32 %v9995_v31, %v4150_v12  ;;  %v4159_v47 = vmul.f32 %v10005_v13, %v4151_v41  ;;  %v12265_v36 = vld [vmem:[#allocation92_spill] sm:$0xff]  ;;  %v12266_v52 = vld [vmem:[#allocation93_spill] sm:$0xff] }
 0x743   : > { %v4210_v62 = vadd.f32 %v4202_v9, %v4192_v17  ;;  %v4211_v22 = vadd.f32 %v4203_v18, %v4193_v7  ;;  %v4262_v48 = vmul.f32 %v12265_v36, %v10180_v56  ;;  %v4263_v37 = vmul.f32 %v12265_v36, %v10272_v30  ;;  %v10290_v57 = vld [vmem:[#allocation5 + $0x46] sm:$0xff] }
 0x744   : > { %v10292_v23 = vld [vmem:[#allocation4 + $0x47] sm:$0xff]  ;;  %v4166_v43 = vadd.f32 %v4158_v58, %v4106_v60  ;;  %v4167_v5 = vadd.f32 %v4159_v47, %v4107_v54  ;;  %v4312_v53 = vmul.f32 %v12266_v52, %v10184_v14  ;;  %v4313_v0 = vmul.f32 %v12266_v52, %v10282_v51 }
 0x745   : > { %v4218_v9 = vmul.f32 %v10011_v19, %v4210_v62  ;;  %v4219_v17 = vmul.f32 %v10014_v16, %v4211_v22  ;;  %v4270_v56 = vadd.f32 %v4262_v48, %v4252_v34  ;;  %v4271_v7 = vadd.f32 %v4263_v37, %v4253_v32  ;;  %v10300_v49 = vld [vmem:[#allocation5 + $0x47] sm:$0xff] }
 0x746   : > { %v4322_v12 = vmul.f32 %v12176_v42, %v10194_v10  ;;  %v4323_v41 = vmul.f32 %v12176_v42, %v10290_v57  ;;  %v4372_v14 = vmul.f32 %v12177_v1, %v10196_v21  ;;  %v4373_v18 = vmul.f32 %v12177_v1, %v10292_v23  ;;  %v10310_v60 = vld [vmem:[#allocation4 + $0x48] sm:$0xff] }
 0x747   : > { %v4226_v54 = vadd.f32 %v4218_v9, %v4166_v43  ;;  %v4227_v58 = vadd.f32 %v4219_v17, %v4167_v5  ;;  %v4278_v48 = vmul.f32 %v9955_v59, %v4270_v56  ;;  %v4279_v37 = vmul.f32 %v9961_v25, %v4271_v7  ;;  %v10318_v21 = vld [vmem:[#allocation5 + $0x48] sm:$0xff]  ;;  %v12267_v5 = vld [vmem:[#allocation97_spill] sm:$0xff]  ;;  %v12268_v7 = vld [vmem:[#allocation98_spill] sm:$0xff] }
 0x748   : > { %v4330_v34 = vadd.f32 %v4322_v12, %v4312_v53  ;;  %v4331_v32 = vadd.f32 %v4323_v41, %v4313_v0  ;;  %v4382_v10 = vmul.f32 %v12178_v11, %v10204_v40  ;;  %v4383_v47 = vmul.f32 %v12178_v11, %v10300_v49  ;;  %v10320_v62 = vld [vmem:[#allocation4 + $0x49] sm:$0xff] }
 0x749   : > { %v4286_v22 = vadd.f32 %v4278_v48, %v4226_v54  ;;  %v4287_v1 = vadd.f32 %v4279_v37, %v4227_v58  ;;  %v4432_v43 = vmul.f32 %v12267_v5, %v10214_v2  ;;  %v4433_v9 = vmul.f32 %v12267_v5, %v10310_v60  ;;  %v10328_v56 = vld [vmem:[#allocation5 + $0x49] sm:$0xff] }
 0x74a   : > { %v4338_v53 = vmul.f32 %v9967_v63, %v4330_v34  ;;  %v4339_v0 = vmul.f32 %v9972_v15, %v4331_v32  ;;  %v4390_v40 = vadd.f32 %v4382_v10, %v4372_v14  ;;  %v4391_v17 = vadd.f32 %v4383_v47, %v4373_v18  ;;  %v12269_v54 = vld [vmem:[#allocation28_spill] sm:$0xff] }
 0x74b   : > { %v4442_v12 = vmul.f32 %v12268_v7, %v10222_v35  ;;  %v4443_v41 = vmul.f32 %v12268_v7, %v10318_v21  ;;  %v4484_v2 = vmul.f32 %v12269_v54, %v10224_v28  ;;  %v4485_v58 = vmul.f32 %v12269_v54, %v10320_v62  ;;  %v10338_v48 = vld [vmem:[#allocation4 + $0x4a] sm:$0xff] }
 0x74c   : > { %v4346_v37 = vadd.f32 %v4338_v53, %v4286_v22  ;;  %v4347_v34 = vadd.f32 %v4339_v0, %v4287_v1  ;;  %v4398_v14 = vmul.f32 %v9975_v24, %v4390_v40  ;;  %v4399_v18 = vmul.f32 %v9978_v46, %v4391_v17  ;;  %v10342_v32 = vld [vmem:[#allocation5 + $0x4a] sm:$0xff] }
 0x74d   : > { %v4450_v35 = vadd.f32 %v4442_v12, %v4432_v43  ;;  %v4451_v10 = vadd.f32 %v4443_v41, %v4433_v9  ;;  %v4494_v47 = vmul.f32 %v12065_v29, %v10232_v61  ;;  %v4495_v28 = vmul.f32 %v12065_v29, %v10328_v56  ;;  %v10348_v7 = vld [vmem:[#allocation4 + $0x4b] sm:$0xff] }
 0x74e   : > { %v4406_v54 = vadd.f32 %v4398_v14, %v4346_v37  ;;  %v4407_v5 = vadd.f32 %v4399_v18, %v4347_v34  ;;  %v4544_v1 = vmul.f32 %v12181_v27, %v10242_v4  ;;  %v4545_v22 = vmul.f32 %v12181_v27, %v10338_v48  ;;  %v12270_v43 = vld [vmem:[#allocation104_spill] sm:$0xff]  ;;  %v12271_v37 = vld [vmem:[#allocation105_spill] sm:$0xff] }
 0x74f   : > { %v4502_v53 = vadd.f32 %v4494_v47, %v4484_v2  ;;  %v4503_v0 = vadd.f32 %v4495_v28, %v4485_v58  ;;  %v4554_v9 = vmul.f32 %v12270_v43, %v10246_v26  ;;  %v4555_v61 = vmul.f32 %v12270_v43, %v10342_v32  ;;  %v10358_v40 = vld [vmem:[#allocation5 + $0x4b] sm:$0xff] }
 0x750   : > { %v10360_v17 = vld [vmem:[#allocation4 + $0x4d] sm:$0xff]  ;;  %v4458_v12 = vadd.f32 %v4450_v35, %v4406_v54  ;;  %v4459_v41 = vadd.f32 %v4451_v10, %v4407_v5  ;;  %v4604_v4 = vmul.f32 %v12271_v37, %v10252_v33  ;;  %v4605_v34 = vmul.f32 %v12271_v37, %v10348_v7  ;;  %v12273_v54 = vld [vmem:[#allocation110_spill] sm:$0xff] }
 0x751   : > { %v4510_v2 = vmul.f32 %v9984_v39, %v4502_v53  ;;  %v4511_v58 = vmul.f32 %v9987_v6, %v4503_v0  ;;  %v4562_v26 = vadd.f32 %v4554_v9, %v4544_v1  ;;  %v4563_v14 = vadd.f32 %v4555_v61, %v4545_v22  ;;  %v10368_v18 = vld [vmem:[#allocation5 + $0x4d] sm:$0xff] }
 0x752   : > { %v12272_v47 = vld [vmem:[#allocation109_spill] sm:$0xff]  ;;  %v4664_v33 = vmul.f32 %v12273_v54, %v10264_v3  ;;  %v4665_v35 = vmul.f32 %v12273_v54, %v10360_v17 }
 0x753   : > { %v4614_v28 = vmul.f32 %v12272_v47, %v10262_v8  ;;  %v4615_v5 = vmul.f32 %v12272_v47, %v10358_v40  ;;  %v10378_v10 = vld [vmem:[#allocation4 + $0x4e] sm:$0xff]  ;;  %v4518_v53 = vadd.f32 %v4510_v2, %v4458_v12  ;;  %v4519_v0 = vadd.f32 %v4511_v58, %v4459_v41  ;;  %v12275_v12 = vld [vmem:[#allocation114_spill] sm:$0xff] }
 0x754   : > { %v4570_v1 = vmul.f32 %v9995_v31, %v4562_v26  ;;  %v4571_v22 = vmul.f32 %v10005_v13, %v4563_v14  ;;  %v12274_v8 = vld [vmem:[#allocation113_spill] sm:$0xff]  ;;  %v4724_v41 = vmul.f32 %v12275_v12, %v10282_v51  ;;  %v4725_v2 = vmul.f32 %v12275_v12, %v10378_v10  ;;  %v12276_v14 = vld [vmem:[#allocation116_spill] sm:$0xff] }
 0x755   : > { %v4622_v9 = vadd.f32 %v4614_v28, %v4604_v4  ;;  %v4623_v61 = vadd.f32 %v4615_v5, %v4605_v34  ;;  %v4674_v37 = vmul.f32 %v12274_v8, %v10272_v30  ;;  %v4675_v47 = vmul.f32 %v12274_v8, %v10368_v18  ;;  %v10386_v3 = vld [vmem:[#allocation5 + $0x4e] sm:$0xff] }
 0x756   : > { %v10388_v43 = vld [vmem:[#allocation4 + $0x4f] sm:$0xff]  ;;  %v4578_v54 = vadd.f32 %v4570_v1, %v4518_v53  ;;  %v4579_v27 = vadd.f32 %v4571_v22, %v4519_v0  ;;  %v4734_v28 = vmul.f32 %v12276_v14, %v10290_v57  ;;  %v4735_v5 = vmul.f32 %v12276_v14, %v10386_v3 }
 0x757   : > { %v4630_v4 = vmul.f32 %v10011_v19, %v4622_v9  ;;  %v4631_v34 = vmul.f32 %v10014_v16, %v4623_v61  ;;  %v4682_v30 = vadd.f32 %v4674_v37, %v4664_v33  ;;  %v4683_v58 = vadd.f32 %v4675_v47, %v4665_v35  ;;  %v10396_v26 = vld [vmem:[#allocation5 + $0x4f] sm:$0xff] }
 0x758   : > { %v12277_v53 = vld [vmem:[#allocation117_spill] sm:$0xff]  ;;  %v4742_v33 = vadd.f32 %v4734_v28, %v4724_v41  ;;  %v4743_v35 = vadd.f32 %v4735_v5, %v4725_v2  ;;  %v12278_v57 = vld [vmem:[#allocation120_spill] sm:$0xff] }
 0x759   : > { %v4784_v51 = vmul.f32 %v12277_v53, %v10292_v23  ;;  %v4785_v0 = vmul.f32 %v12277_v53, %v10388_v43  ;;  %v10406_v1 = vld [vmem:[#allocation4 + $0x50] sm:$0xff]  ;;  %v4638_v22 = vadd.f32 %v4630_v4, %v4578_v54  ;;  %v4639_v9 = vadd.f32 %v4631_v34, %v4579_v27  ;;  %v12279_v27 = vld [vmem:[#allocation122_spill] sm:$0xff] }
 0x75a   : > { %v4690_v37 = vmul.f32 %v9955_v59, %v4682_v30  ;;  %v4691_v47 = vmul.f32 %v9961_v25, %v4683_v58  ;;  %v4794_v61 = vmul.f32 %v12278_v57, %v10300_v49  ;;  %v4795_v14 = vmul.f32 %v12278_v57, %v10396_v26  ;;  %v10414_v23 = vld [vmem:[#allocation5 + $0x50] sm:$0xff]  ;;  %v12280_v58 = vld [vmem:[#allocation124_spill] sm:$0xff] }
 0x75b   : > { %v10416_v12 = vld [vmem:[#allocation4 + $0x51] sm:$0xff]  ;;  %v4844_v54 = vmul.f32 %v12279_v27, %v10310_v60  ;;  %v4845_v4 = vmul.f32 %v12279_v27, %v10406_v1  ;;  %v4750_v41 = vmul.f32 %v9967_v63, %v4742_v33  ;;  %v4751_v2 = vmul.f32 %v9972_v15, %v4743_v35 }
 0x75c   : > { %v4698_v53 = vadd.f32 %v4690_v37, %v4638_v22  ;;  %v4699_v8 = vadd.f32 %v4691_v47, %v4639_v9  ;;  %v4802_v49 = vadd.f32 %v4794_v61, %v4784_v51  ;;  %v4803_v34 = vadd.f32 %v4795_v14, %v4785_v0  ;;  %v10424_v30 = vld [vmem:[#allocation5 + $0x51] sm:$0xff] }
 0x75d   : > { %v4854_v28 = vmul.f32 %v12280_v58, %v10318_v21  ;;  %v4855_v5 = vmul.f32 %v12280_v58, %v10414_v23  ;;  %v12281_v22 = vld [vmem:[#allocation125_spill] sm:$0xff]  ;;  %v12282_v61 = vld [vmem:[#allocation126_spill] sm:$0xff] }
 0x75e   : > { %v4896_v60 = vmul.f32 %v12281_v22, %v10320_v62  ;;  %v4897_v9 = vmul.f32 %v12281_v22, %v10416_v12  ;;  %v10434_v37 = vld [vmem:[#allocation4 + $0x52] sm:$0xff]  ;;  %v4758_v47 = vadd.f32 %v4750_v41, %v4698_v53  ;;  %v4759_v33 = vadd.f32 %v4751_v2, %v4699_v8  ;;  %v12283_v8 = vld [vmem:[#allocation127_spill] sm:$0xff] }
 0x75f   : > { %v4810_v14 = vmul.f32 %v9975_v24, %v4802_v49  ;;  %v4811_v51 = vmul.f32 %v9978_v46, %v4803_v34  ;;  %v10438_v0 = vld [vmem:[#allocation5 + $0x52] sm:$0xff]  ;;  %v4862_v21 = vadd.f32 %v4854_v28, %v4844_v54  ;;  %v4863_v35 = vadd.f32 %v4855_v5, %v4845_v4  ;;  %v12284_v54 = vld [vmem:[#allocation128_spill] sm:$0xff] }
 0x760   : > { %v4906_v58 = vmul.f32 %v12282_v61, %v10328_v56  ;;  %v4907_v62 = vmul.f32 %v12282_v61, %v10424_v30  ;;  %v10444_v27 = vld [vmem:[#allocation4 + $0x53] sm:$0xff]  ;;  %v4956_v53 = vmul.f32 %v12283_v8, %v10338_v48  ;;  %v4957_v41 = vmul.f32 %v12283_v8, %v10434_v37 }
 0x761   : > { %v4818_v22 = vadd.f32 %v4810_v14, %v4758_v47  ;;  %v4819_v57 = vadd.f32 %v4811_v51, %v4759_v33  ;;  %v4966_v4 = vmul.f32 %v12284_v54, %v10342_v32  ;;  %v4967_v56 = vmul.f32 %v12284_v54, %v10438_v0  ;;  %v10454_v34 = vld [vmem:[#allocation5 + $0x53] sm:$0xff] }
 0x762   : > { %v4914_v2 = vadd.f32 %v4906_v58, %v4896_v60  ;;  %v4915_v49 = vadd.f32 %v4907_v62, %v4897_v9  ;;  %v10456_v28 = vld [vmem:[#allocation4 + $0x55] sm:$0xff] }
 0x763   : > { %v4870_v5 = vadd.f32 %v4862_v21, %v4818_v22  ;;  %v4871_v47 = vadd.f32 %v4863_v35, %v4819_v57  ;;  %v12285_v33 = vld [vmem:[#allocation129_spill] sm:$0xff]  ;;  %v4974_v32 = vadd.f32 %v4966_v4, %v4956_v53  ;;  %v4975_v9 = vadd.f32 %v4967_v56, %v4957_v41  ;;  %v12286_v62 = vld [vmem:[#allocation130_spill] sm:$0xff]  ;;  %v12287_v22 = vld [vmem:[#allocation131_spill] sm:$0xff] }
 0x764   : > { %v5016_v48 = vmul.f32 %v12285_v33, %v10348_v7  ;;  %v5017_v14 = vmul.f32 %v12285_v33, %v10444_v27  ;;  %v4922_v58 = vmul.f32 %v9984_v39, %v4914_v2  ;;  %v4923_v60 = vmul.f32 %v9987_v6, %v4915_v49  ;;  %v10464_v51 = vld [vmem:[#allocation5 + $0x55] sm:$0xff] }
 0x765   : > { %v5026_v54 = vmul.f32 %v12286_v62, %v10358_v40  ;;  %v5027_v57 = vmul.f32 %v12286_v62, %v10454_v34  ;;  %v5076_v7 = vmul.f32 %v12287_v22, %v10360_v17  ;;  %v5077_v21 = vmul.f32 %v12287_v22, %v10456_v28  ;;  %v10474_v35 = vld [vmem:[#allocation4 + $0x56] sm:$0xff]  ;;  %v12288_v40 = vld [vmem:[#allocation132_spill] sm:$0xff] }
 0x766   : > { %v4930_v2 = vadd.f32 %v4922_v58, %v4870_v5  ;;  %v4931_v49 = vadd.f32 %v4923_v60, %v4871_v47  ;;  %v4982_v53 = vmul.f32 %v9995_v31, %v4974_v32  ;;  %v4983_v41 = vmul.f32 %v10005_v13, %v4975_v9  ;;  %v10482_v17 = vld [vmem:[#allocation5 + $0x56] sm:$0xff] }
 0x767   : > { %v5034_v4 = vadd.f32 %v5026_v54, %v5016_v48  ;;  %v5035_v56 = vadd.f32 %v5027_v57, %v5017_v14  ;;  %v5086_v33 = vmul.f32 %v12288_v40, %v10368_v18  ;;  %v5087_v62 = vmul.f32 %v12288_v40, %v10464_v51  ;;  %v10484_v8 = vld [vmem:[#allocation4 + $0x57] sm:$0xff] }
 0x768   : > { %v4990_v22 = vadd.f32 %v4982_v53, %v4930_v2  ;;  %v4991_v61 = vadd.f32 %v4983_v41, %v4931_v49  ;;  %v12289_v5 = vld [vmem:[#allocation133_spill] sm:$0xff]  ;;  %v12290_v32 = vld [vmem:[#allocation134_spill] sm:$0xff]  ;;  %v12291_v2 = vld [vmem:[#allocation136_spill] sm:$0xff] }
 0x769   : > { %v5136_v47 = vmul.f32 %v12289_v5, %v10378_v10  ;;  %v5137_v58 = vmul.f32 %v12289_v5, %v10474_v35  ;;  %v5042_v54 = vmul.f32 %v10011_v19, %v5034_v4  ;;  %v5043_v48 = vmul.f32 %v10014_v16, %v5035_v56  ;;  %v10492_v60 = vld [vmem:[#allocation5 + $0x57] sm:$0xff] }
 0x76a   : > { %v5094_v18 = vadd.f32 %v5086_v33, %v5076_v7  ;;  %v5095_v14 = vadd.f32 %v5087_v62, %v5077_v21  ;;  %v5146_v9 = vmul.f32 %v12290_v32, %v10386_v3  ;;  %v5147_v57 = vmul.f32 %v12290_v32, %v10482_v17  ;;  %v10502_v53 = vld [vmem:[#allocation4 + $0x58] sm:$0xff]  ;;  %v12292_v3 = vld [vmem:[#allocation137_spill] sm:$0xff] }
 0x76b   : > { %v5196_v10 = vmul.f32 %v12291_v2, %v10388_v43  ;;  %v5197_v49 = vmul.f32 %v12291_v2, %v10484_v8  ;;  %v5050_v41 = vadd.f32 %v5042_v54, %v4990_v22  ;;  %v5051_v4 = vadd.f32 %v5043_v48, %v4991_v61  ;;  %v10510_v43 = vld [vmem:[#allocation5 + $0x58] sm:$0xff] }
 0x76c   : > { %v5102_v33 = vmul.f32 %v9955_v59, %v5094_v18  ;;  %v5103_v62 = vmul.f32 %v9961_v25, %v5095_v14  ;;  %v5154_v7 = vadd.f32 %v5146_v9, %v5136_v47  ;;  %v5155_v21 = vadd.f32 %v5147_v57, %v5137_v58  ;;  %v10512_v5 = vld [vmem:[#allocation4 + $0x59] sm:$0xff] }
 0x76d   : > { %v5206_v56 = vmul.f32 %v12292_v3, %v10396_v26  ;;  %v5207_v32 = vmul.f32 %v12292_v3, %v10492_v60  ;;  %v12293_v61 = vld [vmem:[#allocation138_spill] sm:$0xff]  ;;  %v12294_v14 = vld [vmem:[#allocation139_spill] sm:$0xff] }
 0x76e   : > { %v5110_v2 = vadd.f32 %v5102_v33, %v5050_v41  ;;  %v5111_v40 = vadd.f32 %v5103_v62, %v5051_v4  ;;  %v5256_v22 = vmul.f32 %v12293_v61, %v10406_v1  ;;  %v5257_v54 = vmul.f32 %v12293_v61, %v10502_v53  ;;  %v10520_v18 = vld [vmem:[#allocation5 + $0x59] sm:$0xff]  ;;  %v12295_v41 = vld [vmem:[#allocation140_spill] sm:$0xff] }
 0x76f   : > { %v5162_v47 = vmul.f32 %v9967_v63, %v5154_v7  ;;  %v5163_v58 = vmul.f32 %v9972_v15, %v5155_v21  ;;  %v5214_v26 = vadd.f32 %v5206_v56, %v5196_v10  ;;  %v5215_v48 = vadd.f32 %v5207_v32, %v5197_v49  ;;  %v10530_v33 = vld [vmem:[#allocation4 + $0x5a] sm:$0xff]  ;;  %v12296_v56 = vld [vmem:[#allocation141_spill] sm:$0xff] }
 0x770   : > { %v5266_v9 = vmul.f32 %v12294_v14, %v10414_v23  ;;  %v5267_v57 = vmul.f32 %v12294_v14, %v10510_v43  ;;  %v5308_v1 = vmul.f32 %v12295_v41, %v10416_v12  ;;  %v5309_v4 = vmul.f32 %v12295_v41, %v10512_v5  ;;  %v10534_v49 = vld [vmem:[#allocation5 + $0x5a] sm:$0xff] }
 0x771   : > { %v5170_v62 = vadd.f32 %v5162_v47, %v5110_v2  ;;  %v5171_v7 = vadd.f32 %v5163_v58, %v5111_v40  ;;  %v5222_v32 = vmul.f32 %v9975_v24, %v5214_v26  ;;  %v5223_v10 = vmul.f32 %v9978_v46, %v5215_v48  ;;  %v10540_v61 = vld [vmem:[#allocation4 + $0x5b] sm:$0xff] }
 0x772   : > { %v5274_v23 = vadd.f32 %v5266_v9, %v5256_v22  ;;  %v5275_v21 = vadd.f32 %v5267_v57, %v5257_v54  ;;  %v5318_v14 = vmul.f32 %v12296_v56, %v10424_v30  ;;  %v5319_v12 = vmul.f32 %v12296_v56, %v10520_v18  ;;  %v12297_v40 = vld [vmem:[#allocation142_spill] sm:$0xff]  ;;  %v12298_v22 = vld [vmem:[#allocation143_spill] sm:$0xff] }
 0x773   : > { %v5230_v41 = vadd.f32 %v5222_v32, %v5170_v62  ;;  %v5231_v3 = vadd.f32 %v5223_v10, %v5171_v7  ;;  %v5368_v2 = vmul.f32 %v12297_v40, %v10434_v37  ;;  %v5369_v47 = vmul.f32 %v12297_v40, %v10530_v33  ;;  %v10550_v48 = vld [vmem:[#allocation5 + $0x5b] sm:$0xff]  ;;  %v12299_v10 = vld [vmem:[#allocation145_spill] sm:$0xff] }
 0x774   : > { %v5326_v58 = vadd.f32 %v5318_v14, %v5308_v1  ;;  %v5327_v26 = vadd.f32 %v5319_v12, %v5309_v4  ;;  %v5378_v54 = vmul.f32 %v12298_v22, %v10438_v0  ;;  %v5379_v30 = vmul.f32 %v12298_v22, %v10534_v49  ;;  %v5471_v9 = vld [vmem:[#allocation4 + $0x5d] sm:$0xff] }
 0x775   : > { %v5282_v57 = vadd.f32 %v5274_v23, %v5230_v41  ;;  %v5283_v62 = vadd.f32 %v5275_v21, %v5231_v3  ;;  %v5428_v7 = vmul.f32 %v12209_v50, %v10444_v27  ;;  %v5429_v37 = vmul.f32 %v12209_v50, %v10540_v61  ;;  %v5479_v32 = vld [vmem:[#allocation5 + $0x5d] sm:$0xff] }
 0x776   : > { %v5334_v14 = vmul.f32 %v9984_v39, %v5326_v58  ;;  %v5335_v1 = vmul.f32 %v9987_v6, %v5327_v26  ;;  %v5386_v4 = vadd.f32 %v5378_v54, %v5368_v2  ;;  %v5387_v0 = vadd.f32 %v5379_v30, %v5369_v47  ;;  %v5531_v23 = vld [vmem:[#allocation4 + $0x5e] sm:$0xff] }
 0x777   : > { %v5438_v12 = vmul.f32 %v12299_v10, %v10454_v34  ;;  %v5439_v41 = vmul.f32 %v12299_v10, %v10550_v48  ;;  %v5488_v3 = vmul.f32 %v12105_v20, %v10456_v28  ;;  %v5489_v27 = vmul.f32 %v12105_v20, %v5471_v9  ;;  %v5539_v30 = vld [vmem:[#allocation5 + $0x5e] sm:$0xff] }
 0x778   : > { %v5342_v21 = vadd.f32 %v5334_v14, %v5282_v57  ;;  %v5343_v50 = vadd.f32 %v5335_v1, %v5283_v62  ;;  %v5394_v58 = vmul.f32 %v9995_v31, %v5386_v4  ;;  %v5395_v2 = vmul.f32 %v10005_v13, %v5387_v0  ;;  %v5591_v10 = vld [vmem:[#allocation4 + $0x5f] sm:$0xff] }
 0x779   : > { %v5446_v47 = vadd.f32 %v5438_v12, %v5428_v7  ;;  %v5447_v26 = vadd.f32 %v5439_v41, %v5429_v37  ;;  %v5498_v34 = vmul.f32 %v12106_v55, %v10464_v51  ;;  %v5499_v54 = vmul.f32 %v12106_v55, %v5479_v32  ;;  %v5599_v1 = vld [vmem:[#allocation5 + $0x5f] sm:$0xff] }
 0x77a   : > { %v5402_v22 = vadd.f32 %v5394_v58, %v5342_v21  ;;  %v5403_v28 = vadd.f32 %v5395_v2, %v5343_v50  ;;  %v5548_v9 = vmul.f32 %v12107_v44, %v10474_v35  ;;  %v5549_v57 = vmul.f32 %v12107_v44, %v5531_v23  ;;  %v12300_v0 = vld [vmem:[#allocation150_spill] sm:$0xff]  ;;  %v5651_v35 = vld [vmem:[#allocation4 + $0x60] sm:$0xff] }
 0x77b   : > { %v5454_v62 = vmul.f32 %v10011_v19, %v5446_v47  ;;  %v5455_v14 = vmul.f32 %v10014_v16, %v5447_v26  ;;  %v5506_v7 = vadd.f32 %v5498_v34, %v5488_v3  ;;  %v5507_v37 = vadd.f32 %v5499_v54, %v5489_v27  ;;  %v12301_v58 = vld [vmem:[#allocation151_spill] sm:$0xff] }
 0x77c   : > { %v5558_v51 = vmul.f32 %v12108_v45, %v10482_v17  ;;  %v5559_v4 = vmul.f32 %v12108_v45, %v5539_v30  ;;  %v5608_v50 = vmul.f32 %v12300_v0, %v10484_v8  ;;  %v5609_v32 = vmul.f32 %v12300_v0, %v5591_v10  ;;  %v5659_v47 = vld [vmem:[#allocation5 + $0x60] sm:$0xff]  ;;  %v12302_v10 = vld [vmem:[#allocation152_spill] sm:$0xff] }
 0x77d   : > { %v5462_v12 = vadd.f32 %v5454_v62, %v5402_v22  ;;  %v5463_v41 = vadd.f32 %v5455_v14, %v5403_v28  ;;  %v5514_v23 = vmul.f32 %v9955_v59, %v5506_v7  ;;  %v5515_v21 = vmul.f32 %v9961_v25, %v5507_v37  ;;  %v5703_v26 = vld [vmem:[#allocation4 + $0x61] sm:$0xff]  ;;  %v12304_v14 = vld [vmem:[#allocation154_spill] sm:$0xff] }
 0x77e   : > { %v5566_v3 = vadd.f32 %v5558_v51, %v5548_v9  ;;  %v5567_v27 = vadd.f32 %v5559_v4, %v5549_v57  ;;  %v5618_v2 = vmul.f32 %v12301_v58, %v10492_v60  ;;  %v5619_v17 = vmul.f32 %v12301_v58, %v5599_v1  ;;  %v5711_v9 = vld [vmem:[#allocation5 + $0x61] sm:$0xff]  ;;  %v12303_v60 = vld [vmem:[#allocation153_spill] sm:$0xff]  ;;  %v12323_v58 = vld [vmem:[#allocation53_spill] sm:$0xff] }
 0x77f   : > { %v5522_v34 = vadd.f32 %v5514_v23, %v5462_v12  ;;  %v5523_v8 = vadd.f32 %v5515_v21, %v5463_v41  ;;  %v5668_v54 = vmul.f32 %v12302_v10, %v10502_v53  ;;  %v5669_v22 = vmul.f32 %v12302_v10, %v5651_v35  ;;  %v5763_v53 = vld [vmem:[#allocation4 + $0x62] sm:$0xff] }
 0x780   : > { %v5574_v59 = vmul.f32 %v9967_v63, %v5566_v3  ;;  %v5575_v25 = vmul.f32 %v9972_v15, %v5567_v27  ;;  %v5626_v30 = vadd.f32 %v5618_v2, %v5608_v50  ;;  %v5627_v28 = vadd.f32 %v5619_v17, %v5609_v32  ;;  %v5771_v4 = vld [vmem:[#allocation5 + $0x62] sm:$0xff] }
 0x781   : > { %v5678_v57 = vmul.f32 %v12303_v60, %v10510_v43  ;;  %v5679_v62 = vmul.f32 %v12303_v60, %v5659_v47  ;;  %v5720_v7 = vmul.f32 %v12304_v14, %v10512_v5  ;;  %v5721_v37 = vmul.f32 %v12304_v14, %v5703_v26  ;;  %v12305_v35 = vld [vmem:[#allocation155_spill] sm:$0xff]  ;;  %v12306_v21 = vld [vmem:[#allocation156_spill] sm:$0xff]  ;;  %v12322_v60 = vld [vmem:[#allocation52_spill] sm:$0xff] }
 0x782   : > { %v5582_v1 = vadd.f32 %v5574_v59, %v5522_v34  ;;  %v5583_v51 = vadd.f32 %v5575_v25, %v5523_v8  ;;  %v5634_v63 = vmul.f32 %v9975_v24, %v5626_v30  ;;  %v5635_v15 = vmul.f32 %v9978_v46, %v5627_v28  ;;  %v5823_v41 = vld [vmem:[#allocation4 + $0x63] sm:$0xff]  ;;  %v12307_v46 = vld [vmem:[#allocation157_spill] sm:$0xff]  ;;  %v3352_v14 = vld [vmem:[#allocation4 + $0x3b] sm:$0xff] }
 0x783   : > { %v5686_v50 = vadd.f32 %v5678_v57, %v5668_v54  ;;  %v5687_v32 = vadd.f32 %v5679_v62, %v5669_v22  ;;  %v5730_v43 = vmul.f32 %v12305_v35, %v10520_v18  ;;  %v5731_v12 = vmul.f32 %v12305_v35, %v5711_v9  ;;  %v5831_v26 = vld [vmem:[#allocation5 + $0x63] sm:$0xff] }
 0x784   : > { %v5642_v23 = vadd.f32 %v5634_v63, %v5582_v1  ;;  %v5643_v5 = vadd.f32 %v5635_v15, %v5583_v51  ;;  %v5780_v3 = vmul.f32 %v12306_v21, %v10530_v33  ;;  %v5781_v27 = vmul.f32 %v12306_v21, %v5763_v53  ;;  %v12308_v8 = vld [vmem:[#allocation99_spill] sm:$0xff]  ;;  %v12309_v28 = vld [vmem:[#allocation55_spill] sm:$0xff] }
 0x785   : > { %v5738_v2 = vadd.f32 %v5730_v43, %v5720_v7  ;;  %v5739_v24 = vadd.f32 %v5731_v12, %v5721_v37  ;;  %v5790_v17 = vmul.f32 %v12307_v46, %v10534_v49  ;;  %v5791_v47 = vmul.f32 %v12307_v46, %v5771_v4  ;;  %v12310_v57 = vld [vmem:[#allocation31_spill] sm:$0xff]  ;;  %v12311_v7 = vld [vmem:[#allocation32_spill] sm:$0xff]  ;;  %v12324_v44 = vld [vmem:[#allocation54_spill] sm:$0xff] }
 0x786   : > { %v5694_v34 = vadd.f32 %v5686_v50, %v5642_v23  ;;  %v5695_v18 = vadd.f32 %v5687_v32, %v5643_v5  ;;  %v5840_v54 = vmul.f32 %v12308_v8, %v10540_v61  ;;  %v5841_v22 = vmul.f32 %v12308_v8, %v5823_v41  ;;  %v10704_v8 = vld [vmem:[#allocation4 + $0x41] sm:$0xff] }
 0x787   : > { %v5746_v59 = vmul.f32 %v9984_v39, %v5738_v2  ;;  %v5747_v33 = vmul.f32 %v9987_v6, %v5739_v24  ;;  %v5798_v25 = vadd.f32 %v5790_v17, %v5780_v3  ;;  %v5799_v30 = vadd.f32 %v5791_v47, %v5781_v27 }
 0x788   : > { %v5850_v9 = vmul.f32 %v12309_v28, %v10550_v48  ;;  %v5851_v49 = vmul.f32 %v12309_v28, %v5831_v26  ;;  %v2712_v62 = vadd.s32 4294967293, %v12310_v57  ;;  %v2713_v37 = vadd.s32 4294967293, %v12311_v7  ;;  %v3232_v28 = vld [vmem:[#allocation4 + $0x39] sm:$0xff] }
 0x789   : > { %v5754_v53 = vadd.f32 %v5746_v59, %v5694_v34  ;;  %v5755_v1 = vadd.f32 %v5747_v33, %v5695_v18  ;;  %v5806_v61 = vmul.f32 %v9995_v31, %v5798_v25  ;;  %v5807_v51 = vmul.f32 %v10005_v13, %v5799_v30  ;;  %v3000_v18 = vld [vmem:[#allocation4 + $0x35] sm:$0xff]  ;;  %v10655_v33 = vld [vmem:[#allocation4 + $0x3d] sm:$0xff] }
 0x78a   : > { %v5858_v39 = vadd.f32 %v5850_v9, %v5840_v54  ;;  %v5859_v63 = vadd.f32 %v5851_v49, %v5841_v22  ;;  %vm2720_vm11 = vcmp.ge.s32.totalorder %v2712_v62, 0  ;;  %vm2721_vm3 = vcmp.ge.s32.totalorder %v2713_v37, 0  ;;  %v3008_v25 = vld [vmem:[#allocation5 + $0x35] sm:$0xff]  ;;  %v10658_v9 = vld [vmem:[#allocation5 + $0x3d] sm:$0xff] }
 0x78b   : > { %v5814_v6 = vadd.f32 %v5806_v61, %v5754_v53  ;;  %v5815_v15 = vadd.f32 %v5807_v51, %v5755_v1  ;;  %v12312_v4 = vmov 0.0   ;;  %v2760_v31 = vadd.s32 4294967294, %v12310_v57  ;;  %v3060_v49 = vld [vmem:[#allocation4 + $0x36] sm:$0xff]  ;;  %v10660_v62 = vld [vmem:[#allocation4 + $0x3e] sm:$0xff] }
 0x78c   : > { %v10621_v48 = vsel %vm2720_vm11, 1.0, %v12312_v4  ;;  %v10624_v50 = vsel %vm2721_vm3, 1.0, %v12312_v4  ;;  %v5866_v32 = vmul.f32 %v10011_v19, %v5858_v39  ;;  %v5867_v43 = vmul.f32 %v10014_v16, %v5859_v63  ;;  %v3068_v61 = vld [vmem:[#allocation5 + $0x36] sm:$0xff]  ;;  %v10669_v51 = vld [vmem:[#allocation5 + $0x3e] sm:$0xff] }
 0x78d   : > { %v2761_v13 = vadd.s32 4294967294, %v12311_v7  ;;  %v2808_v12 = vadd.s32 4294967295, %v12310_v57  ;;  %v2809_v41 = vadd.s32 4294967295, %v12311_v7  ;;  %v2856_v23 = vadd.s32 1, %v12310_v57  ;;  %v3120_v39 = vld [vmem:[#allocation4 + $0x37] sm:$0xff] }
 0x78e   : > { %v2857_v5 = vadd.s32 1, %v12311_v7  ;;  %v5874_v3 = vadd.f32 %v5866_v32, %v5814_v6  ;;  %v5875_v27 = vadd.f32 %v5867_v43, %v5815_v15  ;;  %vm2768_vm9 = vcmp.ge.s32.totalorder %v2760_v31, 0  ;;  %v12314_v6 = vld [vmem:[#allocation42_spill] sm:$0xff]  ;;  %v3128_v43 = vld [vmem:[#allocation5 + $0x37] sm:$0xff] }
 0x78f   : > { %vm2769_vm12 = vcmp.ge.s32.totalorder %v2761_v13, 0  ;;  %v10635_v19 = vsel %vm2768_vm9, 1.0, %v12312_v4  ;;  %vm2816_vm13 = vcmp.ge.s32.totalorder %v2808_v12, 0  ;;  %vm2817_vm14 = vcmp.ge.s32.totalorder %v2809_v41, 0  ;;  %v10677_v32 = vld [vmem:[#allocation4 + $0x3f] sm:$0xff] }
 0x790   : > { %v10638_v16 = vsel %vm2769_vm12, 1.0, %v12312_v4  ;;  %v6360_v2 = vmul.f32 -1.442695, %v5874_v3  ;;  %v6361_v24 = vmul.f32 -1.442695, %v5875_v27  ;;  %v10641_v17 = vsel %vm2816_vm13, 1.0, %v12312_v4 }
 0x791   : > { %v10644_v47 = vsel %vm2817_vm14, 1.0, %v12312_v4  ;;  %vm2872_vm15 = vcmp.lt.s32.totalorder %v2856_v23, 8  ;;  %vm2873_vm1 = vcmp.lt.s32.totalorder %v2857_v5, 8  ;;  %v2904_v26 = vadd.s32 2, %v12310_v57  ;;  %v10679_v31 = vld [vmem:[#allocation5 + $0x3f] sm:$0xff] }
 0x792   : > { %v2905_v34 = vadd.s32 2, %v12311_v7  ;;  %6594 = vpow2.f32 %v6360_v2  ;;  %v10649_v54 = vsel %vm2872_vm15, 1.0, %v12312_v4  ;;  %v10652_v22 = vsel %vm2873_vm1, 1.0, %v12312_v4  ;;  %v12315_v41 = vld [vmem:[#allocation26_spill] sm:$0xff]  ;;  %v3180_v3 = vld [vmem:[#allocation4 + $0x38] sm:$0xff]  ;;  %v12316_v2 = vld [vmem:[#allocation44_spill] sm:$0xff] }
 0x793   : > { %v2952_v59 = vadd.s32 3, %v12310_v57  ;;  %6596 = vpow2.f32 %v6361_v24  ;;  %vm2920_vm2 = vcmp.lt.s32.totalorder %v2904_v26, 8  ;;  %v2953_v30 = vadd.s32 3, %v12311_v7  ;;  %v12313_v57 = vld [vmem:[#allocation41_spill] sm:$0xff] }
 0x794   : > { %vm2921_vm4 = vcmp.lt.s32.totalorder %v2905_v34, 8  ;;  %v10663_v37 = vsel %vm2920_vm2, 1.0, %v12312_v4  ;;  %v3018_v1 = vmul.f32 %v12313_v57, %v3000_v18  ;;  %v3019_v63 = vmul.f32 %v12313_v57, %v10655_v33  ;;  %v12317_v34 = vld [vmem:[#allocation46_spill] sm:$0xff] }
 0x795   : > { %v10666_v53 = vsel %vm2921_vm4, 1.0, %v12312_v4  ;;  %vm2968_vm7 = vcmp.lt.s32.totalorder %v2952_v59, 8  ;;  %vm2969_vm5 = vcmp.lt.s32.totalorder %v2953_v30, 8  ;;  %v3028_v15 = vmul.f32 %v12314_v6, %v3008_v25  ;;  %v10693_v59 = vld [vmem:[#allocation4 + $0x40] sm:$0xff]  ;;  %v12318_v30 = vld [vmem:[#allocation47_spill] sm:$0xff] }
 0x796   : > { %v10672_v7 = vsel %vm2968_vm7, 1.0, %v12312_v4  ;;  %v10682_v13 = vsel %vm2969_vm5, 1.0, %v12312_v4  ;;  %v3029_v12 = vmul.f32 %v12314_v6, %v10658_v9  ;;  %v3078_v23 = vmul.f32 %v12315_v41, %v3060_v49  ;;  %v3188_v6 = vld [vmem:[#allocation5 + $0x38] sm:$0xff] }
 0x797   : > { %v3079_v5 = vmul.f32 %v12315_v41, %v10660_v62  ;;  %v3036_v27 = vadd.f32 %v3028_v15, %v3018_v1  ;;  %v3088_v24 = vmul.f32 %v12316_v2, %v3068_v61  ;;  %v3089_v26 = vmul.f32 %v12316_v2, %v10669_v51  ;;  %v10700_v1 = vld [vmem:[#allocation5 + $0x40] sm:$0xff]  ;;  %v12319_v2 = vld [vmem:[#allocation48_spill] sm:$0xff] }
 0x798   : > { %v3138_v18 = vmul.f32 %v12317_v34, %v3120_v39  ;;  %v3037_v4 = vadd.f32 %v3029_v12, %v3019_v63  ;;  %v3139_v25 = vmul.f32 %v12317_v34, %v10677_v32  ;;  %v3148_v49 = vmul.f32 %v12318_v30, %v3128_v43 }
 0x799   : > { %v3149_v57 = vmul.f32 %v12318_v30, %v10679_v31  ;;  %v3044_v61 = vmul.f32 %v10621_v48, %v3036_v27  ;;  %v3096_v15 = vadd.f32 %v3088_v24, %v3078_v23  ;;  %v3097_v41 = vadd.f32 %v3089_v26, %v3079_v5  ;;  %v3292_v30 = vld [vmem:[#allocation4 + $0x3a] sm:$0xff]  ;;  %v10716_v26 = vld [vmem:[#allocation4 + $0x42] sm:$0xff] }
 0x79a   : > { %v3198_v39 = vmul.f32 %v12319_v2, %v3180_v3  ;;  %v3045_v63 = vmul.f32 %v10624_v50, %v3037_v4  ;;  %v3156_v12 = vadd.f32 %v3148_v49, %v3138_v18  ;;  %v3199_v43 = vmul.f32 %v12319_v2, %v10693_v59  ;;  %v12320_v27 = vld [vmem:[#allocation49_spill] sm:$0xff]  ;;  %v10714_v24 = vld [vmem:[#allocation5 + $0x41] sm:$0xff] }
 0x79b   : > { %v3157_v34 = vadd.f32 %v3149_v57, %v3139_v25  ;;  %v3104_v46 = vmul.f32 %v10635_v19, %v3096_v15  ;;  %v3105_v21 = vmul.f32 %v10638_v16, %v3097_v41  ;;  %v3208_v23 = vmul.f32 %v12320_v27, %v3188_v6  ;;  %v3240_v3 = vld [vmem:[#allocation5 + $0x39] sm:$0xff]  ;;  %v12321_v25 = vld [vmem:[#allocation51_spill] sm:$0xff] }
 0x79c   : > { %v3209_v5 = vmul.f32 %v12320_v27, %v10700_v1  ;;  %v3164_v18 = vmul.f32 %v10641_v17, %v3156_v12  ;;  %v3250_v49 = vmul.f32 %v12321_v25, %v3232_v28  ;;  %v3251_v57 = vmul.f32 %v12321_v25, %v10704_v8  ;;  %v3300_v15 = vld [vmem:[#allocation5 + $0x3a] sm:$0xff]  ;;  %v10723_v41 = vld [vmem:[#allocation5 + $0x42] sm:$0xff] }
 0x79d   : > { %v3165_v4 = vmul.f32 %v10644_v47, %v3157_v34  ;;  %v3112_v6 = vadd.f32 %v3104_v46, %v3044_v61  ;;  %v3113_v2 = vadd.f32 %v3105_v21, %v3045_v63  ;;  %v3216_v27 = vadd.f32 %v3208_v23, %v3198_v39  ;;  %v12325_v23 = vld [vmem:[#allocation56_spill] sm:$0xff] }
 0x79e   : > { %v3217_v35 = vadd.f32 %v3209_v5, %v3199_v43  ;;  %v3260_v10 = vmul.f32 %v12322_v60, %v3240_v3  ;;  %v3261_v12 = vmul.f32 %v12322_v60, %v10714_v24  ;;  %v3310_v34 = vmul.f32 %v12323_v58, %v3292_v30  ;;  %v10734_v43 = vld [vmem:[#allocation4 + $0x43] sm:$0xff]  ;;  %v3360_v60 = vld [vmem:[#allocation5 + $0x3b] sm:$0xff] }
 0x79f   : > { %v3311_v28 = vmul.f32 %v12323_v58, %v10716_v26  ;;  %v6595_v0 = vpop.eup %6594  ;;  %v3172_v25 = vadd.f32 %v3164_v18, %v3112_v6  ;;  %v3173_v45 = vadd.f32 %v3165_v4, %v3113_v2  ;;  %v3320_v55 = vmul.f32 %v12324_v44, %v3300_v15  ;;  %v10737_v18 = vld [vmem:[#allocation5 + $0x43] sm:$0xff] }
 0x7a0   : > { %v3321_v21 = vmul.f32 %v12324_v44, %v10723_v41  ;;  %v6597_v46 = vpop.eup %6596  ;;  %v5906_v61 = vadd.f32 1.0, %v6595_v0  ;;  %v3268_v39 = vadd.f32 %v3260_v10, %v3250_v49  ;;  %v3269_v63 = vadd.f32 %v3261_v12, %v3251_v57  ;;  %v10741_v0 = vld [vmem:[#allocation4 + $0x45] sm:$0xff]  ;;  %v12326_v49 = vld [vmem:[#allocation57_spill] sm:$0xff] }
 0x7a1   : > { %v3370_v30 = vmul.f32 %v12325_v23, %v3352_v14  ;;  %v5907_v5 = vadd.f32 1.0, %v6597_v46  ;;  %v3224_v3 = vadd.f32 %v3216_v27, %v3172_v25  ;;  %v3225_v58 = vadd.f32 %v3217_v35, %v3173_v45  ;;  %v10747_v45 = vld [vmem:[#allocation5 + $0x45] sm:$0xff]  ;;  %v12328_v25 = vld [vmem:[#allocation60_spill] sm:$0xff] }
 0x7a2   : > { %v3328_v20 = vadd.f32 %v3320_v55, %v3310_v34  ;;  %6598 = vrcp.f32 %v5906_v61  ;;  %v3276_v4 = vmul.f32 %v10649_v54, %v3268_v39  ;;  %v3277_v44 = vmul.f32 %v10652_v22, %v3269_v63  ;;  %v10752_v27 = vld [vmem:[#allocation4 + $0x46] sm:$0xff] }
 0x7a3   : > { %v3329_v15 = vadd.f32 %v3321_v21, %v3311_v28  ;;  %6600 = vrcp.f32 %v5907_v5  ;;  %v3371_v14 = vmul.f32 %v12325_v23, %v10734_v43  ;;  %v3380_v57 = vmul.f32 %v12326_v49, %v3360_v60  ;;  %v12327_v34 = vld [vmem:[#allocation59_spill] sm:$0xff] }
 0x7a4   : > { %v3336_v10 = vmul.f32 %v10663_v37, %v3328_v20  ;;  %v3284_v55 = vadd.f32 %v3276_v4, %v3224_v3  ;;  %v3285_v35 = vadd.f32 %v3277_v44, %v3225_v58  ;;  %v3381_v2 = vmul.f32 %v12326_v49, %v10737_v18  ;;  %v10760_v46 = vld [vmem:[#allocation5 + $0x46] sm:$0xff] }
 0x7a5   : > { %v3337_v6 = vmul.f32 %v10666_v53, %v3329_v15  ;;  %v3388_v12 = vadd.f32 %v3380_v57, %v3370_v30  ;;  %v3430_v20 = vmul.f32 %v12327_v34, %v10655_v33  ;;  %v3431_v28 = vmul.f32 %v12327_v34, %v10741_v0  ;;  %v10764_v23 = vld [vmem:[#allocation4 + $0x47] sm:$0xff]  ;;  %v12329_v33 = vld [vmem:[#allocation61_spill] sm:$0xff] }
 0x7a6   : > { %v3440_v21 = vmul.f32 %v12328_v25, %v10658_v9  ;;  %v3344_v61 = vadd.f32 %v3336_v10, %v3284_v55  ;;  %v3389_v63 = vadd.f32 %v3381_v2, %v3371_v14  ;;  %v3441_v60 = vmul.f32 %v12328_v25, %v10747_v45  ;;  %v12330_v44 = vld [vmem:[#allocation62_spill] sm:$0xff]  ;;  %v12331_v55 = vld [vmem:[#allocation63_spill] sm:$0xff] }
 0x7a7   : > { %v3345_v39 = vadd.f32 %v3337_v6, %v3285_v35  ;;  %v3396_v30 = vmul.f32 %v10672_v7, %v3388_v12  ;;  %v3490_v3 = vmul.f32 %v12329_v33, %v10660_v62  ;;  %v3491_v58 = vmul.f32 %v12329_v33, %v10752_v27  ;;  %v10776_v14 = vld [vmem:[#allocation5 + $0x47] sm:$0xff] }
 0x7a8   : > { %v3448_v5 = vadd.f32 %v3440_v21, %v3430_v20  ;;  %v3397_v9 = vmul.f32 %v10682_v13, %v3389_v63  ;;  %v3449_v4 = vadd.f32 %v3441_v60, %v3431_v28  ;;  %v3500_v15 = vmul.f32 %v12330_v44, %v10669_v51  ;;  %v10783_v6 = vld [vmem:[#allocation4 + $0x48] sm:$0xff] }
 0x7a9   : > { %v3501_v10 = vmul.f32 %v12330_v44, %v10760_v46  ;;  %v3404_v49 = vadd.f32 %v3396_v30, %v3344_v61  ;;  %v3550_v62 = vmul.f32 %v12331_v55, %v10677_v32  ;;  %v3551_v35 = vmul.f32 %v12331_v55, %v10764_v23  ;;  %v10786_v20 = vld [vmem:[#allocation5 + $0x48] sm:$0xff]  ;;  %v12332_v32 = vld [vmem:[#allocation65_spill] sm:$0xff] }
 0x7aa   : > { %v3456_v57 = vmul.f32 %v10621_v48, %v3448_v5  ;;  %v3405_v2 = vadd.f32 %v3397_v9, %v3345_v39  ;;  %v3457_v12 = vmul.f32 %v10624_v50, %v3449_v4  ;;  %v3508_v51 = vadd.f32 %v3500_v15, %v3490_v3  ;;  %v10794_v63 = vld [vmem:[#allocation4 + $0x49] sm:$0xff] }
 0x7ab   : > { %v3509_v34 = vadd.f32 %v3501_v10, %v3491_v58  ;;  %v3560_v25 = vmul.f32 %v12241_v38, %v10679_v31  ;;  %v3561_v21 = vmul.f32 %v12241_v38, %v10776_v14  ;;  %v3610_v61 = vmul.f32 %v12332_v32, %v10693_v59  ;;  %v12333_v31 = vld [vmem:[#allocation66_spill] sm:$0xff]  ;;  %v10804_v9 = vld [vmem:[#allocation5 + $0x49] sm:$0xff] }
 0x7ac   : > { %v3464_v28 = vadd.f32 %v3456_v57, %v3404_v49  ;;  %v3465_v60 = vadd.f32 %v3457_v12, %v3405_v2  ;;  %v3516_v39 = vmul.f32 %v10635_v19, %v3508_v51  ;;  %v3611_v5 = vmul.f32 %v12332_v32, %v10783_v6  ;;  %v12334_v44 = vld [vmem:[#allocation67_spill] sm:$0xff]  ;;  %v12335_v2 = vld [vmem:[#allocation68_spill] sm:$0xff] }
 0x7ad   : > { %v3517_v30 = vmul.f32 %v10638_v16, %v3509_v34  ;;  %v3568_v33 = vadd.f32 %v3560_v25, %v3550_v62  ;;  %v3569_v3 = vadd.f32 %v3561_v21, %v3551_v35  ;;  %v3620_v58 = vmul.f32 %v12333_v31, %v10700_v1  ;;  %v10817_v25 = vld [vmem:[#allocation4 + $0x4a] sm:$0xff] }
 0x7ae   : > { %v3621_v38 = vmul.f32 %v12333_v31, %v10786_v20  ;;  %v3524_v59 = vadd.f32 %v3516_v39, %v3464_v28  ;;  %v3662_v15 = vmul.f32 %v12334_v44, %v10704_v8  ;;  %v3663_v10 = vmul.f32 %v12334_v44, %v10794_v63  ;;  %v10820_v39 = vld [vmem:[#allocation5 + $0x4a] sm:$0xff] }
 0x7af   : > { %v3525_v4 = vadd.f32 %v3517_v30, %v3465_v60  ;;  %v6599_v49 = vpop.eup %6598  ;;  %v3576_v57 = vmul.f32 %v10641_v17, %v3568_v33  ;;  %v3577_v55 = vmul.f32 %v10644_v47, %v3569_v3  ;;  %v3628_v62 = vadd.f32 %v3620_v58, %v3610_v61  ;;  %v12337_v33 = vld [vmem:[#allocation69_spill] sm:$0xff]  ;;  %v10824_v31 = vld [vmem:[#allocation4 + $0x4b] sm:$0xff] }
 0x7b0   : > { %v3629_v1 = vadd.f32 %v3621_v38, %v3611_v5  ;;  %v6601_v35 = vpop.eup %6600  ;;  %vm5930_vm6 = vcmp.gt.f32.partialorder %v6599_v49, 0.05  ;;  %vm5938_vm8 = vcmp.lt.f32.partialorder %v6599_v49, 0.05  ;;  %v3672_v12 = vmul.f32 %v12335_v2, %v10714_v24  ;;  %v10826_v58 = vld [vmem:[#allocation5 + $0x4b] sm:$0xff]  ;;  %v12338_v49 = vld [vmem:[#allocation70_spill] sm:$0xff] }
 0x7b1   : > { %v3673_v51 = vmul.f32 %v12335_v2, %v10804_v9  ;;  %vm5931_vm10 = vcmp.gt.f32.partialorder %v6601_v35, 0.05  ;;  %vm5939_vm11 = vcmp.lt.f32.partialorder %v6601_v35, 0.05  ;;  %v12336_v8 = vmov 0.5   ;;  %v12340_v2 = vld [vmem:[#allocation72_spill] sm:$0xff] }
 0x7b2   : > { %v5946_v34 = vsel %vm5938_vm8, 0.0, %v12336_v8  ;;  %v3584_v28 = vadd.f32 %v3576_v57, %v3524_v59  ;;  %v5947_v21 = vsel %vm5939_vm11, 0.0, %v12336_v8  ;;  %v3585_v61 = vadd.f32 %v3577_v55, %v3525_v4 }
 0x7b3   : > { %v5954_v32 = vsel %vm5930_vm6, 1.0, %v5946_v34  ;;  %v3680_v60 = vadd.f32 %v3672_v12, %v3662_v15  ;;  %v5955_v30 = vsel %vm5931_vm10, 1.0, %v5947_v21  ;;  %v3681_v24 = vadd.f32 %v3673_v51, %v3663_v10 }
 0x7b4   : > { %v3636_v5 = vadd.f32 %v3628_v62, %v3584_v28  ;;  %v3722_v3 = vmul.f32 %v12337_v33, %v10716_v26  ;;  %v6539_v38 = vpack.i.bf16 %v5955_v30, %v5954_v32  ;;  %v3637_v59 = vadd.f32 %v3629_v1, %v3585_v61  ;;  %v12339_v26 = vld [vmem:[#allocation71_spill] sm:$0xff] }
 0x7b5   : > { %v3688_v44 = vmul.f32 %v10649_v54, %v3680_v60  ;;  %v3723_v4 = vmul.f32 %v12337_v33, %v10817_v25  ;;  %v3689_v15 = vmul.f32 %v10652_v22, %v3681_v24  ;;  %v3732_v57 = vmul.f32 %v12338_v49, %v10723_v41  ;;  %v10838_v62 = vld [vmem:[#allocation4 + $0x4d] sm:$0xff] }
 0x7b6   : > { %v3733_v10 = vmul.f32 %v12338_v49, %v10820_v39  ;;  %v3782_v55 = vmul.f32 %v12339_v26, %v10734_v43  ;;  %6540 = vperm.xlu1 %6527, %v6539_v38   ;;  %v3783_v35 = vmul.f32 %v12339_v26, %v10824_v31  ;;  %v3792_v12 = vmul.f32 %v12340_v2, %v10737_v18  ;;  %v10846_v41 = vld [vmem:[#allocation5 + $0x4d] sm:$0xff]  ;;  %v12341_v43 = vld [vmem:[#allocation74_spill] sm:$0xff]  ;;  %v12342_v18 = vld [vmem:[#allocation73_spill] sm:$0xff] }
 0x7b7   : > { %v3696_v1 = vadd.f32 %v3688_v44, %v3636_v5  ;;  %v3793_v51 = vmul.f32 %v12340_v2, %v10826_v58  ;;  %v3697_v34 = vadd.f32 %v3689_v15, %v3637_v59  ;;  %v3740_v28 = vadd.f32 %v3732_v57, %v3722_v3  ;;  %v10850_v61 = vld [vmem:[#allocation4 + $0x4e] sm:$0xff] }
 0x7b8   : > { %v3741_v21 = vadd.f32 %v3733_v10, %v3723_v4  ;;  %v3842_v32 = vmul.f32 %v12341_v43, %v10741_v0  ;;  %v3800_v60 = vadd.f32 %v3792_v12, %v3782_v55  ;;  %v3843_v5 = vmul.f32 %v12341_v43, %v10838_v62  ;;  %v10860_v59 = vld [vmem:[#allocation5 + $0x4e] sm:$0xff] }
 0x7b9   : > { %v3801_v30 = vadd.f32 %v3793_v51, %v3783_v35  ;;  %v3852_v24 = vmul.f32 %v12342_v18, %v10747_v45  ;;  %v3748_v33 = vmul.f32 %v10663_v37, %v3740_v28  ;;  %v3853_v3 = vmul.f32 %v12342_v18, %v10846_v41  ;;  %v12343_v0 = vld [vmem:[#allocation76_spill] sm:$0xff]  ;;  %v12344_v35 = vld [vmem:[#allocation75_spill] sm:$0xff]  ;;  %v12345_v28 = vld [vmem:[#allocation78_spill] sm:$0xff] }
 0x7ba   : > { %v3749_v38 = vmul.f32 %v10666_v53, %v3741_v21  ;;  %v3902_v44 = vmul.f32 %v12343_v0, %v10752_v27  ;;  %v10864_v4 = vld [vmem:[#allocation4 + $0x4f] sm:$0xff]  ;;  %v3808_v15 = vmul.f32 %v10672_v7, %v3800_v60  ;;  %v3903_v45 = vmul.f32 %v12343_v0, %v10850_v61 }
 0x7bb   : > { %v3809_v49 = vmul.f32 %v10682_v13, %v3801_v30  ;;  %v3860_v57 = vadd.f32 %v3852_v24, %v3842_v32  ;;  %v3756_v10 = vadd.f32 %v3748_v33, %v3696_v1  ;;  %v3861_v55 = vadd.f32 %v3853_v3, %v3843_v5  ;;  %v10872_v12 = vld [vmem:[#allocation5 + $0x4f] sm:$0xff]  ;;  %v12346_v5 = vld [vmem:[#allocation77_spill] sm:$0xff] }
 0x7bc   : > { %v3757_v26 = vadd.f32 %v3749_v38, %v3697_v34  ;;  %v3912_v2 = vmul.f32 %v12344_v35, %v10760_v46  ;;  %v3913_v51 = vmul.f32 %v12344_v35, %v10860_v59  ;;  %v3962_v21 = vmul.f32 %v12345_v28, %v10764_v23  ;;  %v10881_v32 = vld [vmem:[#allocation4 + $0x50] sm:$0xff]  ;;  %v12347_v23 = vld [vmem:[#allocation83_spill] sm:$0xff] }
 0x7bd   : > { %v3868_v27 = vmul.f32 %v10621_v48, %v3860_v57  ;;  %v3963_v43 = vmul.f32 %v12345_v28, %v10864_v4  ;;  %v3816_v1 = vadd.f32 %v3808_v15, %v3756_v10  ;;  %v3869_v60 = vmul.f32 %v10624_v50, %v3861_v55  ;;  %v10888_v33 = vld [vmem:[#allocation5 + $0x50] sm:$0xff] }
 0x7be   : > { %v3817_v34 = vadd.f32 %v3809_v49, %v3757_v26  ;;  %v3920_v46 = vadd.f32 %v3912_v2, %v3902_v44  ;;  %v3921_v30 = vadd.f32 %v3913_v51, %v3903_v45  ;;  %v3972_v18 = vmul.f32 %v12346_v5, %v10776_v14  ;;  %v10892_v3 = vld [vmem:[#allocation4 + $0x51] sm:$0xff] }
 0x7bf   : > { %v3973_v24 = vmul.f32 %v12346_v5, %v10872_v12  ;;  %v4022_v38 = vmul.f32 %v12347_v23, %v10783_v6  ;;  %v3876_v0 = vadd.f32 %v3868_v27, %v3816_v1  ;;  %v4023_v44 = vmul.f32 %v12347_v23, %v10881_v32  ;;  %v12348_v10 = vld [vmem:[#allocation84_spill] sm:$0xff]  ;;  %v12349_v2 = vld [vmem:[#allocation86_spill] sm:$0xff]  ;;  %v12351_v5 = vld [vmem:[#allocation88_spill] sm:$0xff] }
 0x7c0   : > { %v3877_v15 = vadd.f32 %v3869_v60, %v3817_v34  ;;  %v3928_v49 = vmul.f32 %v10635_v19, %v3920_v46  ;;  %v3929_v57 = vmul.f32 %v10638_v16, %v3921_v30  ;;  %v3980_v14 = vadd.f32 %v3972_v18, %v3962_v21  ;;  %v10900_v55 = vld [vmem:[#allocation5 + $0x51] sm:$0xff]  ;;  %v12350_v46 = vld [vmem:[#allocation87_spill] sm:$0xff] }
 0x7c1   : > { %v3981_v45 = vadd.f32 %v3973_v24, %v3963_v43  ;;  %v4032_v26 = vmul.f32 %v12348_v10, %v10786_v20  ;;  %v4033_v6 = vmul.f32 %v12348_v10, %v10888_v33  ;;  %v4074_v27 = vmul.f32 %v12349_v2, %v10794_v63  ;;  %v10908_v28 = vld [vmem:[#allocation4 + $0x52] sm:$0xff] }
 0x7c2   : > { %v3936_v35 = vadd.f32 %v3928_v49, %v3876_v0  ;;  %v4075_v51 = vmul.f32 %v12349_v2, %v10892_v3  ;;  %v3937_v1 = vadd.f32 %v3929_v57, %v3877_v15  ;;  %v3988_v21 = vmul.f32 %v10641_v17, %v3980_v14  ;;  %v10912_v34 = vld [vmem:[#allocation5 + $0x52] sm:$0xff] }
 0x7c3   : > { %v3989_v43 = vmul.f32 %v10644_v47, %v3981_v45  ;;  %v4040_v20 = vadd.f32 %v4032_v26, %v4022_v38  ;;  %v4041_v60 = vadd.f32 %v4033_v6, %v4023_v44  ;;  %v4084_v30 = vmul.f32 %v12350_v46, %v10804_v9  ;;  %v10920_v24 = vld [vmem:[#allocation4 + $0x53] sm:$0xff] }
 0x7c4   : > { %v4085_v63 = vmul.f32 %v12350_v46, %v10900_v55  ;;  %v4134_v18 = vmul.f32 %v12351_v5, %v10817_v25  ;;  %v3996_v23 = vadd.f32 %v3988_v21, %v3936_v35  ;;  %v4135_v15 = vmul.f32 %v12351_v5, %v10908_v28  ;;  %v12352_v38 = vld [vmem:[#allocation89_spill] sm:$0xff]  ;;  %v12353_v45 = vld [vmem:[#allocation90_spill] sm:$0xff] }
 0x7c5   : > { %v3997_v0 = vadd.f32 %v3989_v43, %v3937_v1  ;;  %v4144_v49 = vmul.f32 %v12352_v38, %v10820_v39  ;;  %v4092_v44 = vadd.f32 %v4084_v30, %v4074_v27  ;;  %v4145_v9 = vmul.f32 %v12352_v38, %v10912_v34  ;;  %v10928_v14 = vld [vmem:[#allocation5 + $0x53] sm:$0xff]  ;;  %v12354_v1 = vld [vmem:[#allocation91_spill] sm:$0xff] }
 0x7c6   : > { %v4093_v57 = vadd.f32 %v4085_v63, %v4075_v51  ;;  %v4194_v25 = vmul.f32 %v12353_v45, %v10824_v31  ;;  %v10932_v10 = vld [vmem:[#allocation4 + $0x55] sm:$0xff]  ;;  %v4048_v26 = vadd.f32 %v4040_v20, %v3996_v23  ;;  %v4195_v2 = vmul.f32 %v12353_v45, %v10920_v24 }
 0x7c7   : > { %v4049_v35 = vadd.f32 %v4041_v60, %v3997_v0  ;;  %v4152_v6 = vadd.f32 %v4144_v49, %v4134_v18  ;;  %v4100_v39 = vmul.f32 %v10649_v54, %v4092_v44  ;;  %v4153_v51 = vadd.f32 %v4145_v9, %v4135_v15  ;;  %v10940_v43 = vld [vmem:[#allocation5 + $0x55] sm:$0xff]  ;;  %v12355_v60 = vld [vmem:[#allocation27_spill] sm:$0xff] }
 0x7c8   : > { %v4101_v27 = vmul.f32 %v10652_v22, %v4093_v57  ;;  %v4204_v21 = vmul.f32 %v12354_v1, %v10826_v58  ;;  %v4205_v20 = vmul.f32 %v12354_v1, %v10928_v14  ;;  %v4254_v46 = vmul.f32 %v12355_v60, %v10838_v62  ;;  %v10949_v63 = vld [vmem:[#allocation4 + $0x56] sm:$0xff] }
 0x7c9   : > { %v4160_v31 = vmul.f32 %v10663_v37, %v4152_v6  ;;  %v4255_v30 = vmul.f32 %v12355_v60, %v10932_v10  ;;  %v4108_v5 = vadd.f32 %v4100_v39, %v4048_v26  ;;  %v4161_v23 = vmul.f32 %v10666_v53, %v4153_v51  ;;  %v10956_v49 = vld [vmem:[#allocation5 + $0x56] sm:$0xff]  ;;  %v12356_v39 = vld [vmem:[#allocation95_spill] sm:$0xff] }
 0x7ca   : > { %v4109_v18 = vadd.f32 %v4101_v27, %v4049_v35  ;;  %v4212_v58 = vadd.f32 %v4204_v21, %v4194_v25  ;;  %v4213_v0 = vadd.f32 %v4205_v20, %v4195_v2  ;;  %v4264_v15 = vmul.f32 %v12265_v36, %v10846_v41  ;;  %v10960_v44 = vld [vmem:[#allocation4 + $0x57] sm:$0xff] }
 0x7cb   : > { %v4265_v38 = vmul.f32 %v12265_v36, %v10940_v43  ;;  %v4314_v62 = vmul.f32 %v12266_v52, %v10850_v61  ;;  %v4168_v57 = vadd.f32 %v4160_v31, %v4108_v5  ;;  %v4315_v25 = vmul.f32 %v12266_v52, %v10949_v63  ;;  %v10968_v6 = vld [vmem:[#allocation5 + $0x57] sm:$0xff] }
 0x7cc   : > { %v4169_v9 = vadd.f32 %v4161_v23, %v4109_v18  ;;  %v4220_v45 = vmul.f32 %v10672_v7, %v4212_v58  ;;  %v4221_v26 = vmul.f32 %v10682_v13, %v4213_v0  ;;  %v4272_v41 = vadd.f32 %v4264_v15, %v4254_v46  ;;  %v10976_v52 = vld [vmem:[#allocation4 + $0x58] sm:$0xff] }
 0x7cd   : > { %v4273_v35 = vadd.f32 %v4265_v38, %v4255_v30  ;;  %v4324_v36 = vmul.f32 %v12176_v42, %v10860_v59  ;;  %v4325_v61 = vmul.f32 %v12176_v42, %v10956_v49  ;;  %v4374_v27 = vmul.f32 %v12356_v39, %v10864_v4  ;;  %v10984_v46 = vld [vmem:[#allocation5 + $0x58] sm:$0xff]  ;;  %v12357_v4 = vld [vmem:[#allocation97_spill] sm:$0xff] }
 0x7ce   : > { %v4228_v2 = vadd.f32 %v4220_v45, %v4168_v57  ;;  %v4375_v51 = vmul.f32 %v12356_v39, %v10960_v44  ;;  %v4229_v1 = vadd.f32 %v4221_v26, %v4169_v9  ;;  %v4280_v21 = vmul.f32 %v10621_v48, %v4272_v41  ;;  %v10988_v5 = vld [vmem:[#allocation4 + $0x59] sm:$0xff]  ;;  %v12359_v45 = vld [vmem:[#allocation28_spill] sm:$0xff] }
 0x7cf   : > { %v4281_v31 = vmul.f32 %v10624_v50, %v4273_v35  ;;  %v4332_v59 = vadd.f32 %v4324_v36, %v4314_v62  ;;  %v4333_v20 = vadd.f32 %v4325_v61, %v4315_v25  ;;  %v4384_v60 = vmul.f32 %v12178_v11, %v10872_v12  ;;  %v10996_v57 = vld [vmem:[#allocation5 + $0x59] sm:$0xff] }
 0x7d0   : > { %v4385_v42 = vmul.f32 %v12178_v11, %v10968_v6  ;;  %v4434_v30 = vmul.f32 %v12357_v4, %v10881_v32  ;;  %v4288_v18 = vadd.f32 %v4280_v21, %v4228_v2  ;;  %v4435_v0 = vmul.f32 %v12357_v4, %v10976_v52  ;;  %v12358_v11 = vld [vmem:[#allocation98_spill] sm:$0xff] }
 0x7d1   : > { %v4289_v23 = vadd.f32 %v4281_v31, %v4229_v1  ;;  %v4340_v58 = vmul.f32 %v10635_v19, %v4332_v59  ;;  %v4341_v15 = vmul.f32 %v10638_v16, %v4333_v20  ;;  %v4392_v12 = vadd.f32 %v4384_v60, %v4374_v27  ;;  %v11004_v41 = vld [vmem:[#allocation4 + $0x5a] sm:$0xff]  ;;  %v12361_v60 = vld [vmem:[#allocation104_spill] sm:$0xff] }
 0x7d2   : > { %v4393_v38 = vadd.f32 %v4385_v42, %v4375_v51  ;;  %v4444_v62 = vmul.f32 %v12358_v11, %v10888_v33  ;;  %v4445_v32 = vmul.f32 %v12358_v11, %v10984_v46  ;;  %v4486_v25 = vmul.f32 %v12359_v45, %v10892_v3  ;;  %v11008_v61 = vld [vmem:[#allocation5 + $0x5a] sm:$0xff] }
 0x7d3   : > { %v4348_v9 = vadd.f32 %v4340_v58, %v4288_v18  ;;  %v4487_v26 = vmul.f32 %v12359_v45, %v10988_v5  ;;  %v4349_v35 = vadd.f32 %v4341_v15, %v4289_v23  ;;  %v4400_v36 = vmul.f32 %v10641_v17, %v4392_v12  ;;  %v12360_v51 = vld [vmem:[#allocation103_spill] sm:$0xff] }
 0x7d4   : > { %v4401_v2 = vmul.f32 %v10644_v47, %v4393_v38  ;;  %v4452_v33 = vadd.f32 %v4444_v62, %v4434_v30  ;;  %v4453_v39 = vadd.f32 %v4445_v32, %v4435_v0  ;;  %v4496_v27 = vmul.f32 %v12065_v29, %v10900_v55  ;;  %v11016_v21 = vld [vmem:[#allocation4 + $0x5b] sm:$0xff]  ;;  %v12363_v62 = vld [vmem:[#allocation109_spill] sm:$0xff] }
 0x7d5   : > { %v4497_v3 = vmul.f32 %v12065_v29, %v10996_v57  ;;  %v4546_v1 = vmul.f32 %v12360_v51, %v10908_v28  ;;  %v4408_v31 = vadd.f32 %v4400_v36, %v4348_v9  ;;  %v4547_v20 = vmul.f32 %v12360_v51, %v11004_v41  ;;  %v11024_v18 = vld [vmem:[#allocation5 + $0x5b] sm:$0xff]  ;;  %v12362_v29 = vld [vmem:[#allocation105_spill] sm:$0xff] }
 0x7d6   : > { %v4409_v59 = vadd.f32 %v4401_v2, %v4349_v35  ;;  %v4556_v42 = vmul.f32 %v12361_v60, %v10912_v34  ;;  %v4504_v4 = vadd.f32 %v4496_v27, %v4486_v25  ;;  %v4557_v55 = vmul.f32 %v12361_v60, %v11008_v61  ;;  %v11028_v23 = vld [vmem:[#allocation4 + $0x5d] sm:$0xff] }
 0x7d7   : > { %v4505_v30 = vadd.f32 %v4497_v3, %v4487_v26  ;;  %v4606_v28 = vmul.f32 %v12362_v29, %v10920_v24  ;;  %v4460_v58 = vadd.f32 %v4452_v33, %v4408_v31  ;;  %v4607_v12 = vmul.f32 %v12362_v29, %v11016_v21  ;;  %v11036_v32 = vld [vmem:[#allocation5 + $0x5d] sm:$0xff]  ;;  %v12365_v3 = vld [vmem:[#allocation113_spill] sm:$0xff] }
 0x7d8   : > { %v4461_v0 = vadd.f32 %v4453_v39, %v4409_v59  ;;  %v4564_v15 = vadd.f32 %v4556_v42, %v4546_v1  ;;  %v4512_v34 = vmul.f32 %v10649_v54, %v4504_v4  ;;  %v4565_v11 = vadd.f32 %v4557_v55, %v4547_v20  ;;  %v12364_v25 = vld [vmem:[#allocation110_spill] sm:$0xff] }
 0x7d9   : > { %v4513_v38 = vmul.f32 %v10652_v22, %v4505_v30  ;;  %v4616_v9 = vmul.f32 %v12363_v62, %v10928_v14  ;;  %v4617_v45 = vmul.f32 %v12363_v62, %v11024_v18  ;;  %v4666_v26 = vmul.f32 %v12364_v25, %v10932_v10  ;;  %v11045_v36 = vld [vmem:[#allocation4 + $0x5e] sm:$0xff] }
 0x7da   : > { %v4572_v24 = vmul.f32 %v10663_v37, %v4564_v15  ;;  %v4667_v35 = vmul.f32 %v12364_v25, %v11028_v23  ;;  %v4520_v2 = vadd.f32 %v4512_v34, %v4460_v58  ;;  %v4573_v39 = vmul.f32 %v10666_v53, %v4565_v11  ;;  %v11052_v31 = vld [vmem:[#allocation5 + $0x5e] sm:$0xff]  ;;  %v12369_v25 = vld [vmem:[#allocation120_spill] sm:$0xff] }
 0x7db   : > { %v4521_v33 = vadd.f32 %v4513_v38, %v4461_v0  ;;  %v4624_v14 = vadd.f32 %v4616_v9, %v4606_v28  ;;  %v4625_v27 = vadd.f32 %v4617_v45, %v4607_v12  ;;  %v4676_v51 = vmul.f32 %v12365_v3, %v10940_v43  ;;  %v12366_v10 = vld [vmem:[#allocation114_spill] sm:$0xff]  ;;  %v12367_v28 = vld [vmem:[#allocation116_spill] sm:$0xff]  ;;  %v12368_v12 = vld [vmem:[#allocation117_spill] sm:$0xff] }
 0x7dc   : > { %v4677_v1 = vmul.f32 %v12365_v3, %v11036_v32  ;;  %v4726_v59 = vmul.f32 %v12366_v10, %v10949_v63  ;;  %v11056_v20 = vld [vmem:[#allocation4 + $0x5f] sm:$0xff]  ;;  %v4580_v60 = vadd.f32 %v4572_v24, %v4520_v2  ;;  %v4727_v30 = vmul.f32 %v12366_v10, %v11045_v36 }
 0x7dd   : > { %v4581_v42 = vadd.f32 %v4573_v39, %v4521_v33  ;;  %v4632_v4 = vmul.f32 %v10672_v7, %v4624_v14  ;;  %v4633_v55 = vmul.f32 %v10682_v13, %v4625_v27  ;;  %v4684_v43 = vadd.f32 %v4676_v51, %v4666_v26  ;;  %v11064_v0 = vld [vmem:[#allocation5 + $0x5f] sm:$0xff] }
 0x7de   : > { %v4685_v29 = vadd.f32 %v4677_v1, %v4667_v35  ;;  %v4736_v58 = vmul.f32 %v12367_v28, %v10956_v49  ;;  %v4737_v63 = vmul.f32 %v12367_v28, %v11052_v31  ;;  %v4786_v34 = vmul.f32 %v12368_v12, %v10960_v44  ;;  %v11072_v11 = vld [vmem:[#allocation4 + $0x60] sm:$0xff]  ;;  %v12370_v44 = vld [vmem:[#allocation122_spill] sm:$0xff] }
 0x7df   : > { %v4640_v15 = vadd.f32 %v4632_v4, %v4580_v60  ;;  %v4787_v38 = vmul.f32 %v12368_v12, %v11056_v20  ;;  %v4641_v62 = vadd.f32 %v4633_v55, %v4581_v42  ;;  %v4692_v9 = vmul.f32 %v10621_v48, %v4684_v43  ;;  %v11080_v2 = vld [vmem:[#allocation5 + $0x60] sm:$0xff] }
 0x7e0   : > { %v4693_v24 = vmul.f32 %v10624_v50, %v4685_v29  ;;  %v4744_v49 = vadd.f32 %v4736_v58, %v4726_v59  ;;  %v4745_v45 = vadd.f32 %v4737_v63, %v4727_v30  ;;  %v4796_v26 = vmul.f32 %v12369_v25, %v10968_v6  ;;  %v11084_v39 = vld [vmem:[#allocation4 + $0x61] sm:$0xff]  ;;  %v12372_v30 = vld [vmem:[#allocation125_spill] sm:$0xff] }
 0x7e1   : > { %v4797_v35 = vmul.f32 %v12369_v25, %v11064_v0  ;;  %v4846_v33 = vmul.f32 %v12370_v44, %v10976_v52  ;;  %v4700_v14 = vadd.f32 %v4692_v9, %v4640_v15  ;;  %v4847_v51 = vmul.f32 %v12370_v44, %v11072_v11  ;;  %v12371_v59 = vld [vmem:[#allocation124_spill] sm:$0xff] }
 0x7e2   : > { %v4701_v27 = vadd.f32 %v4693_v24, %v4641_v62  ;;  %v4752_v3 = vmul.f32 %v10635_v19, %v4744_v49  ;;  %v4753_v1 = vmul.f32 %v10638_v16, %v4745_v45  ;;  %v4804_v6 = vadd.f32 %v4796_v26, %v4786_v34  ;;  %v11092_v42 = vld [vmem:[#allocation5 + $0x61] sm:$0xff]  ;;  %v12373_v34 = vld [vmem:[#allocation126_spill] sm:$0xff] }
 0x7e3   : > { %v4805_v10 = vadd.f32 %v4797_v35, %v4787_v38  ;;  %v4856_v60 = vmul.f32 %v12371_v59, %v10984_v46  ;;  %v4857_v52 = vmul.f32 %v12371_v59, %v11080_v2  ;;  %v4898_v55 = vmul.f32 %v12372_v30, %v10988_v5  ;;  %v11100_v29 = vld [vmem:[#allocation4 + $0x62] sm:$0xff] }
 0x7e4   : > { %v4760_v4 = vadd.f32 %v4752_v3, %v4700_v14  ;;  %v4899_v43 = vmul.f32 %v12372_v30, %v11084_v39  ;;  %v4761_v28 = vadd.f32 %v4753_v1, %v4701_v27  ;;  %v4812_v58 = vmul.f32 %v10641_v17, %v4804_v6  ;;  %v11104_v63 = vld [vmem:[#allocation5 + $0x62] sm:$0xff]  ;;  %v12376_v27 = vld [vmem:[#allocation129_spill] sm:$0xff] }
 0x7e5   : > { %v4813_v15 = vmul.f32 %v10644_v47, %v4805_v10  ;;  %v4864_v46 = vadd.f32 %v4856_v60, %v4846_v33  ;;  %v4865_v12 = vadd.f32 %v4857_v52, %v4847_v51  ;;  %v4908_v38 = vmul.f32 %v12373_v34, %v10996_v57  ;;  %v12374_v62 = vld [vmem:[#allocation127_spill] sm:$0xff]  ;;  %v12375_v26 = vld [vmem:[#allocation128_spill] sm:$0xff] }
 0x7e6   : > { %v4909_v5 = vmul.f32 %v12373_v34, %v11092_v42  ;;  %v4958_v9 = vmul.f32 %v12374_v62, %v11004_v41  ;;  %v11112_v24 = vld [vmem:[#allocation4 + $0x63] sm:$0xff]  ;;  %v4820_v49 = vadd.f32 %v4812_v58, %v4760_v4  ;;  %v4959_v25 = vmul.f32 %v12374_v62, %v11100_v29  ;;  %v12377_v4 = vld [vmem:[#allocation130_spill] sm:$0xff] }
 0x7e7   : > { %v4821_v45 = vadd.f32 %v4813_v15, %v4761_v28  ;;  %v4968_v35 = vmul.f32 %v12375_v26, %v11008_v61  ;;  %v4916_v44 = vadd.f32 %v4908_v38, %v4898_v55  ;;  %v4969_v57 = vmul.f32 %v12375_v26, %v11104_v63  ;;  %v11120_v14 = vld [vmem:[#allocation5 + $0x63] sm:$0xff] }
 0x7e8   : > { %v4917_v33 = vadd.f32 %v4909_v5, %v4899_v43  ;;  %v5018_v41 = vmul.f32 %v12376_v27, %v11016_v21  ;;  %v11124_v3 = vld [vmem:[#allocation4 + $0x65] sm:$0xff]  ;;  %v4872_v51 = vadd.f32 %v4864_v46, %v4820_v49  ;;  %v5019_v10 = vmul.f32 %v12376_v27, %v11112_v24 }
 0x7e9   : > { %v4873_v1 = vadd.f32 %v4865_v12, %v4821_v45  ;;  %v4976_v6 = vadd.f32 %v4968_v35, %v4958_v9  ;;  %v4924_v61 = vmul.f32 %v10649_v54, %v4916_v44  ;;  %v4977_v60 = vadd.f32 %v4969_v57, %v4959_v25  ;;  %v11132_v30 = vld [vmem:[#allocation5 + $0x65] sm:$0xff] }
 0x7ea   : > { %v4925_v59 = vmul.f32 %v10652_v22, %v4917_v33  ;;  %v5028_v52 = vmul.f32 %v12377_v4, %v11024_v18  ;;  %v5029_v55 = vmul.f32 %v12377_v4, %v11120_v14  ;;  %v12378_v43 = vld [vmem:[#allocation131_spill] sm:$0xff]  ;;  %v12379_v5 = vld [vmem:[#allocation132_spill] sm:$0xff] }
 0x7eb   : > { %v4984_v21 = vmul.f32 %v10663_v37, %v4976_v6  ;;  %v5078_v28 = vmul.f32 %v12378_v43, %v11028_v23  ;;  %v5079_v58 = vmul.f32 %v12378_v43, %v11124_v3  ;;  %v11141_v15 = vld [vmem:[#allocation4 + $0x66] sm:$0xff]  ;;  %v4932_v46 = vadd.f32 %v4924_v61, %v4872_v51  ;;  %v12380_v23 = vld [vmem:[#allocation133_spill] sm:$0xff] }
 0x7ec   : > { %v4933_v12 = vadd.f32 %v4925_v59, %v4873_v1  ;;  %v4985_v34 = vmul.f32 %v10666_v53, %v4977_v60  ;;  %v5036_v18 = vadd.f32 %v5028_v52, %v5018_v41  ;;  %v5037_v38 = vadd.f32 %v5029_v55, %v5019_v10  ;;  %v11148_v49 = vld [vmem:[#allocation5 + $0x66] sm:$0xff]  ;;  %v12381_v41 = vld [vmem:[#allocation134_spill] sm:$0xff]  ;;  %v12383_v43 = vld [vmem:[#allocation137_spill] sm:$0xff] }
 0x7ed   : > { %v5088_v62 = vmul.f32 %v12379_v5, %v11036_v32  ;;  %v5089_v9 = vmul.f32 %v12379_v5, %v11132_v30  ;;  %v5138_v45 = vmul.f32 %v12380_v23, %v11045_v36  ;;  %v11152_v25 = vld [vmem:[#allocation4 + $0x67] sm:$0xff]  ;;  %v4992_v26 = vadd.f32 %v4984_v21, %v4932_v46 }
 0x7ee   : > { %v4993_v35 = vadd.f32 %v4985_v34, %v4933_v12  ;;  %v5044_v44 = vmul.f32 %v10672_v7, %v5036_v18  ;;  %v5139_v33 = vmul.f32 %v12380_v23, %v11141_v15  ;;  %v5045_v57 = vmul.f32 %v10682_v13, %v5037_v38  ;;  %v11160_v1 = vld [vmem:[#allocation5 + $0x67] sm:$0xff] }
 0x7ef   : > { %v5096_v32 = vadd.f32 %v5088_v62, %v5078_v28  ;;  %v5097_v27 = vadd.f32 %v5089_v9, %v5079_v58  ;;  %v5148_v51 = vmul.f32 %v12381_v41, %v11052_v31  ;;  %v5149_v36 = vmul.f32 %v12381_v41, %v11148_v49  ;;  %v12382_v10 = vld [vmem:[#allocation136_spill] sm:$0xff] }
 0x7f0   : > { %v5052_v6 = vadd.f32 %v5044_v44, %v4992_v26  ;;  %v5198_v61 = vmul.f32 %v12382_v10, %v11056_v20  ;;  %v5199_v59 = vmul.f32 %v12382_v10, %v11152_v25  ;;  %v11168_v60 = vld [vmem:[#allocation4 + $0x68] sm:$0xff]  ;;  %v5053_v4 = vadd.f32 %v5045_v57, %v4993_v35  ;;  %v12384_v20 = vld [vmem:[#allocation138_spill] sm:$0xff] }
 0x7f1   : > { %v5104_v52 = vmul.f32 %v10621_v48, %v5096_v32  ;;  %v5105_v21 = vmul.f32 %v10624_v50, %v5097_v27  ;;  %v5156_v31 = vadd.f32 %v5148_v51, %v5138_v45  ;;  %v5157_v55 = vadd.f32 %v5149_v36, %v5139_v33  ;;  %v11176_v46 = vld [vmem:[#allocation5 + $0x68] sm:$0xff]  ;;  %v12385_v45 = vld [vmem:[#allocation139_spill] sm:$0xff] }
 0x7f2   : > { %v5208_v28 = vmul.f32 %v12383_v43, %v11064_v0  ;;  %v5209_v58 = vmul.f32 %v12383_v43, %v11160_v1  ;;  %v5258_v12 = vmul.f32 %v12384_v20, %v11072_v11  ;;  %v11180_v34 = vld [vmem:[#allocation4 + $0x69] sm:$0xff]  ;;  %v5259_v62 = vmul.f32 %v12384_v20, %v11168_v60 }
 0x7f3   : > { %v5112_v18 = vadd.f32 %v5104_v52, %v5052_v6  ;;  %v5113_v38 = vadd.f32 %v5105_v21, %v5053_v4  ;;  %v5164_v5 = vmul.f32 %v10635_v19, %v5156_v31  ;;  %v5165_v9 = vmul.f32 %v10638_v16, %v5157_v55  ;;  %v11188_v35 = vld [vmem:[#allocation5 + $0x69] sm:$0xff]  ;;  %v12387_v55 = vld [vmem:[#allocation143_spill] sm:$0xff] }
 0x7f4   : > { %v5216_v0 = vadd.f32 %v5208_v28, %v5198_v61  ;;  %v5217_v23 = vadd.f32 %v5209_v58, %v5199_v59  ;;  %v5268_v26 = vmul.f32 %v12385_v45, %v11080_v2  ;;  %v5269_v11 = vmul.f32 %v12385_v45, %v11176_v46  ;;  %v12386_v33 = vld [vmem:[#allocation140_spill] sm:$0xff] }
 0x7f5   : > { %v5172_v44 = vadd.f32 %v5164_v5, %v5112_v18  ;;  %v5310_v57 = vmul.f32 %v12386_v33, %v11084_v39  ;;  %v5311_v32 = vmul.f32 %v12386_v33, %v11180_v34  ;;  %v11196_v27 = vld [vmem:[#allocation4 + $0x6a] sm:$0xff]  ;;  %v5173_v41 = vadd.f32 %v5165_v9, %v5113_v38 }
 0x7f6   : > { %v5224_v51 = vmul.f32 %v10641_v17, %v5216_v0  ;;  %v5225_v6 = vmul.f32 %v10644_v47, %v5217_v23  ;;  %v5276_v2 = vadd.f32 %v5268_v26, %v5258_v12  ;;  %v11200_v36 = vld [vmem:[#allocation5 + $0x6a] sm:$0xff]  ;;  %v5277_v10 = vadd.f32 %v5269_v11, %v5259_v62 }
 0x7f7   : > { %v5320_v61 = vmul.f32 %v12296_v56, %v11092_v42  ;;  %v5321_v39 = vmul.f32 %v12296_v56, %v11188_v35  ;;  %v5370_v59 = vmul.f32 %v12297_v40, %v11100_v29  ;;  %v11208_v4 = vld [vmem:[#allocation4 + $0x6b] sm:$0xff]  ;;  %v5371_v31 = vmul.f32 %v12297_v40, %v11196_v27 }
 0x7f8   : > { %v5232_v52 = vadd.f32 %v5224_v51, %v5172_v44  ;;  %v5233_v21 = vadd.f32 %v5225_v6, %v5173_v41  ;;  %v5380_v43 = vmul.f32 %v12387_v55, %v11104_v63  ;;  %v5381_v42 = vmul.f32 %v12387_v55, %v11200_v36  ;;  %v11216_v20 = vld [vmem:[#allocation5 + $0x6b] sm:$0xff]  ;;  %v12390_v44 = vld [vmem:[#allocation146_spill] sm:$0xff] }
 0x7f9   : > { %v5328_v28 = vadd.f32 %v5320_v61, %v5310_v57  ;;  %v5329_v58 = vadd.f32 %v5321_v39, %v5311_v32  ;;  %v12388_v56 = vld [vmem:[#allocation144_spill] sm:$0xff]  ;;  %v12389_v0 = vld [vmem:[#allocation145_spill] sm:$0xff]  ;;  %v5490_v11 = vmul.f32 %v12390_v44, %v11124_v3 }
 0x7fa   : > { %v5430_v29 = vmul.f32 %v12388_v56, %v11112_v24  ;;  %v5473_v12 = vld [vmem:[#allocation4 + $0x6d] sm:$0xff]  ;;  %v5284_v18 = vadd.f32 %v5276_v2, %v5232_v52  ;;  %v5285_v38 = vadd.f32 %v5277_v10, %v5233_v21  ;;  %v5388_v5 = vadd.f32 %v5380_v43, %v5370_v59 }
 0x7fb   : > { %v5431_v40 = vmul.f32 %v12388_v56, %v11208_v4  ;;  %v5336_v62 = vmul.f32 %v10649_v54, %v5328_v28  ;;  %v5337_v63 = vmul.f32 %v10652_v22, %v5329_v58  ;;  %v5389_v9 = vadd.f32 %v5381_v42, %v5371_v31  ;;  %v5481_v45 = vld [vmem:[#allocation5 + $0x6d] sm:$0xff] }
 0x7fc   : > { %v5440_v23 = vmul.f32 %v12389_v0, %v11120_v14  ;;  %v5396_v26 = vmul.f32 %v10663_v37, %v5388_v5  ;;  %v5441_v24 = vmul.f32 %v12389_v0, %v11216_v20  ;;  %v5491_v33 = vmul.f32 %v12390_v44, %v5473_v12  ;;  %v5533_v57 = vld [vmem:[#allocation4 + $0x6e] sm:$0xff]  ;;  %v12391_v14 = vld [vmem:[#allocation147_spill] sm:$0xff] }
 0x7fd   : > { %v5344_v32 = vadd.f32 %v5336_v62, %v5284_v18  ;;  %v5345_v41 = vadd.f32 %v5337_v63, %v5285_v38  ;;  %v5397_v51 = vmul.f32 %v10666_v53, %v5389_v9  ;;  %v5500_v10 = vmul.f32 %v12391_v14, %v11132_v30  ;;  %v5541_v39 = vld [vmem:[#allocation5 + $0x6e] sm:$0xff] }
 0x7fe   : > { %v5448_v6 = vadd.f32 %v5440_v23, %v5430_v29  ;;  %v5449_v2 = vadd.f32 %v5441_v24, %v5431_v40  ;;  %v5501_v61 = vmul.f32 %v12391_v14, %v5481_v45  ;;  %v12392_v59 = vld [vmem:[#allocation148_spill] sm:$0xff]  ;;  %v12393_v56 = vld [vmem:[#allocation149_spill] sm:$0xff]  ;;  %v12395_v45 = vld [vmem:[#allocation151_spill] sm:$0xff] }
 0x7ff   : > { %v5550_v52 = vmul.f32 %v12392_v59, %v11141_v15  ;;  %v5593_v21 = vld [vmem:[#allocation4 + $0x6f] sm:$0xff]  ;;  %v5404_v3 = vadd.f32 %v5396_v26, %v5344_v32  ;;  %v5405_v31 = vadd.f32 %v5397_v51, %v5345_v41  ;;  %v5551_v43 = vmul.f32 %v12392_v59, %v5533_v57  ;;  %v12394_v15 = vld [vmem:[#allocation150_spill] sm:$0xff] }
 0x800   : > { %v5456_v55 = vmul.f32 %v10672_v7, %v5448_v6  ;;  %v5457_v28 = vmul.f32 %v10682_v13, %v5449_v2  ;;  %v5508_v58 = vadd.f32 %v5500_v10, %v5490_v11  ;;  %v5509_v42 = vadd.f32 %v5501_v61, %v5491_v33  ;;  %v5601_v29 = vld [vmem:[#allocation5 + $0x6f] sm:$0xff] }
 0x801   : > { %v5560_v30 = vmul.f32 %v12393_v56, %v11148_v49  ;;  %v5561_v18 = vmul.f32 %v12393_v56, %v5541_v39  ;;  %v5610_v38 = vmul.f32 %v12394_v15, %v11152_v25  ;;  %v5611_v5 = vmul.f32 %v12394_v15, %v5593_v21  ;;  %v5653_v40 = vld [vmem:[#allocation4 + $0x70] sm:$0xff]  ;;  %v12396_v44 = vld [vmem:[#allocation152_spill] sm:$0xff] }
 0x802   : > { %v5464_v12 = vadd.f32 %v5456_v55, %v5404_v3  ;;  %v5465_v62 = vadd.f32 %v5457_v28, %v5405_v31  ;;  %v5516_v63 = vmul.f32 %v10621_v48, %v5508_v58  ;;  %v5517_v9 = vmul.f32 %v10624_v50, %v5509_v42  ;;  %v5661_v24 = vld [vmem:[#allocation5 + $0x70] sm:$0xff]  ;;  %v12400_v28 = vld [vmem:[#allocation156_spill] sm:$0xff] }
 0x803   : > { %v5568_v0 = vadd.f32 %v5560_v30, %v5550_v52  ;;  %v5569_v23 = vadd.f32 %v5561_v18, %v5551_v43  ;;  %v5620_v49 = vmul.f32 %v12395_v45, %v11160_v1  ;;  %v5621_v26 = vmul.f32 %v12395_v45, %v5601_v29  ;;  %v5705_v25 = vld [vmem:[#allocation4 + $0x71] sm:$0xff] }
 0x804   : > { %v5670_v11 = vmul.f32 %v12396_v44, %v11168_v60  ;;  %v5524_v33 = vadd.f32 %v5516_v63, %v5464_v12  ;;  %v5525_v57 = vadd.f32 %v5517_v9, %v5465_v62  ;;  %v5671_v48 = vmul.f32 %v12396_v44, %v5653_v40  ;;  %v12397_v6 = vld [vmem:[#allocation153_spill] sm:$0xff]  ;;  %v12398_v60 = vld [vmem:[#allocation154_spill] sm:$0xff] }
 0x805   : > { %v5576_v32 = vmul.f32 %v10635_v19, %v5568_v0  ;;  %v5577_v50 = vmul.f32 %v10638_v16, %v5569_v23  ;;  %v5628_v41 = vadd.f32 %v5620_v49, %v5610_v38  ;;  %v5629_v51 = vadd.f32 %v5621_v26, %v5611_v5  ;;  %v5713_v2 = vld [vmem:[#allocation5 + $0x71] sm:$0xff]  ;;  %v6530_v5 = vpop.permute.xlu1 %6529  ;;  %v6536_v49 = vpop.permute.xlu0 %6535 }
 0x806   : > { %v5680_v1 = vmul.f32 %v12397_v6, %v11176_v46  ;;  %v5681_v10 = vmul.f32 %v12397_v6, %v5661_v24  ;;  %v5722_v61 = vmul.f32 %v12398_v60, %v11180_v34  ;;  %v5723_v39 = vmul.f32 %v12398_v60, %v5705_v25  ;;  %v5765_v59 = vld [vmem:[#allocation4 + $0x72] sm:$0xff]  ;;  %v12399_v46 = vld [vmem:[#allocation155_spill] sm:$0xff] }
 0x807   : > { %v5584_v14 = vadd.f32 %v5576_v32, %v5524_v33  ;;  %v5585_v19 = vadd.f32 %v5577_v50, %v5525_v57  ;;  %v5636_v52 = vmul.f32 %v10641_v17, %v5628_v41  ;;  %v5637_v16 = vmul.f32 %v10644_v47, %v5629_v51  ;;  %v5773_v3 = vld [vmem:[#allocation5 + $0x72] sm:$0xff] }
 0x808   : > { %v5688_v21 = vadd.f32 %v5680_v1, %v5670_v11  ;;  %v5689_v31 = vadd.f32 %v5681_v10, %v5671_v48  ;;  %v5732_v55 = vmul.f32 %v12399_v46, %v11188_v35  ;;  %v5733_v43 = vmul.f32 %v12399_v46, %v5713_v2  ;;  %v5825_v34 = vld [vmem:[#allocation4 + $0x73] sm:$0xff]  ;;  %v12402_v35 = vld [vmem:[#allocation99_spill] sm:$0xff] }
 0x809   : > { %v5782_v58 = vmul.f32 %v12400_v28, %v11196_v27  ;;  %v5644_v42 = vadd.f32 %v5636_v52, %v5584_v14  ;;  %v5645_v56 = vadd.f32 %v5637_v16, %v5585_v19  ;;  %v5783_v30 = vmul.f32 %v12400_v28, %v5765_v59  ;;  %v12401_v17 = vld [vmem:[#allocation157_spill] sm:$0xff]  ;;  %v12406_v48 = vld [vmem:[#allocation34_spill] sm:$0xff]  ;;  %v6610_v2 = vld [vmem:[%s12404_s1 + $0x8] sm:$0xff] }
 0x80a   : > { %v5792_v29 = vmul.f32 %v12401_v17, %v11200_v36  ;;  %v5740_v47 = vadd.f32 %v5732_v55, %v5722_v61  ;;  %v5741_v12 = vadd.f32 %v5733_v43, %v5723_v39  ;;  %v5793_v18 = vmul.f32 %v12401_v17, %v5773_v3  ;;  %v5833_v15 = vld [vmem:[#allocation5 + $0x73] sm:$0xff]  ;;  %v12403_v36 = vld [vmem:[#allocation55_spill] sm:$0xff]  ;;  %v6613_v46 = vld [vmem:[%s12404_s1 + $0x10] sm:$0xff] }
 0x80b   : > { %v5842_v38 = vmul.f32 %v12402_v35, %v11208_v4  ;;  %v5696_v40 = vadd.f32 %v5688_v21, %v5644_v42  ;;  %v5697_v62 = vadd.f32 %v5689_v31, %v5645_v56  ;;  %v5843_v63 = vmul.f32 %v12402_v35, %v5825_v34  ;;  %v12408_v60 = vld [vmem:[#allocation37_spill] sm:$0xff]  ;;  %v12409_v59 = vld [vmem:[#allocation36_spill] sm:$0xff]  ;;  %v6612_v3 = vld [vmem:[%s12404_s1 + $0x18] sm:$0xff] }
 0x80c   : > { %v5800_v27 = vadd.f32 %v5792_v29, %v5782_v58  ;;  %v5748_v9 = vmul.f32 %v10649_v54, %v5740_v47  ;;  %v5749_v0 = vmul.f32 %v10652_v22, %v5741_v12  ;;  %v5801_v23 = vadd.f32 %v5793_v18, %v5783_v30  ;;  %v12405_v22 = vld [vmem:[#allocation33_spill] sm:$0xff] }
 0x80d   : > { %v5852_v45 = vmul.f32 %v12403_v36, %v11216_v20  ;;  %v5853_v24 = vmul.f32 %v12403_v36, %v5833_v15  ;;  %v6532_v4 = vunpack.i.h.bf16 %v6530_v5  ;;  %v6531_v44 = vunpack.i.l.bf16 %v6530_v5  ;;  %v12411_v15 = vld [vmem:[#allocation38_spill] sm:$0xff]  ;;  %v12412_v5 = vld [vmem:[#allocation35_spill] sm:$0xff] }
 0x80e   : > { %v5808_v26 = vmul.f32 %v10663_v37, %v5800_v27  ;;  %v5756_v11 = vadd.f32 %v5748_v9, %v5696_v40  ;;  %v5757_v25 = vadd.f32 %v5749_v0, %v5697_v62  ;;  %v5809_v33 = vmul.f32 %v10666_v53, %v5801_v23  ;;  %v6611_v53 = vld [vmem:[%s12404_s1] sm:$0xff] }
 0x80f   : > { %v5860_v54 = vadd.f32 %v5852_v45, %v5842_v38  ;;  %v5861_v57 = vadd.f32 %v5853_v24, %v5843_v63  ;;  %v5999_v32 = vmul.f32 %v6532_v4, %v12405_v22  ;;  %v5998_v50 = vmul.f32 %v6531_v44, %v12406_v48  ;;  %v6614_v63 = vld [vmem:[%s12404_s1 + $0x28] sm:$0xff]  ;;  %v6615_v23 = vld [vmem:[%s12404_s1 + $0x20] sm:$0xff] }
 0x810   : > { %v6538_v20 = vunpack.i.h.bf16 %v6536_v49  ;;  %v5816_v41 = vadd.f32 %v5808_v26, %v5756_v11  ;;  %v5817_v37 = vadd.f32 %v5809_v33, %v5757_v25  ;;  %v6537_v6 = vunpack.i.l.bf16 %v6536_v49  ;;  %v12414_v4 = vld [vmem:[#allocation40_spill] sm:$0xff]  ;;  %v12415_v11 = vld [vmem:[#allocation39_spill] sm:$0xff] }
 0x811   : > { %v5868_v51 = vmul.f32 %v10672_v7, %v5860_v54  ;;  %v5869_v1 = vmul.f32 %v10682_v13, %v5861_v57  ;;  %v6007_v14 = vadd.f32 %v6610_v2, %v5999_v32  ;;  %v6006_v10 = vadd.f32 %v6611_v53, %v5998_v50  ;;  %v6616_v33 = vld [vmem:[%s12404_s1 + $0x38] sm:$0xff]  ;;  %v6617_v57 = vld [vmem:[%s12404_s1 + $0x30] sm:$0xff] }
 0x812   : > { %v6001_v61 = vmul.f32 %v6538_v20, %v12408_v60  ;;  %v6000_v19 = vmul.f32 %v6537_v6, %v12409_v59 }
 0x813   : > { %v5876_v39 = vadd.f32 %v5868_v51, %v5816_v41  ;;  %v5877_v52 = vadd.f32 %v5869_v1, %v5817_v37  ;;  %v6015_v16 = vmax.f32 %v6007_v14, 0.0  ;;  %v6014_v21 = vmax.f32 %v6006_v10, 0.0 }
 0x814   : > { %v6009_v31 = vadd.f32 %v6612_v3, %v6001_v61  ;;  %v6008_v55 = vadd.f32 %v6613_v46, %v6000_v19 }
 0x815   : > { %v6362_v7 = vmul.f32 -1.442695, %v5876_v39  ;;  %v6363_v43 = vmul.f32 -1.442695, %v5877_v52  ;;  %6022 = vst.msk [vmem:[%s11296_s4] sm:$0xff] %vm623_vm0, %v6014_v21  ;;  %6023 = vst.msk [vmem:[%s11296_s4 + $0x8] sm:$0xff] %vm623_vm0, %v6015_v16 }
 0x816   : > { %v6017_v13 = vmax.f32 %v6009_v31, 0.0  ;;  %v6016_v28 = vmax.f32 %v6008_v55, 0.0 }
 0x817   : > { %6602 = vpow2.f32 %v6362_v7 }
 0x818   : > { %6604 = vpow2.f32 %v6363_v43  ;;  %6025 = vst.msk [vmem:[%s11296_s4 + $0x18] sm:$0xff] %vm623_vm0, %v6017_v13  ;;  %6024 = vst.msk [vmem:[%s11296_s4 + $0x10] sm:$0xff] %vm623_vm0, %v6016_v28 }
 0x824   : > { %v6603_v58 = vpop.eup %6602 }
 0x825   : > { %v6605_v34 = vpop.eup %6604  ;;  %v5908_v42 = vadd.f32 1.0, %v6603_v58 }
 0x826   : > { %v5909_v56 = vadd.f32 1.0, %v6605_v34 }
 0x827   : > { %6606 = vrcp.f32 %v5908_v42 }
 0x828   : > { %6608 = vrcp.f32 %v5909_v56 }
 0x831   : > { %v6541_v30 = vpop.permute.xlu1 %6540 }
 0x832   : > { %v6543_v29 = vunpack.i.h.bf16 %v6541_v30  ;;  %v6542_v47 = vunpack.i.l.bf16 %v6541_v30 }
 0x834   : > { %v6607_v17 = vpop.eup %6606  ;;  %v6003_v35 = vmul.f32 %v6543_v29, %v12411_v15  ;;  %v6002_v40 = vmul.f32 %v6542_v47, %v12412_v5 }
 0x835   : > { %v6609_v12 = vpop.eup %6608  ;;  %vm5932_vm3 = vcmp.gt.f32.partialorder %v6607_v17, 0.05  ;;  %vm5940_vm9 = vcmp.lt.f32.partialorder %v6607_v17, 0.05 }
 0x836   : > { %vm5933_vm12 = vcmp.gt.f32.partialorder %v6609_v12, 0.05  ;;  %vm5941_vm13 = vcmp.lt.f32.partialorder %v6609_v12, 0.05  ;;  %v5948_v18 = vsel %vm5940_vm9, 0.0, %v12336_v8  ;;  %v6011_v9 = vadd.f32 %v6614_v63, %v6003_v35 }
 0x837   : > { %v5949_v38 = vsel %vm5941_vm13, 0.0, %v12336_v8  ;;  %v5956_v62 = vsel %vm5932_vm3, 1.0, %v5948_v18  ;;  %v6010_v36 = vadd.f32 %v6615_v23, %v6002_v40 }
 0x838   : > { %v5957_v27 = vsel %vm5933_vm12, 1.0, %v5949_v38  ;;  %v6019_v45 = vmax.f32 %v6011_v9, 0.0 }
 0x839   : > { %v6544_v0 = vpack.i.bf16 %v5957_v27, %v5956_v62  ;;  %v6018_v49 = vmax.f32 %v6010_v36, 0.0 }
 0x83a   : > { %6027 = vst.msk [vmem:[%s11296_s4 + $0x28] sm:$0xff] %vm623_vm0, %v6019_v45 }
 0x83b   : > { %6545 = vperm.xlu1 %6527, %v6544_v0   ;;  %6026 = vst.msk [vmem:[%s11296_s4 + $0x20] sm:$0xff] %vm623_vm0, %v6018_v49 }
 0x8b6   : > { %v6546_v8 = vpop.permute.xlu1 %6545 }
 0x8b7   : > { %v6548_v26 = vunpack.i.h.bf16 %v6546_v8  ;;  %v6547_v24 = vunpack.i.l.bf16 %v6546_v8 }
 0x8b9   : > { %v6005_v44 = vmul.f32 %v6548_v26, %v12414_v4  ;;  %v6004_v25 = vmul.f32 %v6547_v24, %v12415_v11 }
 0x8bb   : > { %v6013_v54 = vadd.f32 %v6616_v33, %v6005_v44  ;;  %v6012_v22 = vadd.f32 %v6617_v57, %v6004_v25 }
 0x8bd   : > { %v6021_v32 = vmax.f32 %v6013_v54, 0.0  ;;  %v6020_v48 = vmax.f32 %v6012_v22, 0.0 }
 0x8bf   : > { %6028 = vst.msk [vmem:[%s11296_s4 + $0x30] sm:$0xff] %vm623_vm0, %v6020_v48  ;;  %6029 = vst.msk [vmem:[%s11296_s4 + $0x38] sm:$0xff] %vm623_vm0, %v6021_v32 }
 0x8c0   : > { %6674 = shalt.err (!%p6671_p1)
}
 0x8c1   : > { %s6675_s22 = scalar_lea.hbm %s11325_s19, 1024  ;;  %s6679_s30 = scalar_lea.hbm %s12417_s9, 2048 }
 0x8c2   : > { %p6676_p4 = scmp.ne.s32.totalorder %s11325_s19, %s6675_s22  ;;  %p6680_p6 = scmp.lt.s32.totalorder %s11325_s19, %s12417_s9 }
 0x8c3   : > { %p6681_p13 = scmp.lt.s32.totalorder %s6679_s30, %s6675_s22 }
 0x8c4   : > { %p6677_p11 = pnand %p6676_p4, %p12418_p0 }
 0x8c5   : > { %p6682_p3 = por %p6681_p13, %p6680_p6 }
 0x8c6   : > { %p6678_p5 = pneg %p6677_p11 }
 0x8c8   : > { %p6683_p12 = pnand %p6682_p3, %p6678_p5 }
 0x8ca   : > { %6686 = shalt.err (!%p6683_p12)
}
 0x8cb   : > { %s6749_s20 = smov 128   ;;  %s6750_s16 = smov 8  }
 0x8cc   : > { %6459 = dma.vmem_to_hbm [thread:$0]  (%p12418_p0), %s11327_s7, 1024, %s11325_s19, %s6031_s10, %s6749_s20, %s6749_s20, %s6750_s16  }
 0x8cd PF: > { %s12419_s12 = sld [smem:[#allocation15_spill]] }
 0x8ce   : > { %s12420_s29 = sld [smem:[#allocation23_spill]] }
 0x8cf   : > { %s12421_s21 = sld [smem:[#allocation18_spill]] }
 0x8d3   : > { %s6059_s27 = sand.u32 1, %s12419_s12  }
 0x8d4   : > { %p12422_p2 = scmp.ne.s32.totalorder %s12420_s29, 0  ;;  %s6060_s0 = scalar_lea.sflag [#allocation8], %s6059_s27 }
 0x8d5   : > { %p12423_p7 = scmp.ge.s32.totalorder %s12421_s21, 2 }
 0x8d7   : > { %p6470_p8 = pnand %p12423_p7, %p12422_p2 }
 0x8d9   : > { %p6471_p9 = pneg %p6470_p8 }
 0x8db   : > { %6712 = dma.done.wait (%p6471_p9), %s6060_s0, 1024  }
 0x8dc   : > { %6714 = vsyncadd (%p6471_p9), %s6060_s0, 4294966272  ;;  %s12424_s28 = sld [smem:[#allocation20_spill]] }
 0x8dd   : > { %s12425_s25 = sld [smem:[#allocation16_spill]] }
 0x8de   : > { %s12426_s26 = sld [smem:[#allocation17_spill]] }
 0x8df   : > { %s12427_s27 = sld [smem:[#allocation21_spill]] }
 0x8e2   : > { %p27_p10 = scmp.ge.s32.totalorder %s12424_s28, 4  }
 0x8e4   :  { %29 = sbr.rel (!%p27_p10) target bundleno = 21 (0x15), region = 122 }
 0x8e9   :  { %6065 = vsyncpa [#allocation7], 1 }
 0x8ea   :  { %6067 = vsyncpa [#allocation7 + $0x1], 1 }
 0x8eb   :  { %6068 = vsyncpa [#allocation8], 1 }
 0x8ec   :  { %6070 = vsyncpa [#allocation8 + $0x1], 1 }
 0x8ed   :  { %6071 = vsyncpa [#allocation9], 1 }
 0x8ee   :  { %6073 = vsyncpa [#allocation9 + $0x1], 1 }

</bundles_post_ra>
